<compile_context>
chip_gen: v5e
topology: v5e:2x2
jax: 0.10.0
libtpu: 0.0.40
codegen_flags: <defaults>
</compile_context>

<pallas_src>
import math

import jax
import jax.numpy as jnp
from jax import lax
from jax.experimental import pallas as pl
from jax.experimental.pallas import tpu as pltpu

QUALITYS = 5                     # ['bad', 'poor', 'fair', 'good', 'perfect']
NTEXT = QUALITYS * QUALITYS      # 25 prompts per video (spatial x temporal grid)
LOGIT_SCALE = 1.0 / 0.07         # clip.logit_scale.exp() at default init
# TODO(synk): a trained checkpoint's logit_scale differs; plumb it in as a scalar.
MATMUL_DTYPE = jnp.bfloat16      # MXU operand dtype (f32 accumulation everywhere)
# TODO(synk): on v7x the streamed weights (w_img, ws1/wt1) could be fp8 e4m3 to halve
# DMA bytes; kept bf16 so the same script runs on v5e/v6e/v7x.


# ----------------------------------------------------------------------------
# Kernel 1: surrogate image encoder (matmul + bias + L2 normalize, bf16 output)
# TODO(synk): the real CLIP ViT-B/16 encode_image is replaced by this linear surrogate.
# ----------------------------------------------------------------------------
def _encode_kernel(x_ref, w_ref, b_ref, o_ref):
    f = jnp.dot(x_ref[...], w_ref[...],
                preferred_element_type=jnp.float32) + b_ref[...]
    inv_norm = lax.rsqrt(jnp.sum(f * f, axis=1, keepdims=True) + 1e-12)
    o_ref[...] = (f * inv_norm).astype(o_ref.dtype)


def encode_image(x_flat, w, b, *, tile_m):
    bt, p = x_flat.shape
    d = w.shape[1]
    assert bt % tile_m == 0 and (tile_m % 8 == 0 or tile_m == bt)
    # Surrogate dims: the whole (P, D) weight fits in VMEM, so there is no K grid
    # axis, no accumulator scratch, and the weight is streamed from HBM exactly once.
    # TODO(synk): for real CLIP dims (P~150k, D=512) reinstate a K-streaming axis with
    # tile_k ~ 1024-2048, an f32 accumulator and a per-generation VMEM budget.
    return pl.pallas_call(
        _encode_kernel,
        out_shape=jax.ShapeDtypeStruct((bt, d), jnp.bfloat16),
        grid_spec=pltpu.PrefetchScalarGridSpec(
            num_scalar_prefetch=0,
            grid=(bt // tile_m,),
            in_specs=[
                pl.BlockSpec((tile_m, p), lambda i: (i, 0)),   # x rows
                pl.BlockSpec((p, d), lambda i: (0, 0)),        # weight (resident)
                pl.BlockSpec((1, d), lambda i: (0, 0)),        # bias
            ],
            out_specs=pl.BlockSpec((tile_m, d), lambda i: (i, 0)),
        ),
        compiler_params=pltpu.CompilerParams(
            dimension_semantics=("parallel",),
            vmem_limit_bytes=32 * 1024 * 1024,
        ),
    )(x_flat, w, b)


# ----------------------------------------------------------------------------
# Kernel 2: fused similarity + softmax + quality reductions + 6 rectifier MLPs
#           + alpha/beta combine.  1-D grid streams the spatial-rectifier W1.
#   Output: (B, 128) lane-dense slab; cols 0..23 used, layout [col0|col1|col2|col3]
#   with 6 groups [s, t, a, sm, tm, am] per column block; cols = [x, qt, qs, qst].
# ----------------------------------------------------------------------------
def _head_kernel(vis_ref, txt_ref, wsp_ref, wtp_ref, spa_ref, tem_ref,
                 ws1_ref, bs1_ref, ws2_ref, bs2_ref,
                 wt1_ref, bt1_ref, wt2_ref, bt2_ref,
                 o_ref, hs_acc, ht_scr, xg_scr):
    k = pl.program_id(0)

    @pl.when(k == 0)
    def _():
        hs_acc[...] = jnp.zeros_like(hs_acc)

        # Temporal rectifier hidden layer (Din_t fits in a single chunk).
        # Dropout (p=0.2) is identity in eval mode.
        ht_scr[...] = jnp.maximum(
            jnp.dot(tem_ref[...], wt1_ref[...],
                    preferred_element_type=jnp.float32) + bt1_ref[...], 0.0)

        # CLIP similarity: per-frame logits (B, T, N); bf16 operands, f32 accumulate.
        vis = vis_ref[...]
        txt = txt_ref[...]
        n = txt.shape[1]
        cos_pre = LOGIT_SCALE * jnp.einsum('btd,bnd->btn', vis, txt,
                                           preferred_element_type=jnp.float32)
        m = jnp.max(cos_pre, axis=2, keepdims=True)
        e = jnp.exp(cos_pre - m)
        cos = e / jnp.sum(e, axis=2, keepdims=True)          # exact softmax

        # Mean-feature logits == mean over frames of per-frame logits (exact;
        # the reference does not re-normalize the frame-averaged feature).
        cos_pre_m = jnp.mean(cos_pre, axis=1)                 # (B, N)
        mm = jnp.max(cos_pre_m, axis=1, keepdims=True)
        em = jnp.exp(cos_pre_m - mm)
        cos_m = em / jnp.sum(em, axis=1, keepdims=True)

        w_sp = wsp_ref[...]                                   # (1, N): c // 5 + 1
        w_tp = wtp_ref[...]                                   # (1, N): c %  5 + 1
        w_sp3 = w_sp.reshape(1, 1, n)
        w_tp3 = w_tp.reshape(1, 1, n)

        xs = jnp.mean(jnp.sum(cos * w_sp3, axis=2), axis=1, keepdims=True)
        xt = jnp.mean(jnp.sum(cos * w_tp3, axis=2), axis=1, keepdims=True)
        xa = jnp.mean(jnp.mean(cos_pre, axis=2), axis=1, keepdims=True)
        xsm = jnp.sum(cos_m * w_sp, axis=1, keepdims=True)
        xtm = jnp.sum(cos_m * w_tp, axis=1, keepdims=True)
        xam = jnp.mean(cos_pre_m, axis=1, keepdims=True)
        # group order [s, t, a, sm, tm, am]
        xg_scr[...] = jnp.concatenate([xs, xt, xa, xsm, xtm, xam], axis=1)

    # Streamed spatial-rectifier hidden layer: accumulate spa_chunk @ ws1_chunk.
    hs_acc[...] += jnp.dot(spa_ref[...], ws1_ref[...],
                           preferred_element_type=jnp.float32)

    @pl.when(k == pl.num_programs(0) - 1)
    def _():
        hs = jnp.maximum(hs_acc[...] + bs1_ref[...], 0.0)
        # Fused block-diagonal second layers: output columns are already
        # [a1,a2,a3,a1,a2,a3,b1,b2,b3,b1,b2,b3] (rectifier index per group = 1,2,3,1,2,3)
        sp = jnp.dot(hs.astype(jnp.bfloat16), ws2_ref[...],
                     preferred_element_type=jnp.float32) + bs2_ref[...]   # (B, 12)
        tp = jnp.dot(ht_scr[...].astype(jnp.bfloat16), wt2_ref[...],
                     preferred_element_type=jnp.float32) + bt2_ref[...]   # (B, 12)

        a_s = sp[:, 0:6] + 1.0
        b_s = sp[:, 6:12]
        a_t = tp[:, 0:6] + 1.0
        b_t = tp[:, 6:12]

        xg = xg_scr[...]                                      # (B, 6)
        col0 = xg                                             # x
        col1 = jnp.abs(a_t) * xg + b_t                        # qt_*
        col2 = jnp.abs(a_s) * xg + b_s                        # qs_*
        col3 = jnp.sqrt(jnp.abs(a_s * a_t)) * xg + 0.5 * (b_s + b_t)   # qst_*

        pad = jnp.zeros((xg.shape[0], o_ref.shape[1] - 24), jnp.float32)
        o_ref[...] = jnp.concatenate([col0, col1, col2, col3, pad], axis=1)  # (B, 128)


def quality_head(img_feat, txt_feat, wsp, wtp, spa, tem, spa_rect, tem_rect,
                 *, spa_chunk):
    b, t, d = img_feat.shape
    n = txt_feat.shape[1]
    ws1, bs1, ws2, bs2 = spa_rect
    wt1, bt1, wt2, bt2 = tem_rect
    din_s = spa.shape[1]
    din_t = tem.shape[1]
    hid = ws1.shape[1]
    assert din_s % spa_chunk == 0 and spa_chunk % 128 == 0
    n_k = din_s // spa_chunk

    return pl.pallas_call(
        _head_kernel,
        out_shape=jax.ShapeDtypeStruct((b, 128), jnp.float32),
        grid_spec=pltpu.PrefetchScalarGridSpec(
            num_scalar_prefetch=0,
            grid=(n_k,),
            in_specs=[
                pl.BlockSpec((b, t, d), lambda k: (0, 0, 0)),       # vis (resident)
                pl.BlockSpec((b, n, d), lambda k: (0, 0, 0)),       # txt (resident)
                pl.BlockSpec((1, n), lambda k: (0, 0)),             # spatial prompt weights
                pl.BlockSpec((1, n), lambda k: (0, 0)),             # temporal prompt weights
                pl.BlockSpec((b, spa_chunk), lambda k: (0, k)),     # spa activation chunk
                pl.BlockSpec((b, din_t), lambda k: (0, 0)),         # tem activation (resident)
                pl.BlockSpec((spa_chunk, hid), lambda k: (k, 0)),   # ws1 chunk (streamed)
                pl.BlockSpec((1, hid), lambda k: (0, 0)),           # bs1
                pl.BlockSpec((hid, 12), lambda k: (0, 0)),          # ws2 (block-diag fused)
                pl.BlockSpec((1, 12), lambda k: (0, 0)),            # bs2
                pl.BlockSpec((din_t, hid), lambda k: (0, 0)),       # wt1 (resident)
                pl.BlockSpec((1, hid), lambda k: (0, 0)),           # bt1
                pl.BlockSpec((hid, 12), lambda k: (0, 0)),          # wt2
                pl.BlockSpec((1, 12), lambda k: (0, 0)),            # bt2
            ],
            out_specs=pl.BlockSpec((b, 128), lambda k: (0, 0)),
            scratch_shapes=[
                pltpu.VMEM((b, hid), jnp.float32),   # hs accumulator (spatial hidden)
                pltpu.VMEM((b, hid), jnp.float32),   # ht (temporal hidden, step 0)
                pltpu.VMEM((b, 6), jnp.float32),     # xg = [xs, xt, xa, xsm, xtm, xam]
            ],
        ),
        compiler_params=pltpu.CompilerParams(
            dimension_semantics=("arbitrary",),
            vmem_limit_bytes=32 * 1024 * 1024,
        ),
    )(img_feat, txt_feat, wsp, wtp, spa, tem,
      ws1, bs1, ws2, bs2, wt1, bt1, wt2, bt2)


# ----------------------------------------------------------------------------
# Parameter preparation: fuse 3 (Linear(Din,128)->ReLU->Linear(128,2)) rectifiers
# into one (Din, 384) matmul + one block-diagonal (384, 12) matmul whose output
# columns are [a1,a2,a3,a1,a2,a3,b1,b2,b3,b1,b2,b3].
# ----------------------------------------------------------------------------
def fuse_rectifiers(params, w1_dtype=MATMUL_DTYPE, w2_dtype=MATMUL_DTYPE):
    w1f = jnp.concatenate([w1 for (w1, _), _ in params], axis=1).astype(w1_dtype)
    b1f = jnp.concatenate([b1 for (_, b1), _ in params], axis=1)
    h = params[0][1][0].shape[0]
    w2f = jnp.zeros((3 * h, 12), jnp.float32)
    b2f = jnp.zeros((1, 12), jnp.float32)
    for i, (_, (w2, b2)) in enumerate(params):
        for rep in range(2):
            w2f = w2f.at[i * h:(i + 1) * h, rep * 3 + i].set(w2[:, 0])      # alpha_i
            w2f = w2f.at[i * h:(i + 1) * h, 6 + rep * 3 + i].set(w2[:, 1])  # beta_i
            b2f = b2f.at[0, rep * 3 + i].set(b2[0, 0])
            b2f = b2f.at[0, 6 + rep * 3 + i].set(b2[0, 1])
    return w1f, b1f, w2f.astype(w2_dtype), b2f


# ----------------------------------------------------------------------------
# Full forward (glue in plain JAX; heavy compute in the two kernels above)
# ----------------------------------------------------------------------------
def forward(x, tem_feat, spa_feat, text_features, w_img, b_img,
            spa_rect, tem_rect, *, tile_m, spa_chunk):
    B, T = x.shape[0], x.shape[1]

    # encode frames: (B, T, C, H, W) -> (B*T, C*H*W) -> (B*T, D), L2-normalized, bf16
    x_flat = x.reshape(B * T, -1).astype(MATMUL_DTYPE)
    img_feat = encode_image(x_flat, w_img, b_img, tile_m=tile_m).reshape(B, T, -1)

    spa = spa_feat.reshape(B, -1).astype(MATMUL_DTYPE)
    tem = tem_feat.reshape(B, -1).astype(MATMUL_DTYPE)
    txt = text_features.astype(MATMUL_DTYPE)

    # prompt-grid weights: flat column c -> spatial level c//5, temporal level c%5
    col = jnp.arange(NTEXT, dtype=jnp.int32)
    wsp = ((col // QUALITYS) + 1).astype(jnp.float32).reshape(1, NTEXT)
    wtp = ((col % QUALITYS) + 1).astype(jnp.float32).reshape(1, NTEXT)

    out = quality_head(img_feat, txt, wsp, wtp, spa, tem, spa_rect, tem_rect,
                       spa_chunk=spa_chunk)

    # (B, 24) -> (B, 4 cols, 6 groups) -> (6 groups, 4 cols, B); groups [s,t,a,sm,tm,am]
    res = out[:, :24].reshape(B, 4, 6).transpose(2, 1, 0)
    s_out, t_out, a_out = res[0], res[1], res[2]
    sm_out, tm_out, am_out = res[3], res[4], res[5]
    return t_out, s_out, a_out, tm_out, sm_out, am_out


# ----------------------------------------------------------------------------
# Deterministic parameter / input construction and a single run.
# ----------------------------------------------------------------------------
if __name__ == "__main__":
    key = jax.random.PRNGKey(0)
    keys = jax.random.split(key, 24)

    # Small shapes consistent with the module:
    B, T = 2, 8                   # videos, frames per video (x_size[0], x_size[1])
    C, H, W = 3, 16, 16           # small surrogate frames (real CLIP uses 3x224x224)
    D = 128                       # surrogate CLIP embedding dim (real = 512)
    FEAT_LEN = 8
    SPA_DIM = 5 * 256 * FEAT_LEN  # 10240, spatial_rectifier in_channels
    TEM_DIM = 256 * FEAT_LEN      # 2048,  temporal_rectifier in_channels

    x = jax.random.normal(keys[0], (B, T, C, H, W), jnp.float32)
    tem_feat = 0.1 * jax.random.normal(keys[1], (B, FEAT_LEN, 256), jnp.float32)
    spa_feat = 0.1 * jax.random.normal(keys[2], (B, FEAT_LEN, 5 * 256), jnp.float32)

    # Surrogate image-encoder weights (bf16 weight stream, f32 bias / accumulation).
    P = C * H * W
    w_img = (0.02 * jax.random.normal(keys[3], (P, D), jnp.float32)).astype(MATMUL_DTYPE)
    b_img = jnp.zeros((1, D), jnp.float32)

    # Synthetic, pre-normalized text features for the 25 quality prompts per video.
    # TODO(synk): clip.tokenize + encode_text have no Pallas equivalent; synthetic feats.
    txt = jax.random.normal(keys[4], (B, NTEXT, D), jnp.float32)
    txt = txt / jnp.linalg.norm(txt, axis=-1, keepdims=True)

    def linear_init(k, din, dout):
        k1, k2 = jax.random.split(k)
        bound = 1.0 / math.sqrt(din)
        w = jax.random.uniform(k1, (din, dout), jnp.float32, -bound, bound)
        b = jax.random.uniform(k2, (1, dout), jnp.float32, -bound, bound)
        return w, b

    spatial_params = [
        (linear_init(keys[5 + i], SPA_DIM, 128), linear_init(keys[8 + i], 128, 2))
        for i in range(3)
    ]
    temporal_params = [
        (linear_init(keys[11 + i], TEM_DIM, 128), linear_init(keys[14 + i], 128, 2))
        for i in range(3)
    ]
    spa_rect = fuse_rectifiers(spatial_params)
    tem_rect = fuse_rectifiers(temporal_params)

    fwd = jax.jit(forward, static_argnames=("tile_m", "spa_chunk"))
    # tile_m = BT // 2 -> two row tiles so v7x's two TensorCores can each take one;
    # spa_chunk = 2048 -> 5 double-buffered weight chunks for the spatial rectifier.
    outs = fwd(x, tem_feat, spa_feat, txt, w_img, b_img, spa_rect, tem_rect,
               tile_m=(B * T) // 2, spa_chunk=2048)
    outs = jax.block_until_ready(outs)

    t, s, a, tm, sm, am = outs
    assert t.shape == s.shape == a.shape == (4, B)
    assert tm.shape == sm.shape == am.shape == (4, B)
    assert all(bool(jnp.all(jnp.isfinite(o))) for o in outs)
    print("KERNEL_OK")
</pallas_src>

<mosaic_0001>
module attributes {stable_mosaic.version = 11 : i64} {
  func.func @_encode_kernel(%arg0: i32, %arg1: memref<8x768xbf16, #tpu.memory_space<vmem>>, %arg2: memref<768x128xbf16, #tpu.memory_space<vmem>>, %arg3: memref<1x128xf32, #tpu.memory_space<vmem>>, %arg4: memref<8x128xbf16, #tpu.memory_space<vmem>>) attributes {dimension_semantics = [#tpu.dimension_semantics<parallel>], iteration_bounds = array<i64: 2>, scalar_prefetch = 0 : i64, scratch_operands = 0 : i64, tpu.core_type = #tpu.core_type<tc>, window_params = [{transform_indices = @transform_0, window_bounds = array<i64: 8, 768>}, {pipeline_mode = #tpu.pipeline_mode<synchronous>, transform_indices = @transform_1, window_bounds = array<i64: 768, 128>}, {pipeline_mode = #tpu.pipeline_mode<synchronous>, transform_indices = @transform_2, window_bounds = array<i64: 1, 128>}, {transform_indices = @transform_3, window_bounds = array<i64: 8, 128>}]} {
    %c0 = arith.constant 0 : index
    %c0_0 = arith.constant 0 : index
    %0 = vector.load %arg1[%c0, %c0_0] : memref<8x768xbf16, #tpu.memory_space<vmem>>, vector<8x768xbf16>
    %c0_1 = arith.constant 0 : index
    %c0_2 = arith.constant 0 : index
    %1 = vector.load %arg2[%c0_1, %c0_2] : memref<768x128xbf16, #tpu.memory_space<vmem>>, vector<768x128xbf16>
    %cst = arith.constant dense<0.000000e+00> : vector<8x128xf32>
    %2 = tpu.matmul %0, %1, %cst {dimension_numbers = #tpu.dot_dimension_numbers<[1], [0], [0], [1], [0, 0, 1, 1], [], []>} : vector<8x768xbf16>, vector<768x128xbf16>, vector<8x128xf32> -> vector<8x128xf32>
    %c0_3 = arith.constant 0 : index
    %c0_4 = arith.constant 0 : index
    %3 = vector.load %arg3[%c0_3, %c0_4] : memref<1x128xf32, #tpu.memory_space<vmem>>, vector<1x128xf32>
    %4 = vector.broadcast %3 : vector<1x128xf32> to vector<8x128xf32>
    %5 = arith.addf %2, %4 : vector<8x128xf32>
    %6 = arith.mulf %5, %5 : vector<8x128xf32>
    %cst_5 = arith.constant dense<0.000000e+00> : vector<8xf32>
    %7 = vector.multi_reduction <add>, %6, %cst_5 [1] : vector<8x128xf32> to vector<8xf32>
    %8 = vector.shape_cast %7 : vector<8xf32> to vector<8x1xf32>
    %cst_6 = arith.constant 9.99999996E-13 : f32
    %9 = vector.broadcast %cst_6 : f32 to vector<8x1xf32>
    %10 = arith.addf %8, %9 : vector<8x1xf32>
    %11 = math.rsqrt %10 : vector<8x1xf32>
    %12 = vector.broadcast %11 : vector<8x1xf32> to vector<8x128xf32>
    %13 = arith.mulf %5, %12 : vector<8x128xf32>
    %14 = arith.truncf %13 : vector<8x128xf32> to vector<8x128xbf16>
    %c0_7 = arith.constant 0 : index
    %c0_8 = arith.constant 0 : index
    %15 = vector.load %arg4[%c0_7, %c0_8] : memref<8x128xbf16, #tpu.memory_space<vmem>>, vector<8x128xbf16>
    tpu.vector_store %arg4[%c0_7, %c0_8], %14 {strides = array<i32>} : memref<8x128xbf16, #tpu.memory_space<vmem>>, vector<8x128xbf16>,
    return
  }
  func.func @transform_0(%arg0: i32) -> (i32, i32) {
    %c0_i32 = arith.constant 0 : i32
    %c0_i32_0 = arith.constant 0 : i32
    return %arg0, %c0_i32 : i32, i32
  }
  func.func @transform_1(%arg0: i32) -> (i32, i32) {
    %c0_i32 = arith.constant 0 : i32
    %c0_i32_0 = arith.constant 0 : i32
    %c0_i32_1 = arith.constant 0 : i32
    return %c0_i32, %c0_i32_0 : i32, i32
  }
  func.func @transform_2(%arg0: i32) -> (i32, i32) {
    %c0_i32 = arith.constant 0 : i32
    %c0_i32_0 = arith.constant 0 : i32
    %c0_i32_1 = arith.constant 0 : i32
    return %c0_i32, %c0_i32_0 : i32, i32
  }
  func.func @transform_3(%arg0: i32) -> (i32, i32) {
    %c0_i32 = arith.constant 0 : i32
    %c0_i32_0 = arith.constant 0 : i32
    return %arg0, %c0_i32 : i32, i32
  }
}

module attributes {stable_mosaic.version = 11 : i64} {
  func.func @_head_kernel(%arg0: i32, %arg1: memref<2x8x128xbf16, #tpu.memory_space<vmem>>, %arg2: memref<2x25x128xbf16, #tpu.memory_space<vmem>>, %arg3: memref<1x25xf32, #tpu.memory_space<vmem>>, %arg4: memref<1x25xf32, #tpu.memory_space<vmem>>, %arg5: memref<2x2048xbf16, #tpu.memory_space<vmem>>, %arg6: memref<2x2048xbf16, #tpu.memory_space<vmem>>, %arg7: memref<2048x384xbf16, #tpu.memory_space<vmem>>, %arg8: memref<1x384xf32, #tpu.memory_space<vmem>>, %arg9: memref<384x12xbf16, #tpu.memory_space<vmem>>, %arg10: memref<1x12xf32, #tpu.memory_space<vmem>>, %arg11: memref<2048x384xbf16, #tpu.memory_space<vmem>>, %arg12: memref<1x384xf32, #tpu.memory_space<vmem>>, %arg13: memref<384x12xbf16, #tpu.memory_space<vmem>>, %arg14: memref<1x12xf32, #tpu.memory_space<vmem>>, %arg15: memref<2x128xf32, #tpu.memory_space<vmem>>, %arg16: memref<2x384xf32, #tpu.memory_space<vmem>>, %arg17: memref<2x384xf32, #tpu.memory_space<vmem>>, %arg18: memref<2x6xf32, #tpu.memory_space<vmem>>) attributes {dimension_semantics = [#tpu.dimension_semantics<arbitrary>], iteration_bounds = array<i64: 5>, scalar_prefetch = 0 : i64, scratch_operands = 3 : i64, tpu.core_type = #tpu.core_type<tc>, window_params = [{pipeline_mode = #tpu.pipeline_mode<synchronous>, transform_indices = @transform_0, window_bounds = array<i64: 2, 8, 128>}, {pipeline_mode = #tpu.pipeline_mode<synchronous>, transform_indices = @transform_1, window_bounds = array<i64: 2, 25, 128>}, {pipeline_mode = #tpu.pipeline_mode<synchronous>, transform_indices = @transform_2, window_bounds = array<i64: 1, 25>}, {pipeline_mode = #tpu.pipeline_mode<synchronous>, transform_indices = @transform_3, window_bounds = array<i64: 1, 25>}, {transform_indices = @transform_4, window_bounds = array<i64: 2, 2048>}, {pipeline_mode = #tpu.pipeline_mode<synchronous>, transform_indices = @transform_5, window_bounds = array<i64: 2, 2048>}, {transform_indices = @transform_6, window_bounds = array<i64: 2048, 384>}, {pipeline_mode = #tpu.pipeline_mode<synchronous>, transform_indices = @transform_7, window_bounds = array<i64: 1, 384>}, {pipeline_mode = #tpu.pipeline_mode<synchronous>, transform_indices = @transform_8, window_bounds = array<i64: 384, 12>}, {pipeline_mode = #tpu.pipeline_mode<synchronous>, transform_indices = @transform_9, window_bounds = array<i64: 1, 12>}, {pipeline_mode = #tpu.pipeline_mode<synchronous>, transform_indices = @transform_10, window_bounds = array<i64: 2048, 384>}, {pipeline_mode = #tpu.pipeline_mode<synchronous>, transform_indices = @transform_11, window_bounds = array<i64: 1, 384>}, {pipeline_mode = #tpu.pipeline_mode<synchronous>, transform_indices = @transform_12, window_bounds = array<i64: 384, 12>}, {pipeline_mode = #tpu.pipeline_mode<synchronous>, transform_indices = @transform_13, window_bounds = array<i64: 1, 12>}, {pipeline_mode = #tpu.pipeline_mode<synchronous>, transform_indices = @transform_14, window_bounds = array<i64: 2, 128>}]} {
    %c0_i32 = arith.constant 0 : i32
    %0 = arith.cmpi eq, %arg0, %c0_i32 : i32
    %1 = arith.extui %0 : i1 to i32
    %c0_i32_0 = arith.constant 0 : i32
    %2 = arith.cmpi ne, %1, %c0_i32_0 : i32
    scf.if %2 {
      %cst_9 = arith.constant 0.000000e+00 : f32
      %12 = vector.broadcast %cst_9 : f32 to vector<2x384xf32>
      %c0_10 = arith.constant 0 : index
      %c0_11 = arith.constant 0 : index
      %13 = vector.load %arg16[%c0_10, %c0_11] : memref<2x384xf32, #tpu.memory_space<vmem>>, vector<2x384xf32>
      tpu.vector_store %arg16[%c0_10, %c0_11], %12 {strides = array<i32>} : memref<2x384xf32, #tpu.memory_space<vmem>>, vector<2x384xf32>,
      %c0_12 = arith.constant 0 : index
      %c0_13 = arith.constant 0 : index
      %14 = vector.load %arg6[%c0_12, %c0_13] : memref<2x2048xbf16, #tpu.memory_space<vmem>>, vector<2x2048xbf16>
      %c0_14 = arith.constant 0 : index
      %c0_15 = arith.constant 0 : index
      %15 = vector.load %arg11[%c0_14, %c0_15] : memref<2048x384xbf16, #tpu.memory_space<vmem>>, vector<2048x384xbf16>
      %cst_16 = arith.constant dense<0.000000e+00> : vector<2x384xf32>
      %16 = tpu.matmul %14, %15, %cst_16 {dimension_numbers = #tpu.dot_dimension_numbers<[1], [0], [0], [1], [0, 0, 1, 1], [], []>} : vector<2x2048xbf16>, vector<2048x384xbf16>, vector<2x384xf32> -> vector<2x384xf32>
      %c0_17 = arith.constant 0 : index
      %c0_18 = arith.constant 0 : index
      %17 = vector.load %arg12[%c0_17, %c0_18] : memref<1x384xf32, #tpu.memory_space<vmem>>, vector<1x384xf32>
      %18 = vector.broadcast %17 : vector<1x384xf32> to vector<2x384xf32>
      %19 = arith.addf %16, %18 : vector<2x384xf32>
      %cst_19 = arith.constant 0.000000e+00 : f32
      %20 = vector.broadcast %cst_19 : f32 to vector<2x384xf32>
      %21 = arith.maximumf %19, %20 : vector<2x384xf32>
      %c0_20 = arith.constant 0 : index
      %c0_21 = arith.constant 0 : index
      %22 = vector.load %arg17[%c0_20, %c0_21] : memref<2x384xf32, #tpu.memory_space<vmem>>, vector<2x384xf32>
      tpu.vector_store %arg17[%c0_20, %c0_21], %21 {strides = array<i32>} : memref<2x384xf32, #tpu.memory_space<vmem>>, vector<2x384xf32>,
      %c0_22 = arith.constant 0 : index
      %c0_23 = arith.constant 0 : index
      %c0_24 = arith.constant 0 : index
      %23 = vector.load %arg1[%c0_22, %c0_23, %c0_24] : memref<2x8x128xbf16, #tpu.memory_space<vmem>>, vector<2x8x128xbf16>
      %c0_25 = arith.constant 0 : index
      %c0_26 = arith.constant 0 : index
      %c0_27 = arith.constant 0 : index
      %24 = vector.load %arg2[%c0_25, %c0_26, %c0_27] : memref<2x25x128xbf16, #tpu.memory_space<vmem>>, vector<2x25x128xbf16>
      "tpu.trace_start"() <{level = 10 : i32, message = "btd,bnd->btn"}> : () -> ()
      %cst_28 = arith.constant dense<0.000000e+00> : vector<2x8x25xf32>
      %25 = tpu.matmul %23, %24, %cst_28 {dimension_numbers = #tpu.dot_dimension_numbers<[2], [2], [1], [1], [0, 0, 0, 1, 1, 1], [0], [0]>} : vector<2x8x128xbf16>, vector<2x25x128xbf16>, vector<2x8x25xf32> -> vector<2x8x25xf32>
      "tpu.trace_stop"() : () -> ()
      %cst_29 = arith.constant 14.2857141 : f32
      %26 = vector.broadcast %cst_29 : f32 to vector<2x8x25xf32>
      %27 = arith.mulf %26, %25 : vector<2x8x25xf32>
      %cst_30 = arith.constant dense<0xFF800000> : vector<2x8xf32>
      %28 = vector.multi_reduction <maximumf>, %27, %cst_30 [2] : vector<2x8x25xf32> to vector<2x8xf32>
      %29 = vector.shape_cast %28 : vector<2x8xf32> to vector<2x8x1xf32>
      %30 = vector.broadcast %29 : vector<2x8x1xf32> to vector<2x8x25xf32>
      %31 = arith.subf %27, %30 : vector<2x8x25xf32>
      %32 = math.exp %31 : vector<2x8x25xf32>
      %cst_31 = arith.constant dense<0.000000e+00> : vector<2x8xf32>
      %33 = vector.multi_reduction <add>, %32, %cst_31 [2] : vector<2x8x25xf32> to vector<2x8xf32>
      %34 = vector.shape_cast %33 : vector<2x8xf32> to vector<2x8x1xf32>
      %35 = vector.broadcast %34 : vector<2x8x1xf32> to vector<2x8x25xf32>
      %36 = arith.divf %32, %35 : vector<2x8x25xf32>
      %cst_32 = arith.constant dense<0.000000e+00> : vector<2x25xf32>
      %37 = vector.multi_reduction <add>, %27, %cst_32 [1] : vector<2x8x25xf32> to vector<2x25xf32>
      %cst_33 = arith.constant 8.000000e+00 : f32
      %38 = vector.broadcast %cst_33 : f32 to vector<2x25xf32>
      %39 = arith.divf %37, %38 : vector<2x25xf32>
      %cst_34 = arith.constant dense<0xFF800000> : vector<2xf32>
      %40 = vector.multi_reduction <maximumf>, %39, %cst_34 [1] : vector<2x25xf32> to vector<2xf32>
      %41 = vector.shape_cast %40 : vector<2xf32> to vector<2x1xf32>
      %42 = vector.broadcast %41 : vector<2x1xf32> to vector<2x25xf32>
      %43 = arith.subf %39, %42 : vector<2x25xf32>
      %44 = math.exp %43 : vector<2x25xf32>
      %cst_35 = arith.constant dense<0.000000e+00> : vector<2xf32>
      %45 = vector.multi_reduction <add>, %44, %cst_35 [1] : vector<2x25xf32> to vector<2xf32>
      %46 = vector.shape_cast %45 : vector<2xf32> to vector<2x1xf32>
      %47 = vector.broadcast %46 : vector<2x1xf32> to vector<2x25xf32>
      %48 = arith.divf %44, %47 : vector<2x25xf32>
      %c0_36 = arith.constant 0 : index
      %c0_37 = arith.constant 0 : index
      %49 = vector.load %arg3[%c0_36, %c0_37] : memref<1x25xf32, #tpu.memory_space<vmem>>, vector<1x25xf32>
      %c0_38 = arith.constant 0 : index
      %c0_39 = arith.constant 0 : index
      %50 = vector.load %arg4[%c0_38, %c0_39] : memref<1x25xf32, #tpu.memory_space<vmem>>, vector<1x25xf32>
      %51 = vector.shape_cast %49 : vector<1x25xf32> to vector<1x1x25xf32>
      %52 = vector.shape_cast %50 : vector<1x25xf32> to vector<1x1x25xf32>
      %53 = vector.broadcast %51 : vector<1x1x25xf32> to vector<2x8x25xf32>
      %54 = arith.mulf %36, %53 : vector<2x8x25xf32>
      %cst_40 = arith.constant dense<0.000000e+00> : vector<2x8xf32>
      %55 = vector.multi_reduction <add>, %54, %cst_40 [2] : vector<2x8x25xf32> to vector<2x8xf32>
      %cst_41 = arith.constant dense<0.000000e+00> : vector<2xf32>
      %56 = vector.multi_reduction <add>, %55, %cst_41 [1] : vector<2x8xf32> to vector<2xf32>
      %57 = vector.shape_cast %56 : vector<2xf32> to vector<2x1xf32>
      %cst_42 = arith.constant 8.000000e+00 : f32
      %58 = vector.broadcast %cst_42 : f32 to vector<2x1xf32>
      %59 = arith.divf %57, %58 : vector<2x1xf32>
      %60 = vector.broadcast %52 : vector<1x1x25xf32> to vector<2x8x25xf32>
      %61 = arith.mulf %36, %60 : vector<2x8x25xf32>
      %cst_43 = arith.constant dense<0.000000e+00> : vector<2x8xf32>
      %62 = vector.multi_reduction <add>, %61, %cst_43 [2] : vector<2x8x25xf32> to vector<2x8xf32>
      %cst_44 = arith.constant dense<0.000000e+00> : vector<2xf32>
      %63 = vector.multi_reduction <add>, %62, %cst_44 [1] : vector<2x8xf32> to vector<2xf32>
      %64 = vector.shape_cast %63 : vector<2xf32> to vector<2x1xf32>
      %cst_45 = arith.constant 8.000000e+00 : f32
      %65 = vector.broadcast %cst_45 : f32 to vector<2x1xf32>
      %66 = arith.divf %64, %65 : vector<2x1xf32>
      %cst_46 = arith.constant dense<0.000000e+00> : vector<2x8xf32>
      %67 = vector.multi_reduction <add>, %27, %cst_46 [2] : vector<2x8x25xf32> to vector<2x8xf32>
      %cst_47 = arith.constant 2.500000e+01 : f32
      %68 = vector.broadcast %cst_47 : f32 to vector<2x8xf32>
      %69 = arith.divf %67, %68 : vector<2x8xf32>
      %cst_48 = arith.constant dense<0.000000e+00> : vector<2xf32>
      %70 = vector.multi_reduction <add>, %69, %cst_48 [1] : vector<2x8xf32> to vector<2xf32>
      %71 = vector.shape_cast %70 : vector<2xf32> to vector<2x1xf32>
      %cst_49 = arith.constant 8.000000e+00 : f32
      %72 = vector.broadcast %cst_49 : f32 to vector<2x1xf32>
      %73 = arith.divf %71, %72 : vector<2x1xf32>
      %74 = vector.broadcast %49 : vector<1x25xf32> to vector<2x25xf32>
      %75 = arith.mulf %48, %74 : vector<2x25xf32>
      %cst_50 = arith.constant dense<0.000000e+00> : vector<2xf32>
      %76 = vector.multi_reduction <add>, %75, %cst_50 [1] : vector<2x25xf32> to vector<2xf32>
      %77 = vector.shape_cast %76 : vector<2xf32> to vector<2x1xf32>
      %78 = vector.broadcast %50 : vector<1x25xf32> to vector<2x25xf32>
      %79 = arith.mulf %48, %78 : vector<2x25xf32>
      %cst_51 = arith.constant dense<0.000000e+00> : vector<2xf32>
      %80 = vector.multi_reduction <add>, %79, %cst_51 [1] : vector<2x25xf32> to vector<2xf32>
      %81 = vector.shape_cast %80 : vector<2xf32> to vector<2x1xf32>
      %cst_52 = arith.constant dense<0.000000e+00> : vector<2xf32>
      %82 = vector.multi_reduction <add>, %39, %cst_52 [1] : vector<2x25xf32> to vector<2xf32>
      %83 = vector.shape_cast %82 : vector<2xf32> to vector<2x1xf32>
      %cst_53 = arith.constant 2.500000e+01 : f32
      %84 = vector.broadcast %cst_53 : f32 to vector<2x1xf32>
      %85 = arith.divf %83, %84 : vector<2x1xf32>
      %86 = tpu.concatenate %59, %66, %73, %77, %81, %85 in 1 : vector<2x1xf32>, vector<2x1xf32>, vector<2x1xf32>, vector<2x1xf32>, vector<2x1xf32>, vector<2x1xf32> -> vector<2x6xf32>
      %c0_54 = arith.constant 0 : index
      %c0_55 = arith.constant 0 : index
      %87 = vector.load %arg18[%c0_54, %c0_55] : memref<2x6xf32, #tpu.memory_space<vmem>>, vector<2x6xf32>
      tpu.vector_store %arg18[%c0_54, %c0_55], %86 {strides = array<i32>} : memref<2x6xf32, #tpu.memory_space<vmem>>, vector<2x6xf32>,
    } else {
    }
    %c0 = arith.constant 0 : index
    %c0_1 = arith.constant 0 : index
    %3 = vector.load %arg16[%c0, %c0_1] : memref<2x384xf32, #tpu.memory_space<vmem>>, vector<2x384xf32>
    %c0_2 = arith.constant 0 : index
    %c0_3 = arith.constant 0 : index
    %4 = vector.load %arg5[%c0_2, %c0_3] : memref<2x2048xbf16, #tpu.memory_space<vmem>>, vector<2x2048xbf16>
    %c0_4 = arith.constant 0 : index
    %c0_5 = arith.constant 0 : index
    %5 = vector.load %arg7[%c0_4, %c0_5] : memref<2048x384xbf16, #tpu.memory_space<vmem>>, vector<2048x384xbf16>
    %cst = arith.constant dense<0.000000e+00> : vector<2x384xf32>
    %6 = tpu.matmul %4, %5, %cst {dimension_numbers = #tpu.dot_dimension_numbers<[1], [0], [0], [1], [0, 0, 1, 1], [], []>} : vector<2x2048xbf16>, vector<2048x384xbf16>, vector<2x384xf32> -> vector<2x384xf32>
    %7 = arith.addf %3, %6 : vector<2x384xf32>
    %c0_6 = arith.constant 0 : index
    %c0_7 = arith.constant 0 : index
    %8 = vector.load %arg16[%c0_6, %c0_7] : memref<2x384xf32, #tpu.memory_space<vmem>>, vector<2x384xf32>
    tpu.vector_store %arg16[%c0_6, %c0_7], %7 {strides = array<i32>} : memref<2x384xf32, #tpu.memory_space<vmem>>, vector<2x384xf32>,
    %c4_i32 = arith.constant 4 : i32
    %9 = arith.cmpi eq, %arg0, %c4_i32 : i32
    %10 = arith.extui %9 : i1 to i32
    %c0_i32_8 = arith.constant 0 : i32
    %11 = arith.cmpi ne, %10, %c0_i32_8 : i32
    scf.if %11 {
      %c0_9 = arith.constant 0 : index
      %c0_10 = arith.constant 0 : index
      %12 = vector.load %arg16[%c0_9, %c0_10] : memref<2x384xf32, #tpu.memory_space<vmem>>, vector<2x384xf32>
      %c0_11 = arith.constant 0 : index
      %c0_12 = arith.constant 0 : index
      %13 = vector.load %arg8[%c0_11, %c0_12] : memref<1x384xf32, #tpu.memory_space<vmem>>, vector<1x384xf32>
      %14 = vector.broadcast %13 : vector<1x384xf32> to vector<2x384xf32>
      %15 = arith.addf %12, %14 : vector<2x384xf32>
      %cst_13 = arith.constant 0.000000e+00 : f32
      %16 = vector.broadcast %cst_13 : f32 to vector<2x384xf32>
      %17 = arith.maximumf %15, %16 : vector<2x384xf32>
      %18 = arith.truncf %17 : vector<2x384xf32> to vector<2x384xbf16>
      %c0_14 = arith.constant 0 : index
      %c0_15 = arith.constant 0 : index
      %19 = vector.load %arg9[%c0_14, %c0_15] : memref<384x12xbf16, #tpu.memory_space<vmem>>, vector<384x12xbf16>
      %cst_16 = arith.constant dense<0.000000e+00> : vector<2x12xf32>
      %20 = tpu.matmul %18, %19, %cst_16 {dimension_numbers = #tpu.dot_dimension_numbers<[1], [0], [0], [1], [0, 0, 1, 1], [], []>} : vector<2x384xbf16>, vector<384x12xbf16>, vector<2x12xf32> -> vector<2x12xf32>
      %c0_17 = arith.constant 0 : index
      %c0_18 = arith.constant 0 : index
      %21 = vector.load %arg10[%c0_17, %c0_18] : memref<1x12xf32, #tpu.memory_space<vmem>>, vector<1x12xf32>
      %22 = vector.broadcast %21 : vector<1x12xf32> to vector<2x12xf32>
      %23 = arith.addf %20, %22 : vector<2x12xf32>
      %c0_19 = arith.constant 0 : index
      %c0_20 = arith.constant 0 : index
      %24 = vector.load %arg17[%c0_19, %c0_20] : memref<2x384xf32, #tpu.memory_space<vmem>>, vector<2x384xf32>
      %25 = arith.truncf %24 : vector<2x384xf32> to vector<2x384xbf16>
      %c0_21 = arith.constant 0 : index
      %c0_22 = arith.constant 0 : index
      %26 = vector.load %arg13[%c0_21, %c0_22] : memref<384x12xbf16, #tpu.memory_space<vmem>>, vector<384x12xbf16>
      %cst_23 = arith.constant dense<0.000000e+00> : vector<2x12xf32>
      %27 = tpu.matmul %25, %26, %cst_23 {dimension_numbers = #tpu.dot_dimension_numbers<[1], [0], [0], [1], [0, 0, 1, 1], [], []>} : vector<2x384xbf16>, vector<384x12xbf16>, vector<2x12xf32> -> vector<2x12xf32>
      %c0_24 = arith.constant 0 : index
      %c0_25 = arith.constant 0 : index
      %28 = vector.load %arg14[%c0_24, %c0_25] : memref<1x12xf32, #tpu.memory_space<vmem>>, vector<1x12xf32>
      %29 = vector.broadcast %28 : vector<1x12xf32> to vector<2x12xf32>
      %30 = arith.addf %27, %29 : vector<2x12xf32>
      %31 = vector.extract_strided_slice %23 {offsets = [0, 0], sizes = [2, 6], strides = [1, 1]} : vector<2x12xf32> to vector<2x6xf32>
      %cst_26 = arith.constant 1.000000e+00 : f32
      %32 = vector.broadcast %cst_26 : f32 to vector<2x6xf32>
      %33 = arith.addf %31, %32 : vector<2x6xf32>
      %34 = vector.extract_strided_slice %23 {offsets = [0, 6], sizes = [2, 6], strides = [1, 1]} : vector<2x12xf32> to vector<2x6xf32>
      %35 = vector.extract_strided_slice %30 {offsets = [0, 0], sizes = [2, 6], strides = [1, 1]} : vector<2x12xf32> to vector<2x6xf32>
      %cst_27 = arith.constant 1.000000e+00 : f32
      %36 = vector.broadcast %cst_27 : f32 to vector<2x6xf32>
      %37 = arith.addf %35, %36 : vector<2x6xf32>
      %38 = vector.extract_strided_slice %30 {offsets = [0, 6], sizes = [2, 6], strides = [1, 1]} : vector<2x12xf32> to vector<2x6xf32>
      %c0_28 = arith.constant 0 : index
      %c0_29 = arith.constant 0 : index
      %39 = vector.load %arg18[%c0_28, %c0_29] : memref<2x6xf32, #tpu.memory_space<vmem>>, vector<2x6xf32>
      %40 = math.absf %37 : vector<2x6xf32>
      %41 = arith.mulf %40, %39 : vector<2x6xf32>
      %42 = arith.addf %41, %38 : vector<2x6xf32>
      %43 = math.absf %33 : vector<2x6xf32>
      %44 = arith.mulf %43, %39 : vector<2x6xf32>
      %45 = arith.addf %44, %34 : vector<2x6xf32>
      %46 = arith.mulf %33, %37 : vector<2x6xf32>
      %47 = math.absf %46 : vector<2x6xf32>
      %48 = math.sqrt %47 : vector<2x6xf32>
      %49 = arith.mulf %48, %39 : vector<2x6xf32>
      %50 = arith.addf %34, %38 : vector<2x6xf32>
      %cst_30 = arith.constant 5.000000e-01 : f32
      %51 = vector.broadcast %cst_30 : f32 to vector<2x6xf32>
      %52 = arith.mulf %51, %50 : vector<2x6xf32>
      %53 = arith.addf %49, %52 : vector<2x6xf32>
      %cst_31 = arith.constant 0.000000e+00 : f32
      %54 = vector.broadcast %cst_31 : f32 to vector<2x104xf32>
      %55 = tpu.concatenate %39, %42, %45, %53, %54 in 1 : vector<2x6xf32>, vector<2x6xf32>, vector<2x6xf32>, vector<2x6xf32>, vector<2x104xf32> -> vector<2x128xf32>
      %c0_32 = arith.constant 0 : index
      %c0_33 = arith.constant 0 : index
      %56 = vector.load %arg15[%c0_32, %c0_33] : memref<2x128xf32, #tpu.memory_space<vmem>>, vector<2x128xf32>
      tpu.vector_store %arg15[%c0_32, %c0_33], %55 {strides = array<i32>} : memref<2x128xf32, #tpu.memory_space<vmem>>, vector<2x128xf32>,
    } else {
    }
    return
  }
  func.func @transform_0(%arg0: i32) -> (i32, i32, i32) {
    %c0_i32 = arith.constant 0 : i32
    %c0_i32_0 = arith.constant 0 : i32
    %c0_i32_1 = arith.constant 0 : i32
    %c0_i32_2 = arith.constant 0 : i32
    return %c0_i32, %c0_i32_0, %c0_i32_1 : i32, i32, i32
  }
  func.func @transform_1(%arg0: i32) -> (i32, i32, i32) {
    %c0_i32 = arith.constant 0 : i32
    %c0_i32_0 = arith.constant 0 : i32
    %c0_i32_1 = arith.constant 0 : i32
    %c0_i32_2 = arith.constant 0 : i32
    return %c0_i32, %c0_i32_0, %c0_i32_1 : i32, i32, i32
  }
  func.func @transform_2(%arg0: i32) -> (i32, i32) {
    %c0_i32 = arith.constant 0 : i32
    %c0_i32_0 = arith.constant 0 : i32
    %c0_i32_1 = arith.constant 0 : i32
    return %c0_i32, %c0_i32_0 : i32, i32
  }
  func.func @transform_3(%arg0: i32) -> (i32, i32) {
    %c0_i32 = arith.constant 0 : i32
    %c0_i32_0 = arith.constant 0 : i32
    %c0_i32_1 = arith.constant 0 : i32
    return %c0_i32, %c0_i32_0 : i32, i32
  }
  func.func @transform_4(%arg0: i32) -> (i32, i32) {
    %c0_i32 = arith.constant 0 : i32
    %c0_i32_0 = arith.constant 0 : i32
    return %c0_i32, %arg0 : i32, i32
  }
  func.func @transform_5(%arg0: i32) -> (i32, i32) {
    %c0_i32 = arith.constant 0 : i32
    %c0_i32_0 = arith.constant 0 : i32
    %c0_i32_1 = arith.constant 0 : i32
    return %c0_i32, %c0_i32_0 : i32, i32
  }
  func.func @transform_6(%arg0: i32) -> (i32, i32) {
    %c0_i32 = arith.constant 0 : i32
    %c0_i32_0 = arith.constant 0 : i32
    return %arg0, %c0_i32 : i32, i32
  }
  func.func @transform_7(%arg0: i32) -> (i32, i32) {
    %c0_i32 = arith.constant 0 : i32
    %c0_i32_0 = arith.constant 0 : i32
    %c0_i32_1 = arith.constant 0 : i32
    return %c0_i32, %c0_i32_0 : i32, i32
  }
  func.func @transform_8(%arg0: i32) -> (i32, i32) {
    %c0_i32 = arith.constant 0 : i32
    %c0_i32_0 = arith.constant 0 : i32
    %c0_i32_1 = arith.constant 0 : i32
    return %c0_i32, %c0_i32_0 : i32, i32
  }
  func.func @transform_9(%arg0: i32) -> (i32, i32) {
    %c0_i32 = arith.constant 0 : i32
    %c0_i32_0 = arith.constant 0 : i32
    %c0_i32_1 = arith.constant 0 : i32
    return %c0_i32, %c0_i32_0 : i32, i32
  }
  func.func @transform_10(%arg0: i32) -> (i32, i32) {
    %c0_i32 = arith.constant 0 : i32
    %c0_i32_0 = arith.constant 0 : i32
    %c0_i32_1 = arith.constant 0 : i32
    return %c0_i32, %c0_i32_0 : i32, i32
  }
  func.func @transform_11(%arg0: i32) -> (i32, i32) {
    %c0_i32 = arith.constant 0 : i32
    %c0_i32_0 = arith.constant 0 : i32
    %c0_i32_1 = arith.constant 0 : i32
    return %c0_i32, %c0_i32_0 : i32, i32
  }
  func.func @transform_12(%arg0: i32) -> (i32, i32) {
    %c0_i32 = arith.constant 0 : i32
    %c0_i32_0 = arith.constant 0 : i32
    %c0_i32_1 = arith.constant 0 : i32
    return %c0_i32, %c0_i32_0 : i32, i32
  }
  func.func @transform_13(%arg0: i32) -> (i32, i32) {
    %c0_i32 = arith.constant 0 : i32
    %c0_i32_0 = arith.constant 0 : i32
    %c0_i32_1 = arith.constant 0 : i32
    return %c0_i32, %c0_i32_0 : i32, i32
  }
  func.func @transform_14(%arg0: i32) -> (i32, i32) {
    %c0_i32 = arith.constant 0 : i32
    %c0_i32_0 = arith.constant 0 : i32
    %c0_i32_1 = arith.constant 0 : i32
    return %c0_i32, %c0_i32_0 : i32, i32
  }
}

</mosaic_0001>

<bundles_post_ra>
// kernel: forward.2
= control target key start
LH: loop header
LB: loop body
LE: loop exit
PB: predicated region body
PF: predicated region fallthrough
CT: control target
= control target key end

     0   :  { %8 = vsyncpa [#allocation3], 0  ;;  %s1226_s0 = inlined_call_operand.vmem [shape: bf16[16,768], index: 0, kind: input, shape index: {}]   ;;  %s1227_s1 = inlined_call_operand.hbm [shape: bf16[768,128], index: 1, kind: input, shape index: {}]   ;;  %s1228_s2 = inlined_call_operand.hbm [shape: f32[1,128], index: 2, kind: input, shape index: {}]   ;;  %s1229_s3 = inlined_call_operand.vmem [shape: bf16[16,128], index: 3, kind: output, shape index: {}]  }
   0x1   :  { %9 = vsyncpa [#allocation5], 0  ;;  %s1171_s12 = smov 0  }
   0x2 LB: > { %s125_s15 = sshll.u32 %s1227_s1, 4  ;;  %s1180_s16 = sadd.s32 4294967295, %s1145_s12   ;;  %s1145_s12 = sphi %s1171_s12, %s15_s12   ;;  %s126_s15 = int_to_ptr.hbm [resolvable:$true] %s125_s15 }
   0x3   : > { %p785_p0 = scmp.ge.s32.totalorder %s1145_s12, 1  ;;  %p114_p1 = scmp.lt.s32.totalorder %s1145_s12, 3 }
   0x4   : > { %p1052_p2 = scmp.eq.s32.totalorder %s1180_s16, 0  ;;  %s1147_s18 = smov [#allocation2]  }
   0x5   : > { %p1185_p3 = pnand %p785_p0, %p114_p1  ;;  %s127_s19 = sshll.u32 %s1147_s18, 4  ;;  %s128_s19 = int_to_ptr.vmem [resolvable:$true] %s127_s19 }
   0x6   : > { %s140_s22 = sshll.u32 %s1228_s2, 4  ;;  %s1148_s23 = smov [#allocation4]   ;;  %s141_s22 = int_to_ptr.hbm [resolvable:$true] %s140_s22 }
   0x7   : > { %p1045_p4 = pneg %p1185_p3  ;;  %s142_s24 = sshll.u32 %s1148_s23, 4  ;;  %s143_s24 = int_to_ptr.vmem [resolvable:$true] %s142_s24 }
   0x8   : > { %s1149_s25 = smov 64   ;;  %s1150_s26 = smov 4  }
   0x9   : > { %p1046_p5 = pnand %p1052_p2, %p1045_p4  ;;  %163 = sbr.rel (%p1185_p3) target bundleno = 354 (0x162), region = 32 }
   0xb   : > { %1048 = dma.hbm_to_vmem [thread:$0]  (!%p1046_p5), %s126_s15, 6144, %s128_s19, [#allocation3], %s1149_s25, %s1149_s25, %s1150_s26  }
   0xc   : > { %1051 = dma.hbm_to_vmem [thread:$0]  (!%p1046_p5), %s141_s22, 16, %s143_s24, [#allocation5]  }
   0xe   : > { %1136 = dma.done.wait (%p1052_p2), [#allocation3], 6144  }
   0xf   : > { %1138 = vsyncadd (%p1052_p2), [#allocation3], 4294961152 }
  0x10   : > { %1140 = dma.done.wait (%p1052_p2), [#allocation5], 16  }
  0x11   : > { %1142 = vsyncadd (%p1052_p2), [#allocation5], 4294967280  ;;  %v995_v0 = vld [vmem:[#allocation2 + $0x38] sm:$0xff]  ;;  %v994_v2 = vld [vmem:[#allocation2 + $0x30] sm:$0xff]  ;;  %p192_p6 = scmp.lt.s32.totalorder %s1180_s16, 1 }
  0x12   : > { %v1003_v1 = vld [vmem:[#allocation2 + $0x78] sm:$0xff]  ;;  %613 = vmatpush.bf16.msra.mxu0 %v995_v0  ;;  %v1002_v3 = vld [vmem:[#allocation2 + $0x70] sm:$0xff]  ;;  %v993_v8 = vld [vmem:[#allocation2 + $0x28] sm:$0xff] }
  0x13   : > { %626 = vmatpush.bf16.msra.mxu1 %v1003_v1  ;;  %v1011_v4 = vld [vmem:[#allocation2 + $0xb8] sm:$0xff]  ;;  %v1010_v6 = vld [vmem:[#allocation2 + $0xb0] sm:$0xff]  ;;  %v1001_v9 = vld [vmem:[#allocation2 + $0x68] sm:$0xff]  ;;  %s1232_s16 = smov (!%p192_p6, %s1180_s16), 1 }
  0x14   : > { %v1019_v5 = vld [vmem:[#allocation2 + $0xf8] sm:$0xff]  ;;  %639 = vmatpush.bf16.msra.mxu2 %v1011_v4  ;;  %v1018_v7 = vld [vmem:[#allocation2 + $0xf0] sm:$0xff]  ;;  %v1009_v10 = vld [vmem:[#allocation2 + $0xa8] sm:$0xff]  ;;  %s1036_s27 = smul.u32 24, %s1232_s16  ;;  %s793_s4 = sshll.u32 %s1232_s16, 2 }
  0x15   : > { %652 = vmatpush.bf16.msra.mxu3 %v1019_v5  ;;  %v1017_v11 = vld [vmem:[#allocation2 + $0xe8] sm:$0xff]  ;;  %v992_v12 = vld [vmem:[#allocation2 + $0x20] sm:$0xff]  ;;  %v991_v16 = vld [vmem:[#allocation2 + $0x18] sm:$0xff]  ;;  %s200_s7 = scalar_lea.vmem %s1229_s3, %s793_s4 }
  0x16   : > { %614 = vmatpush.bf16.msra.mxu0 %v994_v2  ;;  %v1000_v13 = vld [vmem:[#allocation2 + $0x60] sm:$0xff]  ;;  %v999_v17 = vld [vmem:[#allocation2 + $0x58] sm:$0xff]  ;;  %v990_v20 = vld [vmem:[#allocation2 + $0x10] sm:$0xff]  ;;  %s1214_s30 = scalar_lea.vmem %s1226_s0, %s1036_s27 }
  0x17   : > { %627 = vmatpush.bf16.msra.mxu1 %v1002_v3  ;;  %v1008_v14 = vld [vmem:[#allocation2 + $0xa0] sm:$0xff]  ;;  %v1007_v18 = vld [vmem:[#allocation2 + $0x98] sm:$0xff]  ;;  %v998_v21 = vld [vmem:[#allocation2 + $0x50] sm:$0xff] }
  0x18   : > { %640 = vmatpush.bf16.msra.mxu2 %v1010_v6  ;;  %v1016_v15 = vld [vmem:[#allocation2 + $0xe0] sm:$0xff]  ;;  %v1015_v19 = vld [vmem:[#allocation2 + $0xd8] sm:$0xff]  ;;  %v1006_v22 = vld [vmem:[#allocation2 + $0x90] sm:$0xff] }
  0x19   : > { %653 = vmatpush.bf16.msra.mxu3 %v1018_v7  ;;  %v1014_v23 = vld [vmem:[#allocation2 + $0xd0] sm:$0xff]  ;;  %v989_v24 = vld [vmem:[#allocation2 + $0x8] sm:$0xff]  ;;  %v201_v26 = vld [vmem:[%s1214_s30] sm:$0xff] }
  0x1a   : > { %615 = vmatpush.bf16.msra.mxu0 %v993_v8  ;;  %v997_v25 = vld [vmem:[#allocation2 + $0x48] sm:$0xff]  ;;  %v307_v28 = vunpack.c.l.b16 %v201_v26  ;;  %v308_v30 = vunpack.c.h.b16 %v201_v26  ;;  %v988_v32 = vld [vmem:[#allocation2] sm:$0xff]  ;;  %v1027_v34 = vld [vmem:[#allocation2 + $0x138] sm:$0xff] }
  0x1b   : > { %628 = vmatpush.bf16.msra.mxu1 %v1001_v9  ;;  %v1005_v27 = vld [vmem:[#allocation2 + $0x88] sm:$0xff]  ;;  %v996_v33 = vld [vmem:[#allocation2 + $0x40] sm:$0xff]  ;;  %v1035_v35 = vld [vmem:[#allocation2 + $0x178] sm:$0xff] }
  0x1c   : > { %641 = vmatpush.bf16.msra.mxu2 %v1009_v10  ;;  %v1013_v29 = vld [vmem:[#allocation2 + $0xc8] sm:$0xff]  ;;  %v1004_v36 = vld [vmem:[#allocation2 + $0x80] sm:$0xff]  ;;  %v313_v38 = vpack.c.b16 %v307_v28, %v307_v28  ;;  %v314_v39 = vpack.c.b16 %v308_v30, %v308_v30  ;;  %v1026_v42 = vld [vmem:[#allocation2 + $0x130] sm:$0xff] }
  0x1d   : > { %654 = vmatpush.bf16.msra.mxu3 %v1017_v11  ;;  %v202_v31 = vld [vmem:[%s1214_s30 + $0x8] sm:$0xff]  ;;  %v1012_v41 = vld [vmem:[#allocation2 + $0xc0] sm:$0xff]  ;;  %v1034_v43 = vld [vmem:[#allocation2 + $0x170] sm:$0xff] }
  0x1e   : > { %616 = vmatpush.bf16.msra.mxu0 %v992_v12  ;;  %v309_v37 = vunpack.c.l.b16 %v202_v31  ;;  %v310_v40 = vunpack.c.h.b16 %v202_v31  ;;  %v1025_v46 = vld [vmem:[#allocation2 + $0x128] sm:$0xff]  ;;  %v1024_v48 = vld [vmem:[#allocation2 + $0x120] sm:$0xff]  ;;  %v1023_v50 = vld [vmem:[#allocation2 + $0x118] sm:$0xff] }
  0x1f   : > { %629 = vmatpush.bf16.msra.mxu1 %v1000_v13  ;;  %v1033_v47 = vld [vmem:[#allocation2 + $0x168] sm:$0xff]  ;;  %v1032_v49 = vld [vmem:[#allocation2 + $0x160] sm:$0xff]  ;;  %v1031_v51 = vld [vmem:[#allocation2 + $0x158] sm:$0xff] }
  0x20   : > { %642 = vmatpush.bf16.msra.mxu2 %v1008_v14  ;;  %v315_v44 = vpack.c.b16 %v309_v37, %v309_v37  ;;  %v316_v45 = vpack.c.b16 %v310_v40, %v310_v40  ;;  %v1022_v52 = vld [vmem:[#allocation2 + $0x110] sm:$0xff]  ;;  %v1021_v54 = vld [vmem:[#allocation2 + $0x108] sm:$0xff]  ;;  %v1020_v59 = vld [vmem:[#allocation2 + $0x100] sm:$0xff] }
  0x21   : > { %655 = vmatpush.bf16.msra.mxu3 %v1016_v15  ;;  %v1030_v53 = vld [vmem:[#allocation2 + $0x150] sm:$0xff]  ;;  %v1029_v55 = vld [vmem:[#allocation2 + $0x148] sm:$0xff]  ;;  %v1028_v60 = vld [vmem:[#allocation2 + $0x140] sm:$0xff] }
  0x22   : > { %617 = vmatpush.bf16.msra.mxu0 %v991_v16  ;;  %v203_v56 = vld [vmem:[%s1214_s30 + $0x10] sm:$0xff]  ;;  %v1068_v5 = vld [vmem:[#allocation4] ss:$0 sm:$0xff] }
  0x23   : > { %630 = vmatpush.bf16.msra.mxu1 %v999_v17  ;;  %v311_v57 = vunpack.c.l.b16 %v203_v56  ;;  %v312_v58 = vunpack.c.h.b16 %v203_v56 }
  0x24   : > { %643 = vmatpush.bf16.msra.mxu2 %v1007_v18 }
  0x25   : > { %656 = vmatpush.bf16.msra.mxu3 %v1015_v19  ;;  %v317_v61 = vpack.c.b16 %v311_v57, %v311_v57  ;;  %v318_v62 = vpack.c.b16 %v312_v58, %v312_v58 }
  0x26   : > { %618 = vmatpush.bf16.msra.mxu0 %v990_v20 }
  0x27   : > { %631 = vmatpush.bf16.msra.mxu1 %v998_v21 }
  0x28   : > { %644 = vmatpush.bf16.msra.mxu2 %v1006_v22 }
  0x29   : > { %657 = vmatpush.bf16.msra.mxu3 %v1014_v23 }
  0x2a   : > { %619 = vmatpush.bf16.msra.mxu0 %v989_v24 }
  0x2b   : > { %632 = vmatpush.bf16.msra.mxu1 %v997_v25 }
  0x2c   : > { %645 = vmatpush.bf16.msra.mxu2 %v1005_v27 }
  0x2d   : > { %658 = vmatpush.bf16.msra.mxu3 %v1013_v29 }
  0x2e   : > { %620 = vmatpush.bf16.msra.mxu0 %v988_v32 }
  0x2f   : > { %633 = vmatpush.bf16.msra.mxu1 %v996_v33 }
  0x30   : > { %646 = vmatpush.bf16.msra.mxu2 %v1004_v36 }
  0x31   : > { %621 = vmatmul.bf16.vlgmr.msra.gmra.mxu0 %v313_v38  ;;  %659 = vmatpush.bf16.msra.mxu3 %v1012_v41 }
  0x32   : > { %665 = vmatpush.bf16.msrb.mxu0 %v1027_v34  ;;  %634 = vmatmul.bf16.vlgmr.msra.gmra.mxu1 %v314_v39 }
  0x33   : > { %678 = vmatpush.bf16.msrb.mxu1 %v1035_v35  ;;  %647 = vmatmul.bf16.vlgmr.msra.gmra.mxu2 %v315_v44 }
  0x34   : > { %660 = vmatmul.bf16.vlgmr.msra.gmra.mxu3 %v316_v45 }
  0x36   : > { %666 = vmatpush.bf16.msrb.mxu0 %v1026_v42 }
  0x37   : > { %679 = vmatpush.bf16.msrb.mxu1 %v1034_v43 }
  0x3a   : > { %667 = vmatpush.bf16.msrb.mxu0 %v1025_v46 }
  0x3b   : > { %680 = vmatpush.bf16.msrb.mxu1 %v1033_v47 }
  0x3e   : > { %668 = vmatpush.bf16.msrb.mxu0 %v1024_v48 }
  0x3f   : > { %681 = vmatpush.bf16.msrb.mxu1 %v1032_v49 }
  0x42   : > { %669 = vmatpush.bf16.msrb.mxu0 %v1023_v50 }
  0x43   : > { %682 = vmatpush.bf16.msrb.mxu1 %v1031_v51 }
  0x46   : > { %670 = vmatpush.bf16.msrb.mxu0 %v1022_v52 }
  0x47   : > { %683 = vmatpush.bf16.msrb.mxu1 %v1030_v53 }
  0x4a   : > { %671 = vmatpush.bf16.msrb.mxu0 %v1021_v54 }
  0x4b   : > { %684 = vmatpush.bf16.msrb.mxu1 %v1029_v55 }
  0x4e   : > { %672 = vmatpush.bf16.msrb.mxu0 %v1020_v59 }
  0x4f   : > { %685 = vmatpush.bf16.msrb.mxu1 %v1028_v60 }
  0x51   : > { %673 = vmatmul.bf16.vlgmr.msrb.gmra.mxu0 %v317_v61 }
  0x52   : > { %686 = vmatmul.bf16.vlgmr.msrb.gmra.mxu1 %v318_v62 }
  0xae   : > { %v622_v63 = vpop.f32.mrf.mxu0 }
  0xaf   : > { %v635_v0 = vpop.f32.mrf.mxu1  ;;  %v623_v6 = vadd.f32 %v1068_v5, %v622_v63 }
  0xb1   : > { %v636_v9 = vadd.f32 %v635_v0, %v623_v6 }
  0xb6   : > { %v624_v1 = vpop.f32.mrf.mxu0  ;;  %v648_v3 = vpop.f32.mrf.mxu2 }
  0xb7   : > { %v637_v2 = vpop.f32.mrf.mxu1  ;;  %v661_v4 = vpop.f32.mrf.mxu3  ;;  %v649_v10 = vadd.f32 %v648_v3, %v636_v9 }
  0xb9   : > { %v662_v11 = vadd.f32 %v661_v4, %v649_v10 }
  0xbe   : > { %v650_v7 = vpop.f32.mrf.mxu2 }
  0xbf   : > { %v663_v8 = vpop.f32.mrf.mxu3 }
  0xce   : > { %v674_v12 = vpop.f32.mrf.mxu0 }
  0xcf   : > { %v687_v13 = vpop.f32.mrf.mxu1  ;;  %v675_v14 = vadd.f32 %v674_v12, %v662_v11 }
  0xd1   : > { %v688_v15 = vadd.f32 %v687_v13, %v675_v14 }
  0xd3   : > { %v691_v16 = vmul.f32 %v688_v15, %v688_v15 }
  0xd5   : > { %692 = vadd.xlane.f32.xlu0 %v691_v16 }
  0xd6   : > { %v676_v17 = vpop.f32.mrf.mxu0 }
  0xd7   : > { %v689_v18 = vpop.f32.mrf.mxu1 }
 0x148   : > { %v693_v19 = vpop.xlane.xlu0 %692 }
 0x149   : > { %v694_v20 = vadd.f32 1e-12, %v693_v19 }
 0x14b   : > { %1069 = vrsqrt.f32 %v694_v20  ;;  %vm701_vm1 = vweird.f32 %v694_v20 }
 0x151   : > { %v1070_v21 = vpop.eup %1069 }
 0x152   : > { %v696_v22 = vmul.f32 %v1070_v21, %v694_v20  ;;  %vm702_vm0 = vweird.f32 %v1070_v21 }
 0x153   : > { %vm703_vm2 = vmor %vm701_vm1, %vm702_vm0 }
 0x154   : > { %v697_v23 = vmul.f32 %v1070_v21, %v696_v22 }
 0x156   : > { %v698_v24 = vmul.f32 0.5, %v697_v23 }
 0x158   : > { %v699_v25 = vsub.f32 1.5, %v698_v24 }
 0x15a   : > { %v700_v26 = vmul.f32 %v1070_v21, %v699_v25 }
 0x15c   : > { %v704_v27 = vsel %vm703_vm2, %v1070_v21, %v700_v26 }
 0x15d   : > { %v705_v28 = vmul.f32 %v704_v27, %v688_v15 }
 0x15f   : > { %v706_v29 = vpack.c.bf16 %v705_v28, %v705_v28 }
 0x161   : > { %707 = vst [vmem:[%s200_s7] sm:$0xf] %v706_v29 }
 0x162 PF: > { %s15_s12 = sadd.s32 1, %s1145_s12  }
 0x163   : > { %p12_p7 = scmp.ge.s32.totalorder %s15_s12, 4  }
 0x165   :  { %14 = sbr.rel (!%p12_p7) target bundleno = 2 (0x2), region = 71 }
 0x16a   :  { %727 = vsyncpa [#allocation3], 1 }
 0x16b   :  { %729 = vsyncpa [#allocation3 + $0x1], 1 }
 0x16c   :  { %730 = vsyncpa [#allocation5], 1 }

// kernel: forward.3
= control target key start
LH: loop header
LB: loop body
LE: loop exit
PB: predicated region body
PF: predicated region fallthrough
CT: control target
= control target key end

     0   :  { %s13926_s0 = inlined_call_operand.vmem [shape: bf16[2,8,128], index: 0, kind: input, shape index: {}]   ;;  %s13927_s1 = inlined_call_operand.vmem [shape: bf16[2,25,128], index: 1, kind: input, shape index: {}]   ;;  %s13928_s2 = inlined_call_operand.vmem [shape: f32[1,25], index: 2, kind: input, shape index: {}]   ;;  %s13929_s3 = inlined_call_operand.vmem [shape: f32[1,25], index: 3, kind: input, shape index: {}]   ;;  %s13930_s4 = inlined_call_operand.vmem [shape: bf16[2,10240], index: 4, kind: input, shape index: {}]   ;;  %s13931_s5 = inlined_call_operand.vmem [shape: bf16[2,2048], index: 5, kind: input, shape index: {}]   ;;  %s13932_s6 = inlined_call_operand.hbm [shape: bf16[10240,384], index: 6, kind: input, shape index: {}]   ;;  %s13933_s7 = inlined_call_operand.hbm [shape: f32[1,384], index: 7, kind: input, shape index: {}]   ;;  %s13934_s8 = inlined_call_operand.vmem [shape: bf16[384,12], index: 8, kind: input, shape index: {}]   ;;  %s13935_s9 = inlined_call_operand.hbm [shape: f32[1,12], index: 9, kind: input, shape index: {}]   ;;  %s13936_s10 = inlined_call_operand.hbm [shape: bf16[2048,384], index: 10, kind: input, shape index: {}]   ;;  %s13937_s11 = inlined_call_operand.hbm [shape: f32[1,384], index: 11, kind: input, shape index: {}]   ;;  %s13938_s12 = inlined_call_operand.vmem [shape: bf16[384,12], index: 12, kind: input, shape index: {}]   ;;  %s13939_s13 = inlined_call_operand.hbm [shape: f32[1,12], index: 13, kind: input, shape index: {}]   ;;  %s13940_s14 = inlined_call_operand.vmem [shape: f32[2,128], index: 14, kind: output, shape index: {}]  }
   0x1   :  { %13943 = sst [smem:[#allocation19_spill]] %s13933_s7 }
   0x2   :  { %13944 = sst [smem:[#allocation20_spill]] %s13935_s9 }
   0x3   :  { %13945 = sst [smem:[#allocation21_spill]] %s13936_s10 }
   0x4   :  { %13946 = sst [smem:[#allocation22_spill]] %s13937_s11 }
   0x5   :  { %13947 = sst [smem:[#allocation23_spill]] %s13939_s13 }
   0x6   :  { %13948 = sst [smem:[#allocation24_spill]] %s13940_s14 }
   0x7   :  { %19 = vsyncpa [#allocation6], 0 }
   0x8   :  { %21 = vsyncpa [#allocation6 + $0x1], 0 }
   0x9   :  { %22 = vsyncpa [#allocation8], 0 }
   0xa   :  { %23 = vsyncpa [#allocation11], 0 }
   0xb   :  { %24 = vsyncpa [#allocation14], 0  ;;  %s12623_s29 = smov 0   ;;  %s12625_s30 = smov 0  }
   0xc   :  { %s12627_s15 = smov 0   ;;  %s12629_s16 = smov 0  }
   0xd LB: > { %s13949_s7 = sld [smem:[#allocation19_spill]]  ;;  %s12647_s20 = sadd.s32 4294967295, %s12532_s16   ;;  %s12532_s16 = sphi %s12629_s16, %s13964_s16   ;;  %s12528_s15 = sphi %s12627_s15, %s13963_s15   ;;  %s12524_s30 = sphi %s12625_s30, %s13962_s30   ;;  %s12520_s29 = sphi %s12623_s29, %s13961_s29  }
   0xe   : > { %p8024_p0 = scmp.ge.s32.totalorder %s12532_s16, 1  ;;  %p182_p1 = scmp.eq.s32.totalorder %s12647_s20, 0 }
   0xf   : > { %p360_p2 = scmp.lt.s32.totalorder %s12532_s16, 6  ;;  %p8025_p3 = scmp.ne.s32.totalorder %s12647_s20, 0 }
  0x10   : > { %s12534_s22 = smov [#allocation7]   ;;  %s13951_s10 = sld [smem:[#allocation21_spill]] }
  0x11   : > { %p12653_p4 = pnand %p8024_p0, %p360_p2  ;;  %s389_s23 = sshll.u32 %s12534_s22, 4  ;;  %s390_s23 = int_to_ptr.vmem [resolvable:$true] %s389_s23 }
  0x12   : > { %s12535_s28 = smov [#allocation10]   ;;  %s13941_s18 = smov 192  }
  0x13   : > { %s387_s19 = sshll.u32 %s13949_s7, 4  ;;  %p12170_p5 = pneg %p12653_p4  ;;  %s388_s19 = int_to_ptr.hbm [resolvable:$true] %s387_s19 }
  0x14   : > { %s415_s17 = sshll.u32 %s12535_s28, 4  ;;  %s13942_s22 = smov 12   ;;  %s416_s17 = int_to_ptr.vmem [resolvable:$true] %s415_s17 }
  0x15   : > { %p12664_p6 = pnand %p12170_p5, %p182_p1  ;;  %s13953_s9 = sld [smem:[#allocation20_spill]] }
  0x16   : > { %s413_s26 = sshll.u32 %s13951_s10, 4  ;;  %s12538_s10 = smov [#allocation9]   ;;  %s414_s26 = int_to_ptr.hbm [resolvable:$true] %s413_s26 }
  0x17   : > { %12173 = dma.hbm_to_vmem [thread:$0]  (!%p12664_p6), %s388_s19, 48, %s390_s23, [#allocation8]  }
  0x18   : > { %12179 = dma.hbm_to_vmem [thread:$0]  (!%p12664_p6), %s414_s26, 49152, %s416_s17, [#allocation11], %s13941_s18, %s13941_s18, %s13942_s22  }
  0x19   : > { %s404_s28 = sshll.u32 %s12538_s10, 4  ;;  %s13954_s11 = sld [smem:[#allocation22_spill]]  ;;  %s405_s28 = int_to_ptr.vmem [resolvable:$true] %s404_s28 }
  0x1a   : > { %s12539_s26 = smov [#allocation12]   ;;  %s13955_s13 = sld [smem:[#allocation23_spill]] }
  0x1b   : > { %s402_s7 = sshll.u32 %s13953_s9, 4  ;;  %s430_s17 = sshll.u32 %s12539_s26, 4  ;;  %s403_s7 = int_to_ptr.hbm [resolvable:$true] %s402_s7  ;;  %s431_s17 = int_to_ptr.vmem [resolvable:$true] %s430_s17 }
  0x1c   : > { %12176 = dma.hbm_to_vmem [thread:$0]  (!%p12664_p6), %s403_s7, 16, %s405_s28, [#allocation8]  }
  0x1d   : > { %s12540_s7 = smov [#allocation13]   ;;  %s12691_s19 = sadd.s32 1, %s12532_s16  }
  0x1e   : > { %s445_s28 = sshll.u32 %s12540_s7, 4  ;;  %s165_s23 = ssub.s32 %s12532_s16, %s12691_s19  ;;  %s446_s28 = int_to_ptr.vmem [resolvable:$true] %s445_s28 }
  0x1f   : > { %s428_s14 = sshll.u32 %s13954_s11, 4  ;;  %s168_s26 = sadd.s32 1, %s12528_s15  ;;  %s429_s14 = int_to_ptr.hbm [resolvable:$true] %s428_s14 }
  0x20   : > { %s443_s10 = sshll.u32 %s13955_s13, 4  ;;  %p166_p7 = scmp.eq.s32.totalorder %s165_s23, 0  ;;  %s444_s10 = int_to_ptr.hbm [resolvable:$true] %s443_s10 }
  0x21   : > { %12182 = dma.hbm_to_vmem [thread:$0]  (!%p12664_p6), %s429_s14, 48, %s431_s17, [#allocation11]  }
  0x22   : > { %12185 = dma.hbm_to_vmem [thread:$0]  (!%p12664_p6), %s444_s10, 16, %s446_s28, [#allocation14]  }
  0x23   : > { %p175_p8 = scmp.ne.s32.totalorder %s12528_s15, %s12524_s30  ;;  %p176_p9 = scmp.eq.s32.totalorder %s12532_s16, 0 }
  0x24   : > { %p181_p10 = scmp.ne.s32.totalorder %s12524_s30, %s12520_s29  ;;  %p12195_p13 = scmp.lt.s32.totalorder %s12532_s16, 5 }
  0x25   : > { %s12702_s24 = scalar_select %p166_p7, %s12528_s15, %s168_s26  }
  0x26   : > { %p177_p11 = por %p176_p9, %p175_p8  ;;  %p12706_p12 = por %p182_p1, %p181_p10 }
  0x27   : > { %s464_s27 = sand.u32 1, %s12528_s15   ;;  %s12146_s25 = smul.u32 3072, %s12532_s16 }
  0x28   : > { %s12145_s17 = smul.u32 3072, %s464_s27  ;;  %p12713_p0 = pnand %p12195_p13, %p177_p11 }
  0x29   : > { %s474_s29 = scalar_lea.hbm %s13932_s6, %s12146_s25  ;;  %s465_s22 = scalar_lea.sflag [#allocation6], %s464_s27 }
  0x2a   : > { %s468_s23 = scalar_lea.vmem [#allocation5], %s12145_s17  ;;  %s475_s18 = sshll.u32 %s474_s29, 4  ;;  %s476_s18 = int_to_ptr.hbm [resolvable:$true] %s475_s18 }
  0x2b   : > { %s477_s26 = sshll.u32 %s468_s23, 4  ;;  %s12456_s9 = sshra.s32 %s476_s18, 4  ;;  %s478_s26 = int_to_ptr.vmem [resolvable:$true] %s477_s26  ;;  %s12457_s9 = int_to_ptr.hbm [resolvable:$true] %s12456_s9 }
  0x2c   : > { %s12458_s11 = scalar_lea.hbm %s12457_s9, 3072  ;;  %p12460_p5 = pneg %p12713_p0 }
  0x2d   : > { %p12459_p2 = scmp.ne.s32.totalorder %s12457_s9, %s12458_s11  ;;  %s12463_s7 = scalar_lea.hbm %s13932_s6, 15360 }
  0x2e   : > { %p12464_p8 = scmp.lt.s32.totalorder %s12457_s9, %s13932_s6  ;;  %p12465_p9 = scmp.lt.s32.totalorder %s12463_s7, %s12458_s11 }
  0x2f   : > { %p12461_p6 = pnand %p12460_p5, %p12459_p2 }
  0x30   : > { %p12466_p10 = por %p12465_p9, %p12464_p8 }
  0x31   : > { %p12462_p7 = pneg %p12461_p6 }
  0x33   : > { %p12467_p11 = pnand %p12466_p10, %p12462_p7 }
  0x35   : > { %12470 = shalt.err (!%p12467_p11)
}
  0x36   : > { %s13958_s27 = smov 12   ;;  %s13959_s17 = smov 192  }
  0x37   : > { %12189 = dma.hbm_to_vmem [thread:$0]  (!%p12713_p0), %s476_s18, 49152, %s478_s26, %s465_s22, %s13959_s17, %s13959_s17, %s13958_s27  }
  0x38   : > { %489 = sbr.rel (%p12653_p4) target bundleno = 2087 (0x827), region = 76  ;;  %s491_s13 = sand.u32 (!%p12653_p4), 1, %s12524_s30  }
  0x39   : > { %s12147_s29 = smul.u32 (!%p12653_p4), 3072, %s491_s13  ;;  %s492_s23 = scalar_lea.sflag (!%p12653_p4), [#allocation6], %s491_s13 }
  0x3b   : > { %s12736_s16 = scalar_lea.vmem (!%p12653_p4), [#allocation5], %s12147_s29 }
  0x3d   : > { %12503 = dma.done.wait (%p12706_p12), %s492_s23, 49152  }
  0x3e   : > { %12505 = vsyncadd (%p12706_p12), %s492_s23, 4294918144 }
  0x3f   : > { %12507 = dma.done.wait (%p182_p1), [#allocation8], 64  }
  0x40   : > { %12509 = vsyncadd (%p182_p1), [#allocation8], 4294967232 }
  0x41   : > { %12511 = dma.done.wait (%p182_p1), [#allocation11], 49200  }
  0x42   : > { %12513 = vsyncadd (%p182_p1), [#allocation11], 4294918096 }
  0x43   : > { %12515 = dma.done.wait (%p182_p1), [#allocation14], 16  }
  0x44   : > { %12517 = vsyncadd (%p182_p1), [#allocation14], 4294967280  ;;  %s8040_s9 = sshll.u32 %s12647_s20, 4  ;;  %575 = sbr.rel (%p8025_p3) target bundleno = 1126 (0x466), region = 104 }
  0x45   : > { %p566_p4 = scmp.lt.s32.totalorder %s8040_s9, 79 }
  0x47   : > { %s13966_s9 = smov (!%p566_p4, %s8040_s9), 79 }
  0x48   : > { %s12758_s18 = scalar_lea.vmem %s13930_s4, %s13966_s9 }
  0x49   : > { %v8128_v0 = vld [vmem:[#allocation10 + $0xa8] sm:$0xf]  ;;  %v11347_v1 = vld [vmem:[#allocation10 + $0xb0] sm:$0xf0]  ;;  %v12541_v2 = vmov 0.0   ;;  %vm3815_vm0 = vcmask 1041408  }
  0x4a   : > { %576 = vst [vmem:[#allocation2] sm:$0x3f] %v12541_v2  ;;  %v8129_v3 = vor.u32 %v11347_v1, %v8128_v0  ;;  %v8224_v4 = vld [vmem:[#allocation10 + $0x168] sm:$0xf]  ;;  %v11371_v5 = vld [vmem:[#allocation10 + $0x170] sm:$0xf0] }
  0x4b   : > { %v8225_v6 = vor.u32 %v11371_v5, %v8224_v4  ;;  %v8320_v7 = vld [vmem:[#allocation10 + $0x228] sm:$0xf]  ;;  %v11395_v8 = vld [vmem:[#allocation10 + $0x230] sm:$0xf0]  ;;  %v8116_v12 = vld [vmem:[#allocation10 + $0x90] sm:$0xf] }
  0x4c   : > { %v8416_v9 = vld [vmem:[#allocation10 + $0x2e8] sm:$0xf]  ;;  %3183 = vmatpush.bf16.msra.mxu0 %v8129_v3  ;;  %v8321_v10 = vor.u32 %v11395_v8, %v8320_v7  ;;  %v11419_v11 = vld [vmem:[#allocation10 + $0x2f0] sm:$0xf0]  ;;  %v11344_v13 = vld [vmem:[#allocation10 + $0x98] sm:$0xf0] }
  0x4d   : > { %3196 = vmatpush.bf16.msra.mxu1 %v8225_v6  ;;  %v8417_v14 = vor.u32 %v11419_v11, %v8416_v9  ;;  %v8117_v15 = vor.u32 %v11344_v13, %v8116_v12  ;;  %v8212_v16 = vld [vmem:[#allocation10 + $0x150] sm:$0xf]  ;;  %v11368_v17 = vld [vmem:[#allocation10 + $0x158] sm:$0xf0]  ;;  %v8104_v25 = vld [vmem:[#allocation10 + $0x78] sm:$0xf] }
  0x4e   : > { %v8308_v18 = vld [vmem:[#allocation10 + $0x210] sm:$0xf]  ;;  %3209 = vmatpush.bf16.msra.mxu2 %v8321_v10  ;;  %v8213_v19 = vor.u32 %v11368_v17, %v8212_v16  ;;  %v11392_v20 = vld [vmem:[#allocation10 + $0x218] sm:$0xf0]  ;;  %v11341_v26 = vld [vmem:[#allocation10 + $0x80] sm:$0xf0] }
  0x4f   : > { %v8404_v21 = vld [vmem:[#allocation10 + $0x2d0] sm:$0xf]  ;;  %v11416_v22 = vld [vmem:[#allocation10 + $0x2d8] sm:$0xf0]  ;;  %3222 = vmatpush.bf16.msra.mxu3 %v8417_v14  ;;  %v8309_v23 = vor.u32 %v11392_v20, %v8308_v18  ;;  %v8200_v27 = vld [vmem:[#allocation10 + $0x138] sm:$0xf]  ;;  %v8105_v28 = vor.u32 %v11341_v26, %v8104_v25 }
  0x50   : > { %v8405_v24 = vor.u32 %v11416_v22, %v8404_v21  ;;  %3184 = vmatpush.bf16.msra.mxu0 %v8117_v15  ;;  %v11365_v29 = vld [vmem:[#allocation10 + $0x140] sm:$0xf0]  ;;  %v8296_v30 = vld [vmem:[#allocation10 + $0x1f8] sm:$0xf]  ;;  %v8092_v35 = vld [vmem:[#allocation10 + $0x60] sm:$0xf] }
  0x51   : > { %v11389_v31 = vld [vmem:[#allocation10 + $0x200] sm:$0xf0]  ;;  %3197 = vmatpush.bf16.msra.mxu1 %v8213_v19  ;;  %v8201_v32 = vor.u32 %v11365_v29, %v8200_v27  ;;  %v8392_v33 = vld [vmem:[#allocation10 + $0x2b8] sm:$0xf]  ;;  %v11338_v37 = vld [vmem:[#allocation10 + $0x68] sm:$0xf0] }
  0x52   : > { %v11413_v34 = vld [vmem:[#allocation10 + $0x2c0] sm:$0xf0]  ;;  %3210 = vmatpush.bf16.msra.mxu2 %v8309_v23  ;;  %v8297_v36 = vor.u32 %v11389_v31, %v8296_v30  ;;  %v8188_v38 = vld [vmem:[#allocation10 + $0x120] sm:$0xf]  ;;  %v11362_v39 = vld [vmem:[#allocation10 + $0x128] sm:$0xf0]  ;;  %v8093_v43 = vor.u32 %v11338_v37, %v8092_v35 }
  0x53   : > { %3223 = vmatpush.bf16.msra.mxu3 %v8405_v24  ;;  %v8393_v40 = vor.u32 %v11413_v34, %v8392_v33  ;;  %v8284_v41 = vld [vmem:[#allocation10 + $0x1e0] sm:$0xf]  ;;  %v11386_v42 = vld [vmem:[#allocation10 + $0x1e8] sm:$0xf0]  ;;  %v8189_v46 = vor.u32 %v11362_v39, %v8188_v38  ;;  %v8080_v47 = vld [vmem:[#allocation10 + $0x48] sm:$0xf] }
  0x54   : > { %3185 = vmatpush.bf16.msra.mxu0 %v8105_v28  ;;  %v8380_v44 = vld [vmem:[#allocation10 + $0x2a0] sm:$0xf]  ;;  %v11410_v45 = vld [vmem:[#allocation10 + $0x2a8] sm:$0xf0]  ;;  %v11335_v48 = vld [vmem:[#allocation10 + $0x50] sm:$0xf0]  ;;  %v8285_v49 = vor.u32 %v11386_v42, %v8284_v41 }
  0x55   : > { %3198 = vmatpush.bf16.msra.mxu1 %v8201_v32  ;;  %v8176_v50 = vld [vmem:[#allocation10 + $0x108] sm:$0xf]  ;;  %v11359_v51 = vld [vmem:[#allocation10 + $0x110] sm:$0xf0]  ;;  %v8381_v52 = vor.u32 %v11410_v45, %v8380_v44  ;;  %v8081_v55 = vor.u32 %v11335_v48, %v8080_v47  ;;  %v8068_v59 = vld [vmem:[#allocation10 + $0x30] sm:$0xf] }
  0x56   : > { %3211 = vmatpush.bf16.msra.mxu2 %v8297_v36  ;;  %v8272_v53 = vld [vmem:[#allocation10 + $0x1c8] sm:$0xf]  ;;  %v11383_v54 = vld [vmem:[#allocation10 + $0x1d0] sm:$0xf0]  ;;  %v8177_v58 = vor.u32 %v11359_v51, %v8176_v50  ;;  %v11332_v60 = vld [vmem:[#allocation10 + $0x38] sm:$0xf0] }
  0x57   : > { %3224 = vmatpush.bf16.msra.mxu3 %v8393_v40  ;;  %v8368_v56 = vld [vmem:[#allocation10 + $0x288] sm:$0xf]  ;;  %v11407_v57 = vld [vmem:[#allocation10 + $0x290] sm:$0xf0]  ;;  %v8273_v61 = vor.u32 %v11383_v54, %v8272_v53  ;;  %v8164_v62 = vld [vmem:[#allocation10 + $0xf0] sm:$0xf]  ;;  %v8069_v3 = vor.u32 %v11332_v60, %v8068_v59 }
  0x58   : > { %3186 = vmatpush.bf16.msra.mxu0 %v8093_v43  ;;  %v11356_v63 = vld [vmem:[#allocation10 + $0xf8] sm:$0xf0]  ;;  %v8369_v0 = vor.u32 %v11407_v57, %v8368_v56  ;;  %v8260_v1 = vld [vmem:[#allocation10 + $0x1b0] sm:$0xf]  ;;  %v8056_v7 = vld [vmem:[#allocation10 + $0x18] sm:$0xf] }
  0x59   : > { %3199 = vmatpush.bf16.msra.mxu1 %v8189_v46  ;;  %v11380_v2 = vld [vmem:[#allocation10 + $0x1b8] sm:$0xf0]  ;;  %v8356_v4 = vld [vmem:[#allocation10 + $0x270] sm:$0xf]  ;;  %v8165_v6 = vor.u32 %v11356_v63, %v8164_v62  ;;  %v11329_v8 = vld [vmem:[#allocation10 + $0x20] sm:$0xf0] }
  0x5a   : > { %3212 = vmatpush.bf16.msra.mxu2 %v8285_v49  ;;  %v11404_v5 = vld [vmem:[#allocation10 + $0x278] sm:$0xf0]  ;;  %v8261_v9 = vor.u32 %v11380_v2, %v8260_v1  ;;  %v8152_v10 = vld [vmem:[#allocation10 + $0xd8] sm:$0xf]  ;;  %v11353_v11 = vld [vmem:[#allocation10 + $0xe0] sm:$0xf0]  ;;  %v8057_v16 = vor.u32 %v11329_v8, %v8056_v7 }
  0x5b   : > { %3225 = vmatpush.bf16.msra.mxu3 %v8381_v52  ;;  %v8357_v12 = vor.u32 %v11404_v5, %v8356_v4  ;;  %v8248_v13 = vld [vmem:[#allocation10 + $0x198] sm:$0xf]  ;;  %v11377_v14 = vld [vmem:[#allocation10 + $0x1a0] sm:$0xf0]  ;;  %v8044_v18 = vld [vmem:[#allocation10] sm:$0xf]  ;;  %v8153_v20 = vor.u32 %v11353_v11, %v8152_v10 }
  0x5c   : > { %3187 = vmatpush.bf16.msra.mxu0 %v8081_v55  ;;  %v8344_v15 = vld [vmem:[#allocation10 + $0x258] sm:$0xf]  ;;  %v11401_v17 = vld [vmem:[#allocation10 + $0x260] sm:$0xf0]  ;;  %v11326_v19 = vld [vmem:[#allocation10 + $0x8] sm:$0xf0]  ;;  %v8249_v24 = vor.u32 %v11377_v14, %v8248_v13 }
  0x5d   : > { %3200 = vmatpush.bf16.msra.mxu1 %v8177_v58  ;;  %v8140_v21 = vld [vmem:[#allocation10 + $0xc0] sm:$0xf]  ;;  %v11350_v22 = vld [vmem:[#allocation10 + $0xc8] sm:$0xf0]  ;;  %v8512_v26 = vld [vmem:[#allocation10 + $0x3a8] sm:$0xf]  ;;  %v8345_v28 = vor.u32 %v11401_v17, %v8344_v15  ;;  %v8045_v32 = vor.u32 %v11326_v19, %v8044_v18 }
  0x5e   : > { %3213 = vmatpush.bf16.msra.mxu2 %v8273_v61  ;;  %v8236_v23 = vld [vmem:[#allocation10 + $0x180] sm:$0xf]  ;;  %v11374_v25 = vld [vmem:[#allocation10 + $0x188] sm:$0xf0]  ;;  %v11443_v27 = vld [vmem:[#allocation10 + $0x3b0] sm:$0xf0]  ;;  %v8141_v36 = vor.u32 %v11350_v22, %v8140_v21 }
  0x5f   : > { %3226 = vmatpush.bf16.msra.mxu3 %v8369_v0  ;;  %v8608_v29 = vld [vmem:[#allocation10 + $0x468] sm:$0xf]  ;;  %v11467_v30 = vld [vmem:[#allocation10 + $0x470] sm:$0xf0]  ;;  %v8332_v34 = vld [vmem:[#allocation10 + $0x240] sm:$0xf]  ;;  %v8513_v37 = vor.u32 %v11443_v27, %v8512_v26  ;;  %v8237_v40 = vor.u32 %v11374_v25, %v8236_v23 }
  0x60   : > { %3188 = vmatpush.bf16.msra.mxu0 %v8069_v3  ;;  %v8704_v31 = vld [vmem:[#allocation10 + $0x528] sm:$0xf]  ;;  %v11491_v33 = vld [vmem:[#allocation10 + $0x530] sm:$0xf0]  ;;  %v11398_v35 = vld [vmem:[#allocation10 + $0x248] sm:$0xf0]  ;;  %v8609_v41 = vor.u32 %v11467_v30, %v8608_v29 }
  0x61   : > { %3201 = vmatpush.bf16.msra.mxu1 %v8165_v6  ;;  %v8800_v38 = vld [vmem:[#allocation10 + $0x5e8] sm:$0xf]  ;;  %v11515_v39 = vld [vmem:[#allocation10 + $0x5f0] sm:$0xf0]  ;;  %v8500_v42 = vld [vmem:[#allocation10 + $0x390] sm:$0xf]  ;;  %v8705_v44 = vor.u32 %v11491_v33, %v8704_v31  ;;  %v8333_v45 = vor.u32 %v11398_v35, %v8332_v34 }
  0x62   : > { %3214 = vmatpush.bf16.msra.mxu2 %v8261_v9  ;;  %v11440_v43 = vld [vmem:[#allocation10 + $0x398] sm:$0xf0]  ;;  %v8596_v46 = vld [vmem:[#allocation10 + $0x450] sm:$0xf]  ;;  %v8801_v48 = vor.u32 %v11515_v39, %v8800_v38  ;;  %v8488_v55 = vld [vmem:[#allocation10 + $0x378] sm:$0xf] }
  0x63   : > { %3227 = vmatpush.bf16.msra.mxu3 %v8357_v12  ;;  %v11464_v47 = vld [vmem:[#allocation10 + $0x458] sm:$0xf0]  ;;  %v8692_v49 = vld [vmem:[#allocation10 + $0x510] sm:$0xf]  ;;  %v8501_v51 = vor.u32 %v11440_v43, %v8500_v42  ;;  %v11437_v56 = vld [vmem:[#allocation10 + $0x380] sm:$0xf0] }
  0x64   : > { %3189 = vmatpush.bf16.msra.mxu0 %v8057_v16  ;;  %v11488_v50 = vld [vmem:[#allocation10 + $0x518] sm:$0xf0]  ;;  %v8788_v52 = vld [vmem:[#allocation10 + $0x5d0] sm:$0xf]  ;;  %v8597_v54 = vor.u32 %v11464_v47, %v8596_v46  ;;  %v8584_v58 = vld [vmem:[#allocation10 + $0x438] sm:$0xf]  ;;  %v8489_v0 = vor.u32 %v11437_v56, %v8488_v55 }
  0x65   : > { %3202 = vmatpush.bf16.msra.mxu1 %v8153_v20  ;;  %v11512_v53 = vld [vmem:[#allocation10 + $0x5d8] sm:$0xf0]  ;;  %v8693_v57 = vor.u32 %v11488_v50, %v8692_v49  ;;  %v11461_v59 = vld [vmem:[#allocation10 + $0x440] sm:$0xf0]  ;;  %v8680_v61 = vld [vmem:[#allocation10 + $0x4f8] sm:$0xf] }
  0x66   : > { %3215 = vmatpush.bf16.msra.mxu2 %v8249_v24  ;;  %v8789_v60 = vor.u32 %v11512_v53, %v8788_v52  ;;  %v11485_v62 = vld [vmem:[#allocation10 + $0x500] sm:$0xf0]  ;;  %v8776_v1 = vld [vmem:[#allocation10 + $0x5b8] sm:$0xf]  ;;  %v8585_v3 = vor.u32 %v11461_v59, %v8584_v58  ;;  %v8476_v4 = vld [vmem:[#allocation10 + $0x360] sm:$0xf] }
  0x67   : > { %3228 = vmatpush.bf16.msra.mxu3 %v8345_v28  ;;  %v577_v63 = vld [vmem:[%s13931_s5] sm:$0xff]  ;;  %v11434_v5 = vld [vmem:[#allocation10 + $0x368] sm:$0xf0]  ;;  %v8681_v6 = vor.u32 %v11485_v62, %v8680_v61  ;;  %v8572_v7 = vld [vmem:[#allocation10 + $0x420] sm:$0xf]  ;;  %vm3817_vm1 = vcmask 1043456  }
  0x68   : > { %3190 = vmatpush.bf16.msra.mxu0 %v8045_v32  ;;  %v11509_v2 = vld [vmem:[#allocation10 + $0x5c0] sm:$0xf0]  ;;  %1100 = vst [vmem:[#allocation1] ss:$9 sm:$0xff] %v577_v63  ;;  %v11458_v8 = vld [vmem:[#allocation10 + $0x428] sm:$0xf0]  ;;  %v8477_v12 = vor.u32 %v11434_v5, %v8476_v4 }
  0x69   : > { %3203 = vmatpush.bf16.msra.mxu1 %v8141_v36  ;;  %v8777_v9 = vor.u32 %v11509_v2, %v8776_v1  ;;  %v8668_v10 = vld [vmem:[#allocation10 + $0x4e0] sm:$0xf]  ;;  %v11482_v11 = vld [vmem:[#allocation10 + $0x4e8] sm:$0xf0]  ;;  %v8573_v15 = vor.u32 %v11458_v8, %v8572_v7  ;;  %v8464_v16 = vld [vmem:[#allocation10 + $0x348] sm:$0xf] }
  0x6a   : > { %3216 = vmatpush.bf16.msra.mxu2 %v8237_v40  ;;  %v8764_v13 = vld [vmem:[#allocation10 + $0x5a0] sm:$0xf]  ;;  %v11506_v14 = vld [vmem:[#allocation10 + $0x5a8] sm:$0xf0]  ;;  %v11431_v17 = vld [vmem:[#allocation10 + $0x350] sm:$0xf0]  ;;  %v8669_v19 = vor.u32 %v11482_v11, %v8668_v10 }
  0x6b   : > { %3229 = vmatpush.bf16.msra.mxu3 %v8333_v45  ;;  %v8560_v18 = vld [vmem:[#allocation10 + $0x408] sm:$0xf]  ;;  %v11455_v20 = vld [vmem:[#allocation10 + $0x410] sm:$0xf0]  ;;  %v8765_v23 = vor.u32 %v11506_v14, %v8764_v13  ;;  %v8465_v27 = vor.u32 %v11431_v17, %v8464_v16  ;;  %v8452_v32 = vld [vmem:[#allocation10 + $0x330] sm:$0xf] }
  0x6c   : > { %3235 = vmatpush.bf16.msrb.mxu0 %v8513_v37  ;;  %v8656_v21 = vld [vmem:[#allocation10 + $0x4c8] sm:$0xf]  ;;  %v11479_v22 = vld [vmem:[#allocation10 + $0x4d0] sm:$0xf0]  ;;  %v8561_v31 = vor.u32 %v11455_v20, %v8560_v18  ;;  %v11428_v33 = vld [vmem:[#allocation10 + $0x338] sm:$0xf0] }
  0x6d   : > { %3248 = vmatpush.bf16.msrb.mxu1 %v8609_v41  ;;  %v8752_v28 = vld [vmem:[#allocation10 + $0x588] sm:$0xf]  ;;  %v11503_v29 = vld [vmem:[#allocation10 + $0x590] sm:$0xf0]  ;;  %v8657_v34 = vor.u32 %v11479_v22, %v8656_v21  ;;  %v8548_v35 = vld [vmem:[#allocation10 + $0x3f0] sm:$0xf]  ;;  %v8453_v40 = vor.u32 %v11428_v33, %v8452_v32 }
  0x6e   : > { %3261 = vmatpush.bf16.msrb.mxu2 %v8705_v44  ;;  %v11452_v36 = vld [vmem:[#allocation10 + $0x3f8] sm:$0xf0]  ;;  %v8753_v37 = vor.u32 %v11503_v29, %v8752_v28  ;;  %v8644_v38 = vld [vmem:[#allocation10 + $0x4b0] sm:$0xf]  ;;  %v8440_v43 = vld [vmem:[#allocation10 + $0x318] sm:$0xf] }
  0x6f   : > { %3274 = vmatpush.bf16.msrb.mxu3 %v8801_v48  ;;  %v12765_v24 = vld [vmem:[#allocation1 + $0x12] sm:$0xff]  ;;  %v12767_v25 = vld [vmem:[#allocation1] sm:$0xff]  ;;  %v12772_v30 = vld [vmem:[#allocation1 + $0x9] sm:$0xff]  ;;  %v8549_v44 = vor.u32 %v11452_v36, %v8548_v35  ;;  %vm3883_vm2 = vcmask 203776   ;;  %vm3957_vm4 = vcmask 1041409   ;;  %vm3960_vm5 = vcmask 197632  }
  0x70   : > { %3236 = vmatpush.bf16.msrb.mxu0 %v8501_v51  ;;  %v12769_v26 = vld [vmem:[#allocation1 + $0x1b] sm:$0xff]  ;;  %3217 = vmatmul.bf16.vlgmr.msra.gmra.mxu2 %v12765_v24  ;;  %v8740_v41 = vld [vmem:[#allocation10 + $0x570] sm:$0xf]  ;;  %v8536_v46 = vld [vmem:[#allocation10 + $0x3d8] sm:$0xf]  ;;  %vm4037_vm15 = vcmask 58368  }
  0x71   : > { %3249 = vmatpush.bf16.msrb.mxu1 %v8597_v54  ;;  %3191 = vmatmul.bf16.vlgmr.msra.gmra.mxu0 %v12767_v25  ;;  %v11476_v39 = vld [vmem:[#allocation10 + $0x4b8] sm:$0xf0]  ;;  %v11425_v45 = vld [vmem:[#allocation10 + $0x320] sm:$0xf0]  ;;  %v8632_v49 = vld [vmem:[#allocation10 + $0x498] sm:$0xf] }
  0x72   : > { %3262 = vmatpush.bf16.msrb.mxu2 %v8693_v57  ;;  %3230 = vmatmul.bf16.vlgmr.msra.gmra.mxu3 %v12769_v26  ;;  %v11500_v42 = vld [vmem:[#allocation10 + $0x578] sm:$0xf0]  ;;  %v11449_v47 = vld [vmem:[#allocation10 + $0x3e0] sm:$0xf0]  ;;  %v8645_v48 = vor.u32 %v11476_v39, %v8644_v38  ;;  %v8728_v51 = vld [vmem:[#allocation10 + $0x558] sm:$0xf]  ;;  %v8441_v56 = vor.u32 %v11425_v45, %v8440_v43 }
  0x73   : > { %3275 = vmatpush.bf16.msrb.mxu3 %v8789_v60  ;;  %3204 = vmatmul.bf16.vlgmr.msra.gmra.mxu1 %v12772_v30  ;;  %v11473_v50 = vld [vmem:[#allocation10 + $0x4a0] sm:$0xf0]  ;;  %v8741_v52 = vor.u32 %v11500_v42, %v8740_v41  ;;  %v8428_v54 = vld [vmem:[#allocation10 + $0x300] sm:$0xf]  ;;  %v11422_v55 = vld [vmem:[#allocation10 + $0x308] sm:$0xf0]  ;;  %v8537_v61 = vor.u32 %v11449_v47, %v8536_v46 }
  0x74   : > { %3237 = vmatpush.bf16.msrb.mxu0 %v8489_v0  ;;  %v11497_v53 = vld [vmem:[#allocation10 + $0x560] sm:$0xf0]  ;;  %v8524_v57 = vld [vmem:[#allocation10 + $0x3c0] sm:$0xf]  ;;  %v11446_v58 = vld [vmem:[#allocation10 + $0x3c8] sm:$0xf0]  ;;  %v8429_v10 = vor.u32 %v11422_v55, %v8428_v54 }
  0x75   : > { %3250 = vmatpush.bf16.msrb.mxu1 %v8585_v3  ;;  %v8896_v59 = vld [vmem:[#allocation10 + $0x6a8] sm:$0xf]  ;;  %v11539_v60 = vld [vmem:[#allocation10 + $0x6b0] sm:$0xf0]  ;;  %v8620_v62 = vld [vmem:[#allocation10 + $0x480] sm:$0xf]  ;;  %v8633_v3 = vor.u32 %v11473_v50, %v8632_v49  ;;  %v8729_v7 = vor.u32 %v11497_v53, %v8728_v51  ;;  %v8525_v14 = vor.u32 %v11446_v58, %v8524_v57 }
  0x76   : > { %3263 = vmatpush.bf16.msrb.mxu2 %v8681_v6  ;;  %v11470_v63 = vld [vmem:[#allocation10 + $0x488] sm:$0xf0]  ;;  %v8992_v0 = vld [vmem:[#allocation10 + $0x768] sm:$0xf]  ;;  %v12777_v1 = vld [vmem:[#allocation1 + $0x36] sm:$0xff] }
  0x77   : > { %3276 = vmatpush.bf16.msrb.mxu3 %v8777_v9  ;;  %v578_v2 = vld [vmem:[%s13931_s5 + $0x8] sm:$0xff]  ;;  %v12784_v5 = vld [vmem:[#allocation1 + $0x3f] sm:$0xff]  ;;  %v11563_v8 = vld [vmem:[#allocation10 + $0x770] sm:$0xf0]  ;;  %v8621_v18 = vor.u32 %v11470_v63, %v8620_v62 }
  0x78   : > { %3238 = vmatpush.bf16.msrb.mxu0 %v8477_v12  ;;  %v12782_v4 = vld [vmem:[#allocation1 + $0x24] sm:$0xff]  ;;  %v12786_v6 = vld [vmem:[#allocation1 + $0x2d] sm:$0xff]  ;;  %v8716_v12 = vld [vmem:[#allocation10 + $0x540] sm:$0xf] }
  0x79   : > { %3251 = vmatpush.bf16.msrb.mxu1 %v8573_v15  ;;  %v9088_v9 = vld [vmem:[#allocation10 + $0x828] sm:$0xf]  ;;  %1110 = vst [vmem:[#allocation1] ss:$9 sm:$0xff] %v578_v2  ;;  %v11587_v11 = vld [vmem:[#allocation10 + $0x830] sm:$0xf0]  ;;  %v8897_v15 = vor.u32 %v11539_v60, %v8896_v59 }
  0x7a   : > { %3264 = vmatpush.bf16.msrb.mxu2 %v8669_v19  ;;  %v11494_v13 = vld [vmem:[#allocation10 + $0x548] sm:$0xf0]  ;;  %v9184_v16 = vld [vmem:[#allocation10 + $0x8e8] sm:$0xf]  ;;  %v11611_v17 = vld [vmem:[#allocation10 + $0x8f0] sm:$0xf0]  ;;  %v8993_v19 = vor.u32 %v11563_v8, %v8992_v0  ;;  %v9089_v22 = vor.u32 %v11587_v11, %v9088_v9 }
  0x7b   : > { %3277 = vmatpush.bf16.msrb.mxu3 %v8765_v23  ;;  %v8884_v20 = vld [vmem:[#allocation10 + $0x690] sm:$0xf]  ;;  %v11536_v21 = vld [vmem:[#allocation10 + $0x698] sm:$0xf0]  ;;  %v8717_v23 = vor.u32 %v11494_v13, %v8716_v12  ;;  %v9185_v29 = vor.u32 %v11611_v17, %v9184_v16  ;;  %v11533_v38 = vld [vmem:[#allocation10 + $0x680] sm:$0xf0] }
  0x7c   : > { %3239 = vmatpush.bf16.msrb.mxu0 %v8465_v27  ;;  %v8980_v27 = vld [vmem:[#allocation10 + $0x750] sm:$0xf]  ;;  %v11560_v28 = vld [vmem:[#allocation10 + $0x758] sm:$0xf0]  ;;  %v8885_v33 = vor.u32 %v11536_v21, %v8884_v20  ;;  %v11557_v41 = vld [vmem:[#allocation10 + $0x740] sm:$0xf0] }
  0x7d   : > { %3252 = vmatpush.bf16.msrb.mxu1 %v8561_v31  ;;  %v9076_v31 = vld [vmem:[#allocation10 + $0x810] sm:$0xf]  ;;  %v11584_v32 = vld [vmem:[#allocation10 + $0x818] sm:$0xf0]  ;;  %v8981_v36 = vor.u32 %v11560_v28, %v8980_v27  ;;  %v9064_v43 = vld [vmem:[#allocation10 + $0x7f8] sm:$0xf] }
  0x7e   : > { %3265 = vmatpush.bf16.msrb.mxu2 %v8657_v34  ;;  %v9172_v34 = vld [vmem:[#allocation10 + $0x8d0] sm:$0xf]  ;;  %v11608_v35 = vld [vmem:[#allocation10 + $0x8d8] sm:$0xf0]  ;;  %v9077_v39 = vor.u32 %v11584_v32, %v9076_v31  ;;  %v9160_v46 = vld [vmem:[#allocation10 + $0x8b8] sm:$0xf] }
  0x7f   : > { %3278 = vmatpush.bf16.msrb.mxu3 %v8753_v37  ;;  %v8872_v37 = vld [vmem:[#allocation10 + $0x678] sm:$0xf]  ;;  %v9173_v42 = vor.u32 %v11608_v35, %v9172_v34  ;;  %v11605_v47 = vld [vmem:[#allocation10 + $0x8c0] sm:$0xf0]  ;;  %v8860_v49 = vld [vmem:[#allocation10 + $0x660] sm:$0xf] }
  0x80   : > { %3240 = vmatpush.bf16.msrb.mxu0 %v8453_v40  ;;  %v8968_v40 = vld [vmem:[#allocation10 + $0x738] sm:$0xf]  ;;  %v8873_v45 = vor.u32 %v11533_v38, %v8872_v37  ;;  %v11530_v50 = vld [vmem:[#allocation10 + $0x668] sm:$0xf0]  ;;  %v9161_v54 = vor.u32 %v11605_v47, %v9160_v46  ;;  %v9052_v55 = vld [vmem:[#allocation10 + $0x7e0] sm:$0xf] }
  0x81   : > { %3253 = vmatpush.bf16.msrb.mxu1 %v8549_v44  ;;  %v11581_v44 = vld [vmem:[#allocation10 + $0x800] sm:$0xf0]  ;;  %v11554_v53 = vld [vmem:[#allocation10 + $0x728] sm:$0xf0]  ;;  %v8861_v57 = vor.u32 %v11530_v50, %v8860_v49  ;;  %v9148_v58 = vld [vmem:[#allocation10 + $0x8a0] sm:$0xf] }
  0x82   : > { %3266 = vmatpush.bf16.msrb.mxu2 %v8645_v48  ;;  %v8969_v48 = vor.u32 %v11557_v41, %v8968_v40  ;;  %v9065_v51 = vor.u32 %v11581_v44, %v9064_v43  ;;  %v11602_v59 = vld [vmem:[#allocation10 + $0x8a8] sm:$0xf0]  ;;  %v11527_v62 = vld [vmem:[#allocation10 + $0x650] sm:$0xf0]  ;;  %v8944_v0 = vld [vmem:[#allocation10 + $0x708] sm:$0xf] }
  0x83   : > { %3279 = vmatpush.bf16.msrb.mxu3 %v8741_v52  ;;  %v8956_v52 = vld [vmem:[#allocation10 + $0x720] sm:$0xf]  ;;  %v11551_v2 = vld [vmem:[#allocation10 + $0x710] sm:$0xf0]  ;;  %v8836_v13 = vld [vmem:[#allocation10 + $0x630] sm:$0xf] }
  0x84   : > { %3241 = vmatpush.bf16.msrb.mxu0 %v8441_v56  ;;  %v11578_v56 = vld [vmem:[#allocation10 + $0x7e8] sm:$0xf0]  ;;  %v8957_v60 = vor.u32 %v11554_v53, %v8956_v52  ;;  %v11575_v8 = vld [vmem:[#allocation10 + $0x7d0] sm:$0xf0]  ;;  %v8945_v12 = vor.u32 %v11551_v2, %v8944_v0  ;;  %v8932_v16 = vld [vmem:[#allocation10 + $0x6f0] sm:$0xf] }
  0x85   : > { %3254 = vmatpush.bf16.msrb.mxu1 %v8537_v61  ;;  %v8848_v61 = vld [vmem:[#allocation10 + $0x648] sm:$0xf]  ;;  %v9053_v63 = vor.u32 %v11578_v56, %v9052_v55  ;;  %v11599_v11 = vld [vmem:[#allocation10 + $0x890] sm:$0xf0]  ;;  %v11548_v17 = vld [vmem:[#allocation10 + $0x6f8] sm:$0xf0] }
  0x86   : > { %3267 = vmatpush.bf16.msrb.mxu2 %v8633_v3  ;;  %v9149_v3 = vor.u32 %v11602_v59, %v9148_v58  ;;  %v8849_v9 = vor.u32 %v11527_v62, %v8848_v61  ;;  %v11572_v20 = vld [vmem:[#allocation10 + $0x7b8] sm:$0xf0]  ;;  %v8933_v27 = vor.u32 %v11548_v17, %v8932_v16  ;;  %v8824_v28 = vld [vmem:[#allocation10 + $0x618] sm:$0xf]  ;;  %v8812_v40 = vld [vmem:[#allocation10 + $0x600] sm:$0xf] }
  0x87   : > { %3280 = vmatpush.bf16.msrb.mxu3 %v8729_v7  ;;  %v9040_v7 = vld [vmem:[#allocation10 + $0x7c8] sm:$0xf]  ;;  %v8920_v32 = vld [vmem:[#allocation10 + $0x6d8] sm:$0xf]  ;;  %v11518_v41 = vld [vmem:[#allocation10 + $0x608] sm:$0xf0] }
  0x88   : > { %3242 = vmatpush.bf16.msrb.mxu0 %v8429_v10  ;;  %v9136_v10 = vld [vmem:[#allocation10 + $0x888] sm:$0xf]  ;;  %v9016_v35 = vld [vmem:[#allocation10 + $0x798] sm:$0xf]  ;;  %v8908_v43 = vld [vmem:[#allocation10 + $0x6c0] sm:$0xf] }
  0x89   : > { %3255 = vmatpush.bf16.msrb.mxu1 %v8525_v14  ;;  %v11524_v14 = vld [vmem:[#allocation10 + $0x638] sm:$0xf0]  ;;  %v9112_v37 = vld [vmem:[#allocation10 + $0x858] sm:$0xf]  ;;  %v11542_v44 = vld [vmem:[#allocation10 + $0x6c8] sm:$0xf0] }
  0x8a   : > { %3268 = vmatpush.bf16.msrb.mxu2 %v8621_v18  ;;  %v9137_v18 = vor.u32 %v11599_v11, %v9136_v10  ;;  %v8837_v21 = vor.u32 %v11524_v14, %v8836_v13  ;;  %v11566_v47 = vld [vmem:[#allocation10 + $0x788] sm:$0xf0]  ;;  %v11635_v49 = vld [vmem:[#allocation10 + $0x9b0] sm:$0xf0]  ;;  %v9472_v53 = vld [vmem:[#allocation10 + $0xb28] sm:$0xf]  ;;  %v8909_v58 = vor.u32 %v11542_v44, %v8908_v43 }
  0x8b   : > { %3281 = vmatpush.bf16.msrb.mxu3 %v8717_v23  ;;  %3243 = vmatmul.bf16.vlgmr.msrb.gmra.mxu0 %v12782_v4  ;;  %v11596_v23 = vld [vmem:[#allocation10 + $0x878] sm:$0xf0]  ;;  %v11659_v52 = vld [vmem:[#allocation10 + $0xa70] sm:$0xf0]  ;;  %v9100_v56 = vld [vmem:[#allocation10 + $0x840] sm:$0xf] }
  0x8c   : > { %3287 = vmatpush.bf16.msra.mxu0 %v8897_v15  ;;  %3256 = vmatmul.bf16.vlgmr.msrb.gmra.mxu1 %v12786_v6  ;;  %v9041_v15 = vor.u32 %v11575_v8, %v9040_v7  ;;  %v11683_v55 = vld [vmem:[#allocation10 + $0xb30] sm:$0xf0]  ;;  %v11632_v7 = vld [vmem:[#allocation10 + $0x998] sm:$0xf0]  ;;  %v9364_v8 = vld [vmem:[#allocation10 + $0xa50] sm:$0xf] }
  0x8d   : > { %3300 = vmatpush.bf16.msra.mxu1 %v8993_v19  ;;  %3269 = vmatmul.bf16.vlgmr.msrb.gmra.mxu2 %v12777_v1  ;;  %v9028_v19 = vld [vmem:[#allocation10 + $0x7b0] sm:$0xf]  ;;  %v11707_v61 = vld [vmem:[#allocation10 + $0xbf0] sm:$0xf0]  ;;  %v9473_v0 = vor.u32 %v11683_v55, %v9472_v53  ;;  %v11656_v10 = vld [vmem:[#allocation10 + $0xa58] sm:$0xf0] }
  0x8e   : > { %3313 = vmatpush.bf16.msra.mxu2 %v9089_v22  ;;  %3282 = vmatmul.bf16.vlgmr.msrb.gmra.mxu3 %v12784_v5  ;;  %v9124_v22 = vld [vmem:[#allocation10 + $0x870] sm:$0xf]  ;;  %v9029_v31 = vor.u32 %v11572_v20, %v9028_v19  ;;  %v1111_v13 = vld [vmem:[#allocation1] sm:$0xff]  ;;  %v1113_v16 = vld [vmem:[#allocation1 + $0x12] sm:$0xff]  ;;  %v9365_v20 = vor.u32 %v11656_v10, %v9364_v8 }
  0x8f   : > { %3326 = vmatpush.bf16.msra.mxu3 %v9185_v29  ;;  %v11521_v29 = vld [vmem:[#allocation10 + $0x620] sm:$0xf0]  ;;  %v9125_v34 = vor.u32 %v11596_v23, %v9124_v22  ;;  %v9460_v11 = vld [vmem:[#allocation10 + $0xb10] sm:$0xf]  ;;  %v9256_v22 = vld [vmem:[#allocation10 + $0x978] sm:$0xf] }
  0x90   : > { %3288 = vmatpush.bf16.msra.mxu0 %v8885_v33  ;;  %v11545_v33 = vld [vmem:[#allocation10 + $0x6e0] sm:$0xf0]  ;;  %v8825_v38 = vor.u32 %v11521_v29, %v8824_v28  ;;  %v9556_v14 = vld [vmem:[#allocation10 + $0xbd0] sm:$0xf]  ;;  %v9436_v43 = vld [vmem:[#allocation10 + $0xae0] sm:$0xf] }
  0x91   : > { %3301 = vmatpush.bf16.msra.mxu1 %v8981_v36  ;;  %v11569_v36 = vld [vmem:[#allocation10 + $0x7a0] sm:$0xf0]  ;;  %v1112_v17 = vld [vmem:[#allocation1 + $0x9] sm:$0xff]  ;;  %v9424_v55 = vld [vmem:[#allocation10 + $0xac8] sm:$0xf] }
  0x92   : > { %3314 = vmatpush.bf16.msra.mxu2 %v9077_v39  ;;  %v11593_v39 = vld [vmem:[#allocation10 + $0x860] sm:$0xf0]  ;;  %v9017_v46 = vor.u32 %v11569_v36, %v9016_v35  ;;  %v11674_v44 = vld [vmem:[#allocation10 + $0xae8] sm:$0xf0]  ;;  %v11668_v8 = vld [vmem:[#allocation10 + $0xab8] sm:$0xf0] }
  0x93   : > { %3327 = vmatpush.bf16.msra.mxu3 %v9173_v42  ;;  %v8921_v42 = vor.u32 %v11545_v33, %v8920_v32  ;;  %v9113_v50 = vor.u32 %v11593_v39, %v9112_v37  ;;  %v11629_v23 = vld [vmem:[#allocation10 + $0x980] sm:$0xf0]  ;;  %v9544_v33 = vld [vmem:[#allocation10 + $0xbb8] sm:$0xf]  ;;  %v11626_v39 = vld [vmem:[#allocation10 + $0x968] sm:$0xf0] }
  0x94   : > { %3289 = vmatpush.bf16.msra.mxu0 %v8873_v45  ;;  %v9004_v45 = vld [vmem:[#allocation10 + $0x780] sm:$0xf]  ;;  %v11653_v29 = vld [vmem:[#allocation10 + $0xa40] sm:$0xf0]  ;;  %v9257_v35 = vor.u32 %v11629_v23, %v9256_v22  ;;  %v11692_v10 = vld [vmem:[#allocation10 + $0xb78] sm:$0xf0] }
  0x95   : > { %3302 = vmatpush.bf16.msra.mxu1 %v8969_v48  ;;  %v9280_v48 = vld [vmem:[#allocation10 + $0x9a8] sm:$0xf]  ;;  %v9005_v62 = vor.u32 %v11566_v47, %v9004_v45  ;;  %v11677_v32 = vld [vmem:[#allocation10 + $0xb00] sm:$0xf0]  ;;  %v9532_v45 = vld [vmem:[#allocation10 + $0xba0] sm:$0xf] }
  0x96   : > { %3315 = vmatpush.bf16.msra.mxu2 %v9065_v51  ;;  %v9376_v51 = vld [vmem:[#allocation10 + $0xa68] sm:$0xf]  ;;  %v9281_v59 = vor.u32 %v11635_v49, %v9280_v48  ;;  %v9437_v49 = vor.u32 %v11674_v44, %v9436_v43  ;;  %v11689_v22 = vld [vmem:[#allocation10 + $0xb60] sm:$0xf0]  ;;  %v8322_v43 = vld [vmem:[#allocation10 + $0x234] sm:$0xf0] }
  0x97   : > { %3328 = vmatpush.bf16.msra.mxu3 %v9161_v54  ;;  %v8813_v54 = vor.u32 %v11518_v41, %v8812_v40  ;;  %v9340_v40 = vld [vmem:[#allocation10 + $0xa20] sm:$0xf] }
  0x98   : > { %3290 = vmatpush.bf16.msra.mxu0 %v8861_v57  ;;  %v11590_v57 = vld [vmem:[#allocation10 + $0x848] sm:$0xf0]  ;;  %v9484_v44 = vld [vmem:[#allocation10 + $0xb40] sm:$0xf] }
  0x99   : > { %3303 = vmatpush.bf16.msra.mxu1 %v8957_v60  ;;  %v9568_v60 = vld [vmem:[#allocation10 + $0xbe8] sm:$0xf]  ;;  %v9101_v2 = vor.u32 %v11590_v57, %v9100_v56  ;;  %v11671_v56 = vld [vmem:[#allocation10 + $0xad0] sm:$0xf0] }
  0x9a   : > { %3316 = vmatpush.bf16.msra.mxu2 %v9053_v63  ;;  %v9377_v63 = vor.u32 %v11659_v52, %v9376_v51  ;;  %v11623_v51 = vld [vmem:[#allocation10 + $0x950] sm:$0xf0]  ;;  %v9328_v52 = vld [vmem:[#allocation10 + $0xa08] sm:$0xf] }
  0x9b   : > { %3329 = vmatpush.bf16.msra.mxu3 %v9149_v3  ;;  %v9268_v3 = vld [vmem:[#allocation10 + $0x990] sm:$0xf]  ;;  %v9520_v57 = vld [vmem:[#allocation10 + $0xb88] sm:$0xf] }
  0x9c   : > { %3291 = vmatpush.bf16.msra.mxu0 %v8849_v9  ;;  %v9569_v9 = vor.u32 %v11707_v61, %v9568_v60  ;;  %v9269_v19 = vor.u32 %v11632_v7, %v9268_v3  ;;  %v9220_v60 = vld [vmem:[#allocation10 + $0x930] sm:$0xf] }
  0x9d   : > { %3304 = vmatpush.bf16.msra.mxu1 %v8945_v12  ;;  %v11680_v12 = vld [vmem:[#allocation10 + $0xb18] sm:$0xf0]  ;;  %v9412_v7 = vld [vmem:[#allocation10 + $0xab0] sm:$0xf] }
  0x9e   : > { %3317 = vmatpush.bf16.msra.mxu2 %v9041_v15  ;;  %v11704_v15 = vld [vmem:[#allocation10 + $0xbd8] sm:$0xf0] }
  0x9f   : > { %3330 = vmatpush.bf16.msra.mxu3 %v9137_v18  ;;  %v1114_v18 = vld [vmem:[#allocation1 + $0x1b] sm:$0xff]  ;;  %v9557_v28 = vor.u32 %v11704_v15, %v9556_v14  ;;  %v9208_v14 = vld [vmem:[#allocation10 + $0x918] sm:$0xf] }
  0xa0   : > { %3292 = vmatpush.bf16.msra.mxu0 %v8837_v21  ;;  %v9461_v21 = vor.u32 %v11680_v12, %v9460_v11  ;;  %v11617_v15 = vld [vmem:[#allocation10 + $0x920] sm:$0xf0] }
  0xa1   : > { %3305 = vmatpush.bf16.msra.mxu1 %v8933_v27  ;;  %v9352_v27 = vld [vmem:[#allocation10 + $0xa38] sm:$0xf]  ;;  %v9209_v23 = vor.u32 %v11617_v15, %v9208_v14  ;;  %v11388_v14 = vld [vmem:[#allocation10 + $0x1fc] sm:$0xf]  ;;  %v8298_v15 = vld [vmem:[#allocation10 + $0x204] sm:$0xf0] }
  0xa2   : > { %3318 = vmatpush.bf16.msra.mxu2 %v9029_v31  ;;  %v9448_v31 = vld [vmem:[#allocation10 + $0xaf8] sm:$0xf]  ;;  %v9353_v36 = vor.u32 %v11653_v29, %v9352_v27  ;;  %v9196_v27 = vld [vmem:[#allocation10 + $0x900] sm:$0xf] }
  0xa3   : > { %3331 = vmatpush.bf16.msra.mxu3 %v9125_v34  ;;  %v11701_v34 = vld [vmem:[#allocation10 + $0xbc0] sm:$0xf0]  ;;  %v9449_v37 = vor.u32 %v11677_v32, %v9448_v31  ;;  %v9292_v32 = vld [vmem:[#allocation10 + $0x9c0] sm:$0xf] }
  0xa4   : > { %3293 = vmatpush.bf16.msra.mxu0 %v8825_v38  ;;  %v9244_v38 = vld [vmem:[#allocation10 + $0x960] sm:$0xf]  ;;  %v9545_v41 = vor.u32 %v11701_v34, %v9544_v33  ;;  %v11638_v33 = vld [vmem:[#allocation10 + $0x9c8] sm:$0xf0] }
  0xa5   : > { %3306 = vmatpush.bf16.msra.mxu1 %v8921_v42  ;;  %v11650_v42 = vld [vmem:[#allocation10 + $0xa28] sm:$0xf0]  ;;  %v9245_v47 = vor.u32 %v11626_v39, %v9244_v38  ;;  %v9388_v34 = vld [vmem:[#allocation10 + $0xa80] sm:$0xf]  ;;  %v8130_v38 = vld [vmem:[#allocation10 + $0xb4] sm:$0xf0] }
  0xa6   : > { %3319 = vmatpush.bf16.msra.mxu2 %v9017_v46  ;;  %v11698_v46 = vld [vmem:[#allocation10 + $0xba8] sm:$0xf0]  ;;  %v9341_v48 = vor.u32 %v11650_v42, %v9340_v40  ;;  %v8226_v40 = vld [vmem:[#allocation10 + $0x174] sm:$0xf0] }
  0xa7   : > { %3332 = vmatpush.bf16.msra.mxu3 %v9113_v50  ;;  %v9232_v50 = vld [vmem:[#allocation10 + $0x948] sm:$0xf]  ;;  %v9533_v53 = vor.u32 %v11698_v46, %v9532_v45  ;;  %v11370_v39 = vld [vmem:[#allocation10 + $0x16c] sm:$0xf]  ;;  %v9293_v46 = vor.u32 %v11638_v33, %v9292_v32 }
  0xa8   : > { %3294 = vmatpush.bf16.msra.mxu0 %v8813_v54  ;;  %v11647_v54 = vld [vmem:[#allocation10 + $0xa10] sm:$0xf0]  ;;  %v11686_v45 = vld [vmem:[#allocation10 + $0xb48] sm:$0xf0] }
  0xa9   : > { %3307 = vmatpush.bf16.msra.mxu1 %v8909_v58  ;;  %v11695_v58 = vld [vmem:[#allocation10 + $0xb90] sm:$0xf0]  ;;  %v9329_v61 = vor.u32 %v11647_v54, %v9328_v52 }
  0xaa   : > { %3320 = vmatpush.bf16.msra.mxu2 %v9005_v62  ;;  %v9425_v62 = vor.u32 %v11671_v56, %v9424_v55  ;;  %v9521_v3 = vor.u32 %v11695_v58, %v9520_v57  ;;  %v11343_v54 = vld [vmem:[#allocation10 + $0x94] sm:$0xf]  ;;  %v8118_v55 = vld [vmem:[#allocation10 + $0x9c] sm:$0xf0] }
  0xab   : > { %3333 = vmatpush.bf16.msra.mxu3 %v9101_v2  ;;  %3295 = vmatmul.bf16.vlgmr.msra.gmra.mxu0 %v1111_v13  ;;  %v11644_v2 = vld [vmem:[#allocation10 + $0x9f8] sm:$0xf0]  ;;  %v9413_v13 = vor.u32 %v11668_v8, %v9412_v7  ;;  %v11367_v56 = vld [vmem:[#allocation10 + $0x154] sm:$0xf]  ;;  %v8214_v57 = vld [vmem:[#allocation10 + $0x15c] sm:$0xf0] }
  0xac   : > { %3339 = vmatpush.bf16.msrb.mxu0 %v9281_v59  ;;  %3308 = vmatmul.bf16.vlgmr.msra.gmra.mxu1 %v1112_v17  ;;  %v9233_v59 = vor.u32 %v11623_v51, %v9232_v50  ;;  %v11418_v50 = vld [vmem:[#allocation10 + $0x2ec] sm:$0xf]  ;;  %v8418_v51 = vld [vmem:[#allocation10 + $0x2f4] sm:$0xf0]  ;;  %v11391_v58 = vld [vmem:[#allocation10 + $0x214] sm:$0xf]  ;;  %v8217_v8 = vor.u32 %v11367_v56, %v8214_v57 }
  0xad   : > { %3352 = vmatpush.bf16.msrb.mxu1 %v9377_v63  ;;  %3321 = vmatmul.bf16.vlgmr.msra.gmra.mxu2 %v1113_v16  ;;  %v11620_v63 = vld [vmem:[#allocation10 + $0x938] sm:$0xf0]  ;;  %v9304_v16 = vld [vmem:[#allocation10 + $0x9d8] sm:$0xf]  ;;  %v8406_v7 = vld [vmem:[#allocation10 + $0x2dc] sm:$0xf0] }
  0xae   : > { %3365 = vmatpush.bf16.msrb.mxu2 %v9473_v0  ;;  %3334 = vmatmul.bf16.vlgmr.msra.gmra.mxu3 %v1114_v18  ;;  %v9316_v0 = vld [vmem:[#allocation10 + $0x9f0] sm:$0xf]  ;;  %v9221_v11 = vor.u32 %v11620_v63, %v9220_v60  ;;  %v11641_v18 = vld [vmem:[#allocation10 + $0x9e0] sm:$0xf0]  ;;  %v1115_v60 = vld [vmem:[#allocation1 + $0x24] sm:$0xff] }
  0xaf   : > { %3378 = vmatpush.bf16.msrb.mxu3 %v9569_v9  ;;  %v9508_v9 = vld [vmem:[#allocation10 + $0xb70] sm:$0xf]  ;;  %v9317_v12 = vor.u32 %v11644_v2, %v9316_v0  ;;  %v9305_v29 = vor.u32 %v11641_v18, %v9304_v16  ;;  %v1118_v0 = vld [vmem:[#allocation1 + $0x3f] sm:$0xff]  ;;  %v8121_v2 = vor.u32 %v11343_v54, %v8118_v55  ;;  %v11412_v18 = vld [vmem:[#allocation10 + $0x2bc] sm:$0xf] }
  0xb0   : > { %3340 = vmatpush.bf16.msrb.mxu0 %v9269_v19  ;;  %v9509_v17 = vor.u32 %v11692_v10, %v9508_v9  ;;  %v9400_v19 = vld [vmem:[#allocation10 + $0xa98] sm:$0xf]  ;;  %v11340_v10 = vld [vmem:[#allocation10 + $0x7c] sm:$0xf]  ;;  %v11379_v54 = vld [vmem:[#allocation10 + $0x1b4] sm:$0xf] }
  0xb1   : > { %3353 = vmatpush.bf16.msrb.mxu1 %v9365_v20  ;;  %v11665_v20 = vld [vmem:[#allocation10 + $0xaa0] sm:$0xf0]  ;;  %v1116_v63 = vld [vmem:[#allocation1 + $0x2d] sm:$0xff]  ;;  %v8262_v55 = vld [vmem:[#allocation10 + $0x1bc] sm:$0xf0] }
  0xb2   : > { %3366 = vmatpush.bf16.msrb.mxu2 %v9461_v21  ;;  %v9496_v21 = vld [vmem:[#allocation10 + $0xb58] sm:$0xf]  ;;  %v9401_v31 = vor.u32 %v11665_v20, %v9400_v19  ;;  %v8394_v19 = vld [vmem:[#allocation10 + $0x2c4] sm:$0xf0] }
  0xb3   : > { %3379 = vmatpush.bf16.msrb.mxu3 %v9557_v28  ;;  %v11614_v28 = vld [vmem:[#allocation10 + $0x908] sm:$0xf0]  ;;  %v8397_v32 = vor.u32 %v11412_v18, %v8394_v19  ;;  %v11373_v18 = vld [vmem:[#allocation10 + $0x184] sm:$0xf]  ;;  %v8238_v19 = vld [vmem:[#allocation10 + $0x18c] sm:$0xf0] }
  0xb4   : > { %3341 = vmatpush.bf16.msrb.mxu0 %v9257_v35  ;;  %v9497_v35 = vor.u32 %v11689_v22, %v9496_v21  ;;  %v9197_v42 = vor.u32 %v11614_v28, %v9196_v27  ;;  %v8301_v21 = vor.u32 %v11388_v14, %v8298_v15  ;;  %v11337_v22 = vld [vmem:[#allocation10 + $0x64] sm:$0xf]  ;;  %v8190_v28 = vld [vmem:[#allocation10 + $0x12c] sm:$0xf0] }
  0xb5   : > { %3354 = vmatpush.bf16.msrb.mxu1 %v9353_v36  ;;  %v11662_v36 = vld [vmem:[#allocation10 + $0xa88] sm:$0xf0]  ;;  %v11361_v27 = vld [vmem:[#allocation10 + $0x124] sm:$0xf] }
  0xb6   : > { %3367 = vmatpush.bf16.msrb.mxu2 %v9449_v37  ;;  %v11346_v37 = vld [vmem:[#allocation10 + $0xac] sm:$0xf] }
  0xb7   : > { %3380 = vmatpush.bf16.msrb.mxu3 %v9545_v41  ;;  %v11394_v41 = vld [vmem:[#allocation10 + $0x22c] sm:$0xf] }
  0xb8   : > { %3342 = vmatpush.bf16.msrb.mxu0 %v9245_v47  ;;  %v9389_v47 = vor.u32 %v11662_v36, %v9388_v34  ;;  %v8325_v52 = vor.u32 %v11394_v41, %v8322_v43  ;;  %v11409_v34 = vld [vmem:[#allocation10 + $0x2a4] sm:$0xf]  ;;  %v8193_v36 = vor.u32 %v11361_v27, %v8190_v28  ;;  %v8178_v41 = vld [vmem:[#allocation10 + $0x114] sm:$0xf0]  ;;  %v11490_v28 = vld [vmem:[#allocation10 + $0x52c] sm:$0xf] }
  0xb9   : > { %3355 = vmatpush.bf16.msrb.mxu1 %v9341_v48  ;;  %v8133_v48 = vor.u32 %v11346_v37, %v8130_v38  ;;  %v11334_v38 = vld [vmem:[#allocation10 + $0x4c] sm:$0xf]  ;;  %v8274_v43 = vld [vmem:[#allocation10 + $0x1d4] sm:$0xf0] }
  0xba   : > { %3368 = vmatpush.bf16.msrb.mxu2 %v9437_v49  ;;  %v8229_v49 = vor.u32 %v11370_v39, %v8226_v40  ;;  %v8082_v39 = vld [vmem:[#allocation10 + $0x54] sm:$0xf0]  ;;  %v11358_v40 = vld [vmem:[#allocation10 + $0x10c] sm:$0xf] }
  0xbb   : > { %3381 = vmatpush.bf16.msrb.mxu3 %v9533_v53  ;;  %v9485_v53 = vor.u32 %v11686_v45, %v9484_v44  ;;  %v8085_v45 = vor.u32 %v11334_v38, %v8082_v39  ;;  %v8610_v27 = vld [vmem:[#allocation10 + $0x474] sm:$0xf0] }
  0xbc   : > { %3343 = vmatpush.bf16.msrb.mxu0 %v9233_v59  ;;  %v8310_v59 = vld [vmem:[#allocation10 + $0x21c] sm:$0xf0] }
  0xbd   : > { %3356 = vmatpush.bf16.msrb.mxu1 %v9329_v61  ;;  %v1117_v61 = vld [vmem:[#allocation1 + $0x36] sm:$0xff]  ;;  %v8313_v9 = vor.u32 %v11391_v58, %v8310_v59  ;;  %v11403_v58 = vld [vmem:[#allocation10 + $0x274] sm:$0xf] }
  0xbe   : > { %3369 = vmatpush.bf16.msrb.mxu2 %v9425_v62  ;;  %v8421_v62 = vor.u32 %v11418_v50, %v8418_v51  ;;  %v11331_v50 = vld [vmem:[#allocation10 + $0x34] sm:$0xf]  ;;  %v8070_v51 = vld [vmem:[#allocation10 + $0x3c] sm:$0xf0] }
  0xbf   : > { %3382 = vmatpush.bf16.msrb.mxu3 %v9521_v3  ;;  %v11415_v3 = vld [vmem:[#allocation10 + $0x2d4] sm:$0xf]  ;;  %v8073_v57 = vor.u32 %v11331_v50, %v8070_v51  ;;  %v8358_v59 = vld [vmem:[#allocation10 + $0x27c] sm:$0xf0] }
  0xc0   : > { %3344 = vmatpush.bf16.msrb.mxu0 %v9221_v11  ;;  %v8106_v11 = vld [vmem:[#allocation10 + $0x84] sm:$0xf0]  ;;  %v8409_v16 = vor.u32 %v11415_v3, %v8406_v7  ;;  %v11376_v3 = vld [vmem:[#allocation10 + $0x19c] sm:$0xf]  ;;  %v8790_v50 = vld [vmem:[#allocation10 + $0x5dc] sm:$0xf0] }
  0xc1   : > { %3357 = vmatpush.bf16.msrb.mxu1 %v9317_v12  ;;  %v11364_v12 = vld [vmem:[#allocation10 + $0x13c] sm:$0xf]  ;;  %v8250_v7 = vld [vmem:[#allocation10 + $0x1a4] sm:$0xf0] }
  0xc2   : > { %3370 = vmatpush.bf16.msrb.mxu2 %v9413_v13  ;;  %v8202_v13 = vld [vmem:[#allocation10 + $0x144] sm:$0xf0]  ;;  %v8253_v15 = vor.u32 %v11376_v3, %v8250_v7  ;;  %v8478_v7 = vld [vmem:[#allocation10 + $0x36c] sm:$0xf0] }
  0xc3   : > { %3383 = vmatpush.bf16.msrb.mxu3 %v9509_v17  ;;  %v8109_v17 = vor.u32 %v11340_v10, %v8106_v11  ;;  %v8205_v20 = vor.u32 %v11364_v12, %v8202_v13  ;;  %v8346_v11 = vld [vmem:[#allocation10 + $0x264] sm:$0xf0]  ;;  %v11325_v12 = vld [vmem:[#allocation10 + $0x4] sm:$0xf]  ;;  %v8046_v13 = vld [vmem:[#allocation10 + $0xc] sm:$0xf0] }
  0xc4   : > { %3345 = vmatpush.bf16.msrb.mxu0 %v9209_v23  ;;  %v8094_v23 = vld [vmem:[#allocation10 + $0x6c] sm:$0xf0] }
  0xc5   : > { %3358 = vmatpush.bf16.msrb.mxu1 %v9305_v29  ;;  %v11385_v29 = vld [vmem:[#allocation10 + $0x1e4] sm:$0xf]  ;;  %v8097_v33 = vor.u32 %v11337_v22, %v8094_v23  ;;  %v11466_v23 = vld [vmem:[#allocation10 + $0x46c] sm:$0xf] }
  0xc6   : > { %3371 = vmatpush.bf16.msrb.mxu2 %v9401_v31  ;;  %v8286_v31 = vld [vmem:[#allocation10 + $0x1ec] sm:$0xf0]  ;;  %v8613_v39 = vor.u32 %v11466_v23, %v8610_v27  ;;  %v11478_v23 = vld [vmem:[#allocation10 + $0x4cc] sm:$0xf]  ;;  %v8658_v27 = vld [vmem:[#allocation10 + $0x4d4] sm:$0xf0] }
  0xc7   : > { %3384 = vmatpush.bf16.msrb.mxu3 %v9497_v35  ;;  %v8382_v35 = vld [vmem:[#allocation10 + $0x2ac] sm:$0xf0]  ;;  %v8289_v37 = vor.u32 %v11385_v29, %v8286_v31  ;;  %v8049_v29 = vor.u32 %v11325_v12, %v8046_v13  ;;  %v8706_v31 = vld [vmem:[#allocation10 + $0x534] sm:$0xf0]  ;;  %v11505_v13 = vld [vmem:[#allocation10 + $0x5a4] sm:$0xf] }
  0xc8   : > { %3346 = vmatpush.bf16.msrb.mxu0 %v9197_v42  ;;  %v11382_v42 = vld [vmem:[#allocation10 + $0x1cc] sm:$0xf]  ;;  %v8385_v44 = vor.u32 %v11409_v34, %v8382_v35  ;;  %v8241_v35 = vor.u32 %v11373_v18, %v8238_v19  ;;  %v8670_v12 = vld [vmem:[#allocation10 + $0x4ec] sm:$0xf0]  ;;  %v8466_v19 = vld [vmem:[#allocation10 + $0x354] sm:$0xf0] }
  0xc9   : > { %3359 = vmatpush.bf16.msrb.mxu1 %v9293_v46  ;;  %v11406_v46 = vld [vmem:[#allocation10 + $0x28c] sm:$0xf] }
  0xca   : > { %3372 = vmatpush.bf16.msrb.mxu2 %v9389_v47  ;;  %v8370_v47 = vld [vmem:[#allocation10 + $0x294] sm:$0xf0] }
  0xcb   : > { %3385 = vmatpush.bf16.msrb.mxu3 %v9485_v53  ;;  %3347 = vmatmul.bf16.vlgmr.msrb.gmra.mxu0 %v1115_v60  ;;  %v8166_v53 = vld [vmem:[#allocation10 + $0xfc] sm:$0xf0]  ;;  %v8373_v56 = vor.u32 %v11406_v46, %v8370_v47  ;;  %v11487_v47 = vld [vmem:[#allocation10 + $0x514] sm:$0xf] }
  0xcc   : > { %3391 = vmatpush.bf16.msra.mxu0 %v8133_v48  ;;  %3360 = vmatmul.bf16.vlgmr.msrb.gmra.mxu1 %v1116_v63  ;;  %v8181_v48 = vor.u32 %v11358_v40, %v8178_v41  ;;  %v8058_v63 = vld [vmem:[#allocation10 + $0x24] sm:$0xf0]  ;;  %v11439_v40 = vld [vmem:[#allocation10 + $0x394] sm:$0xf]  ;;  %v8709_v41 = vor.u32 %v11490_v28, %v8706_v31  ;;  %v11502_v28 = vld [vmem:[#allocation10 + $0x58c] sm:$0xf] }
  0xcd   : > { %3404 = vmatpush.bf16.msra.mxu1 %v8229_v49  ;;  %3373 = vmatmul.bf16.vlgmr.msrb.gmra.mxu2 %v1117_v61  ;;  %v8277_v49 = vor.u32 %v11382_v42, %v8274_v43  ;;  %v8265_v61 = vor.u32 %v11379_v54, %v8262_v55  ;;  %v8502_v43 = vld [vmem:[#allocation10 + $0x39c] sm:$0xf0]  ;;  %v8490_v55 = vld [vmem:[#allocation10 + $0x384] sm:$0xf0] }
  0xce   : > { %3417 = vmatpush.bf16.msra.mxu2 %v8325_v52  ;;  %3386 = vmatmul.bf16.vlgmr.msrb.gmra.mxu3 %v1118_v0  ;;  %v11355_v52 = vld [vmem:[#allocation10 + $0xf4] sm:$0xf]  ;;  %v11352_v0 = vld [vmem:[#allocation10 + $0xdc] sm:$0xf]  ;;  %v8505_v51 = vor.u32 %v11439_v40, %v8502_v43  ;;  %v8742_v43 = vld [vmem:[#allocation10 + $0x57c] sm:$0xf0] }
  0xcf   : > { %3430 = vmatpush.bf16.msra.mxu3 %v8421_v62  ;;  %v8169_v60 = vor.u32 %v11355_v52, %v8166_v53  ;;  %v11328_v62 = vld [vmem:[#allocation10 + $0x1c] sm:$0xf]  ;;  %v11475_v40 = vld [vmem:[#allocation10 + $0x4b4] sm:$0xf] }
  0xd0   : > { %3392 = vmatpush.bf16.msra.mxu0 %v8121_v2  ;;  %v8154_v2 = vld [vmem:[#allocation10 + $0xe4] sm:$0xf0]  ;;  %v8061_v10 = vor.u32 %v11328_v62, %v8058_v63  ;;  %v11436_v53 = vld [vmem:[#allocation10 + $0x37c] sm:$0xf] }
  0xd1   : > { %3405 = vmatpush.bf16.msra.mxu1 %v8217_v8  ;;  %v8361_v8 = vor.u32 %v11403_v58, %v8358_v59  ;;  %v8157_v14 = vor.u32 %v11352_v0, %v8154_v2  ;;  %v11484_v59 = vld [vmem:[#allocation10 + $0x4fc] sm:$0xf]  ;;  %v8778_v62 = vld [vmem:[#allocation10 + $0x5c4] sm:$0xf0]  ;;  %v8493_v63 = vor.u32 %v11436_v53, %v8490_v55  ;;  %v11433_v2 = vld [vmem:[#allocation10 + $0x364] sm:$0xf] }
  0xd2   : > { %3418 = vmatpush.bf16.msra.mxu2 %v8313_v9  ;;  %v11400_v9 = vld [vmem:[#allocation10 + $0x25c] sm:$0xf] }
  0xd3   : > { %3431 = vmatpush.bf16.msra.mxu3 %v8409_v16  ;;  %v11349_v16 = vld [vmem:[#allocation10 + $0xc4] sm:$0xf]  ;;  %v8349_v22 = vor.u32 %v11400_v9, %v8346_v11  ;;  %v8574_v9 = vld [vmem:[#allocation10 + $0x42c] sm:$0xf0]  ;;  %v11472_v53 = vld [vmem:[#allocation10 + $0x49c] sm:$0xf] }
  0xd4   : > { %3393 = vmatpush.bf16.msra.mxu0 %v8109_v17  ;;  %v8142_v17 = vld [vmem:[#allocation10 + $0xcc] sm:$0xf0]  ;;  %v11481_v11 = vld [vmem:[#allocation10 + $0x4e4] sm:$0xf]  ;;  %v11496_v55 = vld [vmem:[#allocation10 + $0x55c] sm:$0xf] }
  0xd5   : > { %3406 = vmatpush.bf16.msra.mxu1 %v8205_v20  ;;  %v11442_v20 = vld [vmem:[#allocation10 + $0x3ac] sm:$0xf]  ;;  %v8145_v34 = vor.u32 %v11349_v16, %v8142_v17  ;;  %v8673_v18 = vor.u32 %v11481_v11, %v8670_v12  ;;  %v8898_v11 = vld [vmem:[#allocation10 + $0x6b4] sm:$0xf0] }
  0xd6   : > { %3419 = vmatpush.bf16.msra.mxu2 %v8301_v21  ;;  %v8514_v21 = vld [vmem:[#allocation10 + $0x3b4] sm:$0xf0]  ;;  %v11430_v17 = vld [vmem:[#allocation10 + $0x34c] sm:$0xf] }
  0xd7   : > { %3432 = vmatpush.bf16.msra.mxu3 %v8397_v32  ;;  %v11397_v32 = vld [vmem:[#allocation10 + $0x244] sm:$0xf]  ;;  %v8517_v38 = vor.u32 %v11442_v20, %v8514_v21  ;;  %v11454_v20 = vld [vmem:[#allocation10 + $0x40c] sm:$0xf]  ;;  %v8562_v21 = vld [vmem:[#allocation10 + $0x414] sm:$0xf0]  ;;  %v8469_v31 = vor.u32 %v11430_v17, %v8466_v19 }
  0xd8   : > { %3394 = vmatpush.bf16.msra.mxu0 %v8097_v33  ;;  %v8334_v33 = vld [vmem:[#allocation10 + $0x24c] sm:$0xf0]  ;;  %v11562_v12 = vld [vmem:[#allocation10 + $0x76c] sm:$0xf]  ;;  %v11493_v19 = vld [vmem:[#allocation10 + $0x544] sm:$0xf] }
  0xd9   : > { %3407 = vmatpush.bf16.msra.mxu1 %v8193_v36  ;;  %v11514_v36 = vld [vmem:[#allocation10 + $0x5ec] sm:$0xf]  ;;  %v8337_v42 = vor.u32 %v11397_v32, %v8334_v33  ;;  %v8565_v32 = vor.u32 %v11454_v20, %v8562_v21  ;;  %v11427_v33 = vld [vmem:[#allocation10 + $0x334] sm:$0xf]  ;;  %v8718_v20 = vld [vmem:[#allocation10 + $0x54c] sm:$0xf0] }
  0xda   : > { %3420 = vmatpush.bf16.msra.mxu2 %v8289_v37  ;;  %v8802_v37 = vld [vmem:[#allocation10 + $0x5f4] sm:$0xf0] }
  0xdb   : > { %3433 = vmatpush.bf16.msra.mxu3 %v8385_v44  ;;  %v11463_v44 = vld [vmem:[#allocation10 + $0x454] sm:$0xf]  ;;  %v8805_v46 = vor.u32 %v11514_v36, %v8802_v37  ;;  %v8550_v37 = vld [vmem:[#allocation10 + $0x3fc] sm:$0xf0] }
  0xdc   : > { %3395 = vmatpush.bf16.msra.mxu0 %v8085_v45  ;;  %v8598_v45 = vld [vmem:[#allocation10 + $0x45c] sm:$0xf0]  ;;  %v11451_v36 = vld [vmem:[#allocation10 + $0x3f4] sm:$0xf] }
  0xdd   : > { %3408 = vmatpush.bf16.msra.mxu1 %v8181_v48  ;;  %v8694_v48 = vld [vmem:[#allocation10 + $0x51c] sm:$0xf0]  ;;  %v8601_v52 = vor.u32 %v11463_v44, %v8598_v45  ;;  %v8553_v45 = vor.u32 %v11451_v36, %v8550_v37  ;;  %v8721_v37 = vor.u32 %v11493_v19, %v8718_v20  ;;  %v8946_v20 = vld [vmem:[#allocation10 + $0x714] sm:$0xf0] }
  0xde   : > { %3421 = vmatpush.bf16.msra.mxu2 %v8277_v49  ;;  %v11511_v49 = vld [vmem:[#allocation10 + $0x5d4] sm:$0xf]  ;;  %v8697_v54 = vor.u32 %v11487_v47, %v8694_v48 }
  0xdf   : > { %3434 = vmatpush.bf16.msra.mxu3 %v8373_v56  ;;  %v11460_v56 = vld [vmem:[#allocation10 + $0x43c] sm:$0xf]  ;;  %v8793_v58 = vor.u32 %v11511_v49, %v8790_v50  ;;  %v8442_v49 = vld [vmem:[#allocation10 + $0x324] sm:$0xf0] }
  0xe0   : > { %3396 = vmatpush.bf16.msra.mxu0 %v8073_v57  ;;  %v8586_v57 = vld [vmem:[#allocation10 + $0x444] sm:$0xf0]  ;;  %v11448_v50 = vld [vmem:[#allocation10 + $0x3dc] sm:$0xf] }
  0xe1   : > { %3409 = vmatpush.bf16.msra.mxu1 %v8169_v60  ;;  %v8682_v60 = vld [vmem:[#allocation10 + $0x504] sm:$0xf0]  ;;  %v8589_v0 = vor.u32 %v11460_v56, %v8586_v57 }
  0xe2   : > { %3422 = vmatpush.bf16.msra.mxu2 %v8265_v61  ;;  %v11508_v61 = vld [vmem:[#allocation10 + $0x5bc] sm:$0xf]  ;;  %v8685_v3 = vor.u32 %v11484_v59, %v8682_v60  ;;  %v8730_v56 = vld [vmem:[#allocation10 + $0x564] sm:$0xf0]  ;;  %v11421_v60 = vld [vmem:[#allocation10 + $0x304] sm:$0xf] }
  0xe3   : > { %3435 = vmatpush.bf16.msra.mxu3 %v8361_v8  ;;  %v11457_v8 = vld [vmem:[#allocation10 + $0x424] sm:$0xf] }
  0xe4   : > { %3397 = vmatpush.bf16.msra.mxu0 %v8061_v10  ;;  %v8781_v10 = vor.u32 %v11508_v61, %v8778_v62  ;;  %v8577_v16 = vor.u32 %v11457_v8, %v8574_v9  ;;  %v8430_v61 = vld [vmem:[#allocation10 + $0x30c] sm:$0xf0]  ;;  %v11445_v62 = vld [vmem:[#allocation10 + $0x3c4] sm:$0xf]  ;;  %v8733_v9 = vor.u32 %v11496_v55, %v8730_v56  ;;  %v9066_v55 = vld [vmem:[#allocation10 + $0x804] sm:$0xf0] }
  0xe5   : > { %3410 = vmatpush.bf16.msra.mxu1 %v8157_v14  ;;  %v8766_v14 = vld [vmem:[#allocation10 + $0x5ac] sm:$0xf0]  ;;  %v8433_v17 = vor.u32 %v11421_v60, %v8430_v61  ;;  %v9162_v60 = vld [vmem:[#allocation10 + $0x8c4] sm:$0xf0] }
  0xe6   : > { %3423 = vmatpush.bf16.msra.mxu2 %v8253_v15  ;;  %v8481_v15 = vor.u32 %v11433_v2, %v8478_v7  ;;  %v8526_v2 = vld [vmem:[#allocation10 + $0x3cc] sm:$0xf0] }
  0xe7   : > { %3436 = vmatpush.bf16.msra.mxu3 %v8349_v22  ;;  %v8769_v22 = vor.u32 %v11505_v13, %v8766_v14  ;;  %v8622_v7 = vld [vmem:[#allocation10 + $0x48c] sm:$0xf0]  ;;  %v8994_v14 = vld [vmem:[#allocation10 + $0x774] sm:$0xf0] }
  0xe8   : > { %3398 = vmatpush.bf16.msra.mxu0 %v8049_v29  ;;  %v8754_v29 = vld [vmem:[#allocation10 + $0x594] sm:$0xf0] }
  0xe9   : > { %3411 = vmatpush.bf16.msra.mxu1 %v8145_v34  ;;  %v8454_v34 = vld [vmem:[#allocation10 + $0x33c] sm:$0xf0] }
  0xea   : > { %3424 = vmatpush.bf16.msra.mxu2 %v8241_v35  ;;  %v8661_v35 = vor.u32 %v11478_v23, %v8658_v27  ;;  %v8457_v44 = vor.u32 %v11427_v33, %v8454_v34  ;;  %v11610_v27 = vld [vmem:[#allocation10 + $0x8ec] sm:$0xf]  ;;  %v11535_v33 = vld [vmem:[#allocation10 + $0x694] sm:$0xf]  ;;  %v8886_v34 = vld [vmem:[#allocation10 + $0x69c] sm:$0xf0] }
  0xeb   : > { %3437 = vmatpush.bf16.msra.mxu3 %v8337_v42  ;;  %3399 = vmatmul.bf16.vlgmr.msra.gmra.mxu0 %v12767_v25  ;;  %v11499_v42 = vld [vmem:[#allocation10 + $0x574] sm:$0xf] }
  0xec   : > { %3443 = vmatpush.bf16.msrb.mxu0 %v8517_v38  ;;  %3412 = vmatmul.bf16.vlgmr.msra.gmra.mxu1 %v12772_v30  ;;  %v1091_v38 = vld [vmem:[#allocation12] sm:$0x7] }
  0xed   : > { %3456 = vmatpush.bf16.msrb.mxu1 %v8613_v39  ;;  %3425 = vmatmul.bf16.vlgmr.msra.gmra.mxu2 %v12765_v24  ;;  %v8757_v39 = vor.u32 %v11502_v28, %v8754_v29  ;;  %v1093_v47 = vperm.slane %v1091_v38, 0  ;;  %v9186_v28 = vld [vmem:[#allocation10 + $0x8f4] sm:$0xf0]  ;;  %v8982_v38 = vld [vmem:[#allocation10 + $0x75c] sm:$0xf0] }
  0xee   : > { %3469 = vmatpush.bf16.msrb.mxu2 %v8709_v41  ;;  %3438 = vmatmul.bf16.vlgmr.msra.gmra.mxu3 %v12769_v26  ;;  %v8646_v41 = vld [vmem:[#allocation10 + $0x4bc] sm:$0xf0]  ;;  %v3192_v57 = vpop.f32.mrf.mxu0 }
  0xef   : > { %3482 = vmatpush.bf16.msrb.mxu3 %v8805_v46  ;;  %v11424_v46 = vld [vmem:[#allocation10 + $0x31c] sm:$0xf]  ;;  %v8649_v48 = vor.u32 %v11475_v40, %v8646_v41  ;;  %v9078_v40 = vld [vmem:[#allocation10 + $0x81c] sm:$0xf0] }
  0xf0   : > { %3444 = vmatpush.bf16.msrb.mxu0 %v8505_v51  ;;  %v8538_v51 = vld [vmem:[#allocation10 + $0x3e4] sm:$0xf0]  ;;  %v3205_v8 = vpop.f32.mrf.mxu1 }
  0xf1   : > { %3457 = vmatpush.bf16.msrb.mxu1 %v8601_v52  ;;  %v8745_v52 = vor.u32 %v11499_v42, %v8742_v43  ;;  %v8541_v59 = vor.u32 %v11448_v50, %v8538_v51  ;;  %v9189_v43 = vor.u32 %v11610_v27, %v9186_v28  ;;  %v11532_v50 = vld [vmem:[#allocation10 + $0x67c] sm:$0xf]  ;;  %v8874_v51 = vld [vmem:[#allocation10 + $0x684] sm:$0xf0] }
  0xf2   : > { %3470 = vmatpush.bf16.msrb.mxu2 %v8697_v54  ;;  %v8634_v54 = vld [vmem:[#allocation10 + $0x4a4] sm:$0xf0] }
  0xf3   : > { %3483 = vmatpush.bf16.msrb.mxu3 %v8793_v58  ;;  %v8445_v58 = vor.u32 %v11424_v46, %v8442_v49  ;;  %v3218_v21 = vpop.f32.mrf.mxu2  ;;  %v9174_v46 = vld [vmem:[#allocation10 + $0x8dc] sm:$0xf0] }
  0xf4   : > { %3445 = vmatpush.bf16.msrb.mxu0 %v8493_v63  ;;  %v3193_v63 = vadd.f32 %v3192_v57, %v1093_v47 }
  0xf5   : > { %3458 = vmatpush.bf16.msrb.mxu1 %v8589_v0  ;;  %v8637_v0 = vor.u32 %v11472_v53, %v8634_v54  ;;  %v3231_v36 = vpop.f32.mrf.mxu3  ;;  %v8970_v53 = vld [vmem:[#allocation10 + $0x744] sm:$0xf0]  ;;  %v11580_v54 = vld [vmem:[#allocation10 + $0x7fc] sm:$0xf] }
  0xf6   : > { %3471 = vmatpush.bf16.msrb.mxu2 %v8685_v3  ;;  %v11469_v3 = vld [vmem:[#allocation10 + $0x484] sm:$0xf]  ;;  %v3206_v13 = vadd.f32 %v3205_v8, %v3193_v63  ;;  %v3194_v42 = vpop.f32.mrf.mxu0 }
  0xf7   : > { %3484 = vmatpush.bf16.msrb.mxu3 %v8781_v10  ;;  %v11538_v10 = vld [vmem:[#allocation10 + $0x6ac] sm:$0xf]  ;;  %v11529_v63 = vld [vmem:[#allocation10 + $0x664] sm:$0xf]  ;;  %v9030_v42 = vld [vmem:[#allocation10 + $0x7bc] sm:$0xf0] }
  0xf8   : > { %3446 = vmatpush.bf16.msrb.mxu0 %v8481_v15  ;;  %v11586_v15 = vld [vmem:[#allocation10 + $0x82c] sm:$0xf]  ;;  %v8901_v23 = vor.u32 %v11538_v10, %v8898_v11  ;;  %v3219_v29 = vadd.f32 %v3218_v21, %v3206_v13  ;;  %v3207_v47 = vpop.f32.mrf.mxu1  ;;  %v11577_v8 = vld [vmem:[#allocation10 + $0x7e4] sm:$0xf]  ;;  %v9150_v13 = vld [vmem:[#allocation10 + $0x8ac] sm:$0xf0] }
  0xf9   : > { %3459 = vmatpush.bf16.msrb.mxu1 %v8577_v16  ;;  %v9090_v16 = vld [vmem:[#allocation10 + $0x834] sm:$0xf0]  ;;  %v11574_v21 = vld [vmem:[#allocation10 + $0x7cc] sm:$0xf] }
  0xfa   : > { %3472 = vmatpush.bf16.msrb.mxu2 %v8673_v18  ;;  %v8529_v18 = vor.u32 %v11445_v62, %v8526_v2  ;;  %v3232_v41 = vadd.f32 %v3231_v36, %v3219_v29  ;;  %v9069_v62 = vor.u32 %v11580_v54, %v9066_v55  ;;  %v11553_v2 = vld [vmem:[#allocation10 + $0x724] sm:$0xf]  ;;  %v11598_v29 = vld [vmem:[#allocation10 + $0x88c] sm:$0xf]  ;;  %v11523_v36 = vld [vmem:[#allocation10 + $0x634] sm:$0xf] }
  0xfb   : > { %3485 = vmatpush.bf16.msrb.mxu3 %v8769_v22  ;;  %v8625_v22 = vor.u32 %v11469_v3, %v8622_v7  ;;  %v3220_v57 = vpop.f32.mrf.mxu2  ;;  %v8958_v7 = vld [vmem:[#allocation10 + $0x72c] sm:$0xf0]  ;;  %v8922_v55 = vld [vmem:[#allocation10 + $0x6e4] sm:$0xf0] }
  0xfc   : > { %3447 = vmatpush.bf16.msrb.mxu0 %v8469_v31  ;;  %v8997_v31 = vor.u32 %v11562_v12, %v8994_v14  ;;  %v11601_v12 = vld [vmem:[#allocation10 + $0x8a4] sm:$0xf]  ;;  %v8961_v14 = vor.u32 %v11553_v2, %v8958_v7  ;;  %v9018_v57 = vld [vmem:[#allocation10 + $0x7a4] sm:$0xf0] }
  0xfd   : > { %3460 = vmatpush.bf16.msrb.mxu1 %v8565_v32  ;;  %v9093_v32 = vor.u32 %v11586_v15, %v9090_v16  ;;  %v3233_v3 = vpop.f32.mrf.mxu3  ;;  %v11526_v16 = vld [vmem:[#allocation10 + $0x64c] sm:$0xf]  ;;  %v9153_v27 = vor.u32 %v11601_v12, %v9150_v13  ;;  %v9282_v13 = vld [vmem:[#allocation10 + $0x9b4] sm:$0xf0] }
  0xfe   : > { %3473 = vmatpush.bf16.msrb.mxu2 %v8661_v35  ;;  %v11559_v35 = vld [vmem:[#allocation10 + $0x754] sm:$0xf]  ;;  %v11634_v12 = vld [vmem:[#allocation10 + $0x9ac] sm:$0xf] }
  0xff   : > { %3486 = vmatpush.bf16.msrb.mxu3 %v8757_v39  ;;  %v11583_v39 = vld [vmem:[#allocation10 + $0x814] sm:$0xf] }
 0x100   : > { %3448 = vmatpush.bf16.msrb.mxu0 %v8457_v44  ;;  %v8889_v44 = vor.u32 %v11535_v33, %v8886_v34  ;;  %v9081_v49 = vor.u32 %v11583_v39, %v9078_v40  ;;  %v8934_v39 = vld [vmem:[#allocation10 + $0x6fc] sm:$0xf0]  ;;  %v11571_v40 = vld [vmem:[#allocation10 + $0x7b4] sm:$0xf] }
 0x101   : > { %3461 = vmatpush.bf16.msrb.mxu1 %v8553_v45  ;;  %v11607_v45 = vld [vmem:[#allocation10 + $0x8d4] sm:$0xf] }
 0x102   : > { %3474 = vmatpush.bf16.msrb.mxu2 %v8649_v48  ;;  %v8985_v48 = vor.u32 %v11559_v35, %v8982_v38  ;;  %v9177_v56 = vor.u32 %v11607_v45, %v9174_v46  ;;  %v11547_v38 = vld [vmem:[#allocation10 + $0x6f4] sm:$0xf]  ;;  %v9126_v46 = vld [vmem:[#allocation10 + $0x87c] sm:$0xf0] }
 0x103   : > { %3487 = vmatpush.bf16.msrb.mxu3 %v8745_v52  ;;  %v11556_v52 = vld [vmem:[#allocation10 + $0x73c] sm:$0xf]  ;;  %v11595_v45 = vld [vmem:[#allocation10 + $0x874] sm:$0xf]  ;;  %v8937_v47 = vor.u32 %v11547_v38, %v8934_v39  ;;  %v9366_v39 = vld [vmem:[#allocation10 + $0xa5c] sm:$0xf0] }
 0x104   : > { %3449 = vmatpush.bf16.msrb.mxu0 %v8445_v58  ;;  %v8877_v58 = vor.u32 %v11532_v50, %v8874_v51  ;;  %v8973_v61 = vor.u32 %v11556_v52, %v8970_v53  ;;  %v11520_v51 = vld [vmem:[#allocation10 + $0x61c] sm:$0xf]  ;;  %v8826_v52 = vld [vmem:[#allocation10 + $0x624] sm:$0xf0]  ;;  %v11655_v38 = vld [vmem:[#allocation10 + $0xa54] sm:$0xf] }
 0x105   : > { %3462 = vmatpush.bf16.msrb.mxu1 %v8541_v59  ;;  %v11604_v59 = vld [vmem:[#allocation10 + $0x8bc] sm:$0xf] }
 0x106   : > { %3475 = vmatpush.bf16.msrb.mxu2 %v8637_v0  ;;  %v8862_v0 = vld [vmem:[#allocation10 + $0x66c] sm:$0xf0]  ;;  %v9165_v10 = vor.u32 %v11604_v59, %v9162_v60  ;;  %v11544_v53 = vld [vmem:[#allocation10 + $0x6dc] sm:$0xf] }
 0x107   : > { %3488 = vmatpush.bf16.msrb.mxu3 %v8733_v9  ;;  %v9054_v9 = vld [vmem:[#allocation10 + $0x7ec] sm:$0xf0]  ;;  %v8865_v11 = vor.u32 %v11529_v63, %v8862_v0  ;;  %v11592_v60 = vld [vmem:[#allocation10 + $0x85c] sm:$0xf]  ;;  %v11517_v63 = vld [vmem:[#allocation10 + $0x604] sm:$0xf]  ;;  %v8925_v3 = vor.u32 %v11544_v53, %v8922_v55 }
 0x108   : > { %3450 = vmatpush.bf16.msrb.mxu0 %v8433_v17  ;;  %v9057_v15 = vor.u32 %v11577_v8, %v9054_v9  ;;  %v8850_v17 = vld [vmem:[#allocation10 + $0x654] sm:$0xf0]  ;;  %v3244_v19 = vpop.f32.mrf.mxu0  ;;  %v8814_v0 = vld [vmem:[#allocation10 + $0x60c] sm:$0xf0]  ;;  %v11541_v8 = vld [vmem:[#allocation10 + $0x6c4] sm:$0xf] }
 0x109   : > { %3463 = vmatpush.bf16.msrb.mxu1 %v8529_v18  ;;  %v11550_v18 = vld [vmem:[#allocation10 + $0x70c] sm:$0xf]  ;;  %v8853_v28 = vor.u32 %v11526_v16, %v8850_v17  ;;  %v8910_v9 = vld [vmem:[#allocation10 + $0x6cc] sm:$0xf0]  ;;  %v9378_v16 = vld [vmem:[#allocation10 + $0xa74] sm:$0xf0] }
 0x10a   : > { %3476 = vmatpush.bf16.msrb.mxu2 %v8625_v22  ;;  %v9042_v22 = vld [vmem:[#allocation10 + $0x7d4] sm:$0xf0]  ;;  %v8949_v33 = vor.u32 %v11550_v18, %v8946_v20  ;;  %v11682_v17 = vld [vmem:[#allocation10 + $0xb2c] sm:$0xf]  ;;  %v8817_v18 = vor.u32 %v11517_v63, %v8814_v0  ;;  %v11589_v20 = vld [vmem:[#allocation10 + $0x844] sm:$0xf] }
 0x10b   : > { %3489 = vmatpush.bf16.msrb.mxu3 %v8721_v37  ;;  %3451 = vmatmul.bf16.vlgmr.msrb.gmra.mxu0 %v12782_v4  ;;  %v9045_v34 = vor.u32 %v11574_v21, %v9042_v22  ;;  %v8838_v37 = vld [vmem:[#allocation10 + $0x63c] sm:$0xf0]  ;;  %v9102_v21 = vld [vmem:[#allocation10 + $0x84c] sm:$0xf0]  ;;  %v9354_v53 = vld [vmem:[#allocation10 + $0xa44] sm:$0xf0] }
 0x10c   : > { %3495 = vmatpush.bf16.msra.mxu0 %v8901_v23  ;;  %3464 = vmatmul.bf16.vlgmr.msrb.gmra.mxu1 %v12786_v6  ;;  %v3245_v23 = vadd.f32 %v3244_v19, %v3232_v41  ;;  %v9474_v19 = vld [vmem:[#allocation10 + $0xb34] sm:$0xf0]  ;;  %v9450_v55 = vld [vmem:[#allocation10 + $0xb04] sm:$0xf0] }
 0x10d   : > { %3508 = vmatpush.bf16.msra.mxu1 %v8997_v31  ;;  %3477 = vmatmul.bf16.vlgmr.msrb.gmra.mxu2 %v12777_v1  ;;  %v9138_v31 = vld [vmem:[#allocation10 + $0x894] sm:$0xf0] }
 0x10e   : > { %3521 = vmatpush.bf16.msra.mxu2 %v9093_v32  ;;  %3490 = vmatmul.bf16.vlgmr.msrb.gmra.mxu3 %v12784_v5  ;;  %v3257_v32 = vpop.f32.mrf.mxu1  ;;  %v9141_v41 = vor.u32 %v11598_v29, %v9138_v31  ;;  %v9285_v29 = vor.u32 %v11634_v12, %v9282_v13 }
 0x10f   : > { %3534 = vmatpush.bf16.msra.mxu3 %v9189_v43  ;;  %v3258_v35 = vadd.f32 %v3257_v32, %v3245_v23  ;;  %v8841_v43 = vor.u32 %v11523_v36, %v8838_v37  ;;  %v8913_v23 = vor.u32 %v11541_v8, %v8910_v9  ;;  %v11706_v32 = vld [vmem:[#allocation10 + $0xbec] sm:$0xf]  ;;  %v11631_v36 = vld [vmem:[#allocation10 + $0x994] sm:$0xf]  ;;  %v9270_v37 = vld [vmem:[#allocation10 + $0x99c] sm:$0xf0] }
 0x110   : > { %3496 = vmatpush.bf16.msra.mxu0 %v8889_v44  ;;  %v3270_v44 = vpop.f32.mrf.mxu2  ;;  %v3246_v54 = vpop.f32.mrf.mxu0  ;;  %v9342_v8 = vld [vmem:[#allocation10 + $0xa2c] sm:$0xf0]  ;;  %v11673_v9 = vld [vmem:[#allocation10 + $0xae4] sm:$0xf] }
 0x111   : > { %3509 = vmatpush.bf16.msra.mxu1 %v8985_v48  ;;  %v9033_v48 = vor.u32 %v11571_v40, %v9030_v42  ;;  %v3283_v50 = vpop.f32.mrf.mxu3  ;;  %v11679_v40 = vld [vmem:[#allocation10 + $0xb14] sm:$0xf]  ;;  %v9462_v42 = vld [vmem:[#allocation10 + $0xb1c] sm:$0xf0]  ;;  %v11676_v54 = vld [vmem:[#allocation10 + $0xafc] sm:$0xf] }
 0x112   : > { %3522 = vmatpush.bf16.msra.mxu2 %v9081_v49  ;;  %v3271_v49 = vadd.f32 %v3270_v44, %v3258_v35  ;;  %v9105_v35 = vor.u32 %v11589_v20, %v9102_v21  ;;  %v11703_v44 = vld [vmem:[#allocation10 + $0xbd4] sm:$0xf]  ;;  %v9453_v0 = vor.u32 %v11676_v54, %v9450_v55  ;;  %v11622_v20 = vld [vmem:[#allocation10 + $0x94c] sm:$0xf]  ;;  %v9234_v21 = vld [vmem:[#allocation10 + $0x954] sm:$0xf0] }
 0x113   : > { %3535 = vmatpush.bf16.msra.mxu3 %v9177_v56  ;;  %v11568_v56 = vld [vmem:[#allocation10 + $0x79c] sm:$0xf] }
 0x114   : > { %3497 = vmatpush.bf16.msra.mxu0 %v8877_v58  ;;  %v9129_v58 = vor.u32 %v11595_v45, %v9126_v46  ;;  %v12800_v59 = vadd.f32 %v3283_v50, %v3271_v49  ;;  %v9021_v7 = vor.u32 %v11568_v56, %v9018_v57  ;;  %v9558_v45 = vld [vmem:[#allocation10 + $0xbdc] sm:$0xf0]  ;;  %v9369_v46 = vor.u32 %v11655_v38, %v9366_v39  ;;  %v9258_v49 = vld [vmem:[#allocation10 + $0x984] sm:$0xf0]  ;;  %v11652_v50 = vld [vmem:[#allocation10 + $0xa3c] sm:$0xf] }
 0x115   : > { %3510 = vmatpush.bf16.msra.mxu1 %v8973_v61  ;;  %v8829_v61 = vor.u32 %v11520_v51, %v8826_v52  ;;  %v12269_v51 = vld [vmem:[#allocation1] sm:$0xff]  ;;  %v12270_v52 = vld [vmem:[#allocation1 + $0x12] sm:$0xff]  ;;  %v12271_v56 = vld [vmem:[#allocation1 + $0x9] sm:$0xff]  ;;  %v9561_v57 = vor.u32 %v11703_v44, %v9558_v45  ;;  %v9357_v63 = vor.u32 %v11652_v50, %v9354_v53 }
 0x116   : > { %3523 = vmatpush.bf16.msra.mxu2 %v9069_v62  ;;  %v9114_v62 = vld [vmem:[#allocation10 + $0x864] sm:$0xf0]  ;;  %v3259_v2 = vpop.f32.mrf.mxu1  ;;  %v11643_v38 = vld [vmem:[#allocation10 + $0x9f4] sm:$0xf]  ;;  %v9318_v39 = vld [vmem:[#allocation10 + $0x9fc] sm:$0xf0] }
 0x117   : > { %3536 = vmatpush.bf16.msra.mxu3 %v9165_v10  ;;  %v11565_v10 = vld [vmem:[#allocation10 + $0x784] sm:$0xf]  ;;  %v9321_v50 = vor.u32 %v11643_v38, %v9318_v39  ;;  %v9210_v53 = vld [vmem:[#allocation10 + $0x924] sm:$0xf0]  ;;  %v11640_v54 = vld [vmem:[#allocation10 + $0x9dc] sm:$0xf] }
 0x118   : > { %3498 = vmatpush.bf16.msra.mxu0 %v8865_v11  ;;  %v9006_v11 = vld [vmem:[#allocation10 + $0x78c] sm:$0xf0]  ;;  %v3272_v22 = vpop.f32.mrf.mxu2  ;;  %v11625_v2 = vld [vmem:[#allocation10 + $0x964] sm:$0xf]  ;;  %v8220_v38 = vld [vmem:[#allocation10 + $0x158] sm:$0xf] }
 0x119   : > { %3511 = vmatpush.bf16.msra.mxu1 %v8961_v14  ;;  %v9117_v14 = vor.u32 %v11592_v60, %v9114_v62  ;;  %v9546_v62 = vld [vmem:[#allocation10 + $0xbc4] sm:$0xf0]  ;;  %v11646_v22 = vld [vmem:[#allocation10 + $0xa0c] sm:$0xf]  ;;  %v11369_v39 = vld [vmem:[#allocation10 + $0x160] sm:$0xf0] }
 0x11a   : > { %3524 = vmatpush.bf16.msra.mxu2 %v9057_v15  ;;  %v11658_v15 = vld [vmem:[#allocation10 + $0xa6c] sm:$0xf] }
 0x11b   : > { %3537 = vmatpush.bf16.msra.mxu3 %v9153_v27  ;;  %v9009_v27 = vor.u32 %v11565_v10, %v9006_v11  ;;  %v9381_v31 = vor.u32 %v11658_v15, %v9378_v16  ;;  %v9438_v10 = vld [vmem:[#allocation10 + $0xaec] sm:$0xf0] }
 0x11c   : > { %3499 = vmatpush.bf16.msra.mxu0 %v8853_v28  ;;  %v3285_v28 = vpop.f32.mrf.mxu3  ;;  %v9534_v15 = vld [vmem:[#allocation10 + $0xbac] sm:$0xf0] }
 0x11d   : > { %3512 = vmatpush.bf16.msra.mxu1 %v8949_v33  ;;  %v9570_v33 = vld [vmem:[#allocation10 + $0xbf4] sm:$0xf0] }
 0x11e   : > { %3525 = vmatpush.bf16.msra.mxu2 %v9045_v34  ;;  %v9477_v34 = vor.u32 %v11682_v17, %v9474_v19  ;;  %v9426_v28 = vld [vmem:[#allocation10 + $0xad4] sm:$0xf0] }
 0x11f   : > { %3538 = vmatpush.bf16.msra.mxu3 %v9141_v41  ;;  %v9573_v41 = vor.u32 %v11706_v32, %v9570_v33  ;;  %v9237_v32 = vor.u32 %v11622_v20, %v9234_v21  ;;  %v11694_v33 = vld [vmem:[#allocation10 + $0xb8c] sm:$0xf]  ;;  %v11396_v21 = vld [vmem:[#allocation10 + $0x238] sm:$0xf0] }
 0x120   : > { %3500 = vmatpush.bf16.msra.mxu0 %v8841_v43  ;;  %v9273_v43 = vor.u32 %v11631_v36, %v9270_v37  ;;  %v11619_v36 = vld [vmem:[#allocation10 + $0x934] sm:$0xf]  ;;  %v9222_v37 = vld [vmem:[#allocation10 + $0x93c] sm:$0xf0] }
 0x121   : > { %3513 = vmatpush.bf16.msra.mxu1 %v8937_v47  ;;  %v9465_v47 = vor.u32 %v11679_v40, %v9462_v42  ;;  %v11667_v40 = vld [vmem:[#allocation10 + $0xab4] sm:$0xf]  ;;  %v9414_v42 = vld [vmem:[#allocation10 + $0xabc] sm:$0xf0] }
 0x122   : > { %3526 = vmatpush.bf16.msra.mxu2 %v9033_v48  ;;  %v11628_v48 = vld [vmem:[#allocation10 + $0x97c] sm:$0xf] }
 0x123   : > { %3539 = vmatpush.bf16.msra.mxu3 %v9129_v58  ;;  %v12272_v58 = vld [vmem:[#allocation1 + $0x1b] sm:$0xff]  ;;  %v9261_v60 = vor.u32 %v11628_v48, %v9258_v49 }
 0x124   : > { %3501 = vmatpush.bf16.msra.mxu0 %v8829_v61  ;;  %v11700_v61 = vld [vmem:[#allocation10 + $0xbbc] sm:$0xf]  ;;  %v9510_v48 = vld [vmem:[#allocation10 + $0xb7c] sm:$0xf0] }
 0x125   : > { %3514 = vmatpush.bf16.msra.mxu1 %v8925_v3  ;;  %v9246_v3 = vld [vmem:[#allocation10 + $0x96c] sm:$0xf0]  ;;  %v9549_v11 = vor.u32 %v11700_v61, %v9546_v62  ;;  %v11688_v62 = vld [vmem:[#allocation10 + $0xb5c] sm:$0xf] }
 0x126   : > { %3527 = vmatpush.bf16.msra.mxu2 %v9021_v7  ;;  %v11649_v7 = vld [vmem:[#allocation10 + $0xa24] sm:$0xf]  ;;  %v9249_v13 = vor.u32 %v11625_v2, %v9246_v3  ;;  %v9198_v3 = vld [vmem:[#allocation10 + $0x90c] sm:$0xf0] }
 0x127   : > { %3540 = vmatpush.bf16.msra.mxu3 %v9117_v14  ;;  %v11697_v14 = vld [vmem:[#allocation10 + $0xba4] sm:$0xf]  ;;  %v9345_v17 = vor.u32 %v11649_v7, %v9342_v8 }
 0x128   : > { %3502 = vmatpush.bf16.msra.mxu0 %v8817_v18  ;;  %v3296_v12 = vpop.f32.mrf.mxu0  ;;  %v9441_v18 = vor.u32 %v11673_v9, %v9438_v10  ;;  %v11613_v2 = vld [vmem:[#allocation10 + $0x904] sm:$0xf]  ;;  %v9294_v10 = vld [vmem:[#allocation10 + $0x9cc] sm:$0xf0] }
 0x129   : > { %3515 = vmatpush.bf16.msra.mxu1 %v8913_v23  ;;  %v3297_v16 = vadd.f32 %v3296_v12, %v12800_v59  ;;  %v3309_v19 = vpop.f32.mrf.mxu1  ;;  %v9330_v23 = vld [vmem:[#allocation10 + $0xa14] sm:$0xf0]  ;;  %v11637_v9 = vld [vmem:[#allocation10 + $0x9c4] sm:$0xf]  ;;  %v9390_v12 = vld [vmem:[#allocation10 + $0xa8c] sm:$0xf0]  ;;  %v9201_v20 = vor.u32 %v11613_v2, %v9198_v3 }
 0x12a   : > { %3528 = vmatpush.bf16.msra.mxu2 %v9009_v27  ;;  %v11670_v27 = vld [vmem:[#allocation10 + $0xacc] sm:$0xf]  ;;  %v8100_v3 = vld [vmem:[#allocation10 + $0x68] sm:$0xf] }
 0x12b   : > { %3541 = vmatpush.bf16.msra.mxu3 %v9105_v35  ;;  %3503 = vmatmul.bf16.vlgmr.msra.gmra.mxu0 %v12269_v51  ;;  %v9333_v35 = vor.u32 %v11646_v22, %v9330_v23  ;;  %v9429_v59 = vor.u32 %v11670_v27, %v9426_v28  ;;  %v9417_v51 = vor.u32 %v11667_v40, %v9414_v42  ;;  %v11685_v22 = vld [vmem:[#allocation10 + $0xb44] sm:$0xf]  ;;  %v9486_v23 = vld [vmem:[#allocation10 + $0xb4c] sm:$0xf0]  ;;  %v8316_v40 = vld [vmem:[#allocation10 + $0x218] sm:$0xf] }
 0x12c   : > { %3547 = vmatpush.bf16.msrb.mxu0 %v9285_v29  ;;  %3516 = vmatmul.bf16.vlgmr.msra.gmra.mxu1 %v12271_v56  ;;  %v3310_v29 = vadd.f32 %v3309_v19, %v3297_v16  ;;  %v8232_v16 = vld [vmem:[#allocation10 + $0x170] sm:$0xf]  ;;  %v9297_v28 = vor.u32 %v11637_v9, %v9294_v10  ;;  %v11393_v42 = vld [vmem:[#allocation10 + $0x220] sm:$0xf0]  ;;  %v11363_v9 = vld [vmem:[#allocation10 + $0x130] sm:$0xf0] }
 0x12d   : > { %3560 = vmatpush.bf16.msrb.mxu1 %v9381_v31  ;;  %3529 = vmatmul.bf16.vlgmr.msra.gmra.mxu2 %v12270_v52  ;;  %v9537_v31 = vor.u32 %v11697_v14, %v9534_v15  ;;  %v11616_v52 = vld [vmem:[#allocation10 + $0x91c] sm:$0xf]  ;;  %v8292_v10 = vld [vmem:[#allocation10 + $0x1e8] sm:$0xf] }
 0x12e   : > { %3573 = vmatpush.bf16.msrb.mxu2 %v9477_v34  ;;  %3542 = vmatmul.bf16.vlgmr.msra.gmra.mxu3 %v12272_v58  ;;  %v9522_v34 = vld [vmem:[#allocation10 + $0xb94] sm:$0xf0]  ;;  %v11664_v58 = vld [vmem:[#allocation10 + $0xa9c] sm:$0xf] }
 0x12f   : > { %3586 = vmatpush.bf16.msrb.mxu3 %v9573_v41  ;;  %v11348_v14 = vld [vmem:[#allocation10 + $0xb8] sm:$0xf0] }
 0x130   : > { %3548 = vmatpush.bf16.msrb.mxu0 %v9273_v43  ;;  %v3322_v41 = vpop.f32.mrf.mxu2  ;;  %v9525_v43 = vor.u32 %v11694_v33, %v9522_v34  ;;  %v3298_v49 = vpop.f32.mrf.mxu0  ;;  %v8424_v33 = vld [vmem:[#allocation10 + $0x2f0] sm:$0xf]  ;;  %v11420_v34 = vld [vmem:[#allocation10 + $0x2f8] sm:$0xf0] }
 0x131   : > { %3561 = vmatpush.bf16.msrb.mxu1 %v9369_v46  ;;  %v3323_v44 = vadd.f32 %v3322_v41, %v3310_v29  ;;  %v3335_v45 = vpop.f32.mrf.mxu3  ;;  %v9225_v46 = vor.u32 %v11619_v36, %v9222_v37  ;;  %v3311_v55 = vpop.f32.mrf.mxu1  ;;  %v8124_v36 = vld [vmem:[#allocation10 + $0x98] sm:$0xf]  ;;  %v11345_v37 = vld [vmem:[#allocation10 + $0xa0] sm:$0xf0]  ;;  %v8425_v41 = vor.u32 %v11420_v34, %v8424_v33  ;;  %v11342_v49 = vld [vmem:[#allocation10 + $0x88] sm:$0xf0] }
 0x132   : > { %3574 = vmatpush.bf16.msrb.mxu2 %v9465_v47  ;;  %v11691_v47 = vld [vmem:[#allocation10 + $0xb74] sm:$0xf]  ;;  %v11390_v55 = vld [vmem:[#allocation10 + $0x208] sm:$0xf0]  ;;  %v8376_v34 = vld [vmem:[#allocation10 + $0x290] sm:$0xf] }
 0x133   : > { %3587 = vmatpush.bf16.msrb.mxu3 %v9561_v57  ;;  %v12803_v56 = vadd.f32 %v3335_v45, %v3323_v44  ;;  %v9306_v57 = vld [vmem:[#allocation10 + $0x9e4] sm:$0xf0]  ;;  %v9513_v61 = vor.u32 %v11691_v47, %v9510_v48  ;;  %v8412_v44 = vld [vmem:[#allocation10 + $0x2d8] sm:$0xf]  ;;  %v11417_v45 = vld [vmem:[#allocation10 + $0x2e0] sm:$0xf0]  ;;  %v8317_v47 = vor.u32 %v11393_v42, %v8316_v40 }
 0x134   : > { %3549 = vmatpush.bf16.msrb.mxu0 %v9261_v60  ;;  %v9402_v60 = vld [vmem:[#allocation10 + $0xaa4] sm:$0xf0]  ;;  %v9309_v7 = vor.u32 %v11640_v54, %v9306_v57  ;;  %v8112_v48 = vld [vmem:[#allocation10 + $0x80] sm:$0xf]  ;;  %v12275_v57 = vld [vmem:[#allocation1 + $0x2d] sm:$0xff] }
 0x135   : > { %3562 = vmatpush.bf16.msrb.mxu1 %v9357_v63  ;;  %v9213_v63 = vor.u32 %v11616_v52, %v9210_v53  ;;  %v9405_v8 = vor.u32 %v11664_v58, %v9402_v60  ;;  %v12274_v52 = vld [vmem:[#allocation1 + $0x36] sm:$0xff]  ;;  %v11366_v53 = vld [vmem:[#allocation10 + $0x148] sm:$0xf0]  ;;  %v8413_v58 = vor.u32 %v11417_v45, %v8412_v44  ;;  %v12276_v60 = vld [vmem:[#allocation1 + $0x3f] sm:$0xff] }
 0x136   : > { %3575 = vmatpush.bf16.msrb.mxu2 %v9453_v0  ;;  %v9498_v0 = vld [vmem:[#allocation10 + $0xb64] sm:$0xf0]  ;;  %v8304_v54 = vld [vmem:[#allocation10 + $0x200] sm:$0xf]  ;;  %v11357_v40 = vld [vmem:[#allocation10 + $0x100] sm:$0xf0] }
 0x137   : > { %3588 = vmatpush.bf16.msrb.mxu3 %v9549_v11  ;;  %v11661_v11 = vld [vmem:[#allocation10 + $0xa84] sm:$0xf]  ;;  %v9501_v15 = vor.u32 %v11688_v62, %v9498_v0  ;;  %v8400_v62 = vld [vmem:[#allocation10 + $0x2c0] sm:$0xf]  ;;  %v8305_v2 = vor.u32 %v11390_v55, %v8304_v54  ;;  %v8268_v42 = vld [vmem:[#allocation10 + $0x1b8] sm:$0xf] }
 0x138   : > { %3550 = vmatpush.bf16.msrb.mxu0 %v9249_v13  ;;  %v8136_v13 = vld [vmem:[#allocation10 + $0xb0] sm:$0xf]  ;;  %v3324_v19 = vpop.f32.mrf.mxu2  ;;  %v9393_v29 = vor.u32 %v11661_v11, %v9390_v12  ;;  %v11387_v11 = vld [vmem:[#allocation10 + $0x1f0] sm:$0xf0]  ;;  %v11330_v54 = vld [vmem:[#allocation10 + $0x28] sm:$0xf0] }
 0x139   : > { %3563 = vmatpush.bf16.msrb.mxu1 %v9345_v17  ;;  %v11372_v17 = vld [vmem:[#allocation10 + $0x178] sm:$0xf0]  ;;  %v3337_v27 = vpop.f32.mrf.mxu3  ;;  %v8293_v19 = vor.u32 %v11387_v11, %v8292_v10  ;;  %v8160_v55 = vld [vmem:[#allocation10 + $0xe0] sm:$0xf]  ;;  %v8148_v10 = vld [vmem:[#allocation10 + $0xc8] sm:$0xf] }
 0x13a   : > { %3576 = vmatpush.bf16.msrb.mxu2 %v9441_v18  ;;  %v8328_v18 = vld [vmem:[#allocation10 + $0x230] sm:$0xf]  ;;  %v11360_v27 = vld [vmem:[#allocation10 + $0x118] sm:$0xf0]  ;;  %v11351_v11 = vld [vmem:[#allocation10 + $0xd0] sm:$0xf0] }
 0x13b   : > { %3589 = vmatpush.bf16.msrb.mxu3 %v9537_v31  ;;  %v8137_v31 = vor.u32 %v11348_v14, %v8136_v13 }
 0x13c   : > { %3551 = vmatpush.bf16.msrb.mxu0 %v9237_v32  ;;  %v8233_v32 = vor.u32 %v11372_v17, %v8232_v16  ;;  %v11411_v16 = vld [vmem:[#allocation10 + $0x2b0] sm:$0xf0] }
 0x13d   : > { %3564 = vmatpush.bf16.msrb.mxu1 %v9333_v35  ;;  %v8329_v35 = vor.u32 %v11396_v21, %v8328_v18  ;;  %v8088_v21 = vld [vmem:[#allocation10 + $0x50] sm:$0xf] }
 0x13e   : > { %3577 = vmatpush.bf16.msrb.mxu2 %v9429_v59  ;;  %v9489_v59 = vor.u32 %v11685_v22, %v9486_v23  ;;  %v11336_v22 = vld [vmem:[#allocation10 + $0x58] sm:$0xf0]  ;;  %v8184_v23 = vld [vmem:[#allocation10 + $0x110] sm:$0xf] }
 0x13f   : > { %3590 = vmatpush.bf16.msrb.mxu3 %v9525_v43  ;;  %v8125_v43 = vor.u32 %v11345_v37, %v8124_v36  ;;  %v8089_v33 = vor.u32 %v11336_v22, %v8088_v21  ;;  %v8076_v36 = vld [vmem:[#allocation10 + $0x38] sm:$0xf]  ;;  %v11333_v37 = vld [vmem:[#allocation10 + $0x40] sm:$0xf0]  ;;  %v11492_v22 = vld [vmem:[#allocation10 + $0x538] sm:$0xf0] }
 0x140   : > { %3552 = vmatpush.bf16.msrb.mxu0 %v9225_v46  ;;  %v8221_v46 = vor.u32 %v11369_v39, %v8220_v38  ;;  %v8172_v38 = vld [vmem:[#allocation10 + $0xf8] sm:$0xf] }
 0x141   : > { %3565 = vmatpush.bf16.msrb.mxu1 %v9321_v50  ;;  %v8208_v50 = vld [vmem:[#allocation10 + $0x140] sm:$0xf] }
 0x142   : > { %3578 = vmatpush.bf16.msrb.mxu2 %v9417_v51  ;;  %v12273_v51 = vld [vmem:[#allocation1 + $0x24] sm:$0xff]  ;;  %v8209_v0 = vor.u32 %v11366_v53, %v8208_v50  ;;  %v8064_v53 = vld [vmem:[#allocation10 + $0x20] sm:$0xf] }
 0x143   : > { %3591 = vmatpush.bf16.msrb.mxu3 %v9513_v61  ;;  %v8113_v61 = vor.u32 %v11342_v49, %v8112_v48  ;;  %v11405_v48 = vld [vmem:[#allocation10 + $0x280] sm:$0xf0] }
 0x144   : > { %3553 = vmatpush.bf16.msrb.mxu0 %v9213_v63  ;;  %v11414_v63 = vld [vmem:[#allocation10 + $0x2c8] sm:$0xf0] }
 0x145   : > { %3566 = vmatpush.bf16.msrb.mxu1 %v9309_v7  ;;  %v11339_v7 = vld [vmem:[#allocation10 + $0x70] sm:$0xf0]  ;;  %v8401_v12 = vor.u32 %v11414_v63, %v8400_v62  ;;  %v8352_v63 = vld [vmem:[#allocation10 + $0x260] sm:$0xf] }
 0x146   : > { %3579 = vmatpush.bf16.msrb.mxu2 %v9405_v8  ;;  %v8196_v8 = vld [vmem:[#allocation10 + $0x128] sm:$0xf]  ;;  %v8101_v14 = vor.u32 %v11339_v7, %v8100_v3  ;;  %v11327_v7 = vld [vmem:[#allocation10 + $0x10] sm:$0xf0] }
 0x147   : > { %3592 = vmatpush.bf16.msrb.mxu3 %v9501_v15  ;;  %v8388_v15 = vld [vmem:[#allocation10 + $0x2a8] sm:$0xf]  ;;  %v8197_v18 = vor.u32 %v11363_v9, %v8196_v8 }
 0x148   : > { %3554 = vmatpush.bf16.msrb.mxu0 %v9201_v20  ;;  %v3348_v13 = vpop.f32.mrf.mxu0  ;;  %v8052_v3 = vld [vmem:[#allocation10 + $0x8] sm:$0xf] }
 0x149   : > { %3567 = vmatpush.bf16.msrb.mxu1 %v9297_v28  ;;  %v3349_v17 = vadd.f32 %v3348_v13, %v12803_v56  ;;  %v3361_v20 = vpop.f32.mrf.mxu1  ;;  %v8280_v28 = vld [vmem:[#allocation10 + $0x1d0] sm:$0xf]  ;;  %v11375_v13 = vld [vmem:[#allocation10 + $0x190] sm:$0xf0]  ;;  %v8053_v21 = vor.u32 %v11327_v7, %v8052_v3  ;;  %v8676_v7 = vld [vmem:[#allocation10 + $0x4e8] sm:$0xf] }
 0x14a   : > { %3580 = vmatpush.bf16.msrb.mxu2 %v9393_v29  ;;  %v11384_v29 = vld [vmem:[#allocation10 + $0x1d8] sm:$0xf0]  ;;  %v11459_v3 = vld [vmem:[#allocation10 + $0x430] sm:$0xf0] }
 0x14b   : > { %3593 = vmatpush.bf16.msrb.mxu3 %v9489_v59  ;;  %3555 = vmatmul.bf16.vlgmr.msrb.gmra.mxu0 %v12273_v51  ;;  %v8185_v59 = vor.u32 %v11360_v27, %v8184_v23  ;;  %v8281_v56 = vor.u32 %v11384_v29, %v8280_v28  ;;  %v8173_v51 = vor.u32 %v11357_v40, %v8172_v38  ;;  %v8340_v23 = vld [vmem:[#allocation10 + $0x248] sm:$0xf]  ;;  %v11399_v27 = vld [vmem:[#allocation10 + $0x250] sm:$0xf0]  ;;  %v8604_v38 = vld [vmem:[#allocation10 + $0x458] sm:$0xf] }
 0x14c   : > { %3599 = vmatpush.bf16.msra.mxu0 %v8137_v31  ;;  %3568 = vmatmul.bf16.vlgmr.msrb.gmra.mxu1 %v12275_v57  ;;  %v3362_v31 = vadd.f32 %v3361_v20, %v3349_v17  ;;  %v8712_v20 = vld [vmem:[#allocation10 + $0x530] sm:$0xf]  ;;  %v8149_v29 = vor.u32 %v11351_v11, %v8148_v10  ;;  %v11507_v10 = vld [vmem:[#allocation10 + $0x5b0] sm:$0xf0] }
 0x14d   : > { %3612 = vmatpush.bf16.msra.mxu1 %v8233_v32  ;;  %3581 = vmatmul.bf16.vlgmr.msrb.gmra.mxu2 %v12274_v52  ;;  %v8389_v32 = vor.u32 %v11411_v16, %v8388_v15  ;;  %v11444_v15 = vld [vmem:[#allocation10 + $0x3b8] sm:$0xf0] }
 0x14e   : > { %3625 = vmatpush.bf16.msra.mxu2 %v8329_v35  ;;  %3594 = vmatmul.bf16.vlgmr.msrb.gmra.mxu3 %v12276_v60  ;;  %v11408_v35 = vld [vmem:[#allocation10 + $0x298] sm:$0xf0]  ;;  %v8256_v60 = vld [vmem:[#allocation10 + $0x1a0] sm:$0xf] }
 0x14f   : > { %3638 = vmatpush.bf16.msra.mxu3 %v8425_v41  ;;  %v11381_v41 = vld [vmem:[#allocation10 + $0x1c0] sm:$0xf0]  ;;  %v8377_v44 = vor.u32 %v11408_v35, %v8376_v34 }
 0x150   : > { %3600 = vmatpush.bf16.msra.mxu0 %v8125_v43  ;;  %v3374_v39 = vpop.f32.mrf.mxu2  ;;  %v3350_v49 = vpop.f32.mrf.mxu0  ;;  %v8269_v52 = vor.u32 %v11381_v41, %v8268_v42  ;;  %v8700_v42 = vld [vmem:[#allocation10 + $0x518] sm:$0xf]  ;;  %v11489_v41 = vld [vmem:[#allocation10 + $0x520] sm:$0xf0] }
 0x151   : > { %3613 = vmatpush.bf16.msra.mxu1 %v8221_v46  ;;  %v3375_v43 = vadd.f32 %v3374_v39, %v3362_v31  ;;  %v3387_v45 = vpop.f32.mrf.mxu3  ;;  %v8077_v46 = vor.u32 %v11333_v37, %v8076_v36  ;;  %v3363_v57 = vpop.f32.mrf.mxu1  ;;  %v8341_v36 = vor.u32 %v11399_v27, %v8340_v23  ;;  %v11441_v37 = vld [vmem:[#allocation10 + $0x3a0] sm:$0xf0]  ;;  %v11438_v49 = vld [vmem:[#allocation10 + $0x388] sm:$0xf0]  ;;  %v8760_v23 = vld [vmem:[#allocation10 + $0x590] sm:$0xf] }
 0x152   : > { %3626 = vmatpush.bf16.msra.mxu2 %v8317_v47  ;;  %v8364_v47 = vld [vmem:[#allocation10 + $0x278] sm:$0xf]  ;;  %v11465_v39 = vld [vmem:[#allocation10 + $0x460] sm:$0xf0]  ;;  %v8784_v57 = vld [vmem:[#allocation10 + $0x5c0] sm:$0xf] }
 0x153   : > { %3639 = vmatpush.bf16.msra.mxu3 %v8413_v58  ;;  %v12806_v50 = vadd.f32 %v3387_v45, %v3375_v43  ;;  %v11354_v58 = vld [vmem:[#allocation10 + $0xe8] sm:$0xf0]  ;;  %v8365_v62 = vor.u32 %v11405_v48, %v8364_v47  ;;  %v8796_v43 = vld [vmem:[#allocation10 + $0x5d8] sm:$0xf]  ;;  %v8496_v47 = vld [vmem:[#allocation10 + $0x380] sm:$0xf]  ;;  %v8701_v48 = vor.u32 %v11489_v41, %v8700_v42 }
 0x154   : > { %3601 = vmatpush.bf16.msra.mxu0 %v8113_v61  ;;  %v11378_v61 = vld [vmem:[#allocation10 + $0x1a8] sm:$0xf0]  ;;  %v8161_v8 = vor.u32 %v11354_v58, %v8160_v55  ;;  %v11504_v27 = vld [vmem:[#allocation10 + $0x598] sm:$0xf0] }
 0x155   : > { %3614 = vmatpush.bf16.msra.mxu1 %v8209_v0  ;;  %v8065_v0 = vor.u32 %v11330_v54, %v8064_v53  ;;  %v8257_v9 = vor.u32 %v11378_v61, %v8256_v60  ;;  %v8688_v54 = vld [vmem:[#allocation10 + $0x500] sm:$0xf]  ;;  %v11486_v55 = vld [vmem:[#allocation10 + $0x508] sm:$0xf0]  ;;  %v8497_v60 = vor.u32 %v11438_v49, %v8496_v47 }
 0x156   : > { %3627 = vmatpush.bf16.msra.mxu2 %v8305_v2  ;;  %v11402_v2 = vld [vmem:[#allocation10 + $0x268] sm:$0xf0]  ;;  %v8544_v47 = vld [vmem:[#allocation10 + $0x3e0] sm:$0xf] }
 0x157   : > { %3640 = vmatpush.bf16.msra.mxu3 %v8401_v12  ;;  %v8244_v12 = vld [vmem:[#allocation10 + $0x188] sm:$0xf]  ;;  %v8353_v17 = vor.u32 %v11402_v2, %v8352_v63  ;;  %v11510_v58 = vld [vmem:[#allocation10 + $0x5c8] sm:$0xf0]  ;;  %v8689_v63 = vor.u32 %v11486_v55, %v8688_v54 }
 0x158   : > { %3602 = vmatpush.bf16.msra.mxu0 %v8101_v14  ;;  %v8520_v14 = vld [vmem:[#allocation10 + $0x3b0] sm:$0xf]  ;;  %v3376_v16 = vpop.f32.mrf.mxu2  ;;  %v8245_v31 = vor.u32 %v11375_v13, %v8244_v12  ;;  %v8580_v2 = vld [vmem:[#allocation10 + $0x428] sm:$0xf]  ;;  %v11474_v54 = vld [vmem:[#allocation10 + $0x4a8] sm:$0xf0] }
 0x159   : > { %3615 = vmatpush.bf16.msra.mxu1 %v8197_v18  ;;  %v8616_v18 = vld [vmem:[#allocation10 + $0x470] sm:$0xf]  ;;  %v3389_v28 = vpop.f32.mrf.mxu3  ;;  %v8521_v34 = vor.u32 %v11444_v15, %v8520_v14  ;;  %v8581_v12 = vor.u32 %v11459_v3, %v8580_v2  ;;  %v11432_v15 = vld [vmem:[#allocation10 + $0x358] sm:$0xf0]  ;;  %v8532_v2 = vld [vmem:[#allocation10 + $0x3c8] sm:$0xf] }
 0x15a   : > { %3628 = vmatpush.bf16.msra.mxu2 %v8293_v19  ;;  %v11468_v19 = vld [vmem:[#allocation10 + $0x478] sm:$0xf0]  ;;  %v8472_v13 = vld [vmem:[#allocation10 + $0x350] sm:$0xf] }
 0x15b   : > { %3641 = vmatpush.bf16.msra.mxu3 %v8389_v32  ;;  %v8808_v32 = vld [vmem:[#allocation10 + $0x5f0] sm:$0xf]  ;;  %v8617_v35 = vor.u32 %v11468_v19, %v8616_v18  ;;  %v8473_v28 = vor.u32 %v11432_v15, %v8472_v13  ;;  %v11564_v13 = vld [vmem:[#allocation10 + $0x778] sm:$0xf0] }
 0x15c   : > { %3603 = vmatpush.bf16.msra.mxu0 %v8089_v33  ;;  %v11516_v33 = vld [vmem:[#allocation10 + $0x5f8] sm:$0xf0]  ;;  %v8568_v16 = vld [vmem:[#allocation10 + $0x410] sm:$0xf] }
 0x15d   : > { %3616 = vmatpush.bf16.msra.mxu1 %v8185_v59  ;;  %v8508_v59 = vld [vmem:[#allocation10 + $0x398] sm:$0xf]  ;;  %v8809_v40 = vor.u32 %v11516_v33, %v8808_v32  ;;  %v11588_v15 = vld [vmem:[#allocation10 + $0x838] sm:$0xf0] }
 0x15e   : > { %3629 = vmatpush.bf16.msra.mxu2 %v8281_v56  ;;  %v8713_v56 = vor.u32 %v11492_v22, %v8712_v20  ;;  %v8509_v45 = vor.u32 %v11441_v37, %v8508_v59  ;;  %v8664_v20 = vld [vmem:[#allocation10 + $0x4d0] sm:$0xf]  ;;  %v11453_v59 = vld [vmem:[#allocation10 + $0x400] sm:$0xf0] }
 0x15f   : > { %3642 = vmatpush.bf16.msra.mxu3 %v8377_v44  ;;  %v11513_v44 = vld [vmem:[#allocation10 + $0x5e0] sm:$0xf0] }
 0x160   : > { %3604 = vmatpush.bf16.msra.mxu0 %v8077_v46  ;;  %v8605_v46 = vor.u32 %v11465_v39, %v8604_v38  ;;  %v8797_v53 = vor.u32 %v11513_v44, %v8796_v43  ;;  %v11477_v37 = vld [vmem:[#allocation10 + $0x4c0] sm:$0xf0]  ;;  %v8748_v39 = vld [vmem:[#allocation10 + $0x578] sm:$0xf]  ;;  %v8448_v44 = vld [vmem:[#allocation10 + $0x320] sm:$0xf] }
 0x161   : > { %3617 = vmatpush.bf16.msra.mxu1 %v8173_v51  ;;  %v8592_v51 = vld [vmem:[#allocation10 + $0x440] sm:$0xf] }
 0x162   : > { %3630 = vmatpush.bf16.msra.mxu2 %v8269_v52  ;;  %v11462_v52 = vld [vmem:[#allocation10 + $0x448] sm:$0xf0] }
 0x163   : > { %3643 = vmatpush.bf16.msra.mxu3 %v8365_v62  ;;  %v8593_v61 = vor.u32 %v11462_v52, %v8592_v51  ;;  %v8484_v62 = vld [vmem:[#allocation10 + $0x368] sm:$0xf] }
 0x164   : > { %3605 = vmatpush.bf16.msra.mxu0 %v8065_v0  ;;  %v11435_v0 = vld [vmem:[#allocation10 + $0x370] sm:$0xf0] }
 0x165   : > { %3618 = vmatpush.bf16.msra.mxu1 %v8161_v8  ;;  %v11483_v8 = vld [vmem:[#allocation10 + $0x4f0] sm:$0xf0]  ;;  %v8485_v11 = vor.u32 %v11435_v0, %v8484_v62 }
 0x166   : > { %3631 = vmatpush.bf16.msra.mxu2 %v8257_v9  ;;  %v12812_v9 = vld [vmem:[#allocation12] sm:$0x7]  ;;  %v8677_v14 = vor.u32 %v11483_v8, %v8676_v7  ;;  %v11423_v0 = vld [vmem:[#allocation10 + $0x310] sm:$0xf0]  ;;  %v8628_v7 = vld [vmem:[#allocation10 + $0x488] sm:$0xf] }
 0x167   : > { %3644 = vmatpush.bf16.msra.mxu3 %v8353_v17  ;;  %v11471_v8 = vld [vmem:[#allocation10 + $0x490] sm:$0xf0] }
 0x168   : > { %3606 = vmatpush.bf16.msra.mxu0 %v8053_v21  ;;  %v3400_v17 = vpop.f32.mrf.mxu0  ;;  %v11480_v21 = vld [vmem:[#allocation10 + $0x4d8] sm:$0xf0] }
 0x169   : > { %3619 = vmatpush.bf16.msra.mxu1 %v8149_v29  ;;  %v3413_v18 = vpop.f32.mrf.mxu1  ;;  %v8665_v33 = vor.u32 %v11480_v21, %v8664_v20  ;;  %v9192_v21 = vld [vmem:[#allocation10 + $0x8f0] sm:$0xf] }
 0x16a   : > { %3632 = vmatpush.bf16.msra.mxu2 %v8245_v31  ;;  %v8460_v31 = vld [vmem:[#allocation10 + $0x338] sm:$0xf] }
 0x16b   : > { %3645 = vmatpush.bf16.msra.mxu3 %v8341_v36  ;;  %3607 = vmatmul.bf16.vlgmr.msra.gmra.mxu0 %v12767_v25  ;;  %v1094_v25 = vperm.slane %v12812_v9, 1  ;;  %v8652_v36 = vld [vmem:[#allocation10 + $0x4b8] sm:$0xf] }
 0x16c   : > { %3651 = vmatpush.bf16.msrb.mxu0 %v8521_v34  ;;  %3620 = vmatmul.bf16.vlgmr.msra.gmra.mxu1 %v12772_v30  ;;  %v8772_v30 = vld [vmem:[#allocation10 + $0x5a8] sm:$0xf]  ;;  %v11429_v34 = vld [vmem:[#allocation10 + $0x340] sm:$0xf0] }
 0x16d   : > { %3664 = vmatpush.bf16.msrb.mxu1 %v8617_v35  ;;  %3633 = vmatmul.bf16.vlgmr.msra.gmra.mxu2 %v12765_v24  ;;  %v8785_v24 = vor.u32 %v11510_v58, %v8784_v57  ;;  %v8773_v19 = vor.u32 %v11507_v10, %v8772_v30  ;;  %v3401_v22 = vadd.f32 %v3400_v17, %v1094_v25  ;;  %v8556_v35 = vld [vmem:[#allocation10 + $0x3f8] sm:$0xf]  ;;  %v8736_v58 = vld [vmem:[#allocation10 + $0x560] sm:$0xf]  ;;  %v8904_v30 = vld [vmem:[#allocation10 + $0x6b0] sm:$0xf] }
 0x16e   : > { %3677 = vmatpush.bf16.msrb.mxu2 %v8713_v56  ;;  %3646 = vmatmul.bf16.vlgmr.msra.gmra.mxu3 %v12769_v26  ;;  %v11456_v26 = vld [vmem:[#allocation10 + $0x418] sm:$0xf0]  ;;  %v8761_v56 = vor.u32 %v11504_v27, %v8760_v23  ;;  %v8461_v41 = vor.u32 %v11429_v34, %v8460_v31  ;;  %v8557_v43 = vor.u32 %v11453_v59, %v8556_v35  ;;  %v8724_v17 = vld [vmem:[#allocation10 + $0x548] sm:$0xf]  ;;  %v11537_v31 = vld [vmem:[#allocation10 + $0x6a0] sm:$0xf0] }
 0x16f   : > { %3690 = vmatpush.bf16.msrb.mxu3 %v8809_v40  ;;  %v8569_v29 = vor.u32 %v11456_v26, %v8568_v16  ;;  %v3414_v32 = vadd.f32 %v3413_v18, %v3401_v22  ;;  %v11501_v40 = vld [vmem:[#allocation10 + $0x580] sm:$0xf0]  ;;  %v11540_v10 = vld [vmem:[#allocation10 + $0x6b8] sm:$0xf0]  ;;  %v11495_v18 = vld [vmem:[#allocation10 + $0x550] sm:$0xf0] }
 0x170   : > { %3652 = vmatpush.bf16.msrb.mxu0 %v8509_v45  ;;  %v3426_v38 = vpop.f32.mrf.mxu2  ;;  %v8653_v45 = vor.u32 %v11477_v37, %v8652_v36  ;;  %v3402_v51 = vpop.f32.mrf.mxu0  ;;  %v8749_v52 = vor.u32 %v11501_v40, %v8748_v39  ;;  %v8905_v20 = vor.u32 %v11540_v10, %v8904_v30  ;;  %v11612_v22 = vld [vmem:[#allocation10 + $0x8f8] sm:$0xf0]  ;;  %v11561_v34 = vld [vmem:[#allocation10 + $0x760] sm:$0xf0]  ;;  %v9084_v35 = vld [vmem:[#allocation10 + $0x818] sm:$0xf] }
 0x171   : > { %3665 = vmatpush.bf16.msrb.mxu1 %v8605_v46  ;;  %v3427_v42 = vadd.f32 %v3426_v38, %v3414_v32  ;;  %v11426_v46 = vld [vmem:[#allocation10 + $0x328] sm:$0xf0]  ;;  %v3439_v49 = vpop.f32.mrf.mxu3  ;;  %v3415_v57 = vpop.f32.mrf.mxu1  ;;  %v8988_v32 = vld [vmem:[#allocation10 + $0x758] sm:$0xf]  ;;  %v11585_v59 = vld [vmem:[#allocation10 + $0x820] sm:$0xf0] }
 0x172   : > { %3678 = vmatpush.bf16.msrb.mxu2 %v8701_v48  ;;  %v11450_v48 = vld [vmem:[#allocation10 + $0x3e8] sm:$0xf0]  ;;  %v9180_v37 = vld [vmem:[#allocation10 + $0x8d8] sm:$0xf]  ;;  %v11609_v38 = vld [vmem:[#allocation10 + $0x8e0] sm:$0xf0]  ;;  %v8989_v39 = vor.u32 %v11561_v34, %v8988_v32  ;;  %v9085_v40 = vor.u32 %v11585_v59, %v9084_v35 }
 0x173   : > { %3691 = vmatpush.bf16.msrb.mxu3 %v8797_v53  ;;  %v8640_v53 = vld [vmem:[#allocation10 + $0x4a0] sm:$0xf]  ;;  %v12815_v55 = vadd.f32 %v3439_v49, %v3427_v42  ;;  %v8545_v62 = vor.u32 %v11450_v48, %v8544_v47  ;;  %v9181_v47 = vor.u32 %v11609_v38, %v9180_v37  ;;  %v11606_v51 = vld [vmem:[#allocation10 + $0x8c8] sm:$0xf0]  ;;  %v11531_v57 = vld [vmem:[#allocation10 + $0x670] sm:$0xf0] }
 0x174   : > { %3653 = vmatpush.bf16.msrb.mxu0 %v8497_v60  ;;  %v11498_v60 = vld [vmem:[#allocation10 + $0x568] sm:$0xf0]  ;;  %v8641_v3 = vor.u32 %v11474_v54, %v8640_v53  ;;  %v8880_v42 = vld [vmem:[#allocation10 + $0x680] sm:$0xf]  ;;  %v8868_v54 = vld [vmem:[#allocation10 + $0x668] sm:$0xf] }
 0x175   : > { %3666 = vmatpush.bf16.msrb.mxu1 %v8593_v61  ;;  %v8449_v61 = vor.u32 %v11426_v46, %v8448_v44  ;;  %v8737_v25 = vor.u32 %v11498_v60, %v8736_v58  ;;  %v11558_v44 = vld [vmem:[#allocation10 + $0x748] sm:$0xf0]  ;;  %v9168_v49 = vld [vmem:[#allocation10 + $0x8c0] sm:$0xf]  ;;  %v11555_v58 = vld [vmem:[#allocation10 + $0x730] sm:$0xf0] }
 0x176   : > { %3679 = vmatpush.bf16.msrb.mxu2 %v8689_v63  ;;  %v8436_v63 = vld [vmem:[#allocation10 + $0x308] sm:$0xf]  ;;  %v11582_v46 = vld [vmem:[#allocation10 + $0x808] sm:$0xf0]  ;;  %v9048_v30 = vld [vmem:[#allocation10 + $0x7d0] sm:$0xf] }
 0x177   : > { %3692 = vmatpush.bf16.msrb.mxu3 %v8785_v24  ;;  %v11447_v24 = vld [vmem:[#allocation10 + $0x3d0] sm:$0xf0]  ;;  %v8437_v16 = vor.u32 %v11423_v0, %v8436_v63  ;;  %v9060_v60 = vld [vmem:[#allocation10 + $0x7e8] sm:$0xf]  ;;  %v11576_v10 = vld [vmem:[#allocation10 + $0x7d8] sm:$0xf0] }
 0x178   : > { %3654 = vmatpush.bf16.msrb.mxu0 %v8485_v11  ;;  %v9000_v11 = vld [vmem:[#allocation10 + $0x770] sm:$0xf]  ;;  %v8533_v26 = vor.u32 %v11447_v24, %v8532_v2  ;;  %v9156_v63 = vld [vmem:[#allocation10 + $0x8a8] sm:$0xf]  ;;  %v11597_v32 = vld [vmem:[#allocation10 + $0x880] sm:$0xf0] }
 0x179   : > { %3667 = vmatpush.bf16.msrb.mxu1 %v8581_v12  ;;  %v3428_v12 = vpop.f32.mrf.mxu2  ;;  %v3441_v23 = vpop.f32.mrf.mxu3  ;;  %v9001_v27 = vor.u32 %v11564_v13, %v9000_v11  ;;  %v8856_v24 = vld [vmem:[#allocation10 + $0x650] sm:$0xf]  ;;  %v8832_v59 = vld [vmem:[#allocation10 + $0x620] sm:$0xf]  ;;  %v11546_v38 = vld [vmem:[#allocation10 + $0x6e8] sm:$0xf0] }
 0x17a   : > { %3680 = vmatpush.bf16.msrb.mxu2 %v8677_v14  ;;  %v9096_v14 = vld [vmem:[#allocation10 + $0x830] sm:$0xf] }
 0x17b   : > { %3693 = vmatpush.bf16.msrb.mxu3 %v8773_v19  ;;  %v8629_v19 = vor.u32 %v11471_v8, %v8628_v7  ;;  %v11528_v7 = vld [vmem:[#allocation10 + $0x658] sm:$0xf0]  ;;  %v8952_v8 = vld [vmem:[#allocation10 + $0x710] sm:$0xf] }
 0x17c   : > { %3655 = vmatpush.bf16.msrb.mxu0 %v8473_v28  ;;  %v9097_v28 = vor.u32 %v11588_v15, %v9096_v14  ;;  %v8857_v14 = vor.u32 %v11528_v7, %v8856_v24  ;;  %v9144_v15 = vld [vmem:[#allocation10 + $0x890] sm:$0xf] }
 0x17d   : > { %3668 = vmatpush.bf16.msrb.mxu1 %v8569_v29  ;;  %v8892_v29 = vld [vmem:[#allocation10 + $0x698] sm:$0xf] }
 0x17e   : > { %3681 = vmatpush.bf16.msrb.mxu2 %v8665_v33  ;;  %v8725_v33 = vor.u32 %v11495_v18, %v8724_v17  ;;  %v8893_v36 = vor.u32 %v11537_v31, %v8892_v29  ;;  %v9049_v17 = vor.u32 %v11576_v10, %v9048_v30  ;;  %v8844_v18 = vld [vmem:[#allocation10 + $0x638] sm:$0xf]  ;;  %v11708_v30 = vld [vmem:[#allocation10 + $0xbf8] sm:$0xf0] }
 0x17f   : > { %3694 = vmatpush.bf16.msrb.mxu3 %v8761_v56  ;;  %v9193_v56 = vor.u32 %v11612_v22, %v9192_v21  ;;  %v11549_v21 = vld [vmem:[#allocation10 + $0x700] sm:$0xf0]  ;;  %v9132_v31 = vld [vmem:[#allocation10 + $0x878] sm:$0xf] }
 0x180   : > { %3656 = vmatpush.bf16.msrb.mxu0 %v8461_v41  ;;  %v11534_v41 = vld [vmem:[#allocation10 + $0x688] sm:$0xf0]  ;;  %v11573_v22 = vld [vmem:[#allocation10 + $0x7c0] sm:$0xf0] }
 0x181   : > { %3669 = vmatpush.bf16.msrb.mxu1 %v8557_v43  ;;  %v8976_v43 = vld [vmem:[#allocation10 + $0x740] sm:$0xf]  ;;  %v8881_v48 = vor.u32 %v11534_v41, %v8880_v42  ;;  %v9133_v41 = vor.u32 %v11597_v32, %v9132_v31  ;;  %v12279_v31 = vld [vmem:[#allocation1 + $0x12] sm:$0xff]  ;;  %v11654_v32 = vld [vmem:[#allocation10 + $0xa48] sm:$0xf0] }
 0x182   : > { %3682 = vmatpush.bf16.msrb.mxu2 %v8653_v45  ;;  %v9072_v45 = vld [vmem:[#allocation10 + $0x800] sm:$0xf] }
 0x183   : > { %3695 = vmatpush.bf16.msrb.mxu3 %v8749_v52  ;;  %v8977_v52 = vor.u32 %v11558_v44, %v8976_v43  ;;  %v9073_v53 = vor.u32 %v11582_v46, %v9072_v45  ;;  %v9120_v44 = vld [vmem:[#allocation10 + $0x860] sm:$0xf]  ;;  %v11594_v46 = vld [vmem:[#allocation10 + $0x868] sm:$0xf0] }
 0x184   : > { %3657 = vmatpush.bf16.msrb.mxu0 %v8449_v61  ;;  %v11579_v61 = vld [vmem:[#allocation10 + $0x7f0] sm:$0xf0] }
 0x185   : > { %3670 = vmatpush.bf16.msrb.mxu1 %v8545_v62  ;;  %v8869_v62 = vor.u32 %v11531_v57, %v8868_v54  ;;  %v9012_v54 = vld [vmem:[#allocation10 + $0x788] sm:$0xf]  ;;  %v11567_v57 = vld [vmem:[#allocation10 + $0x790] sm:$0xf0] }
 0x186   : > { %3683 = vmatpush.bf16.msrb.mxu2 %v8641_v3  ;;  %v9061_v3 = vor.u32 %v11579_v61, %v9060_v60  ;;  %v9121_v60 = vor.u32 %v11594_v46, %v9120_v44  ;;  %v9384_v61 = vld [vmem:[#allocation10 + $0xa70] sm:$0xf]  ;;  %v9013_v7 = vor.u32 %v11567_v57, %v9012_v54  ;;  %v9348_v44 = vld [vmem:[#allocation10 + $0xa28] sm:$0xf] }
 0x187   : > { %3696 = vmatpush.bf16.msrb.mxu3 %v8737_v25  ;;  %v9444_v46 = vld [vmem:[#allocation10 + $0xae8] sm:$0xf] }
 0x188   : > { %3658 = vmatpush.bf16.msrb.mxu0 %v8437_v16  ;;  %v3452_v0 = vpop.f32.mrf.mxu0  ;;  %v11600_v16 = vld [vmem:[#allocation10 + $0x898] sm:$0xf0] }
 0x189   : > { %3671 = vmatpush.bf16.msrb.mxu1 %v8533_v26  ;;  %v3453_v25 = vadd.f32 %v3452_v0, %v12815_v55  ;;  %v3465_v11 = vpop.f32.mrf.mxu1  ;;  %v9036_v55 = vld [vmem:[#allocation10 + $0x7b8] sm:$0xf]  ;;  %v9145_v23 = vor.u32 %v11600_v16, %v9144_v15  ;;  %v11684_v0 = vld [vmem:[#allocation10 + $0xb38] sm:$0xf0]  ;;  %v11657_v16 = vld [vmem:[#allocation10 + $0xa60] sm:$0xf0] }
 0x18a   : > { %3684 = vmatpush.bf16.msrb.mxu2 %v8629_v19  ;;  %v11525_v19 = vld [vmem:[#allocation10 + $0x640] sm:$0xf0]  ;;  %v9037_v35 = vor.u32 %v11573_v22, %v9036_v55  ;;  %v9372_v15 = vld [vmem:[#allocation10 + $0xa58] sm:$0xf] }
 0x18b   : > { %3697 = vmatpush.bf16.msrb.mxu3 %v8725_v33  ;;  %3659 = vmatmul.bf16.vlgmr.msrb.gmra.mxu0 %v12782_v4  ;;  %v8964_v4 = vld [vmem:[#allocation10 + $0x728] sm:$0xf]  ;;  %v3466_v13 = vadd.f32 %v3465_v11, %v3453_v25  ;;  %v9373_v55 = vor.u32 %v11657_v16, %v9372_v15 }
 0x18c   : > { %3703 = vmatpush.bf16.msra.mxu0 %v8905_v20  ;;  %3672 = vmatmul.bf16.vlgmr.msrb.gmra.mxu1 %v12786_v6  ;;  %v11603_v6 = vld [vmem:[#allocation10 + $0x8b0] sm:$0xf0]  ;;  %v8965_v2 = vor.u32 %v11555_v58, %v8964_v4  ;;  %v8940_v20 = vld [vmem:[#allocation10 + $0x6f8] sm:$0xf]  ;;  %v9288_v4 = vld [vmem:[#allocation10 + $0x9b0] sm:$0xf] }
 0x18d   : > { %3716 = vmatpush.bf16.msra.mxu1 %v9001_v27  ;;  %3685 = vmatmul.bf16.vlgmr.msrb.gmra.mxu2 %v12777_v1  ;;  %v9169_v1 = vor.u32 %v11606_v51, %v9168_v49  ;;  %v9157_v12 = vor.u32 %v11603_v6, %v9156_v63  ;;  %v8941_v34 = vor.u32 %v11549_v21, %v8940_v20  ;;  %v11636_v58 = vld [vmem:[#allocation10 + $0x9b8] sm:$0xf0]  ;;  %v9564_v20 = vld [vmem:[#allocation10 + $0xbd8] sm:$0xf]  ;;  %v11705_v21 = vld [vmem:[#allocation10 + $0xbe0] sm:$0xf0] }
 0x18e   : > { %3729 = vmatpush.bf16.msra.mxu2 %v9097_v28  ;;  %3698 = vmatmul.bf16.vlgmr.msrb.gmra.mxu3 %v12784_v5  ;;  %v11552_v5 = vld [vmem:[#allocation10 + $0x718] sm:$0xf0]  ;;  %v8845_v28 = vor.u32 %v11525_v19, %v8844_v18 }
 0x18f   : > { %3742 = vmatpush.bf16.msra.mxu3 %v9193_v56  ;;  %v8953_v26 = vor.u32 %v11552_v5, %v8952_v8  ;;  %v11522_v56 = vld [vmem:[#allocation10 + $0x628] sm:$0xf0]  ;;  %v9289_v8 = vor.u32 %v11636_v58, %v9288_v4  ;;  %v9576_v5 = vld [vmem:[#allocation10 + $0xbf0] sm:$0xf] }
 0x190   : > { %3704 = vmatpush.bf16.msra.mxu0 %v8893_v36  ;;  %v3478_v27 = vpop.f32.mrf.mxu2  ;;  %v3454_v33 = vpop.f32.mrf.mxu0  ;;  %v8928_v36 = vld [vmem:[#allocation10 + $0x6e0] sm:$0xf]  ;;  %v8833_v45 = vor.u32 %v11522_v56, %v8832_v59  ;;  %v9577_v18 = vor.u32 %v11708_v30, %v9576_v5  ;;  %v9565_v59 = vor.u32 %v11705_v21, %v9564_v20  ;;  %v11621_v5 = vld [vmem:[#allocation10 + $0x940] sm:$0xf0]  ;;  %v9324_v30 = vld [vmem:[#allocation10 + $0x9f8] sm:$0xf] }
 0x191   : > { %3717 = vmatpush.bf16.msra.mxu1 %v8989_v39  ;;  %v3479_v29 = vadd.f32 %v3478_v27, %v3466_v13  ;;  %v3491_v37 = vpop.f32.mrf.mxu3  ;;  %v9024_v39 = vld [vmem:[#allocation10 + $0x7a0] sm:$0xf]  ;;  %v3467_v42 = vpop.f32.mrf.mxu1  ;;  %v8929_v49 = vor.u32 %v11546_v38, %v8928_v36  ;;  %v9276_v13 = vld [vmem:[#allocation10 + $0x998] sm:$0xf]  ;;  %v11630_v27 = vld [vmem:[#allocation10 + $0x988] sm:$0xf0] }
 0x192   : > { %3730 = vmatpush.bf16.msra.mxu2 %v9085_v40  ;;  %v11570_v40 = vld [vmem:[#allocation10 + $0x7a8] sm:$0xf0]  ;;  %v9456_v33 = vld [vmem:[#allocation10 + $0xb00] sm:$0xf]  ;;  %v9252_v42 = vld [vmem:[#allocation10 + $0x968] sm:$0xf] }
 0x193   : > { %3743 = vmatpush.bf16.msra.mxu3 %v9181_v47  ;;  %v12822_v43 = vadd.f32 %v3491_v37, %v3479_v29  ;;  %v8820_v47 = vld [vmem:[#allocation10 + $0x608] sm:$0xf]  ;;  %v9025_v51 = vor.u32 %v11570_v40, %v9024_v39  ;;  %v12281_v56 = vld [vmem:[#allocation1 + $0x1b] sm:$0xff]  ;;  %v11702_v38 = vld [vmem:[#allocation10 + $0xbc8] sm:$0xf0] }
 0x194   : > { %3705 = vmatpush.bf16.msra.mxu0 %v8881_v48  ;;  %v11519_v48 = vld [vmem:[#allocation10 + $0x610] sm:$0xf0]  ;;  %v12278_v29 = vld [vmem:[#allocation1] sm:$0xff]  ;;  %v9552_v37 = vld [vmem:[#allocation10 + $0xbc0] sm:$0xf] }
 0x195   : > { %3718 = vmatpush.bf16.msra.mxu1 %v8977_v52  ;;  %v8916_v52 = vld [vmem:[#allocation10 + $0x6c8] sm:$0xf]  ;;  %v8821_v6 = vor.u32 %v11519_v48, %v8820_v47  ;;  %v11675_v47 = vld [vmem:[#allocation10 + $0xaf0] sm:$0xf0]  ;;  %v9553_v48 = vor.u32 %v11702_v38, %v9552_v37 }
 0x196   : > { %3731 = vmatpush.bf16.msra.mxu2 %v9073_v53  ;;  %v11543_v53 = vld [vmem:[#allocation10 + $0x6d0] sm:$0xf0]  ;;  %v9445_v4 = vor.u32 %v11675_v47, %v9444_v46  ;;  %v11710_v47 = vld [vmem:[%s13927_s1 + $0x8] sm:$0x10] }
 0x197   : > { %3744 = vmatpush.bf16.msra.mxu3 %v9169_v1  ;;  %v11660_v1 = vld [vmem:[#allocation10 + $0xa78] sm:$0xf0]  ;;  %v8917_v24 = vor.u32 %v11543_v53, %v8916_v52  ;;  %v9540_v52 = vld [vmem:[#allocation10 + $0xba8] sm:$0xf]  ;;  %v11699_v53 = vld [vmem:[#allocation10 + $0xbb0] sm:$0xf0] }
 0x198   : > { %3706 = vmatpush.bf16.msra.mxu0 %v8869_v62  ;;  %v9480_v62 = vld [vmem:[#allocation10 + $0xb30] sm:$0xf]  ;;  %v3480_v63 = vpop.f32.mrf.mxu2  ;;  %v9385_v25 = vor.u32 %v11660_v1, %v9384_v61  ;;  %v11624_v61 = vld [vmem:[#allocation10 + $0x958] sm:$0xf0]  ;;  %v11615_v38 = vld [vmem:[#allocation10 + $0x910] sm:$0xf0] }
 0x199   : > { %3719 = vmatpush.bf16.msra.mxu1 %v8965_v2  ;;  %v9108_v2 = vld [vmem:[#allocation10 + $0x848] sm:$0xf]  ;;  %v3493_v10 = vpop.f32.mrf.mxu3  ;;  %v9481_v11 = vor.u32 %v11684_v0, %v9480_v62  ;;  %v9336_v1 = vld [vmem:[#allocation10 + $0xa10] sm:$0xf]  ;;  %v11648_v62 = vld [vmem:[#allocation10 + $0xa18] sm:$0xf0] }
 0x19a   : > { %3732 = vmatpush.bf16.msra.mxu2 %v9061_v3  ;;  %v11591_v3 = vld [vmem:[#allocation10 + $0x850] sm:$0xf0]  ;;  %v9432_v63 = vld [vmem:[#allocation10 + $0xad0] sm:$0xf] }
 0x19b   : > { %3745 = vmatpush.bf16.msra.mxu3 %v9157_v12  ;;  %v9109_v12 = vor.u32 %v11591_v3, %v9108_v2  ;;  %v9541_v2 = vor.u32 %v11699_v53, %v9540_v52  ;;  %v9492_v52 = vld [vmem:[#allocation10 + $0xb48] sm:$0xf]  ;;  %v11687_v53 = vld [vmem:[#allocation10 + $0xb50] sm:$0xf0] }
 0x19c   : > { %3707 = vmatpush.bf16.msra.mxu0 %v8857_v14  ;;  %v11633_v14 = vld [vmem:[#allocation10 + $0x9a0] sm:$0xf0] }
 0x19d   : > { %3720 = vmatpush.bf16.msra.mxu1 %v8953_v26  ;;  %v9468_v26 = vld [vmem:[#allocation10 + $0xb18] sm:$0xf]  ;;  %v9277_v19 = vor.u32 %v11633_v14, %v9276_v13  ;;  %v11669_v13 = vld [vmem:[#allocation10 + $0xac0] sm:$0xf0] }
 0x19e   : > { %3733 = vmatpush.bf16.msra.mxu2 %v9049_v17  ;;  %v11681_v17 = vld [vmem:[#allocation10 + $0xb20] sm:$0xf0] }
 0x19f   : > { %3746 = vmatpush.bf16.msra.mxu3 %v9145_v23  ;;  %v9469_v22 = vor.u32 %v11681_v17, %v9468_v26  ;;  %v9264_v23 = vld [vmem:[#allocation10 + $0x980] sm:$0xf]  ;;  %v9516_v17 = vld [vmem:[#allocation10 + $0xb78] sm:$0xf] }
 0x1a0   : > { %3708 = vmatpush.bf16.msra.mxu0 %v8845_v28  ;;  %v9360_v28 = vld [vmem:[#allocation10 + $0xa40] sm:$0xf]  ;;  %v9265_v36 = vor.u32 %v11630_v27, %v9264_v23  ;;  %v11618_v23 = vld [vmem:[#allocation10 + $0x928] sm:$0xf0] }
 0x1a1   : > { %3721 = vmatpush.bf16.msra.mxu1 %v8941_v34  ;;  %v11678_v34 = vld [vmem:[#allocation10 + $0xb08] sm:$0xf0]  ;;  %v9361_v39 = vor.u32 %v11654_v32, %v9360_v28  ;;  %v9312_v27 = vld [vmem:[#allocation10 + $0x9e0] sm:$0xf] }
 0x1a2   : > { %3734 = vmatpush.bf16.msra.mxu2 %v9037_v35  ;;  %v12280_v35 = vld [vmem:[#allocation1 + $0x9] sm:$0xff]  ;;  %v9457_v40 = vor.u32 %v11678_v34, %v9456_v33 }
 0x1a3   : > { %3747 = vmatpush.bf16.msra.mxu3 %v9133_v41  ;;  %v11627_v41 = vld [vmem:[#allocation10 + $0x970] sm:$0xf0]  ;;  %v11666_v32 = vld [vmem:[#allocation10 + $0xaa8] sm:$0xf0] }
 0x1a4   : > { %3709 = vmatpush.bf16.msra.mxu0 %v8833_v45  ;;  %v11651_v45 = vld [vmem:[#allocation10 + $0xa30] sm:$0xf0] }
 0x1a5   : > { %3722 = vmatpush.bf16.msra.mxu1 %v8929_v49  ;;  %v9349_v57 = vor.u32 %v11651_v45, %v9348_v44  ;;  %v9584_v44 = vld [vmem:[%s13927_s1 + $0x8] sm:$0xf] }
 0x1a6   : > { %3735 = vmatpush.bf16.msra.mxu2 %v9025_v51  ;;  %v9253_v51 = vor.u32 %v11627_v41, %v9252_v42  ;;  %v9396_v42 = vld [vmem:[#allocation10 + $0xa88] sm:$0xf]  ;;  %v11663_v41 = vld [vmem:[#allocation10 + $0xa90] sm:$0xf0] }
 0x1a7   : > { %3748 = vmatpush.bf16.msra.mxu3 %v9121_v60  ;;  %v9240_v60 = vld [vmem:[#allocation10 + $0x950] sm:$0xf] }
 0x1a8   : > { %3710 = vmatpush.bf16.msra.mxu0 %v8821_v6  ;;  %v3504_v49 = vpop.f32.mrf.mxu0  ;;  %v11672_v6 = vld [vmem:[#allocation10 + $0xad8] sm:$0xf0]  ;;  %v9241_v3 = vor.u32 %v11624_v61, %v9240_v60  ;;  %v9493_v61 = vor.u32 %v11687_v53, %v9492_v52 }
 0x1a9   : > { %3723 = vmatpush.bf16.msra.mxu1 %v8917_v24  ;;  %v3505_v54 = vadd.f32 %v3504_v49, %v12822_v43  ;;  %v3517_v58 = vpop.f32.mrf.mxu1  ;;  %v9528_v24 = vld [vmem:[#allocation10 + $0xb90] sm:$0xf]  ;;  %v9433_v43 = vor.u32 %v11672_v6, %v9432_v63  ;;  %v11712_v49 = vld [vmem:[%s13927_s1 + $0x18] sm:$0x10]  ;;  %v12285_v6 = vld [vmem:[#allocation1 + $0x3f] sm:$0xff] }
 0x1aa   : > { %3736 = vmatpush.bf16.msra.mxu2 %v9013_v7  ;;  %v11696_v7 = vld [vmem:[#allocation10 + $0xb98] sm:$0xf0] }
 0x1ab   : > { %3749 = vmatpush.bf16.msra.mxu3 %v9109_v12  ;;  %3711 = vmatmul.bf16.vlgmr.msra.gmra.mxu0 %v12278_v29  ;;  %v3518_v0 = vadd.f32 %v3517_v58, %v3505_v54  ;;  %v9420_v12 = vld [vmem:[#allocation10 + $0xab8] sm:$0xf]  ;;  %v9529_v15 = vor.u32 %v11696_v7, %v9528_v24  ;;  %v11642_v29 = vld [vmem:[#allocation10 + $0x9e8] sm:$0xf0]  ;;  %v9585_v58 = vor.u32 %v11710_v47, %v9584_v44 }
 0x1ac   : > { %3755 = vmatpush.bf16.msrb.mxu0 %v9289_v8  ;;  %3724 = vmatmul.bf16.vlgmr.msra.gmra.mxu1 %v12280_v35  ;;  %v9337_v8 = vor.u32 %v11648_v62, %v9336_v1  ;;  %v9504_v35 = vld [vmem:[#allocation10 + $0xb60] sm:$0xf]  ;;  %v12282_v1 = vld [vmem:[#allocation1 + $0x24] sm:$0xff]  ;;  %v12283_v62 = vld [vmem:[#allocation1 + $0x2d] sm:$0xff] }
 0x1ad   : > { %3768 = vmatpush.bf16.msrb.mxu1 %v9385_v25  ;;  %3737 = vmatmul.bf16.vlgmr.msra.gmra.mxu2 %v12279_v31  ;;  %v9228_v25 = vld [vmem:[#allocation10 + $0x938] sm:$0xf]  ;;  %v9408_v31 = vld [vmem:[#allocation10 + $0xaa0] sm:$0xf] }
 0x1ae   : > { %3781 = vmatpush.bf16.msrb.mxu2 %v9481_v11  ;;  %3750 = vmatmul.bf16.vlgmr.msra.gmra.mxu3 %v12281_v56  ;;  %v11645_v11 = vld [vmem:[#allocation10 + $0xa00] sm:$0xf0]  ;;  %v9229_v26 = vor.u32 %v11621_v5, %v9228_v25  ;;  %v9204_v56 = vld [vmem:[#allocation10 + $0x908] sm:$0xf]  ;;  %v9409_v37 = vor.u32 %v11666_v32, %v9408_v31  ;;  %v12284_v63 = vld [vmem:[#allocation1 + $0x36] sm:$0xff] }
 0x1af   : > { %3794 = vmatpush.bf16.msrb.mxu3 %v9577_v18  ;;  %v11693_v18 = vld [vmem:[#allocation10 + $0xb80] sm:$0xf0]  ;;  %v9325_v21 = vor.u32 %v11645_v11, %v9324_v30  ;;  %v3822_v30 = vld [vmem:[%s13926_s0 + $0x4] sm:$0xf] }
 0x1b0   : > { %3756 = vmatpush.bf16.msrb.mxu0 %v9277_v19  ;;  %v3530_v10 = vpop.f32.mrf.mxu2  ;;  %v3506_v19 = vpop.f32.mrf.mxu0  ;;  %v9517_v33 = vor.u32 %v11693_v18, %v9516_v17  ;;  %v3821_v25 = vld [vmem:[%s13926_s0] sm:$0xf] }
 0x1b1   : > { %3769 = vmatpush.bf16.msrb.mxu1 %v9373_v55  ;;  %v3531_v14 = vadd.f32 %v3530_v10, %v3518_v0  ;;  %v3543_v16 = vpop.f32.mrf.mxu3  ;;  %v9421_v55 = vor.u32 %v11669_v13, %v9420_v12  ;;  %v3519_v28 = vpop.f32.mrf.mxu1  ;;  %v11709_v0 = vld [vmem:[%s13927_s1] sm:$0xff]  ;;  %v1095_v19 = vperm.slane %v12812_v9, 2 }
 0x1b2   : > { %3782 = vmatpush.bf16.msrb.mxu2 %v9469_v22  ;;  %v9216_v22 = vld [vmem:[#allocation10 + $0x920] sm:$0xf] }
 0x1b3   : > { %3795 = vmatpush.bf16.msrb.mxu3 %v9565_v59  ;;  %v12825_v20 = vadd.f32 %v3543_v16, %v3531_v14  ;;  %v9217_v34 = vor.u32 %v11618_v23, %v9216_v22  ;;  %v11690_v59 = vld [vmem:[#allocation10 + $0xb68] sm:$0xf0] }
 0x1b4   : > { %3757 = vmatpush.bf16.msrb.mxu0 %v9265_v36  ;;  %v9313_v36 = vor.u32 %v11642_v29, %v9312_v27  ;;  %v9505_v46 = vor.u32 %v11690_v59, %v9504_v35 }
 0x1b5   : > { %3770 = vmatpush.bf16.msrb.mxu1 %v9361_v39  ;;  %v9300_v39 = vld [vmem:[#allocation10 + $0x9c8] sm:$0xf] }
 0x1b6   : > { %3783 = vmatpush.bf16.msrb.mxu2 %v9457_v40  ;;  %v11639_v40 = vld [vmem:[#allocation10 + $0x9d0] sm:$0xf0] }
 0x1b7   : > { %3796 = vmatpush.bf16.msrb.mxu3 %v9553_v48  ;;  %v9592_v48 = vld [vmem:[%s13927_s1 + $0x18] sm:$0xf] }
 0x1b8   : > { %3758 = vmatpush.bf16.msrb.mxu0 %v9253_v51  ;;  %v3532_v45 = vpop.f32.mrf.mxu2  ;;  %v9205_v51 = vor.u32 %v11615_v38, %v9204_v56  ;;  %v9593_v60 = vor.u32 %v11712_v49, %v9592_v48 }
 0x1b9   : > { %3771 = vmatpush.bf16.msrb.mxu1 %v9349_v57  ;;  %v3545_v54 = vpop.f32.mrf.mxu3  ;;  %v9301_v57 = vor.u32 %v11639_v40, %v9300_v39 }
 0x1ba   : > { %3784 = vmatpush.bf16.msrb.mxu2 %v9445_v4  ;;  %v9397_v4 = vor.u32 %v11663_v41, %v9396_v42 }
 0x1bb   : > { %3797 = vmatpush.bf16.msrb.mxu3 %v9541_v2  ;;  %v11711_v2 = vld [vmem:[%s13927_s1 + $0x10] sm:$0xff] }
 0x1bc   : > { %3759 = vmatpush.bf16.msrb.mxu0 %v9241_v3 }
 0x1bd   : > { %3772 = vmatpush.bf16.msrb.mxu1 %v9337_v8 }
 0x1be   : > { %3785 = vmatpush.bf16.msrb.mxu2 %v9433_v43 }
 0x1bf   : > { %3798 = vmatpush.bf16.msrb.mxu3 %v9529_v15  ;;  %v3807_v15 = vmax.f32 %v12806_v50, 0.0 }
 0x1c0   : > { %3760 = vmatpush.bf16.msrb.mxu0 %v9229_v26 }
 0x1c1   : > { %3773 = vmatpush.bf16.msrb.mxu1 %v9325_v21 }
 0x1c2   : > { %3786 = vmatpush.bf16.msrb.mxu2 %v9421_v55 }
 0x1c3   : > { %3799 = vmatpush.bf16.msrb.mxu3 %v9517_v33 }
 0x1c4   : > { %3761 = vmatpush.bf16.msrb.mxu0 %v9217_v34 }
 0x1c5   : > { %3774 = vmatpush.bf16.msrb.mxu1 %v9313_v36 }
 0x1c6   : > { %3787 = vmatpush.bf16.msrb.mxu2 %v9409_v37 }
 0x1c7   : > { %3800 = vmatpush.bf16.msrb.mxu3 %v9505_v46 }
 0x1c8   : > { %3762 = vmatpush.bf16.msrb.mxu0 %v9205_v51  ;;  %v3556_v3 = vpop.f32.mrf.mxu0 }
 0x1c9   : > { %3775 = vmatpush.bf16.msrb.mxu1 %v9301_v57  ;;  %v3557_v24 = vadd.f32 %v3556_v3, %v12825_v20  ;;  %v3569_v7 = vpop.f32.mrf.mxu1 }
 0x1ca   : > { %3788 = vmatpush.bf16.msrb.mxu2 %v9397_v4 }
 0x1cb   : > { %3801 = vmatpush.bf16.msrb.mxu3 %v9493_v61  ;;  %3763 = vmatmul.bf16.vlgmr.msrb.gmra.mxu0 %v12282_v1  ;;  %v3570_v8 = vadd.f32 %v3569_v7, %v3557_v24  ;;  %v12542_v1 = vmov 8.0  }
 0x1cc   : > { %3849 = vmatpush.bf16.xpose.msra.mxu0 %v9585_v58  ;;  %3776 = vmatmul.bf16.vlgmr.msrb.gmra.mxu1 %v12283_v62  ;;  %12249 = vrcp.f32 %v12542_v1 }
 0x1cd   : > { %3874 = vmatpush.bf16.xpose.msra.mxu1 %v9593_v60  ;;  %3789 = vmatmul.bf16.vlgmr.msrb.gmra.mxu2 %v12284_v63 }
 0x1ce   : > { %3802 = vmatmul.bf16.vlgmr.msrb.gmra.mxu3 %v12285_v6 }
 0x1d0   : > { %v3582_v43 = vpop.f32.mrf.mxu2  ;;  %v3558_v11 = vpop.f32.mrf.mxu0 }
 0x1d1   : > { %v3583_v5 = vadd.f32 %v3582_v43, %v3570_v8  ;;  %v3595_v10 = vpop.f32.mrf.mxu3  ;;  %v3571_v13 = vpop.f32.mrf.mxu1 }
 0x1d2   : > { %v12250_v24 = vpop.eup %12249 }
 0x1d3   : > { %v3596_v12 = vadd.f32 %v3595_v10, %v3583_v5  ;;  %v3947_v43 = vmul.f32 8.0, %v12250_v24  ;;  %vm3951_vm3 = vweird.f32 %v12250_v24 }
 0x1d4   : > { %3850 = vmatpush.bf16.xpose.msra.mxu0 %v11709_v0 }
 0x1d5   : > { %3875 = vmatpush.bf16.xpose.msra.mxu1 %v11711_v2  ;;  %v3808_v14 = vmax.f32 %v3596_v12, 0.0  ;;  %v3948_v13 = vsub.f32 1.0, %v3947_v43 }
 0x1d7   : > { %v3813_v16 = vrot.slane %v3808_v14, 6 }
 0x1d8   : > { %v3584_v26 = vpop.f32.mrf.mxu2 }
 0x1d9   : > { %v3816_v17 = vsel %vm3815_vm0, %v3807_v15, %v3813_v16  ;;  %v3597_v18 = vpop.f32.mrf.mxu3 }
 0x1db   : > { %3851 = vmatmul.bf16.vlgmr.msra.gmra.mxu0 %v3821_v25 }
 0x1dc   : > { %3876 = vmatmul.bf16.vlgmr.msra.gmra.mxu1 %v3822_v30 }
 0x1e8   : > { %v3608_v20 = vpop.f32.mrf.mxu0 }
 0x1e9   : > { %v3621_v21 = vpop.f32.mrf.mxu1  ;;  %v3609_v55 = vadd.f32 %v3608_v20, %v1095_v19 }
 0x1eb   : > { %v3622_v22 = vadd.f32 %v3621_v21, %v3609_v55  ;;  %v3949_v21 = vmul.f32 %v12250_v24, %v3948_v13 }
 0x1f0   : > { %v3634_v23 = vpop.f32.mrf.mxu2  ;;  %v3610_v29 = vpop.f32.mrf.mxu0 }
 0x1f1   : > { %v3635_v27 = vadd.f32 %v3634_v23, %v3622_v22  ;;  %v3647_v28 = vpop.f32.mrf.mxu3  ;;  %v3623_v32 = vpop.f32.mrf.mxu1 }
 0x1f3   : > { %v3648_v31 = vadd.f32 %v3647_v28, %v3635_v27 }
 0x1f8   : > { %v3636_v33 = vpop.f32.mrf.mxu2 }
 0x1f9   : > { %v3649_v34 = vpop.f32.mrf.mxu3 }
 0x208   : > { %v3660_v35 = vpop.f32.mrf.mxu0 }
 0x209   : > { %v3673_v50 = vpop.f32.mrf.mxu1  ;;  %v3661_v42 = vadd.f32 %v3660_v35, %v3648_v31  ;;  %v3950_v31 = vadd.f32 %v12250_v24, %v3949_v21 }
 0x20b   : > { %v3674_v46 = vadd.f32 %v3673_v50, %v3661_v42  ;;  %v12858_v50 = vsel %vm3951_vm3, %v12250_v24, %v3950_v31 }
 0x210   : > { %v3686_v59 = vpop.f32.mrf.mxu2  ;;  %v3662_v56 = vpop.f32.mrf.mxu0 }
 0x211   : > { %v3699_v36 = vpop.f32.mrf.mxu3  ;;  %v3675_v37 = vpop.f32.mrf.mxu1  ;;  %v3687_v48 = vadd.f32 %v3686_v59, %v3674_v46 }
 0x213   : > { %v3700_v52 = vadd.f32 %v3699_v36, %v3687_v48 }
 0x218   : > { %v3688_v38 = vpop.f32.mrf.mxu2 }
 0x219   : > { %v3701_v9 = vpop.f32.mrf.mxu3 }
 0x228   : > { %v3712_v39 = vpop.f32.mrf.mxu0 }
 0x229   : > { %v3725_v40 = vpop.f32.mrf.mxu1  ;;  %v3713_v53 = vadd.f32 %v3712_v39, %v3700_v52 }
 0x22b   : > { %v3726_v54 = vadd.f32 %v3725_v40, %v3713_v53 }
 0x230   : > { %v3738_v41 = vpop.f32.mrf.mxu2  ;;  %v3714_v45 = vpop.f32.mrf.mxu0 }
 0x231   : > { %v3751_v44 = vpop.f32.mrf.mxu3  ;;  %v3727_v47 = vpop.f32.mrf.mxu1  ;;  %v3739_v57 = vadd.f32 %v3738_v41, %v3726_v54 }
 0x233   : > { %v3752_v4 = vadd.f32 %v3751_v44, %v3739_v57 }
 0x238   : > { %v3740_v49 = vpop.f32.mrf.mxu2 }
 0x239   : > { %v3753_v51 = vpop.f32.mrf.mxu3 }
 0x248   : > { %v3764_v58 = vpop.f32.mrf.mxu0 }
 0x249   : > { %v3777_v60 = vpop.f32.mrf.mxu1  ;;  %v3765_v61 = vadd.f32 %v3764_v58, %v3752_v4 }
 0x24b   : > { %v3778_v62 = vadd.f32 %v3777_v60, %v3765_v61 }
 0x250   : > { %v3790_v63 = vpop.f32.mrf.mxu2  ;;  %v3766_v0 = vpop.f32.mrf.mxu0 }
 0x251   : > { %v3791_v6 = vadd.f32 %v3790_v63, %v3778_v62  ;;  %v3779_v2 = vpop.f32.mrf.mxu1  ;;  %v3803_v3 = vpop.f32.mrf.mxu3  ;;  %v12543_v63 = vmov 25.0  }
 0x253   : > { %v3804_v7 = vadd.f32 %v3803_v3, %v3791_v6 }
 0x255   : > { %v3809_v8 = vmax.f32 %v3804_v7, 0.0 }
 0x257   : > { %v3814_v25 = vrot.slane %v3809_v8, 4 }
 0x258   : > { %v3792_v5 = vpop.f32.mrf.mxu2  ;;  %v3852_v10 = vpop.f32.mrf.mxu0 }
 0x259   : > { %v3818_v30 = vsel %vm3817_vm1, %v3816_v17, %v3814_v25  ;;  %v3881_v11 = vmul.f32 14.285714, %v3852_v10  ;;  %v3877_v12 = vpop.f32.mrf.mxu1  ;;  %v3805_v14 = vpop.f32.mrf.mxu3 }
 0x25a   : > { %3820 = vst [vmem:[#allocation3] sm:$0x3f] %v3818_v30  ;;  %v3882_v15 = vmul.f32 14.285714, %v3877_v12 }
 0x25b   : > { %v3932_v16 = vsel %vm3883_vm2, %v3881_v11, 0.0  ;;  %v3884_v26 = vsel %vm3883_vm2, %v3881_v11, -inf }
 0x25c   : > { %v3933_v18 = vrot.slane %v3932_v16, 4  ;;  %v3939_v19 = vsel %vm3883_vm2, %v3882_v15, 0.0  ;;  %3885 = vmax.xlane.f32.xlu0 %v3884_v26  ;;  %v3887_v29 = vsel %vm3883_vm2, %v3882_v15, -inf  ;;  %v12888_v26 = vld [vmem:[%s13928_s2] ss:$0 sm:$0xff] }
 0x25d   : > { %v3940_v20 = vrot.slane %v3939_v19, 4 }
 0x25e   : > { %v3934_v55 = vadd.f32 %v3933_v18, %v3932_v16 }
 0x25f   : > { %v3941_v17 = vadd.f32 %v3940_v20, %v3939_v19 }
 0x260   : > { %v3935_v22 = vrot.slane %v3934_v55, 2  ;;  %v3854_v23 = vpop.f32.mrf.mxu0 }
 0x261   : > { %v3942_v27 = vrot.slane %v3941_v17, 2  ;;  %v3879_v28 = vpop.f32.mrf.mxu1 }
 0x262   : > { %v3936_v32 = vadd.f32 %v3935_v22, %v3934_v55 }
 0x263   : > { %v3943_v33 = vadd.f32 %v3942_v27, %v3941_v17 }
 0x264   : > { %3888 = vmax.xlane.f32.xlu0 %v3887_v29  ;;  %v3937_v34 = vrot.slane %v3936_v32, 1 }
 0x265   : > { %v3944_v35 = vrot.slane %v3943_v33, 1 }
 0x266   : > { %v3938_v59 = vadd.f32 %v3937_v34, %v3936_v32  ;;  %v4031_v34 = vlaneseq }
 0x267   : > { %v3945_v56 = vadd.f32 %v3944_v35, %v3943_v33 }
 0x268   : > { %v3953_v36 = vmul.f32 %v12858_v50, %v3938_v59 }
 0x269   : > { %v3954_v37 = vmul.f32 %v12858_v50, %v3945_v56 }
 0x26b   : > { %v12863_v38 = vsel %vm3957_vm4, %v3954_v37, %v3953_v36 }
 0x26c   : > { %v3961_v9 = vsel %vm3960_vm5, %v12863_v38, -inf  ;;  %4063 = vadd.xlane.f32.xlu0 %v3932_v16  ;;  %v12883_v16 = vld [vmem:[%s13929_s3] ss:$0 sm:$0xff] }
 0x26d   : > { %3962 = vmax.xlane.f32.xlu1 %v3961_v9 }
 0x2cf   : > { %v3886_v39 = vpop.xlane.xlu0 %3885 }
 0x2d0   : > { %v3890_v40 = vsub.f32 %v3881_v11, %v3886_v39 }
 0x2d2   : > { %v3892_v42 = vmul.f32 1.442695, %v3890_v40 }
 0x2d4   : > { %12251 = vpow2.f32 %v3892_v42  ;;  %v12898_v42 = vand.u32 127, %v4031_v34  ;;  %v4106_v34 = vsel %vm3960_vm5, %v12863_v38, 0.0 }
 0x2d7   : > { %v3889_v41 = vpop.xlane.xlu0 %3888 }
 0x2d8   : > { %v3891_v44 = vsub.f32 %v3882_v15, %v3889_v41 }
 0x2da   : > { %v12252_v45 = vpop.eup %12251  ;;  %v3894_v46 = vmul.f32 1.442695, %v3891_v44 }
 0x2db   : > { %v3896_v47 = vsel %vm3883_vm2, %v12252_v45, 0.0 }
 0x2dc   : > { %12253 = vpow2.f32 %v3894_v46  ;;  %3897 = vadd.xlane.f32.xlu1 %v3896_v47 }
 0x2e0   : > { %v3963_v48 = vpop.xlane.xlu1 %3962 }
 0x2e1   : > { %v3965_v49 = vrot.slane %v3963_v48, 1  ;;  %v3968_v51 = vsub.f32 %v3953_v36, %v3963_v48  ;;  %v4064_v36 = vpop.xlane.xlu0 %4063 }
 0x2e2   : > { %v12868_v52 = vpop.eup %12253 }
 0x2e3   : > { %v3969_v53 = vsub.f32 %v3954_v37, %v3965_v49  ;;  %v3899_v54 = vsel %vm3883_vm2, %v12868_v52, 0.0  ;;  %v3970_v57 = vmul.f32 1.442695, %v3968_v51 }
 0x2e4   : > { %4065 = vadd.xlane.f32.xlu1 %v3939_v19  ;;  %3900 = vadd.xlane.f32.xlu2 %v3899_v54 }
 0x2e5   : > { %v3972_v4 = vmul.f32 1.442695, %v3969_v53 }
 0x2e7   : > { %12255 = vpow2.f32 %v3972_v4 }
 0x2e8   : > { %12257 = vpow2.f32 %v3970_v57 }
 0x2e9   : > { %12259 = vrcp.f32 %v12543_v63 }
 0x2ed   : > { %v12872_v58 = vpop.eup %12255 }
 0x2ee   : > { %v3976_v60 = vrot.slane %v12872_v58, 7  ;;  %v12875_v61 = vpop.eup %12257 }
 0x2ef   : > { %v12260_v0 = vpop.eup %12259 }
 0x2f0   : > { %v3977_v1 = vsel %vm3957_vm4, %v3976_v60, %v12875_v61  ;;  %v4068_v3 = vmul.f32 25.0, %v12260_v0  ;;  %vm4072_vm11 = vweird.f32 %v12260_v0 }
 0x2f1   : > { %v3979_v62 = vsel %vm3960_vm5, %v3977_v1, 0.0 }
 0x2f2   : > { %3980 = vadd.xlane.f32.xlu2 %v3979_v62  ;;  %v4069_v43 = vsub.f32 1.0, %v4068_v3 }
 0x2f4   : > { %v4070_v12 = vmul.f32 %v12260_v0, %v4069_v43 }
 0x2f6   : > { %v4071_v21 = vadd.f32 %v12260_v0, %v4070_v12 }
 0x2f8   : > { %v12894_v56 = vsel %vm4072_vm11, %v12260_v0, %v4071_v21  ;;  %vm4114_vm11 = vcmask 23552  }
 0x2f9   : > { %v4074_v41 = vmul.f32 %v12894_v56, %v4064_v36 }
 0x2fb   : > { %v4078_v54 = vperm.slane %v4074_v41, %v12898_v42 }
 0x34f   : > { %v3898_v6 = vpop.xlane.xlu1 %3897 }
 0x350   : > { %12261 = vrcp.f32 %v3898_v6  ;;  %v3913_v25 = vand.u32 2147483648, %v3898_v6  ;;  %v3911_v30 = vand.u32 2147483647, %v3898_v6  ;;  %vm3907_vm7 = vweird.f32 %v3898_v6 }
 0x352   : > { %v3914_v13 = vor.u32 1.1754944e-38, %v3913_v25  ;;  %vm3912_vm9 = vcmp.eq.f32.partialorder %v3911_v30, 8.507059e+37 }
 0x356   : > { %v12262_v2 = vpop.eup %12261 }
 0x357   : > { %v3903_v24 = vmul.f32 %v12262_v2, %v3898_v6  ;;  %v3901_v7 = vpop.xlane.xlu2 %3900  ;;  %vm3908_vm6 = vweird.f32 %v12262_v2  ;;  %v4066_v28 = vpop.xlane.xlu1 %4065 }
 0x358   : > { %12263 = vrcp.f32 %v3901_v7  ;;  %vm3909_vm8 = vmor %vm3907_vm7, %vm3908_vm6  ;;  %v3928_v55 = vand.u32 2147483648, %v3901_v7  ;;  %v3926_v17 = vand.u32 2147483647, %v3901_v7  ;;  %vm3922_vm12 = vweird.f32 %v3901_v7 }
 0x359   : > { %v3904_v8 = vsub.f32 1.0, %v3903_v24  ;;  %v4075_v9 = vmul.f32 %v12894_v56, %v4066_v28 }
 0x35a   : > { %v3929_v35 = vor.u32 1.1754944e-38, %v3928_v55  ;;  %vm3927_vm14 = vcmp.eq.f32.partialorder %v3926_v17, 8.507059e+37 }
 0x35b   : > { %v3905_v5 = vmul.f32 %v12262_v2, %v3904_v8  ;;  %v4079_v47 = vperm.slane %v4075_v9, %v12898_v42 }
 0x35d   : > { %v3906_v10 = vadd.f32 %v12262_v2, %v3905_v5  ;;  %v4080_v60 = vsel %vm3957_vm4, %v4079_v47, %v4078_v54 }
 0x35e   : > { %v12264_v11 = vpop.eup %12263 }
 0x35f   : > { %v3918_v14 = vmul.f32 %v12264_v11, %v3901_v7  ;;  %v3910_v15 = vsel %vm3909_vm8, %v12262_v2, %v3906_v10  ;;  %vm3923_vm10 = vweird.f32 %v12264_v11  ;;  %v4082_v7 = vsel %vm4037_vm15, %v4080_v60, 0.0 }
 0x360   : > { %v3915_v18 = vsel %vm3912_vm9, %v3914_v13, %v3910_v15  ;;  %vm3924_vm13 = vmor %vm3922_vm12, %vm3923_vm10  ;;  %vm4112_vm10 = vcmask 15360   ;;  %vm4116_vm12 = vcmask 31744  }
 0x361   : > { %v3919_v19 = vsub.f32 1.0, %v3918_v14  ;;  %v3916_v20 = vmul.f32 %v12252_v45, %v3915_v18 }
 0x363   : > { %v3920_v22 = vmul.f32 %v12264_v11, %v3919_v19  ;;  %v4045_v23 = vmul.f32 %v12883_v16, %v3916_v20  ;;  %v4021_v27 = vmul.f32 %v12888_v26, %v3916_v20 }
 0x365   : > { %v3981_v29 = vpop.xlane.xlu2 %3980  ;;  %v4047_v31 = vsel %vm3883_vm2, %v4045_v23, 0.0  ;;  %v4023_v32 = vsel %vm3883_vm2, %v4021_v27, 0.0  ;;  %v3921_v33 = vadd.f32 %v12264_v11, %v3920_v22 }
 0x366   : > { %v3983_v59 = vrot.slane %v3981_v29, 1  ;;  %12265 = vrcp.f32 %v3981_v29  ;;  %4048 = vadd.xlane.f32.xlu1 %v4047_v31  ;;  %4024 = vadd.xlane.f32.xlu2 %v4023_v32  ;;  %v3997_v4 = vand.u32 2147483648, %v3981_v29  ;;  %v3995_v62 = vand.u32 2147483647, %v3981_v29 }
 0x367   : > { %v3925_v37 = vsel %vm3924_vm13, %v12264_v11, %v3921_v33  ;;  %vm3991_vm1 = vweird.f32 %v3981_v29  ;;  %vm4118_vm13 = vcmask 39936  }
 0x368   : > { %12267 = vrcp.f32 %v3983_v59  ;;  %v3930_v39 = vsel %vm3927_vm14, %v3929_v35, %v3925_v37  ;;  %v4012_v6 = vand.u32 2147483648, %v3983_v59  ;;  %v4010_v3 = vand.u32 2147483647, %v3983_v59 }
 0x369   : > { %v3931_v40 = vmul.f32 %v12868_v52, %v3930_v39  ;;  %v3998_v24 = vor.u32 1.1754944e-38, %v3997_v4  ;;  %vm3996_vm6 = vcmp.eq.f32.partialorder %v3995_v62, 8.507059e+37  ;;  %vm4006_vm7 = vweird.f32 %v3983_v59 }
 0x36a   : > { %v4013_v5 = vor.u32 1.1754944e-38, %v4012_v6  ;;  %vm4011_vm9 = vcmp.eq.f32.partialorder %v4010_v3, 8.507059e+37 }
 0x36b   : > { %v4046_v44 = vmul.f32 %v12883_v16, %v3931_v40  ;;  %v4022_v45 = vmul.f32 %v12888_v26, %v3931_v40 }
 0x36c   : > { %v12266_v46 = vpop.eup %12265 }
 0x36d   : > { %v3987_v48 = vmul.f32 %v12266_v46, %v3981_v29  ;;  %v4050_v49 = vsel %vm3883_vm2, %v4046_v44, 0.0  ;;  %v4026_v51 = vsel %vm3883_vm2, %v4022_v45, 0.0  ;;  %vm3992_vm0 = vweird.f32 %v12266_v46 }
 0x36e   : > { %v12268_v53 = vpop.eup %12267  ;;  %4051 = vadd.xlane.f32.xlu2 %v4050_v49  ;;  %4027 = vadd.xlane.f32.xlu0 %v4026_v51  ;;  %vm3993_vm3 = vmor %vm3991_vm1, %vm3992_vm0 }
 0x36f   : > { %v3988_v52 = vsub.f32 1.0, %v3987_v48  ;;  %v4002_v57 = vmul.f32 %v12268_v53, %v3983_v59  ;;  %vm4007_vm2 = vweird.f32 %v12268_v53 }
 0x370   : > { %vm4008_vm8 = vmor %vm4006_vm7, %vm4007_vm2 }
 0x371   : > { %v3989_v1 = vmul.f32 %v12266_v46, %v3988_v52  ;;  %v4003_v63 = vsub.f32 1.0, %v4002_v57 }
 0x373   : > { %v3990_v0 = vadd.f32 %v12266_v46, %v3989_v1  ;;  %v4004_v2 = vmul.f32 %v12268_v53, %v4003_v63 }
 0x375   : > { %v3994_v8 = vsel %vm3993_vm3, %v12266_v46, %v3990_v0  ;;  %v4005_v43 = vadd.f32 %v12268_v53, %v4004_v2 }
 0x376   : > { %4083 = vadd.xlane.f32.xlu2 %v4082_v7  ;;  %v3999_v25 = vsel %vm3996_vm6, %v3998_v24, %v3994_v8 }
 0x377   : > { %v4000_v30 = vmul.f32 %v12875_v61, %v3999_v25  ;;  %v4009_v10 = vsel %vm4008_vm8, %v12268_v53, %v4005_v43 }
 0x378   : > { %v4014_v11 = vsel %vm4011_vm9, %v4013_v5, %v4009_v10 }
 0x379   : > { %v4015_v12 = vmul.f32 %v12872_v58, %v4014_v11  ;;  %v4086_v13 = vmul.f32 %v12888_v26, %v4000_v30  ;;  %v4096_v18 = vmul.f32 %v12883_v16, %v4000_v30 }
 0x37b   : > { %v4097_v14 = vmul.f32 %v12883_v16, %v4015_v12  ;;  %v4087_v15 = vmul.f32 %v12888_v26, %v4015_v12 }
 0x37d   : > { %v4100_v19 = vrot.slane %v4097_v14, 7  ;;  %v4090_v20 = vrot.slane %v4087_v15, 7 }
 0x37f   : > { %v4101_v21 = vsel %vm3957_vm4, %v4100_v19, %v4096_v18  ;;  %v4091_v55 = vsel %vm3957_vm4, %v4090_v20, %v4086_v13 }
 0x380   : > { %v4103_v61 = vsel %vm3960_vm5, %v4101_v21, 0.0  ;;  %v4093_v35 = vsel %vm3960_vm5, %v4091_v55, 0.0  ;;  %vm4120_vm5 = vcmask 41984  }
 0x381   : > { %4104 = vadd.xlane.f32.xlu2 %v4103_v61 }
 0x3d9   : > { %v4025_v17 = vpop.xlane.xlu2 %4024  ;;  %v4049_v22 = vpop.xlane.xlu1 %4048 }
 0x3da   : > { %v4055_v27 = vperm.slane %v4049_v22, %v12898_v42  ;;  %v4033_v28 = vperm.slane %v4025_v17, %v12898_v42 }
 0x3e1   : > { %v4052_v58 = vpop.xlane.xlu2 %4051  ;;  %v4028_v23 = vpop.xlane.xlu0 %4027 }
 0x3e2   : > { %v4056_v26 = vperm.slane %v4052_v58, %v12898_v42  ;;  %v4034_v16 = vperm.slane %v4028_v23, %v12898_v42 }
 0x3e4   : > { %v4057_v29 = vsel %vm3957_vm4, %v4056_v26, %v4055_v27  ;;  %v4035_v31 = vsel %vm3957_vm4, %v4034_v16, %v4033_v28  ;;  %vm4110_vm4 = vcmask 7168  }
 0x3e5   : > { %v4059_v32 = vsel %vm4037_vm15, %v4057_v29, 0.0  ;;  %v4038_v33 = vsel %vm4037_vm15, %v4035_v31, 0.0 }
 0x3e6   : > { %4060 = vadd.xlane.f32.xlu1 %v4059_v32  ;;  %4039 = vadd.xlane.f32.xlu0 %v4038_v33 }
 0x3e9   : > { %v4084_v37 = vpop.xlane.xlu2 %4083 }
 0x3ea   : > { %v4085_v42 = vmul.f32 %v4084_v37, %v12858_v50 }
 0x3ee   : > { %4107 = vadd.xlane.f32.xlu1 %v4106_v34  ;;  %4094 = vadd.xlane.f32.xlu0 %v4093_v35 }
 0x3f4   : > { %v4105_v45 = vpop.xlane.xlu2 %4104 }
 0x459   : > { %v4061_v59 = vpop.xlane.xlu1 %4060  ;;  %v4040_v36 = vpop.xlane.xlu0 %4039 }
 0x45a   : > { %v4062_v9 = vmul.f32 %v4061_v59, %v12858_v50  ;;  %v4041_v39 = vmul.f32 %v4040_v36, %v12858_v50 }
 0x45c   : > { %v4111_v40 = vsel %vm4110_vm4, %v4041_v39, %v4062_v9 }
 0x45d   : > { %v4113_v38 = vsel %vm4112_vm10, %v4111_v40, %v4085_v42 }
 0x461   : > { %v4108_v41 = vpop.xlane.xlu1 %4107  ;;  %v4095_v44 = vpop.xlane.xlu0 %4094 }
 0x462   : > { %v4109_v46 = vmul.f32 %v4108_v41, %v12894_v56  ;;  %v4115_v47 = vsel %vm4114_vm11, %v4113_v38, %v4095_v44 }
 0x463   : > { %v4117_v48 = vsel %vm4116_vm12, %v4115_v47, %v4105_v45 }
 0x464   : > { %v4119_v49 = vsel %vm4118_vm13, %v4117_v48, %v4109_v46 }
 0x465   : > { %4121 = vst.msk [vmem:[#allocation4] sm:$0x3] %vm4120_vm5, %v4119_v49 }
 0x466 PF: > { %v9680_v50 = vld [vmem:[%s12736_s16 + $0xa8] sm:$0xf]  ;;  %v11735_v56 = vld [vmem:[%s12736_s16 + $0xb0] sm:$0xf0]  ;;  %v9668_v63 = vld [vmem:[%s12736_s16 + $0x90] sm:$0xf] }
 0x467   : > { %v9776_v51 = vld [vmem:[%s12736_s16 + $0x168] sm:$0xf]  ;;  %v9681_v53 = vor.u32 %v11735_v56, %v9680_v50  ;;  %v11759_v54 = vld [vmem:[%s12736_s16 + $0x170] sm:$0xf0]  ;;  %v11732_v0 = vld [vmem:[%s12736_s16 + $0x98] sm:$0xf0] }
 0x468   : > { %v9872_v52 = vld [vmem:[%s12736_s16 + $0x228] sm:$0xf]  ;;  %v11783_v57 = vld [vmem:[%s12736_s16 + $0x230] sm:$0xf0]  ;;  %v9777_v4 = vor.u32 %v11759_v54, %v9776_v51  ;;  %v9764_v2 = vld [vmem:[%s12736_s16 + $0x150] sm:$0xf]  ;;  %v9669_v24 = vor.u32 %v11732_v0, %v9668_v63 }
 0x469   : > { %v9873_v60 = vor.u32 %v11783_v57, %v9872_v52  ;;  %v9968_v1 = vld [vmem:[%s12736_s16 + $0x2e8] sm:$0xf]  ;;  %v11807_v62 = vld [vmem:[%s12736_s16 + $0x2f0] sm:$0xf0]  ;;  %6721 = vmatpush.bf16.msra.mxu0 %v9681_v53  ;;  %v11756_v3 = vld [vmem:[%s12736_s16 + $0x158] sm:$0xf0] }
 0x46a   : > { %v9969_v6 = vor.u32 %v11807_v62, %v9968_v1  ;;  %6734 = vmatpush.bf16.msra.mxu1 %v9777_v4  ;;  %v9765_v7 = vor.u32 %v11756_v3, %v9764_v2  ;;  %v9860_v8 = vld [vmem:[%s12736_s16 + $0x210] sm:$0xf]  ;;  %v11780_v43 = vld [vmem:[%s12736_s16 + $0x218] sm:$0xf0]  ;;  %v9656_v10 = vld [vmem:[%s12736_s16 + $0x78] sm:$0xf] }
 0x46b   : > { %6747 = vmatpush.bf16.msra.mxu2 %v9873_v60  ;;  %v9956_v25 = vld [vmem:[%s12736_s16 + $0x2d0] sm:$0xf]  ;;  %v9861_v5 = vor.u32 %v11780_v43, %v9860_v8  ;;  %v11804_v30 = vld [vmem:[%s12736_s16 + $0x2d8] sm:$0xf0]  ;;  %v11729_v11 = vld [vmem:[%s12736_s16 + $0x80] sm:$0xf0] }
 0x46c   : > { %6760 = vmatpush.bf16.msra.mxu3 %v9969_v6  ;;  %v9957_v12 = vor.u32 %v11804_v30, %v9956_v25  ;;  %v9752_v13 = vld [vmem:[%s12736_s16 + $0x138] sm:$0xf]  ;;  %v11753_v14 = vld [vmem:[%s12736_s16 + $0x140] sm:$0xf0]  ;;  %v9657_v18 = vor.u32 %v11729_v11, %v9656_v10  ;;  %v9644_v17 = vld [vmem:[%s12736_s16 + $0x60] sm:$0xf] }
 0x46d   : > { %v9848_v15 = vld [vmem:[%s12736_s16 + $0x1f8] sm:$0xf]  ;;  %6722 = vmatpush.bf16.msra.mxu0 %v9669_v24  ;;  %v11777_v19 = vld [vmem:[%s12736_s16 + $0x200] sm:$0xf0]  ;;  %v9753_v55 = vor.u32 %v11753_v14, %v9752_v13  ;;  %v11726_v22 = vld [vmem:[%s12736_s16 + $0x68] sm:$0xf0] }
 0x46e   : > { %v9944_v20 = vld [vmem:[%s12736_s16 + $0x2b8] sm:$0xf]  ;;  %v11801_v21 = vld [vmem:[%s12736_s16 + $0x2c0] sm:$0xf0]  ;;  %6735 = vmatpush.bf16.msra.mxu1 %v9765_v7  ;;  %v9849_v61 = vor.u32 %v11777_v19, %v9848_v15  ;;  %v9740_v58 = vld [vmem:[%s12736_s16 + $0x120] sm:$0xf]  ;;  %v9645_v31 = vor.u32 %v11726_v22, %v9644_v17 }
 0x46f   : > { %6748 = vmatpush.bf16.msra.mxu2 %v9861_v5  ;;  %v9945_v23 = vor.u32 %v11801_v21, %v9944_v20  ;;  %v11750_v27 = vld [vmem:[%s12736_s16 + $0x128] sm:$0xf0]  ;;  %v9836_v28 = vld [vmem:[%s12736_s16 + $0x1e0] sm:$0xf]  ;;  %v9632_v34 = vld [vmem:[%s12736_s16 + $0x48] sm:$0xf] }
 0x470   : > { %6761 = vmatpush.bf16.msra.mxu3 %v9957_v12  ;;  %v11774_v26 = vld [vmem:[%s12736_s16 + $0x1e8] sm:$0xf0]  ;;  %v9932_v16 = vld [vmem:[%s12736_s16 + $0x2a0] sm:$0xf]  ;;  %v9741_v32 = vor.u32 %v11750_v27, %v9740_v58  ;;  %v11723_v35 = vld [vmem:[%s12736_s16 + $0x50] sm:$0xf0] }
 0x471   : > { %v11798_v29 = vld [vmem:[%s12736_s16 + $0x2a8] sm:$0xf0]  ;;  %6723 = vmatpush.bf16.msra.mxu0 %v9657_v18  ;;  %v9837_v33 = vor.u32 %v11774_v26, %v9836_v28  ;;  %v9728_v59 = vld [vmem:[%s12736_s16 + $0x108] sm:$0xf]  ;;  %v11747_v37 = vld [vmem:[%s12736_s16 + $0x110] sm:$0xf0]  ;;  %v9633_v41 = vor.u32 %v11723_v35, %v9632_v34 }
 0x472   : > { %6736 = vmatpush.bf16.msra.mxu1 %v9753_v55  ;;  %v9933_v36 = vor.u32 %v11798_v29, %v9932_v16  ;;  %v9824_v9 = vld [vmem:[%s12736_s16 + $0x1c8] sm:$0xf]  ;;  %v11771_v39 = vld [vmem:[%s12736_s16 + $0x1d0] sm:$0xf0]  ;;  %v9729_v38 = vor.u32 %v11747_v37, %v9728_v59  ;;  %v9620_v45 = vld [vmem:[%s12736_s16 + $0x30] sm:$0xf] }
 0x473   : > { %6749 = vmatpush.bf16.msra.mxu2 %v9849_v61  ;;  %v9920_v40 = vld [vmem:[%s12736_s16 + $0x288] sm:$0xf]  ;;  %v11795_v42 = vld [vmem:[%s12736_s16 + $0x290] sm:$0xf0]  ;;  %v9825_v44 = vor.u32 %v11771_v39, %v9824_v9  ;;  %v11720_v46 = vld [vmem:[%s12736_s16 + $0x38] sm:$0xf0] }
 0x474   : > { %6762 = vmatpush.bf16.msra.mxu3 %v9945_v23  ;;  %v9716_v47 = vld [vmem:[%s12736_s16 + $0xf0] sm:$0xf]  ;;  %v9921_v48 = vor.u32 %v11795_v42, %v9920_v40  ;;  %v11744_v49 = vld [vmem:[%s12736_s16 + $0xf8] sm:$0xf0]  ;;  %v9621_v54 = vor.u32 %v11720_v46, %v9620_v45  ;;  %v9608_v4 = vld [vmem:[%s12736_s16 + $0x18] sm:$0xf] }
 0x475   : > { %6724 = vmatpush.bf16.msra.mxu0 %v9645_v31  ;;  %v9812_v50 = vld [vmem:[%s12736_s16 + $0x1b0] sm:$0xf]  ;;  %v11768_v56 = vld [vmem:[%s12736_s16 + $0x1b8] sm:$0xf0]  ;;  %v9717_v52 = vor.u32 %v11744_v49, %v9716_v47  ;;  %v11717_v60 = vld [vmem:[%s12736_s16 + $0x20] sm:$0xf0] }
 0x476   : > { %6737 = vmatpush.bf16.msra.mxu1 %v9741_v32  ;;  %v9908_v51 = vld [vmem:[%s12736_s16 + $0x270] sm:$0xf]  ;;  %v11792_v53 = vld [vmem:[%s12736_s16 + $0x278] sm:$0xf0]  ;;  %v9813_v57 = vor.u32 %v11768_v56, %v9812_v50  ;;  %v9704_v1 = vld [vmem:[%s12736_s16 + $0xd8] sm:$0xf]  ;;  %v9609_v24 = vor.u32 %v11717_v60, %v9608_v4 }
 0x477   : > { %6750 = vmatpush.bf16.msra.mxu2 %v9837_v33  ;;  %v9909_v62 = vor.u32 %v11792_v53, %v9908_v51  ;;  %v11741_v63 = vld [vmem:[%s12736_s16 + $0xe0] sm:$0xf0]  ;;  %v9800_v6 = vld [vmem:[%s12736_s16 + $0x198] sm:$0xf]  ;;  %v9596_v7 = vld [vmem:[%s12736_s16] sm:$0xf] }
 0x478   : > { %6763 = vmatpush.bf16.msra.mxu3 %v9933_v36  ;;  %v11765_v0 = vld [vmem:[%s12736_s16 + $0x1a0] sm:$0xf0]  ;;  %v9896_v2 = vld [vmem:[%s12736_s16 + $0x258] sm:$0xf]  ;;  %v11714_v8 = vld [vmem:[%s12736_s16 + $0x8] sm:$0xf0]  ;;  %v9705_v43 = vor.u32 %v11741_v63, %v9704_v1 }
 0x479   : > { %6725 = vmatpush.bf16.msra.mxu0 %v9633_v41  ;;  %v11789_v3 = vld [vmem:[%s12736_s16 + $0x260] sm:$0xf0]  ;;  %v9801_v25 = vor.u32 %v11765_v0, %v9800_v6  ;;  %v9692_v5 = vld [vmem:[%s12736_s16 + $0xc0] sm:$0xf]  ;;  %v11738_v30 = vld [vmem:[%s12736_s16 + $0xc8] sm:$0xf0]  ;;  %v9597_v20 = vor.u32 %v11714_v8, %v9596_v7 }
 0x47a   : > { %6738 = vmatpush.bf16.msra.mxu1 %v9729_v38  ;;  %v9788_v10 = vld [vmem:[%s12736_s16 + $0x180] sm:$0xf]  ;;  %v9897_v11 = vor.u32 %v11789_v3, %v9896_v2  ;;  %v11762_v12 = vld [vmem:[%s12736_s16 + $0x188] sm:$0xf0]  ;;  %v10064_v15 = vld [vmem:[%s12736_s16 + $0x3a8] sm:$0xf]  ;;  %v9693_v17 = vor.u32 %v11738_v30, %v9692_v5 }
 0x47b   : > { %6751 = vmatpush.bf16.msra.mxu2 %v9825_v44  ;;  %v9884_v13 = vld [vmem:[%s12736_s16 + $0x240] sm:$0xf]  ;;  %v11786_v14 = vld [vmem:[%s12736_s16 + $0x248] sm:$0xf0]  ;;  %v11831_v18 = vld [vmem:[%s12736_s16 + $0x3b0] sm:$0xf0]  ;;  %v9789_v22 = vor.u32 %v11762_v12, %v9788_v10 }
 0x47c   : > { %6764 = vmatpush.bf16.msra.mxu3 %v9921_v48  ;;  %v10160_v19 = vld [vmem:[%s12736_s16 + $0x468] sm:$0xf]  ;;  %v11855_v21 = vld [vmem:[%s12736_s16 + $0x470] sm:$0xf0]  ;;  %v9885_v27 = vor.u32 %v11786_v14, %v9884_v13  ;;  %v10065_v28 = vor.u32 %v11831_v18, %v10064_v15  ;;  %v10052_v29 = vld [vmem:[%s12736_s16 + $0x390] sm:$0xf] }
 0x47d   : > { %6726 = vmatpush.bf16.msra.mxu0 %v9621_v54  ;;  %v10256_v55 = vld [vmem:[%s12736_s16 + $0x528] sm:$0xf]  ;;  %v11879_v61 = vld [vmem:[%s12736_s16 + $0x530] sm:$0xf0]  ;;  %v10161_v26 = vor.u32 %v11855_v21, %v10160_v19  ;;  %v11828_v31 = vld [vmem:[%s12736_s16 + $0x398] sm:$0xf0] }
 0x47e   : > { %6739 = vmatpush.bf16.msra.mxu1 %v9717_v52  ;;  %v10352_v58 = vld [vmem:[%s12736_s16 + $0x5e8] sm:$0xf]  ;;  %v11903_v23 = vld [vmem:[%s12736_s16 + $0x5f0] sm:$0xf0]  ;;  %v10257_v16 = vor.u32 %v11879_v61, %v10256_v55  ;;  %v10148_v32 = vld [vmem:[%s12736_s16 + $0x450] sm:$0xf]  ;;  %v10053_v9 = vor.u32 %v11828_v31, %v10052_v29 }
 0x47f   : > { %6752 = vmatpush.bf16.msra.mxu2 %v9813_v57  ;;  %v10353_v33 = vor.u32 %v11903_v23, %v10352_v58  ;;  %v11852_v34 = vld [vmem:[%s12736_s16 + $0x458] sm:$0xf0]  ;;  %v10244_v35 = vld [vmem:[%s12736_s16 + $0x510] sm:$0xf]  ;;  %v10040_v39 = vld [vmem:[%s12736_s16 + $0x378] sm:$0xf] }
 0x480   : > { %6765 = vmatpush.bf16.msra.mxu3 %v9909_v62  ;;  %v11876_v59 = vld [vmem:[%s12736_s16 + $0x518] sm:$0xf0]  ;;  %v10340_v36 = vld [vmem:[%s12736_s16 + $0x5d0] sm:$0xf]  ;;  %v11825_v40 = vld [vmem:[%s12736_s16 + $0x380] sm:$0xf0]  ;;  %v10149_v42 = vor.u32 %v11852_v34, %v10148_v32 }
 0x481   : > { %6727 = vmatpush.bf16.msra.mxu0 %v9609_v24  ;;  %v11900_v37 = vld [vmem:[%s12736_s16 + $0x5d8] sm:$0xf0]  ;;  %v10245_v41 = vor.u32 %v11876_v59, %v10244_v35  ;;  %v10136_v38 = vld [vmem:[%s12736_s16 + $0x438] sm:$0xf]  ;;  %v11849_v44 = vld [vmem:[%s12736_s16 + $0x440] sm:$0xf0]  ;;  %v10041_v56 = vor.u32 %v11825_v40, %v10040_v39 }
 0x482   : > { %6740 = vmatpush.bf16.msra.mxu1 %v9705_v43  ;;  %v4123_v45 = vld [vmem:[%s12758_s18] sm:$0xff]  ;;  %v10341_v46 = vor.u32 %v11900_v37, %v10340_v36  ;;  %v10232_v47 = vld [vmem:[%s12736_s16 + $0x4f8] sm:$0xf]  ;;  %v11873_v48 = vld [vmem:[%s12736_s16 + $0x500] sm:$0xf0]  ;;  %v10137_v51 = vor.u32 %v11849_v44, %v10136_v38  ;;  %vm7350_vm14 = vcmask 1041408  }
 0x483   : > { %6753 = vmatpush.bf16.msra.mxu2 %v9801_v25  ;;  %4638 = vst [vmem:[#allocation1] ss:$9 sm:$0xff] %v4123_v45  ;;  %v10328_v49 = vld [vmem:[%s12736_s16 + $0x5b8] sm:$0xf]  ;;  %v11897_v50 = vld [vmem:[%s12736_s16 + $0x5c0] sm:$0xf0]  ;;  %v10233_v53 = vor.u32 %v11873_v48, %v10232_v47 }
 0x484   : > { %6766 = vmatpush.bf16.msra.mxu3 %v9897_v11  ;;  %v10028_v54 = vld [vmem:[%s12736_s16 + $0x360] sm:$0xf]  ;;  %v11822_v52 = vld [vmem:[%s12736_s16 + $0x368] sm:$0xf0]  ;;  %v10329_v4 = vor.u32 %v11897_v50, %v10328_v49  ;;  %v10016_v0 = vld [vmem:[%s12736_s16 + $0x348] sm:$0xf] }
 0x485   : > { %6728 = vmatpush.bf16.msra.mxu0 %v9597_v20  ;;  %v10124_v57 = vld [vmem:[%s12736_s16 + $0x420] sm:$0xf]  ;;  %v11846_v60 = vld [vmem:[%s12736_s16 + $0x428] sm:$0xf0]  ;;  %v10029_v2 = vor.u32 %v11822_v52, %v10028_v54  ;;  %v11819_v3 = vld [vmem:[%s12736_s16 + $0x350] sm:$0xf0] }
 0x486   : > { %6741 = vmatpush.bf16.msra.mxu1 %v9693_v17  ;;  %v10220_v1 = vld [vmem:[%s12736_s16 + $0x4e0] sm:$0xf]  ;;  %v11870_v62 = vld [vmem:[%s12736_s16 + $0x4e8] sm:$0xf0]  ;;  %v10112_v24 = vld [vmem:[%s12736_s16 + $0x408] sm:$0xf]  ;;  %v10125_v8 = vor.u32 %v11846_v60, %v10124_v57  ;;  %v10017_v18 = vor.u32 %v11819_v3, %v10016_v0 }
 0x487   : > { %6754 = vmatpush.bf16.msra.mxu2 %v9789_v22  ;;  %v10316_v63 = vld [vmem:[%s12736_s16 + $0x5a0] sm:$0xf]  ;;  %v11894_v6 = vld [vmem:[%s12736_s16 + $0x5a8] sm:$0xf0]  ;;  %v11843_v7 = vld [vmem:[%s12736_s16 + $0x410] sm:$0xf0]  ;;  %v10221_v43 = vor.u32 %v11870_v62, %v10220_v1 }
 0x488   : > { %6767 = vmatpush.bf16.msra.mxu3 %v9885_v27  ;;  %v10317_v10 = vor.u32 %v11894_v6, %v10316_v63  ;;  %v10208_v11 = vld [vmem:[%s12736_s16 + $0x4c8] sm:$0xf]  ;;  %v11867_v12 = vld [vmem:[%s12736_s16 + $0x4d0] sm:$0xf0]  ;;  %v10113_v19 = vor.u32 %v11843_v7, %v10112_v24  ;;  %v10004_v21 = vld [vmem:[%s12736_s16 + $0x330] sm:$0xf] }
 0x489   : > { %6773 = vmatpush.bf16.msrb.mxu0 %v10065_v28  ;;  %v10304_v14 = vld [vmem:[%s12736_s16 + $0x588] sm:$0xf]  ;;  %v11891_v15 = vld [vmem:[%s12736_s16 + $0x590] sm:$0xf0]  ;;  %v10209_v20 = vor.u32 %v11867_v12, %v10208_v11  ;;  %v11816_v55 = vld [vmem:[%s12736_s16 + $0x338] sm:$0xf0] }
 0x48a   : > { %6786 = vmatpush.bf16.msrb.mxu1 %v10161_v26  ;;  %v13034_v25 = vld [vmem:[#allocation1 + $0x12] sm:$0xff]  ;;  %v13036_v5 = vld [vmem:[#allocation1] sm:$0xff]  ;;  %v13043_v13 = vld [vmem:[#allocation1 + $0x9] sm:$0xff]  ;;  %v10305_v17 = vor.u32 %v11891_v15, %v10304_v14  ;;  %v10005_v26 = vor.u32 %v11816_v55, %v10004_v21  ;;  %vm7352_vm15 = vcmask 1043456   ;;  %p11130_p1 = scmp.ne.s32.totalorder %s12647_s20, 4 }
 0x48b   : > { %6799 = vmatpush.bf16.msrb.mxu2 %v10257_v16  ;;  %v13038_v30 = vld [vmem:[#allocation1 + $0x1b] sm:$0xff]  ;;  %6729 = vmatmul.bf16.vlgmr.msra.gmra.mxu0 %v13036_v5  ;;  %v10100_v61 = vld [vmem:[%s12736_s16 + $0x3f0] sm:$0xf]  ;;  %v11840_v22 = vld [vmem:[%s12736_s16 + $0x3f8] sm:$0xf0]  ;;  %s12544_s11 = smov (!%p11130_p1), 122  }
 0x48c   : > { %6812 = vmatpush.bf16.msrb.mxu3 %v10353_v33  ;;  %6755 = vmatmul.bf16.vlgmr.msra.gmra.mxu2 %v13034_v25  ;;  %v10196_v58 = vld [vmem:[%s12736_s16 + $0x4b0] sm:$0xf]  ;;  %v11864_v23 = vld [vmem:[%s12736_s16 + $0x4b8] sm:$0xf0]  ;;  %v9992_v16 = vld [vmem:[%s12736_s16 + $0x318] sm:$0xf]  ;;  %v10101_v29 = vor.u32 %v11840_v22, %v10100_v61 }
 0x48d   : > { %6774 = vmatpush.bf16.msrb.mxu0 %v10053_v9  ;;  %6768 = vmatmul.bf16.vlgmr.msra.gmra.mxu3 %v13038_v30  ;;  %v10292_v27 = vld [vmem:[%s12736_s16 + $0x570] sm:$0xf]  ;;  %v11888_v28 = vld [vmem:[%s12736_s16 + $0x578] sm:$0xf0]  ;;  %v10197_v31 = vor.u32 %v11864_v23, %v10196_v58  ;;  %v11813_v32 = vld [vmem:[%s12736_s16 + $0x320] sm:$0xf0] }
 0x48e   : > { %6787 = vmatpush.bf16.msrb.mxu1 %v10149_v42  ;;  %v10088_v33 = vld [vmem:[%s12736_s16 + $0x3d8] sm:$0xf]  ;;  %v11837_v34 = vld [vmem:[%s12736_s16 + $0x3e0] sm:$0xf0]  ;;  %v10293_v35 = vor.u32 %v11888_v28, %v10292_v27  ;;  %v9980_v39 = vld [vmem:[%s12736_s16 + $0x300] sm:$0xf]  ;;  %v9993_v42 = vor.u32 %v11813_v32, %v9992_v16 }
 0x48f   : > { %6800 = vmatpush.bf16.msrb.mxu2 %v10245_v41  ;;  %6742 = vmatmul.bf16.vlgmr.msra.gmra.mxu1 %v13043_v13  ;;  %v10184_v59 = vld [vmem:[%s12736_s16 + $0x498] sm:$0xf]  ;;  %v11861_v36 = vld [vmem:[%s12736_s16 + $0x4a0] sm:$0xf0]  ;;  %v11810_v40 = vld [vmem:[%s12736_s16 + $0x308] sm:$0xf0]  ;;  %v10089_v48 = vor.u32 %v11837_v34, %v10088_v33 }
 0x490   : > { %6813 = vmatpush.bf16.msrb.mxu3 %v10341_v46  ;;  %v10280_v37 = vld [vmem:[%s12736_s16 + $0x558] sm:$0xf]  ;;  %v11885_v9 = vld [vmem:[%s12736_s16 + $0x560] sm:$0xf0]  ;;  %v10076_v41 = vld [vmem:[%s12736_s16 + $0x3c0] sm:$0xf]  ;;  %v10185_v49 = vor.u32 %v11861_v36, %v10184_v59  ;;  %v9981_v1 = vor.u32 %v11810_v40, %v9980_v39 }
 0x491   : > { %6775 = vmatpush.bf16.msrb.mxu0 %v10041_v56  ;;  %v11834_v38 = vld [vmem:[%s12736_s16 + $0x3c8] sm:$0xf0]  ;;  %v10172_v44 = vld [vmem:[%s12736_s16 + $0x480] sm:$0xf]  ;;  %v4124_v47 = vld [vmem:[%s12758_s18 + $0x8] sm:$0xff]  ;;  %s12545_s21 = smov (!%p11130_p1), 6  }
 0x492   : > { %6788 = vmatpush.bf16.msrb.mxu1 %v10137_v51  ;;  %v11858_v45 = vld [vmem:[%s12736_s16 + $0x488] sm:$0xf0]  ;;  %v13072_v46 = vld [vmem:[#allocation1 + $0x36] sm:$0xff]  ;;  %v13079_v51 = vld [vmem:[#allocation1 + $0x2d] sm:$0xff]  ;;  %v10077_v0 = vor.u32 %v11834_v38, %v10076_v41  ;;  %s12546_s20 = smov (!%p11130_p1), 12   ;;  %s12547_s22 = smov (!%p11130_p1), 18  }
 0x493   : > { %6801 = vmatpush.bf16.msrb.mxu2 %v10233_v53  ;;  %v13075_v50 = vld [vmem:[#allocation1 + $0x24] sm:$0xff]  ;;  %v10281_v53 = vor.u32 %v11885_v9, %v10280_v37  ;;  %v10268_v54 = vld [vmem:[%s12736_s16 + $0x540] sm:$0xf]  ;;  %v10448_v57 = vld [vmem:[%s12736_s16 + $0x6a8] sm:$0xf]  ;;  %s13960_s26 = sld [smem:[#allocation24_spill]] (!%p11130_p1) }
 0x494   : > { %6814 = vmatpush.bf16.msrb.mxu3 %v10329_v4  ;;  %v13077_v56 = vld [vmem:[#allocation1 + $0x3f] sm:$0xff]  ;;  %v11927_v4 = vld [vmem:[%s12736_s16 + $0x6b0] sm:$0xf0]  ;;  %v11924_v12 = vld [vmem:[%s12736_s16 + $0x698] sm:$0xf0] }
 0x495   : > { %6776 = vmatpush.bf16.msrb.mxu0 %v10029_v2  ;;  %v11882_v52 = vld [vmem:[%s12736_s16 + $0x548] sm:$0xf0]  ;;  %4648 = vst [vmem:[#allocation1] ss:$9 sm:$0xff] %v4124_v47  ;;  %v10544_v60 = vld [vmem:[%s12736_s16 + $0x768] sm:$0xf]  ;;  %v10173_v2 = vor.u32 %v11858_v45, %v10172_v44 }
 0x496   : > { %6789 = vmatpush.bf16.msrb.mxu1 %v10125_v8  ;;  %v11951_v62 = vld [vmem:[%s12736_s16 + $0x770] sm:$0xf0]  ;;  %v10640_v63 = vld [vmem:[%s12736_s16 + $0x828] sm:$0xf]  ;;  %v10269_v7 = vor.u32 %v11882_v52, %v10268_v54  ;;  %v10449_v8 = vor.u32 %v11927_v4, %v10448_v57  ;;  %v10436_v11 = vld [vmem:[%s12736_s16 + $0x690] sm:$0xf] }
 0x497   : > { %6802 = vmatpush.bf16.msrb.mxu2 %v10221_v43  ;;  %v11975_v6 = vld [vmem:[%s12736_s16 + $0x830] sm:$0xf0]  ;;  %v10736_v3 = vld [vmem:[%s12736_s16 + $0x8e8] sm:$0xf]  ;;  %v10545_v43 = vor.u32 %v11951_v62, %v10544_v60  ;;  %v10532_v14 = vld [vmem:[%s12736_s16 + $0x750] sm:$0xf]  ;;  %v10437_v61 = vor.u32 %v11924_v12, %v10436_v11 }
 0x498   : > { %6815 = vmatpush.bf16.msrb.mxu3 %v10317_v10  ;;  %v11999_v24 = vld [vmem:[%s12736_s16 + $0x8f0] sm:$0xf0]  ;;  %v10641_v10 = vor.u32 %v11975_v6, %v10640_v63  ;;  %v10724_v21 = vld [vmem:[%s12736_s16 + $0x8d0] sm:$0xf]  ;;  %v11996_v55 = vld [vmem:[%s12736_s16 + $0x8d8] sm:$0xf0] }
 0x499   : > { %6777 = vmatpush.bf16.msrb.mxu0 %v10017_v18  ;;  %v10737_v15 = vor.u32 %v11999_v24, %v10736_v3  ;;  %v11948_v18 = vld [vmem:[%s12736_s16 + $0x758] sm:$0xf0]  ;;  %v10424_v58 = vld [vmem:[%s12736_s16 + $0x678] sm:$0xf]  ;;  %v11921_v23 = vld [vmem:[%s12736_s16 + $0x680] sm:$0xf0]  ;;  %v10725_v28 = vor.u32 %v11996_v55, %v10724_v21 }
 0x49a   : > { %6790 = vmatpush.bf16.msrb.mxu1 %v10113_v19  ;;  %v10628_v19 = vld [vmem:[%s12736_s16 + $0x810] sm:$0xf]  ;;  %v10520_v27 = vld [vmem:[%s12736_s16 + $0x738] sm:$0xf]  ;;  %v11993_v32 = vld [vmem:[%s12736_s16 + $0x8c0] sm:$0xf0]  ;;  %v10425_v33 = vor.u32 %v11921_v23, %v10424_v58 }
 0x49b   : > { %6803 = vmatpush.bf16.msrb.mxu2 %v10209_v20  ;;  %v11972_v20 = vld [vmem:[%s12736_s16 + $0x818] sm:$0xf0]  ;;  %v10616_v16 = vld [vmem:[%s12736_s16 + $0x7f8] sm:$0xf]  ;;  %v10412_v59 = vld [vmem:[%s12736_s16 + $0x660] sm:$0xf] }
 0x49c   : > { %6816 = vmatpush.bf16.msrb.mxu3 %v10305_v17  ;;  %v10533_v17 = vor.u32 %v11948_v18, %v10532_v14  ;;  %v10629_v22 = vor.u32 %v11972_v20, %v10628_v19  ;;  %v11918_v36 = vld [vmem:[%s12736_s16 + $0x668] sm:$0xf0]  ;;  %v10508_v37 = vld [vmem:[%s12736_s16 + $0x720] sm:$0xf]  ;;  %v11939_v52 = vld [vmem:[%s12736_s16 + $0x710] sm:$0xf0] }
 0x49d   : > { %6778 = vmatpush.bf16.msrb.mxu0 %v10005_v26  ;;  %v11945_v26 = vld [vmem:[%s12736_s16 + $0x740] sm:$0xf0]  ;;  %v11942_v39 = vld [vmem:[%s12736_s16 + $0x728] sm:$0xf0]  ;;  %v10604_v40 = vld [vmem:[%s12736_s16 + $0x7e0] sm:$0xf]  ;;  %v10413_v44 = vor.u32 %v11918_v36, %v10412_v59 }
 0x49e   : > { %6791 = vmatpush.bf16.msrb.mxu1 %v10101_v29  ;;  %v11969_v29 = vld [vmem:[%s12736_s16 + $0x800] sm:$0xf0]  ;;  %v10521_v34 = vor.u32 %v11945_v26, %v10520_v27  ;;  %v10700_v41 = vld [vmem:[%s12736_s16 + $0x8a0] sm:$0xf]  ;;  %v11990_v38 = vld [vmem:[%s12736_s16 + $0x8a8] sm:$0xf0]  ;;  %v10509_v45 = vor.u32 %v11942_v39, %v10508_v37 }
 0x49f   : > { %6804 = vmatpush.bf16.msrb.mxu2 %v10197_v31  ;;  %v10712_v31 = vld [vmem:[%s12736_s16 + $0x8b8] sm:$0xf]  ;;  %v10701_v54 = vor.u32 %v11990_v38, %v10700_v41  ;;  %v10592_v57 = vld [vmem:[%s12736_s16 + $0x7c8] sm:$0xf]  ;;  %v11963_v4 = vld [vmem:[%s12736_s16 + $0x7d0] sm:$0xf0] }
 0x4a0   : > { %6817 = vmatpush.bf16.msrb.mxu3 %v10293_v35  ;;  %v10617_v35 = vor.u32 %v11969_v29, %v10616_v16  ;;  %v10713_v9 = vor.u32 %v11993_v32, %v10712_v31  ;;  %v10688_v60 = vld [vmem:[%s12736_s16 + $0x888] sm:$0xf]  ;;  %v10593_v6 = vor.u32 %v11963_v4, %v10592_v57  ;;  %v10484_v3 = vld [vmem:[%s12736_s16 + $0x6f0] sm:$0xf]  ;;  %v11984_v11 = vld [vmem:[%s12736_s16 + $0x878] sm:$0xf0] }
 0x4a1   : > { %6779 = vmatpush.bf16.msrb.mxu0 %v9993_v42  ;;  %v11966_v42 = vld [vmem:[%s12736_s16 + $0x7e8] sm:$0xf0]  ;;  %v10376_v18 = vld [vmem:[%s12736_s16 + $0x618] sm:$0xf]  ;;  %v11909_v19 = vld [vmem:[%s12736_s16 + $0x620] sm:$0xf0] }
 0x4a2   : > { %6792 = vmatpush.bf16.msrb.mxu1 %v10089_v48  ;;  %v10605_v47 = vor.u32 %v11966_v42, %v10604_v40  ;;  %v10400_v48 = vld [vmem:[%s12736_s16 + $0x648] sm:$0xf]  ;;  %v10472_v20 = vld [vmem:[%s12736_s16 + $0x6d8] sm:$0xf]  ;;  %v11933_v55 = vld [vmem:[%s12736_s16 + $0x6e0] sm:$0xf0]  ;;  %v10377_v23 = vor.u32 %v11909_v19, %v10376_v18 }
 0x4a3   : > { %6805 = vmatpush.bf16.msrb.mxu2 %v10185_v49  ;;  %v11915_v49 = vld [vmem:[%s12736_s16 + $0x650] sm:$0xf0]  ;;  %v11981_v58 = vld [vmem:[%s12736_s16 + $0x860] sm:$0xf0]  ;;  %v10364_v27 = vld [vmem:[%s12736_s16 + $0x600] sm:$0xf]  ;;  %v10473_v26 = vor.u32 %v11933_v55, %v10472_v20 }
 0x4a4   : > { %6818 = vmatpush.bf16.msrb.mxu3 %v10281_v53  ;;  %v10496_v53 = vld [vmem:[%s12736_s16 + $0x708] sm:$0xf]  ;;  %v10401_v62 = vor.u32 %v11915_v49, %v10400_v48  ;;  %v10460_v29 = vld [vmem:[%s12736_s16 + $0x6c0] sm:$0xf]  ;;  %v11930_v31 = vld [vmem:[%s12736_s16 + $0x6c8] sm:$0xf0] }
 0x4a5   : > { %6780 = vmatpush.bf16.msrb.mxu0 %v9981_v1  ;;  %v11987_v1 = vld [vmem:[%s12736_s16 + $0x890] sm:$0xf0]  ;;  %v10497_v63 = vor.u32 %v11939_v52, %v10496_v53  ;;  %v10556_v32 = vld [vmem:[%s12736_s16 + $0x780] sm:$0xf]  ;;  %v11978_v59 = vld [vmem:[%s12736_s16 + $0x848] sm:$0xf0]  ;;  %v10461_v38 = vor.u32 %v11930_v31, %v10460_v29 }
 0x4a6   : > { %6793 = vmatpush.bf16.msrb.mxu1 %v10077_v0  ;;  %v10388_v0 = vld [vmem:[%s12736_s16 + $0x630] sm:$0xf]  ;;  %v10689_v24 = vor.u32 %v11987_v1, %v10688_v60  ;;  %v10832_v36 = vld [vmem:[%s12736_s16 + $0x9a8] sm:$0xf]  ;;  %v12023_v37 = vld [vmem:[%s12736_s16 + $0x9b0] sm:$0xf0] }
 0x4a7   : > { %6806 = vmatpush.bf16.msrb.mxu2 %v10173_v2  ;;  %v11912_v2 = vld [vmem:[%s12736_s16 + $0x638] sm:$0xf0]  ;;  %v12047_v40 = vld [vmem:[%s12736_s16 + $0xa70] sm:$0xf0]  ;;  %v11024_v42 = vld [vmem:[%s12736_s16 + $0xb28] sm:$0xf]  ;;  %v10833_v49 = vor.u32 %v12023_v37, %v10832_v36 }
 0x4a8   : > { %6819 = vmatpush.bf16.msrb.mxu3 %v10269_v7  ;;  %6781 = vmatmul.bf16.vlgmr.msrb.gmra.mxu0 %v13075_v50  ;;  %v11936_v7 = vld [vmem:[%s12736_s16 + $0x6f8] sm:$0xf0]  ;;  %v10389_v12 = vor.u32 %v11912_v2, %v10388_v0  ;;  %v12071_v41 = vld [vmem:[%s12736_s16 + $0xb30] sm:$0xf0]  ;;  %v10820_v52 = vld [vmem:[%s12736_s16 + $0x990] sm:$0xf] }
 0x4a9   : > { %6825 = vmatpush.bf16.msra.mxu0 %v10449_v8  ;;  %6794 = vmatmul.bf16.vlgmr.msrb.gmra.mxu1 %v13079_v51  ;;  %v10580_v8 = vld [vmem:[%s12736_s16 + $0x7b0] sm:$0xf]  ;;  %v10485_v14 = vor.u32 %v11936_v7, %v10484_v3  ;;  %v12020_v57 = vld [vmem:[%s12736_s16 + $0x998] sm:$0xf0]  ;;  %v4652_v7 = vld [vmem:[#allocation1 + $0x1b] sm:$0xff] }
 0x4aa   : > { %6838 = vmatpush.bf16.msra.mxu1 %v10545_v43  ;;  %6807 = vmatmul.bf16.vlgmr.msrb.gmra.mxu2 %v13072_v46  ;;  %v11960_v43 = vld [vmem:[%s12736_s16 + $0x7b8] sm:$0xf0]  ;;  %v10916_v4 = vld [vmem:[%s12736_s16 + $0xa50] sm:$0xf]  ;;  %v12041_v18 = vld [vmem:[%s12736_s16 + $0xa40] sm:$0xf0] }
 0x4ab   : > { %6851 = vmatpush.bf16.msra.mxu2 %v10641_v10  ;;  %6820 = vmatmul.bf16.vlgmr.msrb.gmra.mxu3 %v13077_v56  ;;  %v10676_v10 = vld [vmem:[%s12736_s16 + $0x870] sm:$0xf]  ;;  %v12044_v1 = vld [vmem:[%s12736_s16 + $0xa58] sm:$0xf0]  ;;  %v11000_v19 = vld [vmem:[%s12736_s16 + $0xaf8] sm:$0xf] }
 0x4ac   : > { %6864 = vmatpush.bf16.msra.mxu3 %v10737_v15  ;;  %v10581_v15 = vor.u32 %v11960_v43, %v10580_v8  ;;  %v10677_v21 = vor.u32 %v11984_v11, %v10676_v10  ;;  %v11108_v0 = vld [vmem:[%s12736_s16 + $0xbd0] sm:$0xf]  ;;  %v12092_v2 = vld [vmem:[%s12736_s16 + $0xbd8] sm:$0xf0]  ;;  %v10821_v8 = vor.u32 %v12020_v57, %v10820_v52  ;;  %v10917_v43 = vor.u32 %v12044_v1, %v10916_v4  ;;  %v10808_v11 = vld [vmem:[%s12736_s16 + $0x978] sm:$0xf] }
 0x4ad   : > { %6826 = vmatpush.bf16.msra.mxu0 %v10437_v61  ;;  %v10568_v61 = vld [vmem:[%s12736_s16 + $0x798] sm:$0xf]  ;;  %v4651_v3 = vld [vmem:[#allocation1 + $0x12] sm:$0xff]  ;;  %v12065_v20 = vld [vmem:[%s12736_s16 + $0xb00] sm:$0xf0] }
 0x4ae   : > { %6839 = vmatpush.bf16.msra.mxu1 %v10533_v17  ;;  %v11957_v17 = vld [vmem:[%s12736_s16 + $0x7a0] sm:$0xf0]  ;;  %v12062_v29 = vld [vmem:[%s12736_s16 + $0xae8] sm:$0xf0]  ;;  %v11084_v31 = vld [vmem:[%s12736_s16 + $0xba0] sm:$0xf] }
 0x4af   : > { %6852 = vmatpush.bf16.msra.mxu2 %v10629_v22  ;;  %v10664_v22 = vld [vmem:[%s12736_s16 + $0x858] sm:$0xf]  ;;  %v10569_v16 = vor.u32 %v11957_v17, %v10568_v61  ;;  %v12089_v55 = vld [vmem:[%s12736_s16 + $0xbc0] sm:$0xf0]  ;;  %v12011_v36 = vld [vmem:[%s12736_s16 + $0x950] sm:$0xf0] }
 0x4b0   : > { %6865 = vmatpush.bf16.msra.mxu3 %v10725_v28  ;;  %v11906_v28 = vld [vmem:[%s12736_s16 + $0x608] sm:$0xf0]  ;;  %v10880_v37 = vld [vmem:[%s12736_s16 + $0xa08] sm:$0xf]  ;;  %v12032_v52 = vld [vmem:[%s12736_s16 + $0x9f8] sm:$0xf0] }
 0x4b1   : > { %6827 = vmatpush.bf16.msra.mxu0 %v10425_v33  ;;  %v10665_v33 = vor.u32 %v11981_v58, %v10664_v22  ;;  %v10365_v39 = vor.u32 %v11906_v28, %v10364_v27  ;;  %v11001_v22 = vor.u32 %v12065_v20, %v11000_v19  ;;  %v10796_v58 = vld [vmem:[%s12736_s16 + $0x960] sm:$0xf]  ;;  %v10964_v57 = vld [vmem:[%s12736_s16 + $0xab0] sm:$0xf]  ;;  %v12056_v4 = vld [vmem:[%s12736_s16 + $0xab8] sm:$0xf0] }
 0x4b2   : > { %6840 = vmatpush.bf16.msra.mxu1 %v10521_v34  ;;  %v11954_v34 = vld [vmem:[%s12736_s16 + $0x788] sm:$0xf0]  ;;  %v10892_v27 = vld [vmem:[%s12736_s16 + $0xa20] sm:$0xf]  ;;  %v12080_v1 = vld [vmem:[%s12736_s16 + $0xb78] sm:$0xf0] }
 0x4b3   : > { %6853 = vmatpush.bf16.msra.mxu2 %v10617_v35  ;;  %v10652_v35 = vld [vmem:[%s12736_s16 + $0x840] sm:$0xf] }
 0x4b4   : > { %6866 = vmatpush.bf16.msra.mxu3 %v10713_v9  ;;  %v10928_v9 = vld [vmem:[%s12736_s16 + $0xa68] sm:$0xf]  ;;  %v10653_v48 = vor.u32 %v11978_v59, %v10652_v35  ;;  %v10844_v20 = vld [vmem:[%s12736_s16 + $0x9c0] sm:$0xf] }
 0x4b5   : > { %6828 = vmatpush.bf16.msra.mxu0 %v10413_v44  ;;  %v10557_v44 = vor.u32 %v11954_v34, %v10556_v32  ;;  %v10929_v53 = vor.u32 %v12047_v40, %v10928_v9  ;;  %v12086_v32 = vld [vmem:[%s12736_s16 + $0xba8] sm:$0xf0]  ;;  %v10784_v59 = vld [vmem:[%s12736_s16 + $0x948] sm:$0xf] }
 0x4b6   : > { %6841 = vmatpush.bf16.msra.mxu1 %v10509_v45  ;;  %v11120_v45 = vld [vmem:[%s12736_s16 + $0xbe8] sm:$0xf]  ;;  %v11085_v9 = vor.u32 %v12086_v32, %v11084_v31  ;;  %v9874_v31 = vld [vmem:[%s12736_s16 + $0x234] sm:$0xf0] }
 0x4b7   : > { %6854 = vmatpush.bf16.msra.mxu2 %v10605_v47  ;;  %v12095_v47 = vld [vmem:[%s12736_s16 + $0xbf0] sm:$0xf0]  ;;  %v10976_v40 = vld [vmem:[%s12736_s16 + $0xac8] sm:$0xf] }
 0x4b8   : > { %6867 = vmatpush.bf16.msra.mxu3 %v10701_v54  ;;  %v11025_v54 = vor.u32 %v12071_v41, %v11024_v42  ;;  %v11121_v60 = vor.u32 %v12095_v47, %v11120_v45  ;;  %v12059_v42 = vld [vmem:[%s12736_s16 + $0xad0] sm:$0xf0]  ;;  %v11072_v41 = vld [vmem:[%s12736_s16 + $0xb88] sm:$0xf] }
 0x4b9   : > { %6829 = vmatpush.bf16.msra.mxu0 %v10401_v62  ;;  %v11012_v62 = vld [vmem:[%s12736_s16 + $0xb10] sm:$0xf]  ;;  %v10977_v47 = vor.u32 %v12059_v42, %v10976_v40  ;;  %v9670_v40 = vld [vmem:[%s12736_s16 + $0x9c] sm:$0xf0]  ;;  %v11755_v42 = vld [vmem:[%s12736_s16 + $0x154] sm:$0xf] }
 0x4ba   : > { %6842 = vmatpush.bf16.msra.mxu1 %v10497_v63  ;;  %v12068_v63 = vld [vmem:[%s12736_s16 + $0xb18] sm:$0xf0] }
 0x4bb   : > { %6855 = vmatpush.bf16.msra.mxu2 %v10593_v6  ;;  %v4649_v6 = vld [vmem:[#allocation1] sm:$0xff]  ;;  %v11013_v10 = vor.u32 %v12068_v63, %v11012_v62 }
 0x4bc   : > { %6868 = vmatpush.bf16.msra.mxu3 %v10689_v24  ;;  %v4650_v24 = vld [vmem:[#allocation1 + $0x9] sm:$0xff] }
 0x4bd   : > { %6830 = vmatpush.bf16.msra.mxu0 %v10389_v12  ;;  %v12017_v12 = vld [vmem:[%s12736_s16 + $0x980] sm:$0xf0] }
 0x4be   : > { %6843 = vmatpush.bf16.msra.mxu1 %v10485_v14  ;;  %v10904_v14 = vld [vmem:[%s12736_s16 + $0xa38] sm:$0xf]  ;;  %v10809_v61 = vor.u32 %v12017_v12, %v10808_v11  ;;  %v12077_v11 = vld [vmem:[%s12736_s16 + $0xb60] sm:$0xf0] }
 0x4bf   : > { %6856 = vmatpush.bf16.msra.mxu2 %v10581_v15  ;;  %v11109_v15 = vor.u32 %v12092_v2, %v11108_v0  ;;  %v10905_v17 = vor.u32 %v12041_v18, %v10904_v14  ;;  %v10760_v0 = vld [vmem:[%s12736_s16 + $0x918] sm:$0xf]  ;;  %v12005_v2 = vld [vmem:[%s12736_s16 + $0x920] sm:$0xf0]  ;;  %v10748_v14 = vld [vmem:[%s12736_s16 + $0x900] sm:$0xf] }
 0x4c0   : > { %6869 = vmatpush.bf16.msra.mxu3 %v10677_v21  ;;  %v11096_v21 = vld [vmem:[%s12736_s16 + $0xbb8] sm:$0xf]  ;;  %v10761_v12 = vor.u32 %v12005_v2, %v10760_v0  ;;  %v9754_v0 = vld [vmem:[%s12736_s16 + $0x144] sm:$0xf0]  ;;  %v11776_v2 = vld [vmem:[%s12736_s16 + $0x1fc] sm:$0xf] }
 0x4c1   : > { %6831 = vmatpush.bf16.msra.mxu0 %v10377_v23  ;;  %v12014_v23 = vld [vmem:[%s12736_s16 + $0x968] sm:$0xf0]  ;;  %v11097_v28 = vor.u32 %v12089_v55, %v11096_v21  ;;  %v10940_v55 = vld [vmem:[%s12736_s16 + $0xa80] sm:$0xf] }
 0x4c2   : > { %6844 = vmatpush.bf16.msra.mxu1 %v10473_v26  ;;  %v12038_v26 = vld [vmem:[%s12736_s16 + $0xa28] sm:$0xf0] }
 0x4c3   : > { %6857 = vmatpush.bf16.msra.mxu2 %v10569_v16  ;;  %v10988_v16 = vld [vmem:[%s12736_s16 + $0xae0] sm:$0xf]  ;;  %v10893_v34 = vor.u32 %v12038_v26, %v10892_v27  ;;  %v12026_v21 = vld [vmem:[%s12736_s16 + $0x9c8] sm:$0xf0]  ;;  %v9682_v27 = vld [vmem:[%s12736_s16 + $0xb4] sm:$0xf0] }
 0x4c4   : > { %6870 = vmatpush.bf16.msra.mxu3 %v10665_v33  ;;  %v10797_v33 = vor.u32 %v12014_v23, %v10796_v58  ;;  %v10989_v35 = vor.u32 %v12062_v29, %v10988_v16  ;;  %v12074_v58 = vld [vmem:[%s12736_s16 + $0xb48] sm:$0xf0]  ;;  %v9778_v16 = vld [vmem:[%s12736_s16 + $0x174] sm:$0xf0]  ;;  %v10845_v32 = vor.u32 %v12026_v21, %v10844_v20  ;;  %v9838_v20 = vld [vmem:[%s12736_s16 + $0x1ec] sm:$0xf0] }
 0x4c5   : > { %6832 = vmatpush.bf16.msra.mxu0 %v10365_v39  ;;  %v12035_v39 = vld [vmem:[%s12736_s16 + $0xa10] sm:$0xf0]  ;;  %v11734_v23 = vld [vmem:[%s12736_s16 + $0xac] sm:$0xf]  ;;  %v11797_v21 = vld [vmem:[%s12736_s16 + $0x2a4] sm:$0xf] }
 0x4c6   : > { %6845 = vmatpush.bf16.msra.mxu1 %v10461_v38  ;;  %v12083_v38 = vld [vmem:[%s12736_s16 + $0xb90] sm:$0xf0]  ;;  %v10881_v45 = vor.u32 %v12035_v39, %v10880_v37  ;;  %v11782_v29 = vld [vmem:[%s12736_s16 + $0x22c] sm:$0xf] }
 0x4c7   : > { %6858 = vmatpush.bf16.msra.mxu2 %v10557_v44  ;;  %v10785_v44 = vor.u32 %v12011_v36, %v10784_v59  ;;  %v9685_v36 = vor.u32 %v11734_v23, %v9682_v27  ;;  %v11731_v39 = vld [vmem:[%s12736_s16 + $0x94] sm:$0xf]  ;;  %v9634_v23 = vld [vmem:[%s12736_s16 + $0x54] sm:$0xf0]  ;;  %v11746_v27 = vld [vmem:[%s12736_s16 + $0x10c] sm:$0xf] }
 0x4c8   : > { %6871 = vmatpush.bf16.msra.mxu3 %v10653_v48  ;;  %6833 = vmatmul.bf16.vlgmr.msra.gmra.mxu0 %v4649_v6  ;;  %v10772_v48 = vld [vmem:[%s12736_s16 + $0x930] sm:$0xf]  ;;  %v10965_v6 = vor.u32 %v12056_v4, %v10964_v57  ;;  %v9673_v57 = vor.u32 %v11731_v39, %v9670_v40  ;;  %v9718_v39 = vld [vmem:[%s12736_s16 + $0xfc] sm:$0xf0]  ;;  %v11767_v40 = vld [vmem:[%s12736_s16 + $0x1b4] sm:$0xf] }
 0x4c9   : > { %6877 = vmatpush.bf16.msrb.mxu0 %v10833_v49  ;;  %6846 = vmatmul.bf16.vlgmr.msra.gmra.mxu1 %v4650_v24  ;;  %v12008_v49 = vld [vmem:[%s12736_s16 + $0x938] sm:$0xf0] }
 0x4ca   : > { %6890 = vmatpush.bf16.msrb.mxu1 %v10929_v53  ;;  %6859 = vmatmul.bf16.vlgmr.msra.gmra.mxu2 %v4651_v3  ;;  %v10868_v53 = vld [vmem:[%s12736_s16 + $0x9f0] sm:$0xf]  ;;  %v10773_v62 = vor.u32 %v12008_v49, %v10772_v48  ;;  %v10856_v3 = vld [vmem:[%s12736_s16 + $0x9d8] sm:$0xf]  ;;  %v11803_v48 = vld [vmem:[%s12736_s16 + $0x2d4] sm:$0xf] }
 0x4cb   : > { %6903 = vmatpush.bf16.msrb.mxu2 %v11025_v54  ;;  %6872 = vmatmul.bf16.vlgmr.msra.gmra.mxu3 %v4652_v7  ;;  %v11073_v54 = vor.u32 %v12083_v38, %v11072_v41  ;;  %v10869_v63 = vor.u32 %v12032_v52, %v10868_v53  ;;  %v12029_v7 = vld [vmem:[%s12736_s16 + $0x9e0] sm:$0xf0]  ;;  %v9766_v38 = vld [vmem:[%s12736_s16 + $0x15c] sm:$0xf0]  ;;  %v4656_v52 = vld [vmem:[#allocation1 + $0x3f] sm:$0xff] }
 0x4cc   : > { %6916 = vmatpush.bf16.msrb.mxu3 %v11121_v60  ;;  %v11060_v60 = vld [vmem:[%s12736_s16 + $0xb70] sm:$0xf]  ;;  %v10857_v18 = vor.u32 %v12029_v7, %v10856_v3  ;;  %v9958_v49 = vld [vmem:[%s12736_s16 + $0x2dc] sm:$0xf0]  ;;  %v9769_v4 = vor.u32 %v11755_v42, %v9766_v38  ;;  %v9850_v3 = vld [vmem:[%s12736_s16 + $0x204] sm:$0xf0] }
 0x4cd   : > { %6878 = vmatpush.bf16.msrb.mxu0 %v10821_v8  ;;  %v11061_v24 = vor.u32 %v12080_v1, %v11060_v60  ;;  %v10952_v8 = vld [vmem:[%s12736_s16 + $0xa98] sm:$0xf]  ;;  %v4655_v53 = vld [vmem:[#allocation1 + $0x36] sm:$0xff]  ;;  %v11728_v1 = vld [vmem:[%s12736_s16 + $0x7c] sm:$0xf] }
 0x4ce   : > { %6891 = vmatpush.bf16.msrb.mxu1 %v10917_v43  ;;  %v12053_v43 = vld [vmem:[%s12736_s16 + $0xaa0] sm:$0xf0]  ;;  %v9946_v7 = vld [vmem:[%s12736_s16 + $0x2c4] sm:$0xf0]  ;;  %v9814_v42 = vld [vmem:[%s12736_s16 + $0x1bc] sm:$0xf0] }
 0x4cf   : > { %6904 = vmatpush.bf16.msrb.mxu2 %v11013_v10  ;;  %v11048_v10 = vld [vmem:[%s12736_s16 + $0xb58] sm:$0xf]  ;;  %v10953_v19 = vor.u32 %v12053_v43, %v10952_v8  ;;  %v9910_v38 = vld [vmem:[%s12736_s16 + $0x27c] sm:$0xf0] }
 0x4d0   : > { %6917 = vmatpush.bf16.msrb.mxu3 %v11109_v15  ;;  %v12002_v15 = vld [vmem:[%s12736_s16 + $0x908] sm:$0xf0] }
 0x4d1   : > { %6879 = vmatpush.bf16.msrb.mxu0 %v10809_v61  ;;  %v11049_v61 = vor.u32 %v12077_v11, %v11048_v10  ;;  %v10749_v26 = vor.u32 %v12002_v15, %v10748_v14  ;;  %v9853_v10 = vor.u32 %v11776_v2, %v9850_v3  ;;  %v11725_v11 = vld [vmem:[%s12736_s16 + $0x64] sm:$0xf] }
 0x4d2   : > { %6892 = vmatpush.bf16.msrb.mxu1 %v10905_v17  ;;  %v12050_v17 = vld [vmem:[%s12736_s16 + $0xa88] sm:$0xf0]  ;;  %v11749_v14 = vld [vmem:[%s12736_s16 + $0x124] sm:$0xf] }
 0x4d3   : > { %6905 = vmatpush.bf16.msrb.mxu2 %v11001_v22  ;;  %v11036_v22 = vld [vmem:[%s12736_s16 + $0xb40] sm:$0xf]  ;;  %v11737_v3 = vld [vmem:[%s12736_s16 + $0xc4] sm:$0xf] }
 0x4d4   : > { %6918 = vmatpush.bf16.msrb.mxu3 %v11097_v28  ;;  %v11758_v28 = vld [vmem:[%s12736_s16 + $0x16c] sm:$0xf]  ;;  %v11037_v59 = vor.u32 %v12074_v58, %v11036_v22 }
 0x4d5   : > { %6880 = vmatpush.bf16.msrb.mxu0 %v10797_v33  ;;  %v10941_v33 = vor.u32 %v12050_v17, %v10940_v55  ;;  %v9781_v37 = vor.u32 %v11758_v28, %v9778_v16  ;;  %v9934_v55 = vld [vmem:[%s12736_s16 + $0x2ac] sm:$0xf0]  ;;  %v11722_v58 = vld [vmem:[%s12736_s16 + $0x4c] sm:$0xf] }
 0x4d6   : > { %6893 = vmatpush.bf16.msrb.mxu1 %v10893_v34  ;;  %v11806_v34 = vld [vmem:[%s12736_s16 + $0x2ec] sm:$0xf]  ;;  %v9937_v28 = vor.u32 %v11797_v21, %v9934_v55  ;;  %v10258_v21 = vld [vmem:[%s12736_s16 + $0x534] sm:$0xf0] }
 0x4d7   : > { %6906 = vmatpush.bf16.msrb.mxu2 %v10989_v35  ;;  %v9970_v35 = vld [vmem:[%s12736_s16 + $0x2f4] sm:$0xf0]  ;;  %v11770_v16 = vld [vmem:[%s12736_s16 + $0x1cc] sm:$0xf] }
 0x4d8   : > { %6919 = vmatpush.bf16.msrb.mxu3 %v11085_v9  ;;  %v9877_v9 = vor.u32 %v11782_v29, %v9874_v31  ;;  %v9973_v41 = vor.u32 %v11806_v34, %v9970_v35  ;;  %v9826_v29 = vld [vmem:[%s12736_s16 + $0x1d4] sm:$0xf0]  ;;  %v11794_v31 = vld [vmem:[%s12736_s16 + $0x28c] sm:$0xf] }
 0x4d9   : > { %6881 = vmatpush.bf16.msrb.mxu0 %v10785_v44  ;;  %v11779_v44 = vld [vmem:[%s12736_s16 + $0x214] sm:$0xf]  ;;  %v9829_v35 = vor.u32 %v11770_v16, %v9826_v29  ;;  %v10054_v16 = vld [vmem:[%s12736_s16 + $0x39c] sm:$0xf0] }
 0x4da   : > { %6894 = vmatpush.bf16.msrb.mxu1 %v10881_v45  ;;  %v9862_v45 = vld [vmem:[%s12736_s16 + $0x21c] sm:$0xf0]  ;;  %v11851_v29 = vld [vmem:[%s12736_s16 + $0x454] sm:$0xf] }
 0x4db   : > { %6907 = vmatpush.bf16.msrb.mxu2 %v10977_v47  ;;  %v4653_v47 = vld [vmem:[#allocation1 + $0x24] sm:$0xff]  ;;  %v9865_v60 = vor.u32 %v11779_v44, %v9862_v45 }
 0x4dc   : > { %6920 = vmatpush.bf16.msrb.mxu3 %v11073_v54  ;;  %v4654_v54 = vld [vmem:[#allocation1 + $0x2d] sm:$0xff] }
 0x4dd   : > { %6882 = vmatpush.bf16.msrb.mxu0 %v10773_v62  ;;  %v9658_v62 = vld [vmem:[%s12736_s16 + $0x84] sm:$0xf0] }
 0x4de   : > { %6895 = vmatpush.bf16.msrb.mxu1 %v10869_v63  ;;  %v11752_v63 = vld [vmem:[%s12736_s16 + $0x13c] sm:$0xf]  ;;  %v9661_v8 = vor.u32 %v11728_v1, %v9658_v62  ;;  %v9898_v1 = vld [vmem:[%s12736_s16 + $0x264] sm:$0xf0] }
 0x4df   : > { %6908 = vmatpush.bf16.msrb.mxu2 %v10965_v6  ;;  %v9961_v6 = vor.u32 %v11803_v48, %v9958_v49  ;;  %v9757_v43 = vor.u32 %v11752_v63, %v9754_v0  ;;  %v11716_v48 = vld [vmem:[%s12736_s16 + $0x1c] sm:$0xf]  ;;  %v9610_v49 = vld [vmem:[%s12736_s16 + $0x24] sm:$0xf0]  ;;  %v11713_v63 = vld [vmem:[%s12736_s16 + $0x4] sm:$0xf] }
 0x4e0   : > { %6921 = vmatpush.bf16.msrb.mxu3 %v11061_v24  ;;  %v11800_v24 = vld [vmem:[%s12736_s16 + $0x2bc] sm:$0xf]  ;;  %v9613_v62 = vor.u32 %v11716_v48, %v9610_v49  ;;  %v10330_v48 = vld [vmem:[%s12736_s16 + $0x5c4] sm:$0xf0] }
 0x4e1   : > { %6883 = vmatpush.bf16.msrb.mxu0 %v10761_v12  ;;  %v9646_v12 = vld [vmem:[%s12736_s16 + $0x6c] sm:$0xf0]  ;;  %v9949_v15 = vor.u32 %v11800_v24, %v9946_v7  ;;  %v11761_v7 = vld [vmem:[%s12736_s16 + $0x184] sm:$0xf] }
 0x4e2   : > { %6896 = vmatpush.bf16.msrb.mxu1 %v10857_v18  ;;  %v9742_v18 = vld [vmem:[%s12736_s16 + $0x12c] sm:$0xf0] }
 0x4e3   : > { %6909 = vmatpush.bf16.msrb.mxu2 %v10953_v19  ;;  %v11773_v19 = vld [vmem:[%s12736_s16 + $0x1e4] sm:$0xf]  ;;  %v9745_v17 = vor.u32 %v11749_v14, %v9742_v18  ;;  %v9694_v24 = vld [vmem:[%s12736_s16 + $0xcc] sm:$0xf0]  ;;  %v10066_v14 = vld [vmem:[%s12736_s16 + $0x3b4] sm:$0xf0] }
 0x4e4   : > { %6922 = vmatpush.bf16.msrb.mxu3 %v11049_v61  ;;  %v9649_v61 = vor.u32 %v11725_v11, %v9646_v12  ;;  %v9841_v22 = vor.u32 %v11773_v19, %v9838_v20  ;;  %v9886_v11 = vld [vmem:[%s12736_s16 + $0x24c] sm:$0xf0]  ;;  %v11830_v12 = vld [vmem:[%s12736_s16 + $0x3ac] sm:$0xf]  ;;  %v10162_v19 = vld [vmem:[%s12736_s16 + $0x474] sm:$0xf0]  ;;  %v9697_v55 = vor.u32 %v11737_v3, %v9694_v24 }
 0x4e5   : > { %6884 = vmatpush.bf16.msrb.mxu0 %v10749_v26  ;;  %v9730_v26 = vld [vmem:[%s12736_s16 + $0x114] sm:$0xf0]  ;;  %v11878_v20 = vld [vmem:[%s12736_s16 + $0x52c] sm:$0xf] }
 0x4e6   : > { %6897 = vmatpush.bf16.msrb.mxu1 %v10845_v32  ;;  %v9922_v32 = vld [vmem:[%s12736_s16 + $0x294] sm:$0xf0]  ;;  %v9733_v34 = vor.u32 %v11746_v27, %v9730_v26  ;;  %v11827_v26 = vld [vmem:[%s12736_s16 + $0x394] sm:$0xf] }
 0x4e7   : > { %6910 = vmatpush.bf16.msrb.mxu2 %v10941_v33  ;;  %v9637_v33 = vor.u32 %v11722_v58, %v9634_v23  ;;  %v10069_v23 = vor.u32 %v11830_v12, %v10066_v14  ;;  %v11866_v12 = vld [vmem:[%s12736_s16 + $0x4cc] sm:$0xf]  ;;  %v10210_v14 = vld [vmem:[%s12736_s16 + $0x4d4] sm:$0xf0] }
 0x4e8   : > { %6923 = vmatpush.bf16.msrb.mxu3 %v11037_v59  ;;  %6885 = vmatmul.bf16.vlgmr.msrb.gmra.mxu0 %v4653_v47  ;;  %v11719_v59 = vld [vmem:[%s12736_s16 + $0x34] sm:$0xf]  ;;  %v9817_v47 = vor.u32 %v11767_v40, %v9814_v42  ;;  %v10042_v40 = vld [vmem:[%s12736_s16 + $0x384] sm:$0xf0]  ;;  %v11848_v42 = vld [vmem:[%s12736_s16 + $0x43c] sm:$0xf] }
 0x4e9   : > { %6929 = vmatpush.bf16.msra.mxu0 %v9685_v36  ;;  %6898 = vmatmul.bf16.vlgmr.msrb.gmra.mxu1 %v4654_v54  ;;  %v9622_v36 = vld [vmem:[%s12736_s16 + $0x3c] sm:$0xf0] }
 0x4ea   : > { %6942 = vmatpush.bf16.msra.mxu1 %v9781_v37  ;;  %6911 = vmatmul.bf16.vlgmr.msrb.gmra.mxu2 %v4655_v53  ;;  %v11743_v37 = vld [vmem:[%s12736_s16 + $0xf4] sm:$0xf]  ;;  %v9625_v44 = vor.u32 %v11719_v59, %v9622_v36  ;;  %v11740_v53 = vld [vmem:[%s12736_s16 + $0xdc] sm:$0xf]  ;;  %v10342_v59 = vld [vmem:[%s12736_s16 + $0x5dc] sm:$0xf0]  ;;  %v10057_v36 = vor.u32 %v11827_v26, %v10054_v16 }
 0x4eb   : > { %6955 = vmatpush.bf16.msra.mxu2 %v9877_v9  ;;  %6924 = vmatmul.bf16.vlgmr.msrb.gmra.mxu3 %v4656_v52  ;;  %v9925_v9 = vor.u32 %v11794_v31, %v9922_v32  ;;  %v9721_v45 = vor.u32 %v11743_v37, %v9718_v39  ;;  %v9706_v52 = vld [vmem:[%s12736_s16 + $0xe4] sm:$0xf0]  ;;  %v10150_v32 = vld [vmem:[%s12736_s16 + $0x45c] sm:$0xf0]  ;;  %v11824_v39 = vld [vmem:[%s12736_s16 + $0x37c] sm:$0xf] }
 0x4ec   : > { %6968 = vmatpush.bf16.msra.mxu3 %v9973_v41  ;;  %v11791_v41 = vld [vmem:[%s12736_s16 + $0x274] sm:$0xf]  ;;  %v9709_v0 = vor.u32 %v11740_v53, %v9706_v52  ;;  %v10153_v37 = vor.u32 %v11851_v29, %v10150_v32  ;;  %v10045_v49 = vor.u32 %v11824_v39, %v10042_v40  ;;  %v11821_v52 = vld [vmem:[%s12736_s16 + $0x364] sm:$0xf]  ;;  %v10294_v26 = vld [vmem:[%s12736_s16 + $0x57c] sm:$0xf0] }
 0x4ed   : > { %6930 = vmatpush.bf16.msra.mxu0 %v9673_v57  ;;  %v9913_v54 = vor.u32 %v11791_v41, %v9910_v38  ;;  %v11764_v57 = vld [vmem:[%s12736_s16 + $0x19c] sm:$0xf]  ;;  %v10138_v38 = vld [vmem:[%s12736_s16 + $0x444] sm:$0xf0] }
 0x4ee   : > { %6943 = vmatpush.bf16.msra.mxu1 %v9769_v4  ;;  %v9802_v4 = vld [vmem:[%s12736_s16 + $0x1a4] sm:$0xf0]  ;;  %v10141_v53 = vor.u32 %v11848_v42, %v10138_v38  ;;  %v11884_v42 = vld [vmem:[%s12736_s16 + $0x55c] sm:$0xf] }
 0x4ef   : > { %6956 = vmatpush.bf16.msra.mxu2 %v9865_v60  ;;  %v11788_v60 = vld [vmem:[%s12736_s16 + $0x25c] sm:$0xf]  ;;  %v9805_v2 = vor.u32 %v11764_v57, %v9802_v4  ;;  %v10030_v57 = vld [vmem:[%s12736_s16 + $0x36c] sm:$0xf0]  ;;  %v11845_v4 = vld [vmem:[%s12736_s16 + $0x424] sm:$0xf] }
 0x4f0   : > { %6969 = vmatpush.bf16.msra.mxu3 %v9961_v6  ;;  %v9598_v6 = vld [vmem:[%s12736_s16 + $0xc] sm:$0xf0]  ;;  %v10186_v39 = vld [vmem:[%s12736_s16 + $0x4a4] sm:$0xf0] }
 0x4f1   : > { %6931 = vmatpush.bf16.msra.mxu0 %v9661_v8  ;;  %v9901_v8 = vor.u32 %v11788_v60, %v9898_v1  ;;  %v9601_v18 = vor.u32 %v11713_v63, %v9598_v6  ;;  %v10126_v1 = vld [vmem:[%s12736_s16 + $0x42c] sm:$0xf0]  ;;  %v11893_v6 = vld [vmem:[%s12736_s16 + $0x5a4] sm:$0xf] }
 0x4f2   : > { %6944 = vmatpush.bf16.msra.mxu1 %v9757_v43  ;;  %v9790_v43 = vld [vmem:[%s12736_s16 + $0x18c] sm:$0xf0]  ;;  %v10129_v3 = vor.u32 %v11845_v4, %v10126_v1 }
 0x4f3   : > { %6957 = vmatpush.bf16.msra.mxu2 %v9853_v10  ;;  %v11785_v10 = vld [vmem:[%s12736_s16 + $0x244] sm:$0xf]  ;;  %v10222_v63 = vld [vmem:[%s12736_s16 + $0x4ec] sm:$0xf0] }
 0x4f4   : > { %6970 = vmatpush.bf16.msra.mxu3 %v9949_v15  ;;  %v11854_v15 = vld [vmem:[%s12736_s16 + $0x46c] sm:$0xf]  ;;  %v9889_v58 = vor.u32 %v11785_v10, %v9886_v11  ;;  %v10114_v11 = vld [vmem:[%s12736_s16 + $0x414] sm:$0xf0]  ;;  %v10174_v4 = vld [vmem:[%s12736_s16 + $0x48c] sm:$0xf0] }
 0x4f5   : > { %6932 = vmatpush.bf16.msra.mxu0 %v9649_v61  ;;  %v9793_v61 = vor.u32 %v11761_v7, %v9790_v43  ;;  %v10165_v27 = vor.u32 %v11854_v15, %v10162_v19  ;;  %v11818_v7 = vld [vmem:[%s12736_s16 + $0x34c] sm:$0xf]  ;;  %v10270_v1 = vld [vmem:[%s12736_s16 + $0x54c] sm:$0xf0] }
 0x4f6   : > { %6945 = vmatpush.bf16.msra.mxu1 %v9745_v17  ;;  %v11902_v17 = vld [vmem:[%s12736_s16 + $0x5ec] sm:$0xf] }
 0x4f7   : > { %6958 = vmatpush.bf16.msra.mxu2 %v9841_v22  ;;  %v10354_v22 = vld [vmem:[%s12736_s16 + $0x5f4] sm:$0xf0]  ;;  %v11842_v43 = vld [vmem:[%s12736_s16 + $0x40c] sm:$0xf] }
 0x4f8   : > { %6971 = vmatpush.bf16.msra.mxu3 %v9937_v28  ;;  %v10261_v28 = vor.u32 %v11878_v20, %v10258_v21  ;;  %v10357_v31 = vor.u32 %v11902_v17, %v10354_v22  ;;  %v11890_v15 = vld [vmem:[%s12736_s16 + $0x58c] sm:$0xf]  ;;  %v10117_v20 = vor.u32 %v11842_v43, %v10114_v11  ;;  %v10213_v21 = vor.u32 %v11866_v12, %v10210_v14  ;;  %v11839_v17 = vld [vmem:[%s12736_s16 + $0x3f4] sm:$0xf] }
 0x4f9   : > { %6933 = vmatpush.bf16.msra.mxu0 %v9637_v33  ;;  %v11875_v33 = vld [vmem:[%s12736_s16 + $0x514] sm:$0xf]  ;;  %v11998_v14 = vld [vmem:[%s12736_s16 + $0x8ec] sm:$0xf] }
 0x4fa   : > { %6946 = vmatpush.bf16.msra.mxu1 %v9733_v34  ;;  %v10246_v34 = vld [vmem:[%s12736_s16 + $0x51c] sm:$0xf0] }
 0x4fb   : > { %6959 = vmatpush.bf16.msra.mxu2 %v9829_v35  ;;  %v11899_v35 = vld [vmem:[%s12736_s16 + $0x5d4] sm:$0xf] }
 0x4fc   : > { %6972 = vmatpush.bf16.msra.mxu3 %v9925_v9  ;;  %v10249_v9 = vor.u32 %v11875_v33, %v10246_v34  ;;  %v10345_v41 = vor.u32 %v11899_v35, %v10342_v59  ;;  %v11812_v33 = vld [vmem:[%s12736_s16 + $0x31c] sm:$0xf]  ;;  %v9994_v34 = vld [vmem:[%s12736_s16 + $0x324] sm:$0xf0] }
 0x4fd   : > { %6934 = vmatpush.bf16.msra.mxu0 %v9625_v44  ;;  %v11872_v44 = vld [vmem:[%s12736_s16 + $0x4fc] sm:$0xf]  ;;  %v9997_v38 = vor.u32 %v11812_v33, %v9994_v34 }
 0x4fe   : > { %6947 = vmatpush.bf16.msra.mxu1 %v9721_v45  ;;  %v10234_v45 = vld [vmem:[%s12736_s16 + $0x504] sm:$0xf0]  ;;  %v11836_v35 = vld [vmem:[%s12736_s16 + $0x3dc] sm:$0xf] }
 0x4ff   : > { %6960 = vmatpush.bf16.msra.mxu2 %v9817_v47  ;;  %v11896_v47 = vld [vmem:[%s12736_s16 + $0x5bc] sm:$0xf] }
 0x500   : > { %6973 = vmatpush.bf16.msra.mxu3 %v9913_v54  ;;  %v10237_v54 = vor.u32 %v11872_v44, %v10234_v45  ;;  %v10333_v60 = vor.u32 %v11896_v47, %v10330_v48  ;;  %v11809_v44 = vld [vmem:[%s12736_s16 + $0x304] sm:$0xf]  ;;  %v9982_v45 = vld [vmem:[%s12736_s16 + $0x30c] sm:$0xf0] }
 0x501   : > { %6935 = vmatpush.bf16.msra.mxu0 %v9613_v62  ;;  %v11869_v62 = vld [vmem:[%s12736_s16 + $0x4e4] sm:$0xf] }
 0x502   : > { %6948 = vmatpush.bf16.msra.mxu1 %v9709_v0  ;;  %v10318_v0 = vld [vmem:[%s12736_s16 + $0x5ac] sm:$0xf0]  ;;  %v10225_v24 = vor.u32 %v11869_v62, %v10222_v63 }
 0x503   : > { %6961 = vmatpush.bf16.msra.mxu2 %v9805_v2  ;;  %v10033_v2 = vor.u32 %v11821_v52, %v10030_v57  ;;  %v10321_v10 = vor.u32 %v11893_v6, %v10318_v0  ;;  %v11926_v6 = vld [vmem:[%s12736_s16 + $0x6ac] sm:$0xf]  ;;  %v10450_v0 = vld [vmem:[%s12736_s16 + $0x6b4] sm:$0xf0] }
 0x504   : > { %6974 = vmatpush.bf16.msra.mxu3 %v9901_v8  ;;  %v10018_v8 = vld [vmem:[%s12736_s16 + $0x354] sm:$0xf0] }
 0x505   : > { %6936 = vmatpush.bf16.msra.mxu0 %v9601_v18  ;;  %v10306_v18 = vld [vmem:[%s12736_s16 + $0x594] sm:$0xf0]  ;;  %v10021_v19 = vor.u32 %v11818_v7, %v10018_v8  ;;  %v11974_v7 = vld [vmem:[%s12736_s16 + $0x82c] sm:$0xf] }
 0x506   : > { %6949 = vmatpush.bf16.msra.mxu1 %v9697_v55  ;;  %v11815_v55 = vld [vmem:[%s12736_s16 + $0x334] sm:$0xf]  ;;  %v10309_v22 = vor.u32 %v11890_v15, %v10306_v18  ;;  %v10642_v8 = vld [vmem:[%s12736_s16 + $0x834] sm:$0xf0] }
 0x507   : > { %6962 = vmatpush.bf16.msra.mxu2 %v9793_v61  ;;  %v10006_v61 = vld [vmem:[%s12736_s16 + $0x33c] sm:$0xf0]  ;;  %v10738_v15 = vld [vmem:[%s12736_s16 + $0x8f4] sm:$0xf0] }
 0x508   : > { %6975 = vmatpush.bf16.msra.mxu3 %v9889_v58  ;;  %6937 = vmatmul.bf16.vlgmr.msra.gmra.mxu0 %v13036_v5  ;;  %v10102_v58 = vld [vmem:[%s12736_s16 + $0x3fc] sm:$0xf0]  ;;  %v10009_v16 = vor.u32 %v11815_v55, %v10006_v61  ;;  %v6730_v29 = vpop.f32.mrf.mxu0  ;;  %v10645_v55 = vor.u32 %v11974_v7, %v10642_v8  ;;  %v11923_v61 = vld [vmem:[%s12736_s16 + $0x694] sm:$0xf] }
 0x509   : > { %6981 = vmatpush.bf16.msrb.mxu0 %v10069_v23  ;;  %6950 = vmatmul.bf16.vlgmr.msra.gmra.mxu1 %v13043_v13  ;;  %v11863_v23 = vld [vmem:[%s12736_s16 + $0x4b4] sm:$0xf] }
 0x50a   : > { %6994 = vmatpush.bf16.msrb.mxu1 %v10165_v27  ;;  %6963 = vmatmul.bf16.vlgmr.msra.gmra.mxu2 %v13034_v25  ;;  %v10198_v27 = vld [vmem:[%s12736_s16 + $0x4bc] sm:$0xf0] }
 0x50b   : > { %7007 = vmatpush.bf16.msrb.mxu2 %v10261_v28  ;;  %6976 = vmatmul.bf16.vlgmr.msra.gmra.mxu3 %v13038_v30  ;;  %v11887_v28 = vld [vmem:[%s12736_s16 + $0x574] sm:$0xf]  ;;  %v10201_v32 = vor.u32 %v11863_v23, %v10198_v27  ;;  %v10534_v23 = vld [vmem:[%s12736_s16 + $0x75c] sm:$0xf0] }
 0x50c   : > { %7020 = vmatpush.bf16.msrb.mxu3 %v10357_v31  ;;  %v10105_v31 = vor.u32 %v11839_v17, %v10102_v58  ;;  %v6743_v59 = vpop.f32.mrf.mxu1  ;;  %v10438_v17 = vld [vmem:[%s12736_s16 + $0x69c] sm:$0xf0]  ;;  %v10741_v58 = vor.u32 %v11998_v14, %v10738_v15  ;;  %v11971_v27 = vld [vmem:[%s12736_s16 + $0x814] sm:$0xf]  ;;  %v11986_v14 = vld [vmem:[%s12736_s16 + $0x88c] sm:$0xf] }
 0x50d   : > { %6982 = vmatpush.bf16.msrb.mxu0 %v10057_v36  ;;  %v10297_v36 = vor.u32 %v11887_v28, %v10294_v26  ;;  %v6744_v40 = vadd.f32 %v6743_v59, %v6730_v29  ;;  %v10630_v28 = vld [vmem:[%s12736_s16 + $0x81c] sm:$0xf0]  ;;  %v11995_v26 = vld [vmem:[%s12736_s16 + $0x8d4] sm:$0xf]  ;;  %v10426_v59 = vld [vmem:[%s12736_s16 + $0x684] sm:$0xf0] }
 0x50e   : > { %6995 = vmatpush.bf16.msrb.mxu1 %v10153_v37  ;;  %v10090_v37 = vld [vmem:[%s12736_s16 + $0x3e4] sm:$0xf0]  ;;  %v10633_v34 = vor.u32 %v11971_v27, %v10630_v28  ;;  %v10690_v15 = vld [vmem:[%s12736_s16 + $0x894] sm:$0xf0]  ;;  %v10582_v27 = vld [vmem:[%s12736_s16 + $0x7bc] sm:$0xf0] }
 0x50f   : > { %7008 = vmatpush.bf16.msrb.mxu2 %v10249_v9  ;;  %v11860_v9 = vld [vmem:[%s12736_s16 + $0x49c] sm:$0xf]  ;;  %v10093_v47 = vor.u32 %v11836_v35, %v10090_v37  ;;  %v6756_v52 = vpop.f32.mrf.mxu2 }
 0x510   : > { %7021 = vmatpush.bf16.msrb.mxu3 %v10345_v41  ;;  %v10282_v41 = vld [vmem:[%s12736_s16 + $0x564] sm:$0xf0]  ;;  %v10189_v48 = vor.u32 %v11860_v9, %v10186_v39  ;;  %v6757_v62 = vadd.f32 %v6756_v52, %v6744_v40  ;;  %v6769_v63 = vpop.f32.mrf.mxu3  ;;  %v11920_v35 = vld [vmem:[%s12736_s16 + $0x67c] sm:$0xf]  ;;  %v11965_v52 = vld [vmem:[%s12736_s16 + $0x7e4] sm:$0xf] }
 0x511   : > { %6983 = vmatpush.bf16.msrb.mxu0 %v10045_v49  ;;  %v11833_v49 = vld [vmem:[%s12736_s16 + $0x3c4] sm:$0xf]  ;;  %v10285_v57 = vor.u32 %v11884_v42, %v10282_v41  ;;  %v10522_v9 = vld [vmem:[%s12736_s16 + $0x744] sm:$0xf0]  ;;  %v11968_v39 = vld [vmem:[%s12736_s16 + $0x7fc] sm:$0xf] }
 0x512   : > { %6996 = vmatpush.bf16.msrb.mxu1 %v10141_v53  ;;  %v10078_v53 = vld [vmem:[%s12736_s16 + $0x3cc] sm:$0xf0]  ;;  %v13353_v43 = vadd.f32 %v6769_v63, %v6757_v62  ;;  %v10618_v40 = vld [vmem:[%s12736_s16 + $0x804] sm:$0xf0]  ;;  %v11992_v42 = vld [vmem:[%s12736_s16 + $0x8bc] sm:$0xf] }
 0x513   : > { %7009 = vmatpush.bf16.msrb.mxu2 %v10237_v54  ;;  %v11857_v54 = vld [vmem:[%s12736_s16 + $0x484] sm:$0xf]  ;;  %v10081_v11 = vor.u32 %v11833_v49, %v10078_v53  ;;  %v10714_v41 = vld [vmem:[%s12736_s16 + $0x8c4] sm:$0xf0] }
 0x514   : > { %7022 = vmatpush.bf16.msrb.mxu3 %v10333_v60  ;;  %v11881_v60 = vld [vmem:[%s12736_s16 + $0x544] sm:$0xf]  ;;  %v10177_v12 = vor.u32 %v11857_v54, %v10174_v4  ;;  %v6745_v18 = vpop.f32.mrf.mxu1  ;;  %v10717_v53 = vor.u32 %v11992_v42, %v10714_v41  ;;  %v10510_v54 = vld [vmem:[%s12736_s16 + $0x72c] sm:$0xf0]  ;;  %v11956_v42 = vld [vmem:[%s12736_s16 + $0x79c] sm:$0xf] }
 0x515   : > { %6984 = vmatpush.bf16.msrb.mxu0 %v10033_v2  ;;  %v11950_v2 = vld [vmem:[%s12736_s16 + $0x76c] sm:$0xf]  ;;  %v11941_v49 = vld [vmem:[%s12736_s16 + $0x724] sm:$0xf]  ;;  %v10570_v41 = vld [vmem:[%s12736_s16 + $0x7a4] sm:$0xf0] }
 0x516   : > { %6997 = vmatpush.bf16.msrb.mxu1 %v10129_v3  ;;  %v9985_v3 = vor.u32 %v11809_v44, %v9982_v45  ;;  %v10621_v45 = vor.u32 %v11968_v39, %v10618_v40  ;;  %v11989_v4 = vld [vmem:[%s12736_s16 + $0x8a4] sm:$0xf]  ;;  %v10513_v63 = vor.u32 %v11941_v49, %v10510_v54  ;;  %v10474_v40 = vld [vmem:[%s12736_s16 + $0x6e4] sm:$0xf0] }
 0x517   : > { %7010 = vmatpush.bf16.msrb.mxu2 %v10225_v24  ;;  %v10546_v24 = vld [vmem:[%s12736_s16 + $0x774] sm:$0xf0]  ;;  %v6758_v29 = vpop.f32.mrf.mxu2  ;;  %v11929_v54 = vld [vmem:[%s12736_s16 + $0x6c4] sm:$0xf] }
 0x518   : > { %7023 = vmatpush.bf16.msrb.mxu3 %v10321_v10  ;;  %v6732_v10 = vpop.f32.mrf.mxu0  ;;  %v10678_v29 = vld [vmem:[%s12736_s16 + $0x87c] sm:$0xf0] }
 0x519   : > { %6985 = vmatpush.bf16.msrb.mxu0 %v10021_v19  ;;  %v10273_v19 = vor.u32 %v11881_v60, %v10270_v1  ;;  %v10702_v60 = vld [vmem:[%s12736_s16 + $0x8ac] sm:$0xf0]  ;;  %v10498_v10 = vld [vmem:[%s12736_s16 + $0x714] sm:$0xf0] }
 0x51a   : > { %6998 = vmatpush.bf16.msrb.mxu1 %v10117_v20  ;;  %v10453_v20 = vor.u32 %v11926_v6, %v10450_v0  ;;  %v11914_v0 = vld [vmem:[%s12736_s16 + $0x64c] sm:$0xf]  ;;  %v10705_v8 = vor.u32 %v11989_v4, %v10702_v60 }
 0x51b   : > { %7011 = vmatpush.bf16.msrb.mxu2 %v10213_v21  ;;  %v10549_v21 = vor.u32 %v11950_v2, %v10546_v24  ;;  %v10402_v2 = vld [vmem:[%s12736_s16 + $0x654] sm:$0xf0] }
 0x51c   : > { %7024 = vmatpush.bf16.msrb.mxu3 %v10309_v22  ;;  %v11947_v22 = vld [vmem:[%s12736_s16 + $0x754] sm:$0xf] }
 0x51d   : > { %6986 = vmatpush.bf16.msrb.mxu0 %v10009_v16  ;;  %v10726_v16 = vld [vmem:[%s12736_s16 + $0x8dc] sm:$0xf0]  ;;  %v10537_v33 = vor.u32 %v11947_v22, %v10534_v23  ;;  %v10693_v22 = vor.u32 %v11986_v14, %v10690_v15  ;;  %v11959_v23 = vld [vmem:[%s12736_s16 + $0x7b4] sm:$0xf]  ;;  %v12094_v14 = vld [vmem:[%s12736_s16 + $0xbec] sm:$0xf] }
 0x51e   : > { %6999 = vmatpush.bf16.msrb.mxu1 %v10105_v31  ;;  %v10441_v31 = vor.u32 %v11923_v61, %v10438_v17  ;;  %v10729_v37 = vor.u32 %v11995_v26, %v10726_v16  ;;  %v11935_v61 = vld [vmem:[%s12736_s16 + $0x6f4] sm:$0xf]  ;;  %v11122_v15 = vld [vmem:[%s12736_s16 + $0xbf4] sm:$0xf0] }
 0x51f   : > { %7012 = vmatpush.bf16.msrb.mxu2 %v10201_v32  ;;  %v6771_v32 = vpop.f32.mrf.mxu3  ;;  %v11983_v16 = vld [vmem:[%s12736_s16 + $0x874] sm:$0xf] }
 0x520   : > { %7025 = vmatpush.bf16.msrb.mxu3 %v10297_v36  ;;  %v11944_v36 = vld [vmem:[%s12736_s16 + $0x73c] sm:$0xf]  ;;  %v10681_v39 = vor.u32 %v11983_v16, %v10678_v29 }
 0x521   : > { %6987 = vmatpush.bf16.msrb.mxu0 %v9997_v38  ;;  %v10429_v38 = vor.u32 %v11920_v35, %v10426_v59  ;;  %v10525_v44 = vor.u32 %v11944_v36, %v10522_v9  ;;  %v10585_v35 = vor.u32 %v11959_v23, %v10582_v27  ;;  %v11908_v59 = vld [vmem:[%s12736_s16 + $0x61c] sm:$0xf]  ;;  %v10378_v36 = vld [vmem:[%s12736_s16 + $0x624] sm:$0xf0]  ;;  %v11014_v23 = vld [vmem:[%s12736_s16 + $0xb1c] sm:$0xf0] }
 0x522   : > { %7000 = vmatpush.bf16.msrb.mxu1 %v10093_v47  ;;  %v11917_v47 = vld [vmem:[%s12736_s16 + $0x664] sm:$0xf]  ;;  %v12091_v27 = vld [vmem:[%s12736_s16 + $0xbd4] sm:$0xf] }
 0x523   : > { %7013 = vmatpush.bf16.msrb.mxu2 %v10189_v48  ;;  %v10414_v48 = vld [vmem:[%s12736_s16 + $0x66c] sm:$0xf0] }
 0x524   : > { %7026 = vmatpush.bf16.msrb.mxu3 %v10285_v57  ;;  %v10606_v57 = vld [vmem:[%s12736_s16 + $0x7ec] sm:$0xf0]  ;;  %v10417_v1 = vor.u32 %v11917_v47, %v10414_v48  ;;  %v11905_v47 = vld [vmem:[%s12736_s16 + $0x604] sm:$0xf] }
 0x525   : > { %6988 = vmatpush.bf16.msrb.mxu0 %v9985_v3  ;;  %v6782_v62 = vpop.f32.mrf.mxu0  ;;  %v10609_v6 = vor.u32 %v11965_v52, %v10606_v57  ;;  %v11938_v3 = vld [vmem:[%s12736_s16 + $0x70c] sm:$0xf]  ;;  %v10366_v48 = vld [vmem:[%s12736_s16 + $0x60c] sm:$0xf0]  ;;  %v11953_v57 = vld [vmem:[%s12736_s16 + $0x784] sm:$0xf] }
 0x526   : > { %7001 = vmatpush.bf16.msrb.mxu1 %v10081_v11  ;;  %v6783_v24 = vadd.f32 %v6782_v62, %v13353_v43  ;;  %v6795_v7 = vpop.f32.mrf.mxu1  ;;  %v11962_v11 = vld [vmem:[%s12736_s16 + $0x7cc] sm:$0xf]  ;;  %v10501_v43 = vor.u32 %v11938_v3, %v10498_v10  ;;  %v10462_v52 = vld [vmem:[%s12736_s16 + $0x6cc] sm:$0xf0]  ;;  %v11977_v62 = vld [vmem:[%s12736_s16 + $0x844] sm:$0xf] }
 0x527   : > { %7014 = vmatpush.bf16.msrb.mxu2 %v10177_v12  ;;  %v10594_v12 = vld [vmem:[%s12736_s16 + $0x7d4] sm:$0xf0]  ;;  %v12046_v3 = vld [vmem:[%s12736_s16 + $0xa6c] sm:$0xf] }
 0x528   : > { %7027 = vmatpush.bf16.msrb.mxu3 %v10273_v19  ;;  %6989 = vmatmul.bf16.vlgmr.msrb.gmra.mxu0 %v13075_v50  ;;  %v6796_v18 = vadd.f32 %v6795_v7, %v6783_v24  ;;  %v10405_v19 = vor.u32 %v11914_v0, %v10402_v2  ;;  %v12022_v0 = vld [vmem:[%s12736_s16 + $0x9ac] sm:$0xf]  ;;  %v10834_v2 = vld [vmem:[%s12736_s16 + $0x9b4] sm:$0xf0]  ;;  %v10369_v24 = vor.u32 %v11905_v47, %v10366_v48  ;;  %v12013_v48 = vld [vmem:[%s12736_s16 + $0x964] sm:$0xf] }
 0x529   : > { %7033 = vmatpush.bf16.msra.mxu0 %v10453_v20  ;;  %7002 = vmatmul.bf16.vlgmr.msrb.gmra.mxu1 %v13079_v51  ;;  %v10597_v20 = vor.u32 %v11962_v11, %v10594_v12  ;;  %v10930_v7 = vld [vmem:[%s12736_s16 + $0xa74] sm:$0xf0]  ;;  %v10465_v11 = vor.u32 %v11929_v54, %v10462_v52  ;;  %v10894_v52 = vld [vmem:[%s12736_s16 + $0xa2c] sm:$0xf0] }
 0x52a   : > { %7046 = vmatpush.bf16.msra.mxu1 %v10549_v21  ;;  %7015 = vmatmul.bf16.vlgmr.msrb.gmra.mxu2 %v13072_v46  ;;  %v11911_v21 = vld [vmem:[%s12736_s16 + $0x634] sm:$0xf]  ;;  %v11026_v10 = vld [vmem:[%s12736_s16 + $0xb34] sm:$0xf0] }
 0x52b   : > { %7059 = vmatpush.bf16.msra.mxu2 %v10645_v55  ;;  %7028 = vmatmul.bf16.vlgmr.msrb.gmra.mxu3 %v13077_v56  ;;  %v10390_v55 = vld [vmem:[%s12736_s16 + $0x63c] sm:$0xf0] }
 0x52c   : > { %7072 = vmatpush.bf16.msra.mxu3 %v10741_v58  ;;  %v10486_v58 = vld [vmem:[%s12736_s16 + $0x6fc] sm:$0xf0] }
 0x52d   : > { %7034 = vmatpush.bf16.msra.mxu0 %v10441_v31  ;;  %v6808_v17 = vpop.f32.mrf.mxu2  ;;  %v10393_v31 = vor.u32 %v11911_v21, %v10390_v55  ;;  %v12019_v21 = vld [vmem:[%s12736_s16 + $0x994] sm:$0xf]  ;;  %v10822_v55 = vld [vmem:[%s12736_s16 + $0x99c] sm:$0xf0] }
 0x52e   : > { %7047 = vmatpush.bf16.msra.mxu1 %v10537_v33  ;;  %v6809_v28 = vadd.f32 %v6808_v17, %v6796_v18  ;;  %v6821_v26 = vpop.f32.mrf.mxu3  ;;  %v6784_v33 = vpop.f32.mrf.mxu0  ;;  %v11125_v17 = vor.u32 %v12094_v14, %v11122_v15  ;;  %v12058_v14 = vld [vmem:[%s12736_s16 + $0xacc] sm:$0xf] }
 0x52f   : > { %7060 = vmatpush.bf16.msra.mxu2 %v10633_v34  ;;  %v10489_v34 = vor.u32 %v11935_v61, %v10486_v58  ;;  %v6797_v9 = vpop.f32.mrf.mxu1  ;;  %v12043_v61 = vld [vmem:[%s12736_s16 + $0xa54] sm:$0xf]  ;;  %v10810_v33 = vld [vmem:[%s12736_s16 + $0x984] sm:$0xf0]  ;;  %v12082_v15 = vld [vmem:[%s12736_s16 + $0xb8c] sm:$0xf] }
 0x530   : > { %7073 = vmatpush.bf16.msra.mxu3 %v10729_v37  ;;  %v13402_v32 = vadd.f32 %v6821_v26, %v6809_v28  ;;  %v11932_v37 = vld [vmem:[%s12736_s16 + $0x6dc] sm:$0xf]  ;;  %v12067_v58 = vld [vmem:[%s12736_s16 + $0xb14] sm:$0xf]  ;;  %v11110_v28 = vld [vmem:[%s12736_s16 + $0xbdc] sm:$0xf0]  ;;  %v10825_v26 = vor.u32 %v12019_v21, %v10822_v55 }
 0x531   : > { %7035 = vmatpush.bf16.msra.mxu0 %v10429_v38  ;;  %v11980_v38 = vld [vmem:[%s12736_s16 + $0x85c] sm:$0xf]  ;;  %v10477_v49 = vor.u32 %v11932_v37, %v10474_v40  ;;  %v11017_v29 = vor.u32 %v12067_v58, %v11014_v23  ;;  %v11002_v9 = vld [vmem:[%s12736_s16 + $0xb04] sm:$0xf0]  ;;  %v12288_v40 = vld [vmem:[#allocation1 + $0x9] sm:$0xff] }
 0x532   : > { %7048 = vmatpush.bf16.msra.mxu1 %v10525_v44  ;;  %v10666_v44 = vld [vmem:[%s12736_s16 + $0x864] sm:$0xf0]  ;;  %v12064_v37 = vld [vmem:[%s12736_s16 + $0xafc] sm:$0xf]  ;;  %v12007_v21 = vld [vmem:[%s12736_s16 + $0x934] sm:$0xf] }
 0x533   : > { %7061 = vmatpush.bf16.msra.mxu2 %v10621_v45  ;;  %v10381_v45 = vor.u32 %v11908_v59, %v10378_v36  ;;  %v10669_v60 = vor.u32 %v11980_v38, %v10666_v44  ;;  %v11113_v59 = vor.u32 %v12091_v27, %v11110_v28  ;;  %v10906_v36 = vld [vmem:[%s12736_s16 + $0xa44] sm:$0xf0]  ;;  %v11005_v47 = vor.u32 %v12064_v37, %v11002_v9  ;;  %v10774_v55 = vld [vmem:[%s12736_s16 + $0x93c] sm:$0xf0]  ;;  %v12055_v23 = vld [vmem:[%s12736_s16 + $0xab4] sm:$0xf] }
 0x534   : > { %7074 = vmatpush.bf16.msra.mxu3 %v10717_v53  ;;  %v10573_v53 = vor.u32 %v11956_v42, %v10570_v41  ;;  %v12088_v42 = vld [vmem:[%s12736_s16 + $0xbbc] sm:$0xf]  ;;  %v11098_v41 = vld [vmem:[%s12736_s16 + $0xbc4] sm:$0xf0]  ;;  %v10870_v58 = vld [vmem:[%s12736_s16 + $0x9fc] sm:$0xf0] }
 0x535   : > { %7036 = vmatpush.bf16.msra.mxu0 %v10417_v1  ;;  %v6810_v4 = vpop.f32.mrf.mxu2  ;;  %v10558_v1 = vld [vmem:[%s12736_s16 + $0x78c] sm:$0xf0]  ;;  %v12289_v38 = vld [vmem:[#allocation1 + $0x1b] sm:$0xff]  ;;  %v11101_v54 = vor.u32 %v12088_v42, %v11098_v41  ;;  %v10966_v27 = vld [vmem:[%s12736_s16 + $0xabc] sm:$0xf0] }
 0x536   : > { %7049 = vmatpush.bf16.msra.mxu1 %v10513_v63  ;;  %v10654_v63 = vld [vmem:[%s12736_s16 + $0x84c] sm:$0xf0]  ;;  %v10561_v12 = vor.u32 %v11953_v57, %v10558_v1  ;;  %v12061_v57 = vld [vmem:[%s12736_s16 + $0xae4] sm:$0xf]  ;;  %v12004_v37 = vld [vmem:[%s12736_s16 + $0x91c] sm:$0xf] }
 0x537   : > { %7062 = vmatpush.bf16.msra.mxu2 %v10609_v6  ;;  %v6823_v6 = vpop.f32.mrf.mxu3  ;;  %v10657_v18 = vor.u32 %v11977_v62, %v10654_v63  ;;  %v10990_v4 = vld [vmem:[%s12736_s16 + $0xaec] sm:$0xf0]  ;;  %v12085_v1 = vld [vmem:[%s12736_s16 + $0xba4] sm:$0xf]  ;;  %v10762_v9 = vld [vmem:[%s12736_s16 + $0x924] sm:$0xf0] }
 0x538   : > { %7075 = vmatpush.bf16.msra.mxu3 %v10705_v8  ;;  %v12070_v8 = vld [vmem:[%s12736_s16 + $0xb2c] sm:$0xf]  ;;  %v11086_v62 = vld [vmem:[%s12736_s16 + $0xbac] sm:$0xf0]  ;;  %v10858_v42 = vld [vmem:[%s12736_s16 + $0x9e4] sm:$0xf0] }
 0x539   : > { %7037 = vmatpush.bf16.msra.mxu0 %v10405_v19  ;;  %v10837_v19 = vor.u32 %v12022_v0, %v10834_v2  ;;  %v12052_v41 = vld [vmem:[%s12736_s16 + $0xa9c] sm:$0xf] }
 0x53a   : > { %7050 = vmatpush.bf16.msra.mxu1 %v10501_v43  ;;  %v10933_v43 = vor.u32 %v12046_v3, %v10930_v7  ;;  %v10993_v3 = vor.u32 %v12061_v57, %v10990_v4  ;;  %v10786_v7 = vld [vmem:[%s12736_s16 + $0x954] sm:$0xf0]  ;;  %v10846_v57 = vld [vmem:[%s12736_s16 + $0x9cc] sm:$0xf0]  ;;  %v12049_v4 = vld [vmem:[%s12736_s16 + $0xa84] sm:$0xf] }
 0x53b   : > { %7063 = vmatpush.bf16.msra.mxu2 %v10597_v20  ;;  %v11029_v20 = vor.u32 %v12070_v8, %v11026_v10  ;;  %v12034_v8 = vld [vmem:[%s12736_s16 + $0xa0c] sm:$0xf]  ;;  %v11089_v10 = vor.u32 %v12085_v1, %v11086_v62  ;;  %v10942_v1 = vld [vmem:[%s12736_s16 + $0xa8c] sm:$0xf0]  ;;  %v12073_v62 = vld [vmem:[%s12736_s16 + $0xb44] sm:$0xf] }
 0x53c   : > { %7076 = vmatpush.bf16.msra.mxu3 %v10693_v22  ;;  %v10918_v22 = vld [vmem:[%s12736_s16 + $0xa5c] sm:$0xf0] }
 0x53d   : > { %7038 = vmatpush.bf16.msra.mxu0 %v10393_v31  ;;  %v10921_v16 = vor.u32 %v12043_v61, %v10918_v22  ;;  %v12016_v31 = vld [vmem:[%s12736_s16 + $0x97c] sm:$0xf]  ;;  %v12031_v61 = vld [vmem:[%s12736_s16 + $0x9f4] sm:$0xf] }
 0x53e   : > { %7051 = vmatpush.bf16.msra.mxu1 %v10489_v34  ;;  %v12040_v34 = vld [vmem:[%s12736_s16 + $0xa3c] sm:$0xf]  ;;  %v10813_v44 = vor.u32 %v12016_v31, %v10810_v33  ;;  %v10777_v33 = vor.u32 %v12007_v21, %v10774_v55  ;;  %v9676_v21 = vld [vmem:[%s12736_s16 + $0x98] sm:$0xf]  ;;  %v11733_v55 = vld [vmem:[%s12736_s16 + $0xa0] sm:$0xf0] }
 0x53f   : > { %7064 = vmatpush.bf16.msra.mxu2 %v10585_v35  ;;  %v12286_v35 = vld [vmem:[#allocation1] sm:$0xff] }
 0x540   : > { %7077 = vmatpush.bf16.msra.mxu3 %v10681_v39  ;;  %v12287_v39 = vld [vmem:[#allocation1 + $0x12] sm:$0xff] }
 0x541   : > { %7039 = vmatpush.bf16.msra.mxu0 %v10381_v45  ;;  %v10909_v45 = vor.u32 %v12040_v34, %v10906_v36  ;;  %v10969_v36 = vor.u32 %v12055_v23, %v10966_v27  ;;  %v11781_v23 = vld [vmem:[%s12736_s16 + $0x220] sm:$0xf0]  ;;  %v9964_v27 = vld [vmem:[%s12736_s16 + $0x2d8] sm:$0xf] }
 0x542   : > { %7052 = vmatpush.bf16.msra.mxu1 %v10477_v49  ;;  %v10798_v49 = vld [vmem:[%s12736_s16 + $0x96c] sm:$0xf0] }
 0x543   : > { %7065 = vmatpush.bf16.msra.mxu2 %v10573_v53  ;;  %v12037_v53 = vld [vmem:[%s12736_s16 + $0xa24] sm:$0xf]  ;;  %v10801_v6 = vor.u32 %v12013_v48, %v10798_v49  ;;  %v10750_v49 = vld [vmem:[%s12736_s16 + $0x90c] sm:$0xf0] }
 0x544   : > { %7078 = vmatpush.bf16.msra.mxu3 %v10669_v60  ;;  %v10897_v2 = vor.u32 %v12037_v53, %v10894_v52  ;;  %v12001_v48 = vld [vmem:[%s12736_s16 + $0x904] sm:$0xf] }
 0x545   : > { %7040 = vmatpush.bf16.msra.mxu0 %v10369_v24  ;;  %v6834_v60 = vpop.f32.mrf.mxu0  ;;  %v12010_v24 = vld [vmem:[%s12736_s16 + $0x94c] sm:$0xf]  ;;  %v12025_v52 = vld [vmem:[%s12736_s16 + $0x9c4] sm:$0xf] }
 0x546   : > { %7053 = vmatpush.bf16.msra.mxu1 %v10465_v11  ;;  %v6835_v63 = vadd.f32 %v6834_v60, %v13402_v32  ;;  %v6847_v0 = vpop.f32.mrf.mxu1  ;;  %v10978_v32 = vld [vmem:[%s12736_s16 + $0xad4] sm:$0xf0] }
 0x547   : > { %7066 = vmatpush.bf16.msra.mxu2 %v10561_v12  ;;  %v10882_v12 = vld [vmem:[%s12736_s16 + $0xa14] sm:$0xf0] }
 0x548   : > { %7079 = vmatpush.bf16.msra.mxu3 %v10657_v18  ;;  %7041 = vmatmul.bf16.vlgmr.msra.gmra.mxu0 %v12286_v35  ;;  %v6848_v11 = vadd.f32 %v6847_v0, %v6835_v63  ;;  %v11074_v18 = vld [vmem:[%s12736_s16 + $0xb94] sm:$0xf0]  ;;  %v11038_v63 = vld [vmem:[%s12736_s16 + $0xb4c] sm:$0xf0] }
 0x549   : > { %7085 = vmatpush.bf16.msrb.mxu0 %v10837_v19  ;;  %7054 = vmatmul.bf16.vlgmr.msra.gmra.mxu1 %v12288_v40  ;;  %v10789_v19 = vor.u32 %v12010_v24, %v10786_v7  ;;  %v9688_v0 = vld [vmem:[%s12736_s16 + $0xb0] sm:$0xf]  ;;  %v10753_v7 = vor.u32 %v12001_v48, %v10750_v49  ;;  %v9652_v49 = vld [vmem:[%s12736_s16 + $0x68] sm:$0xf] }
 0x54a   : > { %7098 = vmatpush.bf16.msrb.mxu1 %v10933_v43  ;;  %7067 = vmatmul.bf16.vlgmr.msra.gmra.mxu2 %v12287_v39  ;;  %v10885_v43 = vor.u32 %v12034_v8, %v10882_v12  ;;  %v12028_v39 = vld [vmem:[%s12736_s16 + $0x9dc] sm:$0xf]  ;;  %v10849_v12 = vor.u32 %v12025_v52, %v10846_v57  ;;  %v11751_v57 = vld [vmem:[%s12736_s16 + $0x130] sm:$0xf0] }
 0x54b   : > { %7111 = vmatpush.bf16.msrb.mxu2 %v11029_v20  ;;  %7080 = vmatmul.bf16.vlgmr.msra.gmra.mxu3 %v12289_v38  ;;  %v10981_v20 = vor.u32 %v12058_v14, %v10978_v32  ;;  %v10954_v38 = vld [vmem:[%s12736_s16 + $0xaa4] sm:$0xf0]  ;;  %v10861_v53 = vor.u32 %v12028_v39, %v10858_v42  ;;  %v11760_v8 = vld [vmem:[%s12736_s16 + $0x178] sm:$0xf0]  ;;  %v10945_v14 = vor.u32 %v12049_v4, %v10942_v1  ;;  %v9976_v32 = vld [vmem:[%s12736_s16 + $0x2f0] sm:$0xf] }
 0x54c   : > { %7124 = vmatpush.bf16.msrb.mxu3 %v11125_v17  ;;  %v11077_v17 = vor.u32 %v12082_v15, %v11074_v18  ;;  %v11808_v15 = vld [vmem:[%s12736_s16 + $0x2f8] sm:$0xf0]  ;;  %v11041_v18 = vor.u32 %v12073_v62, %v11038_v63  ;;  %v11778_v39 = vld [vmem:[%s12736_s16 + $0x208] sm:$0xf0]  ;;  %v9844_v4 = vld [vmem:[%s12736_s16 + $0x1e8] sm:$0xf] }
 0x54d   : > { %7086 = vmatpush.bf16.msrb.mxu0 %v10825_v26  ;;  %v6860_v22 = vpop.f32.mrf.mxu2  ;;  %v6836_v31 = vpop.f32.mrf.mxu0  ;;  %v12292_v42 = vld [vmem:[#allocation1 + $0x2d] sm:$0xff]  ;;  %v9940_v62 = vld [vmem:[%s12736_s16 + $0x2a8] sm:$0xf] }
 0x54e   : > { %7099 = vmatpush.bf16.msrb.mxu1 %v10921_v16  ;;  %v6861_v28 = vadd.f32 %v6860_v22, %v6848_v11  ;;  %v6873_v26 = vpop.f32.mrf.mxu3  ;;  %v12079_v16 = vld [vmem:[%s12736_s16 + $0xb74] sm:$0xf]  ;;  %v6849_v34 = vpop.f32.mrf.mxu1  ;;  %v11784_v11 = vld [vmem:[%s12736_s16 + $0x238] sm:$0xf0]  ;;  %v11757_v22 = vld [vmem:[%s12736_s16 + $0x160] sm:$0xf0] }
 0x54f   : > { %7112 = vmatpush.bf16.msrb.mxu2 %v11017_v29  ;;  %v11062_v29 = vld [vmem:[%s12736_s16 + $0xb7c] sm:$0xf0]  ;;  %v11799_v63 = vld [vmem:[%s12736_s16 + $0x2b0] sm:$0xf0] }
 0x550   : > { %7125 = vmatpush.bf16.msrb.mxu3 %v11113_v59  ;;  %v13469_v35 = vadd.f32 %v6873_v26, %v6861_v28  ;;  %v10873_v59 = vor.u32 %v12031_v61, %v10870_v58  ;;  %v11065_v40 = vor.u32 %v12079_v16, %v11062_v29  ;;  %v9772_v61 = vld [vmem:[%s12736_s16 + $0x158] sm:$0xf]  ;;  %v11805_v28 = vld [vmem:[%s12736_s16 + $0x2e0] sm:$0xf0]  ;;  %v9677_v26 = vor.u32 %v11733_v55, %v9676_v21  ;;  %v9664_v31 = vld [vmem:[%s12736_s16 + $0x80] sm:$0xf] }
 0x551   : > { %7087 = vmatpush.bf16.msrb.mxu0 %v10813_v44  ;;  %v12076_v44 = vld [vmem:[%s12736_s16 + $0xb5c] sm:$0xf]  ;;  %v9868_v58 = vld [vmem:[%s12736_s16 + $0x218] sm:$0xf]  ;;  %v9773_v16 = vor.u32 %v11757_v22, %v9772_v61  ;;  %v9760_v34 = vld [vmem:[%s12736_s16 + $0x140] sm:$0xf] }
 0x552   : > { %7100 = vmatpush.bf16.msrb.mxu1 %v10909_v45  ;;  %v11050_v45 = vld [vmem:[%s12736_s16 + $0xb64] sm:$0xf0]  ;;  %v9869_v29 = vor.u32 %v11781_v23, %v9868_v58  ;;  %v9628_v21 = vld [vmem:[%s12736_s16 + $0x38] sm:$0xf]  ;;  %v11721_v55 = vld [vmem:[%s12736_s16 + $0x40] sm:$0xf0] }
 0x553   : > { %7113 = vmatpush.bf16.msrb.mxu2 %v11005_v47  ;;  %v10765_v47 = vor.u32 %v12004_v37, %v10762_v9  ;;  %v11053_v60 = vor.u32 %v12076_v44, %v11050_v45  ;;  %v11754_v37 = vld [vmem:[%s12736_s16 + $0x148] sm:$0xf0]  ;;  %v9856_v9 = vld [vmem:[%s12736_s16 + $0x200] sm:$0xf]  ;;  %v9724_v61 = vld [vmem:[%s12736_s16 + $0xf8] sm:$0xf] }
 0x554   : > { %7126 = vmatpush.bf16.msrb.mxu3 %v11101_v54  ;;  %v10957_v54 = vor.u32 %v12052_v41, %v10954_v38  ;;  %v9952_v41 = vld [vmem:[%s12736_s16 + $0x2c0] sm:$0xf]  ;;  %v11802_v38 = vld [vmem:[%s12736_s16 + $0x2c8] sm:$0xf0]  ;;  %v9857_v48 = vor.u32 %v11778_v39, %v9856_v9  ;;  %v11745_v58 = vld [vmem:[%s12736_s16 + $0x100] sm:$0xf0] }
 0x555   : > { %7088 = vmatpush.bf16.msrb.mxu0 %v10801_v6  ;;  %v6862_v6 = vpop.f32.mrf.mxu2  ;;  %v12293_v44 = vld [vmem:[#allocation1 + $0x3f] sm:$0xff]  ;;  %v9953_v52 = vor.u32 %v11802_v38, %v9952_v41  ;;  %v9820_v23 = vld [vmem:[%s12736_s16 + $0x1b8] sm:$0xf]  ;;  %v9616_v9 = vld [vmem:[%s12736_s16 + $0x20] sm:$0xf] }
 0x556   : > { %7101 = vmatpush.bf16.msrb.mxu1 %v10897_v2  ;;  %v11736_v2 = vld [vmem:[%s12736_s16 + $0xb8] sm:$0xf0]  ;;  %v6875_v24 = vpop.f32.mrf.mxu3  ;;  %v11718_v39 = vld [vmem:[%s12736_s16 + $0x28] sm:$0xf0]  ;;  %v9808_v38 = vld [vmem:[%s12736_s16 + $0x1a0] sm:$0xf] }
 0x557   : > { %7114 = vmatpush.bf16.msrb.mxu2 %v10993_v3  ;;  %v9784_v3 = vld [vmem:[%s12736_s16 + $0x170] sm:$0xf]  ;;  %v11742_v41 = vld [vmem:[%s12736_s16 + $0xe8] sm:$0xf0] }
 0x558   : > { %7127 = vmatpush.bf16.msrb.mxu3 %v11089_v10  ;;  %v9880_v10 = vld [vmem:[%s12736_s16 + $0x230] sm:$0xf] }
 0x559   : > { %7089 = vmatpush.bf16.msrb.mxu0 %v10789_v19  ;;  %v9689_v19 = vor.u32 %v11736_v2, %v9688_v0 }
 0x55a   : > { %7102 = vmatpush.bf16.msrb.mxu1 %v10885_v43  ;;  %v9785_v43 = vor.u32 %v11760_v8, %v9784_v3  ;;  %v11724_v8 = vld [vmem:[%s12736_s16 + $0x58] sm:$0xf0] }
 0x55b   : > { %7115 = vmatpush.bf16.msrb.mxu2 %v10981_v20  ;;  %v9881_v20 = vor.u32 %v11784_v11, %v9880_v10  ;;  %v9736_v10 = vld [vmem:[%s12736_s16 + $0x110] sm:$0xf]  ;;  %v9941_v11 = vor.u32 %v11799_v63, %v9940_v62  ;;  %v11763_v62 = vld [vmem:[%s12736_s16 + $0x190] sm:$0xf0]  ;;  %v9892_v63 = vld [vmem:[%s12736_s16 + $0x248] sm:$0xf] }
 0x55c   : > { %7128 = vmatpush.bf16.msrb.mxu3 %v11077_v17  ;;  %v9977_v17 = vor.u32 %v11808_v15, %v9976_v32  ;;  %v9832_v32 = vld [vmem:[%s12736_s16 + $0x1d0] sm:$0xf] }
 0x55d   : > { %7090 = vmatpush.bf16.msrb.mxu0 %v10777_v33  ;;  %v11730_v33 = vld [vmem:[%s12736_s16 + $0x88] sm:$0xf0]  ;;  %v9928_v15 = vld [vmem:[%s12736_s16 + $0x290] sm:$0xf] }
 0x55e   : > { %7103 = vmatpush.bf16.msrb.mxu1 %v10873_v59  ;;  %v12290_v59 = vld [vmem:[#allocation1 + $0x24] sm:$0xff]  ;;  %v9665_v45 = vor.u32 %v11730_v33, %v9664_v31  ;;  %v9629_v33 = vor.u32 %v11721_v55, %v9628_v21  ;;  %v10060_v21 = vld [vmem:[%s12736_s16 + $0x398] sm:$0xf]  ;;  %v11829_v55 = vld [vmem:[%s12736_s16 + $0x3a0] sm:$0xf0] }
 0x55f   : > { %7116 = vmatpush.bf16.msrb.mxu2 %v10969_v36  ;;  %v9965_v36 = vor.u32 %v11805_v28, %v9964_v27  ;;  %v11769_v27 = vld [vmem:[%s12736_s16 + $0x1c0] sm:$0xf0] }
 0x560   : > { %7129 = vmatpush.bf16.msrb.mxu3 %v11065_v40  ;;  %v12291_v40 = vld [vmem:[#allocation1 + $0x36] sm:$0xff] }
 0x561   : > { %7091 = vmatpush.bf16.msrb.mxu0 %v10765_v47  ;;  %v9761_v47 = vor.u32 %v11754_v37, %v9760_v34  ;;  %v9821_v37 = vor.u32 %v11769_v27, %v9820_v23  ;;  %v11877_v23 = vld [vmem:[%s12736_s16 + $0x520] sm:$0xf0]  ;;  %v10348_v27 = vld [vmem:[%s12736_s16 + $0x5d8] sm:$0xf] }
 0x562   : > { %7104 = vmatpush.bf16.msrb.mxu1 %v10861_v53  ;;  %v11727_v53 = vld [vmem:[%s12736_s16 + $0x70] sm:$0xf0] }
 0x563   : > { %7117 = vmatpush.bf16.msrb.mxu2 %v10957_v54  ;;  %v9748_v54 = vld [vmem:[%s12736_s16 + $0x128] sm:$0xf]  ;;  %v9653_v0 = vor.u32 %v11727_v53, %v9652_v49  ;;  %v11715_v53 = vld [vmem:[%s12736_s16 + $0x10] sm:$0xf0] }
 0x564   : > { %7130 = vmatpush.bf16.msrb.mxu3 %v11053_v60  ;;  %v11775_v60 = vld [vmem:[%s12736_s16 + $0x1f0] sm:$0xf0]  ;;  %v9749_v3 = vor.u32 %v11751_v57, %v9748_v54  ;;  %v9604_v49 = vld [vmem:[%s12736_s16 + $0x8] sm:$0xf] }
 0x565   : > { %7092 = vmatpush.bf16.msrb.mxu0 %v10753_v7  ;;  %v6886_v1 = vpop.f32.mrf.mxu0  ;;  %v9845_v24 = vor.u32 %v11775_v60, %v9844_v4  ;;  %v9640_v7 = vld [vmem:[%s12736_s16 + $0x50] sm:$0xf]  ;;  %v9700_v57 = vld [vmem:[%s12736_s16 + $0xc8] sm:$0xf]  ;;  %v11739_v4 = vld [vmem:[%s12736_s16 + $0xd0] sm:$0xf0] }
 0x566   : > { %7105 = vmatpush.bf16.msrb.mxu1 %v10849_v12  ;;  %v6887_v6 = vadd.f32 %v6886_v1, %v13469_v35  ;;  %v6899_v2 = vpop.f32.mrf.mxu1  ;;  %v11772_v35 = vld [vmem:[%s12736_s16 + $0x1d8] sm:$0xf0]  ;;  %v9796_v60 = vld [vmem:[%s12736_s16 + $0x188] sm:$0xf] }
 0x567   : > { %7118 = vmatpush.bf16.msrb.mxu2 %v10945_v14  ;;  %v11748_v14 = vld [vmem:[%s12736_s16 + $0x118] sm:$0xf0] }
 0x568   : > { %7131 = vmatpush.bf16.msrb.mxu3 %v11041_v18  ;;  %7093 = vmatmul.bf16.vlgmr.msrb.gmra.mxu0 %v12290_v59  ;;  %v6900_v12 = vadd.f32 %v6899_v2, %v6887_v6  ;;  %v11796_v18 = vld [vmem:[%s12736_s16 + $0x298] sm:$0xf0]  ;;  %v11787_v6 = vld [vmem:[%s12736_s16 + $0x250] sm:$0xf0]  ;;  %v10072_v2 = vld [vmem:[%s12736_s16 + $0x3b0] sm:$0xf] }
 0x569   : > { %7137 = vmatpush.bf16.msra.mxu0 %v9689_v19  ;;  %7106 = vmatmul.bf16.vlgmr.msrb.gmra.mxu1 %v12292_v42  ;;  %v9641_v19 = vor.u32 %v11724_v8, %v9640_v7  ;;  %v9605_v8 = vor.u32 %v11715_v53, %v9604_v49  ;;  %v11871_v49 = vld [vmem:[%s12736_s16 + $0x4f0] sm:$0xf0]  ;;  %v10324_v53 = vld [vmem:[%s12736_s16 + $0x5a8] sm:$0xf] }
 0x56a   : > { %7150 = vmatpush.bf16.msra.mxu1 %v9785_v43  ;;  %7119 = vmatmul.bf16.vlgmr.msrb.gmra.mxu2 %v12291_v40  ;;  %v9737_v43 = vor.u32 %v11748_v14, %v9736_v10  ;;  %v9712_v40 = vld [vmem:[%s12736_s16 + $0xe0] sm:$0xf]  ;;  %v11856_v10 = vld [vmem:[%s12736_s16 + $0x478] sm:$0xf0]  ;;  %v9701_v14 = vor.u32 %v11739_v4, %v9700_v57 }
 0x56b   : > { %7163 = vmatpush.bf16.msra.mxu2 %v9881_v20  ;;  %7132 = vmatmul.bf16.vlgmr.msrb.gmra.mxu3 %v12293_v44  ;;  %v9833_v20 = vor.u32 %v11772_v35, %v9832_v32  ;;  %v11766_v44 = vld [vmem:[%s12736_s16 + $0x1a8] sm:$0xf0]  ;;  %v9713_v54 = vor.u32 %v11742_v41, %v9712_v40  ;;  %v9797_v32 = vor.u32 %v11763_v62, %v9796_v60  ;;  %v10360_v35 = vld [vmem:[%s12736_s16 + $0x5f0] sm:$0xf]  ;;  %v10336_v40 = vld [vmem:[%s12736_s16 + $0x5c0] sm:$0xf] }
 0x56c   : > { %7176 = vmatpush.bf16.msra.mxu3 %v9977_v17  ;;  %v9929_v17 = vor.u32 %v11796_v18, %v9928_v15  ;;  %v11904_v15 = vld [vmem:[%s12736_s16 + $0x5f8] sm:$0xf0]  ;;  %v9893_v18 = vor.u32 %v11787_v6, %v9892_v63  ;;  %v10024_v60 = vld [vmem:[%s12736_s16 + $0x350] sm:$0xf] }
 0x56d   : > { %7138 = vmatpush.bf16.msra.mxu0 %v9677_v26  ;;  %v6912_v22 = vpop.f32.mrf.mxu2  ;;  %v6888_v31 = vpop.f32.mrf.mxu0  ;;  %v10120_v62 = vld [vmem:[%s12736_s16 + $0x410] sm:$0xf] }
 0x56e   : > { %7151 = vmatpush.bf16.msra.mxu1 %v9773_v16  ;;  %v6913_v28 = vadd.f32 %v6912_v22, %v6900_v12  ;;  %v6925_v26 = vpop.f32.mrf.mxu3  ;;  %v9916_v16 = vld [vmem:[%s12736_s16 + $0x278] sm:$0xf]  ;;  %v6901_v34 = vpop.f32.mrf.mxu1  ;;  %v11880_v12 = vld [vmem:[%s12736_s16 + $0x538] sm:$0xf0]  ;;  %v11853_v22 = vld [vmem:[%s12736_s16 + $0x460] sm:$0xf0] }
 0x56f   : > { %7164 = vmatpush.bf16.msra.mxu2 %v9869_v29  ;;  %v11793_v29 = vld [vmem:[%s12736_s16 + $0x280] sm:$0xf0]  ;;  %v10048_v31 = vld [vmem:[%s12736_s16 + $0x380] sm:$0xf] }
 0x570   : > { %7177 = vmatpush.bf16.msra.mxu3 %v9965_v36  ;;  %v13536_v59 = vadd.f32 %v6925_v26, %v6913_v28  ;;  %v9725_v36 = vor.u32 %v11745_v58, %v9724_v61  ;;  %v9917_v42 = vor.u32 %v11793_v29, %v9916_v16  ;;  %v10156_v61 = vld [vmem:[%s12736_s16 + $0x458] sm:$0xf]  ;;  %v11901_v28 = vld [vmem:[%s12736_s16 + $0x5e0] sm:$0xf0]  ;;  %v10061_v26 = vor.u32 %v11829_v55, %v10060_v21  ;;  %v10144_v34 = vld [vmem:[%s12736_s16 + $0x440] sm:$0xf] }
 0x571   : > { %7139 = vmatpush.bf16.msra.mxu0 %v9665_v45  ;;  %v9904_v45 = vld [vmem:[%s12736_s16 + $0x260] sm:$0xf]  ;;  %v10252_v58 = vld [vmem:[%s12736_s16 + $0x518] sm:$0xf]  ;;  %v10157_v16 = vor.u32 %v11853_v22, %v10156_v61 }
 0x572   : > { %7152 = vmatpush.bf16.msra.mxu1 %v9761_v47  ;;  %v11790_v47 = vld [vmem:[%s12736_s16 + $0x268] sm:$0xf0]  ;;  %v10253_v29 = vor.u32 %v11877_v23, %v10252_v58  ;;  %v10300_v61 = vld [vmem:[%s12736_s16 + $0x578] sm:$0xf] }
 0x573   : > { %7165 = vmatpush.bf16.msra.mxu2 %v9857_v48  ;;  %v9617_v48 = vor.u32 %v11718_v39, %v9616_v9  ;;  %v9905_v1 = vor.u32 %v11790_v47, %v9904_v45  ;;  %v10240_v9 = vld [vmem:[%s12736_s16 + $0x500] sm:$0xf]  ;;  %v11874_v39 = vld [vmem:[%s12736_s16 + $0x508] sm:$0xf0]  ;;  %v11823_v45 = vld [vmem:[%s12736_s16 + $0x370] sm:$0xf0] }
 0x574   : > { %7178 = vmatpush.bf16.msra.mxu3 %v9953_v52  ;;  %v9809_v52 = vor.u32 %v11766_v44, %v9808_v38  ;;  %v10241_v44 = vor.u32 %v11874_v39, %v10240_v9  ;;  %v10132_v47 = vld [vmem:[%s12736_s16 + $0x428] sm:$0xf]  ;;  %v10288_v9 = vld [vmem:[%s12736_s16 + $0x560] sm:$0xf]  ;;  %v11886_v39 = vld [vmem:[%s12736_s16 + $0x568] sm:$0xf0] }
 0x575   : > { %7140 = vmatpush.bf16.msra.mxu0 %v9653_v0  ;;  %v6914_v0 = vpop.f32.mrf.mxu2 }
 0x576   : > { %7153 = vmatpush.bf16.msra.mxu1 %v9749_v3  ;;  %v11832_v3 = vld [vmem:[%s12736_s16 + $0x3b8] sm:$0xf0]  ;;  %v6927_v7 = vpop.f32.mrf.mxu3 }
 0x577   : > { %7166 = vmatpush.bf16.msra.mxu2 %v9845_v24  ;;  %v10168_v24 = vld [vmem:[%s12736_s16 + $0x470] sm:$0xf]  ;;  %v11844_v0 = vld [vmem:[%s12736_s16 + $0x418] sm:$0xf0] }
 0x578   : > { %7179 = vmatpush.bf16.msra.mxu3 %v9941_v11  ;;  %v10264_v11 = vld [vmem:[%s12736_s16 + $0x530] sm:$0xf] }
 0x579   : > { %7141 = vmatpush.bf16.msra.mxu0 %v9641_v19  ;;  %v10073_v19 = vor.u32 %v11832_v3, %v10072_v2  ;;  %v10216_v2 = vld [vmem:[%s12736_s16 + $0x4d0] sm:$0xf]  ;;  %v11868_v3 = vld [vmem:[%s12736_s16 + $0x4d8] sm:$0xf0] }
 0x57a   : > { %7154 = vmatpush.bf16.msra.mxu1 %v9737_v43  ;;  %v10169_v43 = vor.u32 %v11856_v10, %v10168_v24  ;;  %v10312_v7 = vld [vmem:[%s12736_s16 + $0x590] sm:$0xf] }
 0x57b   : > { %7167 = vmatpush.bf16.msra.mxu2 %v9833_v20  ;;  %v10265_v20 = vor.u32 %v11880_v12, %v10264_v11  ;;  %v10121_v11 = vor.u32 %v11844_v0, %v10120_v62  ;;  %v10217_v12 = vor.u32 %v11868_v3, %v10216_v2  ;;  %v11976_v62 = vld [vmem:[%s12736_s16 + $0x838] sm:$0xf0]  ;;  %v10744_v0 = vld [vmem:[%s12736_s16 + $0x8f0] sm:$0xf] }
 0x57c   : > { %7180 = vmatpush.bf16.msra.mxu3 %v9929_v17  ;;  %v10361_v17 = vor.u32 %v11904_v15, %v10360_v35  ;;  %v10108_v35 = vld [vmem:[%s12736_s16 + $0x3f8] sm:$0xf]  ;;  %v12000_v2 = vld [vmem:[%s12736_s16 + $0x8f8] sm:$0xf0] }
 0x57d   : > { %7142 = vmatpush.bf16.msra.mxu0 %v9629_v33  ;;  %v11826_v33 = vld [vmem:[%s12736_s16 + $0x388] sm:$0xf0] }
 0x57e   : > { %7155 = vmatpush.bf16.msra.mxu1 %v9725_v36  ;;  %v10349_v36 = vor.u32 %v11901_v28, %v10348_v27  ;;  %v10049_v41 = vor.u32 %v11826_v33, %v10048_v31 }
 0x57f   : > { %7168 = vmatpush.bf16.msra.mxu2 %v9821_v37  ;;  %v11850_v37 = vld [vmem:[%s12736_s16 + $0x448] sm:$0xf0] }
 0x580   : > { %7181 = vmatpush.bf16.msra.mxu3 %v9917_v42  ;;  %v11898_v42 = vld [vmem:[%s12736_s16 + $0x5c8] sm:$0xf0]  ;;  %v10145_v38 = vor.u32 %v11850_v37, %v10144_v34 }
 0x581   : > { %7143 = vmatpush.bf16.msra.mxu0 %v9617_v48  ;;  %v11847_v48 = vld [vmem:[%s12736_s16 + $0x430] sm:$0xf0]  ;;  %v11838_v34 = vld [vmem:[%s12736_s16 + $0x3e8] sm:$0xf0] }
 0x582   : > { %7156 = vmatpush.bf16.msra.mxu1 %v9713_v54  ;;  %v11895_v54 = vld [vmem:[%s12736_s16 + $0x5b0] sm:$0xf0]  ;;  %v10133_v57 = vor.u32 %v11847_v48, %v10132_v47  ;;  %v11862_v37 = vld [vmem:[%s12736_s16 + $0x4a8] sm:$0xf0]  ;;  %v10180_v47 = vld [vmem:[%s12736_s16 + $0x488] sm:$0xf]  ;;  %v10289_v48 = vor.u32 %v11886_v39, %v10288_v9 }
 0x583   : > { %7169 = vmatpush.bf16.msra.mxu2 %v9809_v52  ;;  %v10325_v6 = vor.u32 %v11895_v54, %v10324_v53  ;;  %v11883_v53 = vld [vmem:[%s12736_s16 + $0x550] sm:$0xf0]  ;;  %v10708_v39 = vld [vmem:[%s12736_s16 + $0x8a8] sm:$0xf] }
 0x584   : > { %7182 = vmatpush.bf16.msra.mxu3 %v9905_v1  ;;  %v11820_v1 = vld [vmem:[%s12736_s16 + $0x358] sm:$0xf0]  ;;  %v11967_v9 = vld [vmem:[%s12736_s16 + $0x7f0] sm:$0xf0] }
 0x585   : > { %7144 = vmatpush.bf16.msra.mxu0 %v9605_v8  ;;  %v6938_v52 = vpop.f32.mrf.mxu0  ;;  %v11892_v8 = vld [vmem:[%s12736_s16 + $0x598] sm:$0xf0]  ;;  %v10025_v10 = vor.u32 %v11820_v1, %v10024_v60  ;;  %v10648_v1 = vld [vmem:[%s12736_s16 + $0x830] sm:$0xf] }
 0x586   : > { %7157 = vmatpush.bf16.msra.mxu1 %v9701_v14  ;;  %v6951_v63 = vpop.f32.mrf.mxu1  ;;  %v10012_v14 = vld [vmem:[%s12736_s16 + $0x338] sm:$0xf]  ;;  %v11952_v60 = vld [vmem:[%s12736_s16 + $0x778] sm:$0xf0] }
 0x587   : > { %7170 = vmatpush.bf16.msra.mxu2 %v9797_v32  ;;  %v6952_v24 = vadd.f32 %v6951_v63, %v6938_v52  ;;  %v11817_v32 = vld [vmem:[%s12736_s16 + $0x340] sm:$0xf0]  ;;  %v11928_v52 = vld [vmem:[%s12736_s16 + $0x6b8] sm:$0xf0] }
 0x588   : > { %7183 = vmatpush.bf16.msra.mxu3 %v9893_v18  ;;  %7145 = vmatmul.bf16.vlgmr.msra.gmra.mxu0 %v13036_v5  ;;  %v10337_v5 = vor.u32 %v11898_v42, %v10336_v40  ;;  %v10313_v18 = vor.u32 %v11892_v8, %v10312_v7  ;;  %v10013_v22 = vor.u32 %v11817_v32, %v10012_v14  ;;  %v9988_v42 = vld [vmem:[%s12736_s16 + $0x308] sm:$0xf]  ;;  %v11949_v32 = vld [vmem:[%s12736_s16 + $0x760] sm:$0xf0] }
 0x589   : > { %7189 = vmatpush.bf16.msrb.mxu0 %v10073_v19  ;;  %7158 = vmatmul.bf16.vlgmr.msra.gmra.mxu1 %v13043_v13  ;;  %v11841_v19 = vld [vmem:[%s12736_s16 + $0x400] sm:$0xf0]  ;;  %v10649_v8 = vor.u32 %v11976_v62, %v10648_v1  ;;  %v10745_v14 = vor.u32 %v12000_v2, %v10744_v0  ;;  %v10492_v62 = vld [vmem:[%s12736_s16 + $0x6f8] sm:$0xf] }
 0x58a   : > { %7202 = vmatpush.bf16.msrb.mxu1 %v10169_v43  ;;  %7171 = vmatmul.bf16.vlgmr.msra.gmra.mxu2 %v13034_v25  ;;  %v10036_v25 = vld [vmem:[%s12736_s16 + $0x368] sm:$0xf]  ;;  %v10204_v43 = vld [vmem:[%s12736_s16 + $0x4b8] sm:$0xf]  ;;  %v10109_v27 = vor.u32 %v11841_v19, %v10108_v35  ;;  %v11997_v19 = vld [vmem:[%s12736_s16 + $0x8e0] sm:$0xf0] }
 0x58b   : > { %7215 = vmatpush.bf16.msrb.mxu2 %v10265_v20  ;;  %7184 = vmatmul.bf16.vlgmr.msra.gmra.mxu3 %v13038_v30  ;;  %v10228_v30 = vld [vmem:[%s12736_s16 + $0x4e8] sm:$0xf]  ;;  %v10037_v13 = vor.u32 %v11823_v45, %v10036_v25  ;;  %v11865_v20 = vld [vmem:[%s12736_s16 + $0x4c0] sm:$0xf0]  ;;  %v11835_v45 = vld [vmem:[%s12736_s16 + $0x3d0] sm:$0xf0] }
 0x58c   : > { %7228 = vmatpush.bf16.msrb.mxu3 %v10361_v17  ;;  %v10229_v4 = vor.u32 %v11871_v49, %v10228_v30  ;;  %v11889_v17 = vld [vmem:[%s12736_s16 + $0x580] sm:$0xf0]  ;;  %v10205_v28 = vor.u32 %v11865_v20, %v10204_v43  ;;  %v10084_v25 = vld [vmem:[%s12736_s16 + $0x3c8] sm:$0xf]  ;;  %v11859_v30 = vld [vmem:[%s12736_s16 + $0x490] sm:$0xf0] }
 0x58d   : > { %7190 = vmatpush.bf16.msrb.mxu0 %v10061_v26  ;;  %v6964_v15 = vpop.f32.mrf.mxu2  ;;  %v6940_v23 = vpop.f32.mrf.mxu0  ;;  %v10000_v26 = vld [vmem:[%s12736_s16 + $0x320] sm:$0xf]  ;;  %v10301_v33 = vor.u32 %v11889_v17, %v10300_v61  ;;  %v10276_v49 = vld [vmem:[%s12736_s16 + $0x548] sm:$0xf]  ;;  %v10085_v63 = vor.u32 %v11835_v45, %v10084_v25  ;;  %v10636_v35 = vld [vmem:[%s12736_s16 + $0x818] sm:$0xf] }
 0x58e   : > { %7203 = vmatpush.bf16.msrb.mxu1 %v10157_v16  ;;  %v6965_v21 = vadd.f32 %v6964_v15, %v6952_v24  ;;  %v6977_v55 = vpop.f32.mrf.mxu3  ;;  %v11814_v16 = vld [vmem:[%s12736_s16 + $0x328] sm:$0xf0]  ;;  %v6953_v31 = vpop.f32.mrf.mxu1  ;;  %v10277_v3 = vor.u32 %v11883_v53, %v10276_v49  ;;  %v11973_v15 = vld [vmem:[%s12736_s16 + $0x820] sm:$0xf0]  ;;  %v10528_v17 = vld [vmem:[%s12736_s16 + $0x740] sm:$0xf] }
 0x58f   : > { %7216 = vmatpush.bf16.msrb.mxu2 %v10253_v29  ;;  %v10096_v29 = vld [vmem:[%s12736_s16 + $0x3e0] sm:$0xf]  ;;  %v10001_v40 = vor.u32 %v11814_v16, %v10000_v26  ;;  %v11922_v61 = vld [vmem:[%s12736_s16 + $0x688] sm:$0xf0]  ;;  %v11916_v25 = vld [vmem:[%s12736_s16 + $0x658] sm:$0xf0] }
 0x590   : > { %7229 = vmatpush.bf16.msrb.mxu3 %v10349_v36  ;;  %v13606_v58 = vadd.f32 %v6977_v55, %v6965_v21  ;;  %v10192_v36 = vld [vmem:[%s12736_s16 + $0x4a0] sm:$0xf]  ;;  %v10637_v21 = vor.u32 %v11973_v15, %v10636_v35  ;;  %v11946_v23 = vld [vmem:[%s12736_s16 + $0x748] sm:$0xf0]  ;;  %v10504_v45 = vld [vmem:[%s12736_s16 + $0x710] sm:$0xf] }
 0x591   : > { %7191 = vmatpush.bf16.msrb.mxu0 %v10049_v41  ;;  %v11811_v41 = vld [vmem:[%s12736_s16 + $0x310] sm:$0xf0]  ;;  %v10432_v55 = vld [vmem:[%s12736_s16 + $0x680] sm:$0xf]  ;;  %v11994_v16 = vld [vmem:[%s12736_s16 + $0x8c8] sm:$0xf0] }
 0x592   : > { %7204 = vmatpush.bf16.msrb.mxu1 %v10145_v38  ;;  %v10097_v38 = vor.u32 %v11838_v34, %v10096_v29  ;;  %v10720_v26 = vld [vmem:[%s12736_s16 + $0x8c0] sm:$0xf]  ;;  %v10433_v29 = vor.u32 %v11922_v61, %v10432_v55  ;;  %v11919_v34 = vld [vmem:[%s12736_s16 + $0x670] sm:$0xf0]  ;;  %v10600_v49 = vld [vmem:[%s12736_s16 + $0x7d0] sm:$0xf] }
 0x593   : > { %7217 = vmatpush.bf16.msrb.mxu2 %v10241_v44  ;;  %v10193_v44 = vor.u32 %v11862_v37, %v10192_v36  ;;  %v11943_v36 = vld [vmem:[%s12736_s16 + $0x730] sm:$0xf0]  ;;  %v10612_v37 = vld [vmem:[%s12736_s16 + $0x7e8] sm:$0xf]  ;;  %v11964_v53 = vld [vmem:[%s12736_s16 + $0x7d8] sm:$0xf0] }
 0x594   : > { %7230 = vmatpush.bf16.msrb.mxu3 %v10337_v5  ;;  %v11913_v1 = vld [vmem:[%s12736_s16 + $0x640] sm:$0xf0]  ;;  %v10588_v2 = vld [vmem:[%s12736_s16 + $0x7b8] sm:$0xf]  ;;  %v10384_v15 = vld [vmem:[%s12736_s16 + $0x620] sm:$0xf] }
 0x595   : > { %7192 = vmatpush.bf16.msrb.mxu0 %v10037_v13  ;;  %v6966_v5 = vpop.f32.mrf.mxu2  ;;  %v10456_v13 = vld [vmem:[%s12736_s16 + $0x6b0] sm:$0xf]  ;;  %v11937_v0 = vld [vmem:[%s12736_s16 + $0x700] sm:$0xf0]  ;;  %v10576_v55 = vld [vmem:[%s12736_s16 + $0x7a0] sm:$0xf] }
 0x596   : > { %7205 = vmatpush.bf16.msrb.mxu1 %v10133_v57  ;;  %v6979_v54 = vpop.f32.mrf.mxu3  ;;  %v10552_v57 = vld [vmem:[%s12736_s16 + $0x770] sm:$0xf]  ;;  %v10457_v24 = vor.u32 %v11928_v52, %v10456_v13  ;;  %v11988_v13 = vld [vmem:[%s12736_s16 + $0x898] sm:$0xf0]  ;;  %v11958_v61 = vld [vmem:[%s12736_s16 + $0x7a8] sm:$0xf0] }
 0x597   : > { %7218 = vmatpush.bf16.msrb.mxu2 %v10229_v4  ;;  %v9989_v4 = vor.u32 %v11811_v41, %v9988_v42  ;;  %v10553_v7 = vor.u32 %v11952_v60, %v10552_v57  ;;  %v10696_v54 = vld [vmem:[%s12736_s16 + $0x890] sm:$0xf]  ;;  %v10396_v60 = vld [vmem:[%s12736_s16 + $0x638] sm:$0xf] }
 0x598   : > { %7231 = vmatpush.bf16.msrb.mxu3 %v10325_v6  ;;  %v10181_v6 = vor.u32 %v11859_v30, %v10180_v47  ;;  %v11940_v30 = vld [vmem:[%s12736_s16 + $0x718] sm:$0xf0] }
 0x599   : > { %7193 = vmatpush.bf16.msrb.mxu0 %v10025_v10  ;;  %v10444_v10 = vld [vmem:[%s12736_s16 + $0x698] sm:$0xf] }
 0x59a   : > { %7206 = vmatpush.bf16.msrb.mxu1 %v10121_v11  ;;  %v11925_v11 = vld [vmem:[%s12736_s16 + $0x6a0] sm:$0xf0] }
 0x59b   : > { %7219 = vmatpush.bf16.msrb.mxu2 %v10217_v12  ;;  %v10540_v12 = vld [vmem:[%s12736_s16 + $0x758] sm:$0xf]  ;;  %v10445_v43 = vor.u32 %v11925_v11, %v10444_v10  ;;  %v11985_v10 = vld [vmem:[%s12736_s16 + $0x880] sm:$0xf0]  ;;  %v10397_v11 = vor.u32 %v11913_v1, %v10396_v60 }
 0x59c   : > { %7232 = vmatpush.bf16.msrb.mxu3 %v10313_v18  ;;  %v10732_v18 = vld [vmem:[%s12736_s16 + $0x8d8] sm:$0xf]  ;;  %v10541_v20 = vor.u32 %v11949_v32, %v10540_v12  ;;  %v10493_v32 = vor.u32 %v11937_v0, %v10492_v62  ;;  %v12093_v1 = vld [vmem:[%s12736_s16 + $0xbe0] sm:$0xf0]  ;;  %v10816_v0 = vld [vmem:[%s12736_s16 + $0x980] sm:$0xf] }
 0x59d   : > { %7194 = vmatpush.bf16.msrb.mxu0 %v10013_v22  ;;  %v10733_v22 = vor.u32 %v11997_v19, %v10732_v18  ;;  %v11910_v18 = vld [vmem:[%s12736_s16 + $0x628] sm:$0xf0]  ;;  %v10480_v19 = vld [vmem:[%s12736_s16 + $0x6e0] sm:$0xf]  ;;  %v11116_v60 = vld [vmem:[%s12736_s16 + $0xbd8] sm:$0xf] }
 0x59e   : > { %7207 = vmatpush.bf16.msrb.mxu1 %v10109_v27  ;;  %v10624_v27 = vld [vmem:[%s12736_s16 + $0x800] sm:$0xf] }
 0x59f   : > { %7220 = vmatpush.bf16.msrb.mxu2 %v10205_v28  ;;  %v11970_v28 = vld [vmem:[%s12736_s16 + $0x808] sm:$0xf0] }
 0x5a0   : > { %7233 = vmatpush.bf16.msrb.mxu3 %v10301_v33  ;;  %v10625_v31 = vor.u32 %v11970_v28, %v10624_v27  ;;  %v10420_v33 = vld [vmem:[%s12736_s16 + $0x668] sm:$0xf]  ;;  %v11907_v28 = vld [vmem:[%s12736_s16 + $0x610] sm:$0xf0] }
 0x5a1   : > { %7195 = vmatpush.bf16.msrb.mxu0 %v10001_v40  ;;  %v11991_v40 = vld [vmem:[%s12736_s16 + $0x8b0] sm:$0xf0]  ;;  %v10372_v27 = vld [vmem:[%s12736_s16 + $0x608] sm:$0xf] }
 0x5a2   : > { %7208 = vmatpush.bf16.msrb.mxu1 %v10097_v38  ;;  %v10613_v38 = vor.u32 %v11967_v9, %v10612_v37  ;;  %v10840_v9 = vld [vmem:[%s12736_s16 + $0x9b0] sm:$0xf] }
 0x5a3   : > { %7221 = vmatpush.bf16.msrb.mxu2 %v10193_v44  ;;  %v10408_v44 = vld [vmem:[%s12736_s16 + $0x650] sm:$0xf] }
 0x5a4   : > { %7234 = vmatpush.bf16.msrb.mxu3 %v10289_v48  ;;  %v10709_v48 = vor.u32 %v11991_v40, %v10708_v39  ;;  %v10409_v57 = vor.u32 %v11916_v25, %v10408_v44  ;;  %v12024_v39 = vld [vmem:[%s12736_s16 + $0x9b8] sm:$0xf0]  ;;  %v10936_v40 = vld [vmem:[%s12736_s16 + $0xa70] sm:$0xf] }
 0x5a5   : > { %7196 = vmatpush.bf16.msrb.mxu0 %v9989_v4  ;;  %v6990_v42 = vpop.f32.mrf.mxu0  ;;  %v10601_v4 = vor.u32 %v11964_v53, %v10600_v49  ;;  %v10828_v53 = vld [vmem:[%s12736_s16 + $0x998] sm:$0xf] }
 0x5a6   : > { %7209 = vmatpush.bf16.msrb.mxu1 %v10085_v63  ;;  %v6991_v47 = vadd.f32 %v6990_v42, %v13606_v58  ;;  %v7003_v5 = vpop.f32.mrf.mxu1  ;;  %v10505_v58 = vor.u32 %v11940_v30, %v10504_v45  ;;  %v12048_v42 = vld [vmem:[%s12736_s16 + $0xa78] sm:$0xf0]  ;;  %v11128_v45 = vld [vmem:[%s12736_s16 + $0xbf0] sm:$0xf] }
 0x5a7   : > { %7222 = vmatpush.bf16.msrb.mxu2 %v10181_v6  ;;  %v10697_v6 = vor.u32 %v11988_v13, %v10696_v54  ;;  %v10937_v30 = vor.u32 %v12048_v42, %v10936_v40  ;;  %v12021_v54 = vld [vmem:[%s12736_s16 + $0x9a0] sm:$0xf0]  ;;  %v10924_v13 = vld [vmem:[%s12736_s16 + $0xa58] sm:$0xf]  ;;  %v10984_v40 = vld [vmem:[%s12736_s16 + $0xad0] sm:$0xf] }
 0x5a8   : > { %7235 = vmatpush.bf16.msrb.mxu3 %v10277_v3  ;;  %7197 = vmatmul.bf16.vlgmr.msrb.gmra.mxu0 %v13075_v50  ;;  %v10516_v50 = vld [vmem:[%s12736_s16 + $0x728] sm:$0xf]  ;;  %v7004_v52 = vadd.f32 %v7003_v5, %v6991_v47  ;;  %v11961_v3 = vld [vmem:[%s12736_s16 + $0x7c0] sm:$0xf0]  ;;  %v12096_v47 = vld [vmem:[%s12736_s16 + $0xbf8] sm:$0xf0]  ;;  %v10829_v62 = vor.u32 %v12021_v54, %v10828_v53 }
 0x5a9   : > { %7241 = vmatpush.bf16.msra.mxu0 %v10457_v24  ;;  %7210 = vmatmul.bf16.vlgmr.msrb.gmra.mxu1 %v13079_v51  ;;  %v10421_v51 = vor.u32 %v11919_v34, %v10420_v33  ;;  %v10517_v41 = vor.u32 %v11943_v36, %v10516_v50  ;;  %v10589_v35 = vor.u32 %v11961_v3, %v10588_v2  ;;  %v11955_v50 = vld [vmem:[%s12736_s16 + $0x790] sm:$0xf0]  ;;  %v12018_v2 = vld [vmem:[%s12736_s16 + $0x988] sm:$0xf0]  ;;  %v10912_v3 = vld [vmem:[%s12736_s16 + $0xa40] sm:$0xf] }
 0x5aa   : > { %7254 = vmatpush.bf16.msra.mxu1 %v10553_v7  ;;  %7223 = vmatmul.bf16.vlgmr.msrb.gmra.mxu2 %v13072_v46  ;;  %v10529_v46 = vor.u32 %v11946_v23, %v10528_v17  ;;  %v10672_v17 = vld [vmem:[%s12736_s16 + $0x860] sm:$0xf]  ;;  %v10385_v23 = vor.u32 %v11910_v18, %v10384_v15  ;;  %v11979_v36 = vld [vmem:[%s12736_s16 + $0x850] sm:$0xf0]  ;;  %v12090_v15 = vld [vmem:[%s12736_s16 + $0xbc8] sm:$0xf0] }
 0x5ab   : > { %7267 = vmatpush.bf16.msra.mxu2 %v10649_v8  ;;  %7236 = vmatmul.bf16.vlgmr.msrb.gmra.mxu3 %v13077_v56  ;;  %v10721_v56 = vor.u32 %v11994_v16, %v10720_v26  ;;  %v10684_v8 = vld [vmem:[%s12736_s16 + $0x878] sm:$0xf]  ;;  %v10577_v16 = vor.u32 %v11958_v61, %v10576_v55  ;;  %v12297_v18 = vld [vmem:[#allocation1 + $0x1b] sm:$0xff]  ;;  %v12015_v55 = vld [vmem:[%s12736_s16 + $0x970] sm:$0xf0] }
 0x5ac   : > { %7280 = vmatpush.bf16.msra.mxu3 %v10745_v14  ;;  %v10900_v61 = vld [vmem:[%s12736_s16 + $0xa28] sm:$0xf]  ;;  %v12084_v42 = vld [vmem:[%s12736_s16 + $0xb98] sm:$0xf0]  ;;  %v12057_v53 = vld [vmem:[%s12736_s16 + $0xac0] sm:$0xf0] }
 0x5ad   : > { %7242 = vmatpush.bf16.msra.mxu0 %v10445_v43  ;;  %v7016_v63 = vpop.f32.mrf.mxu2  ;;  %v6992_v14 = vpop.f32.mrf.mxu0 }
 0x5ae   : > { %7255 = vmatpush.bf16.msra.mxu1 %v10541_v20  ;;  %v7017_v24 = vadd.f32 %v7016_v63, %v7004_v52  ;;  %v7029_v7 = vpop.f32.mrf.mxu3  ;;  %v7005_v43 = vpop.f32.mrf.mxu1  ;;  %v10685_v20 = vor.u32 %v11985_v10, %v10684_v8  ;;  %v11129_v52 = vor.u32 %v12096_v47, %v11128_v45  ;;  %v12042_v8 = vld [vmem:[%s12736_s16 + $0xa48] sm:$0xf0]  ;;  %v11008_v10 = vld [vmem:[%s12736_s16 + $0xb00] sm:$0xf]  ;;  %v12009_v45 = vld [vmem:[%s12736_s16 + $0x940] sm:$0xf0] }
 0x5af   : > { %7268 = vmatpush.bf16.msra.mxu2 %v10637_v21  ;;  %v11934_v21 = vld [vmem:[%s12736_s16 + $0x6e8] sm:$0xf0]  ;;  %v12295_v14 = vld [vmem:[#allocation1 + $0x12] sm:$0xff]  ;;  %v10913_v43 = vor.u32 %v12042_v8, %v10912_v3  ;;  %v10876_v47 = vld [vmem:[%s12736_s16 + $0x9f8] sm:$0xf] }
 0x5b0   : > { %7281 = vmatpush.bf16.msra.mxu3 %v10733_v22  ;;  %v13677_v12 = vadd.f32 %v7029_v7, %v7017_v24  ;;  %v11982_v22 = vld [vmem:[%s12736_s16 + $0x868] sm:$0xf0]  ;;  %v10481_v26 = vor.u32 %v11934_v21, %v10480_v19  ;;  %v11117_v7 = vor.u32 %v12093_v1, %v11116_v60  ;;  %v10817_v19 = vor.u32 %v12018_v2, %v10816_v0  ;;  %v10804_v21 = vld [vmem:[%s12736_s16 + $0x968] sm:$0xf]  ;;  %v10864_v2 = vld [vmem:[%s12736_s16 + $0x9e0] sm:$0xf] }
 0x5b1   : > { %7243 = vmatpush.bf16.msra.mxu0 %v10433_v29  ;;  %v10468_v29 = vld [vmem:[%s12736_s16 + $0x6c8] sm:$0xf]  ;;  %v10673_v34 = vor.u32 %v11982_v22, %v10672_v17  ;;  %v12039_v22 = vld [vmem:[%s12736_s16 + $0xa30] sm:$0xf0]  ;;  %v12006_v0 = vld [vmem:[%s12736_s16 + $0x928] sm:$0xf0] }
 0x5b2   : > { %7256 = vmatpush.bf16.msra.mxu1 %v10529_v46  ;;  %v11931_v46 = vld [vmem:[%s12736_s16 + $0x6d0] sm:$0xf0]  ;;  %v12294_v24 = vld [vmem:[#allocation1] sm:$0xff] }
 0x5b3   : > { %7269 = vmatpush.bf16.msra.mxu2 %v10625_v31  ;;  %v10564_v31 = vld [vmem:[%s12736_s16 + $0x788] sm:$0xf]  ;;  %v10469_v44 = vor.u32 %v11931_v46, %v10468_v29  ;;  %v10805_v46 = vor.u32 %v12015_v55, %v10804_v21  ;;  %v12054_v8 = vld [vmem:[%s12736_s16 + $0xaa8] sm:$0xf0]  ;;  %v12051_v55 = vld [vmem:[%s12736_s16 + $0xa90] sm:$0xf0] }
 0x5b4   : > { %7282 = vmatpush.bf16.msra.mxu3 %v10721_v56  ;;  %v10660_v56 = vld [vmem:[%s12736_s16 + $0x848] sm:$0xf]  ;;  %v10565_v25 = vor.u32 %v11955_v50, %v10564_v31  ;;  %v10792_v50 = vld [vmem:[%s12736_s16 + $0x950] sm:$0xf] }
 0x5b5   : > { %7244 = vmatpush.bf16.msra.mxu0 %v10421_v51  ;;  %v7018_v33 = vpop.f32.mrf.mxu2  ;;  %v10373_v51 = vor.u32 %v11907_v28, %v10372_v27  ;;  %v10661_v5 = vor.u32 %v11979_v36, %v10660_v56  ;;  %v12063_v27 = vld [vmem:[%s12736_s16 + $0xaf0] sm:$0xf0]  ;;  %v12012_v56 = vld [vmem:[%s12736_s16 + $0x958] sm:$0xf0]  ;;  %v10888_v36 = vld [vmem:[%s12736_s16 + $0xa10] sm:$0xf] }
 0x5b6   : > { %7257 = vmatpush.bf16.msra.mxu1 %v10517_v41  ;;  %v7031_v37 = vpop.f32.mrf.mxu3  ;;  %v11032_v41 = vld [vmem:[%s12736_s16 + $0xb30] sm:$0xf]  ;;  %v10901_v33 = vor.u32 %v12039_v22, %v10900_v61  ;;  %v10948_v21 = vld [vmem:[%s12736_s16 + $0xa88] sm:$0xf]  ;;  %v12075_v22 = vld [vmem:[%s12736_s16 + $0xb50] sm:$0xf0] }
 0x5b7   : > { %7270 = vmatpush.bf16.msra.mxu2 %v10613_v38  ;;  %v12072_v38 = vld [vmem:[%s12736_s16 + $0xb38] sm:$0xf0] }
 0x5b8   : > { %7283 = vmatpush.bf16.msra.mxu3 %v10709_v48  ;;  %v10841_v48 = vor.u32 %v12024_v39, %v10840_v9  ;;  %v11033_v49 = vor.u32 %v12072_v38, %v11032_v41  ;;  %v12036_v39 = vld [vmem:[%s12736_s16 + $0xa18] sm:$0xf0]  ;;  %v10793_v41 = vor.u32 %v12012_v56, %v10792_v50 }
 0x5b9   : > { %7245 = vmatpush.bf16.msra.mxu0 %v10409_v57  ;;  %v12045_v57 = vld [vmem:[%s12736_s16 + $0xa60] sm:$0xf0]  ;;  %v10889_v38 = vor.u32 %v12036_v39, %v10888_v36 }
 0x5ba   : > { %7258 = vmatpush.bf16.msra.mxu1 %v10505_v58  ;;  %v11020_v58 = vld [vmem:[%s12736_s16 + $0xb18] sm:$0xf]  ;;  %v10925_v63 = vor.u32 %v12045_v57, %v10924_v13  ;;  %v12081_v57 = vld [vmem:[%s12736_s16 + $0xb80] sm:$0xf0] }
 0x5bb   : > { %7271 = vmatpush.bf16.msra.mxu2 %v10601_v4  ;;  %v12069_v4 = vld [vmem:[%s12736_s16 + $0xb20] sm:$0xf0] }
 0x5bc   : > { %7284 = vmatpush.bf16.msra.mxu3 %v10697_v6  ;;  %v11021_v6 = vor.u32 %v12069_v4, %v11020_v58 }
 0x5bd   : > { %7246 = vmatpush.bf16.msra.mxu0 %v10397_v11  ;;  %v12066_v11 = vld [vmem:[%s12736_s16 + $0xb08] sm:$0xf0] }
 0x5be   : > { %7259 = vmatpush.bf16.msra.mxu1 %v10493_v32  ;;  %v12296_v32 = vld [vmem:[#allocation1 + $0x9] sm:$0xff] }
 0x5bf   : > { %7272 = vmatpush.bf16.msra.mxu2 %v10589_v35  ;;  %v11104_v35 = vld [vmem:[%s12736_s16 + $0xbc0] sm:$0xf] }
 0x5c0   : > { %7285 = vmatpush.bf16.msra.mxu3 %v10685_v20  ;;  %v11009_v20 = vor.u32 %v12066_v11, %v11008_v10  ;;  %v11105_v17 = vor.u32 %v12090_v15, %v11104_v35  ;;  %v11056_v10 = vld [vmem:[%s12736_s16 + $0xb60] sm:$0xf]  ;;  %v12078_v11 = vld [vmem:[%s12736_s16 + $0xb68] sm:$0xf0]  ;;  %v10756_v15 = vld [vmem:[%s12736_s16 + $0x908] sm:$0xf] }
 0x5c1   : > { %7247 = vmatpush.bf16.msra.mxu0 %v10385_v23  ;;  %v10996_v23 = vld [vmem:[%s12736_s16 + $0xae8] sm:$0xf] }
 0x5c2   : > { %7260 = vmatpush.bf16.msra.mxu1 %v10481_v26  ;;  %v11092_v26 = vld [vmem:[%s12736_s16 + $0xba8] sm:$0xf] }
 0x5c3   : > { %7273 = vmatpush.bf16.msra.mxu2 %v10577_v16  ;;  %v12087_v16 = vld [vmem:[%s12736_s16 + $0xbb0] sm:$0xf0] }
 0x5c4   : > { %7286 = vmatpush.bf16.msra.mxu3 %v10673_v34  ;;  %v10997_v34 = vor.u32 %v12063_v27, %v10996_v23  ;;  %v11093_v37 = vor.u32 %v12087_v16, %v11092_v26  ;;  %v10949_v26 = vor.u32 %v12051_v55, %v10948_v21 }
 0x5c5   : > { %7248 = vmatpush.bf16.msra.mxu0 %v10373_v51  ;;  %v7042_v28 = vpop.f32.mrf.mxu0  ;;  %v11080_v51 = vld [vmem:[%s12736_s16 + $0xb90] sm:$0xf] }
 0x5c6   : > { %7261 = vmatpush.bf16.msra.mxu1 %v10469_v44  ;;  %v7043_v29 = vadd.f32 %v7042_v28, %v13677_v12  ;;  %v7055_v31 = vpop.f32.mrf.mxu1  ;;  %v12060_v12 = vld [vmem:[%s12736_s16 + $0xad8] sm:$0xf0] }
 0x5c7   : > { %7274 = vmatpush.bf16.msra.mxu2 %v10565_v25  ;;  %v10985_v44 = vor.u32 %v12060_v12, %v10984_v40  ;;  %v10780_v25 = vld [vmem:[%s12736_s16 + $0x938] sm:$0xf] }
 0x5c8   : > { %7287 = vmatpush.bf16.msra.mxu3 %v10661_v5  ;;  %7249 = vmatmul.bf16.vlgmr.msra.gmra.mxu0 %v12294_v24  ;;  %v7056_v9 = vadd.f32 %v7055_v31, %v7043_v29  ;;  %v11081_v5 = vor.u32 %v12084_v42, %v11080_v51  ;;  %v10781_v4 = vor.u32 %v12009_v45, %v10780_v25  ;;  %v12030_v24 = vld [vmem:[%s12736_s16 + $0x9e8] sm:$0xf0]  ;;  %v12300_v31 = vld [vmem:[#allocation1 + $0x36] sm:$0xff] }
 0x5c9   : > { %7293 = vmatpush.bf16.msrb.mxu0 %v10841_v48  ;;  %7262 = vmatmul.bf16.vlgmr.msra.gmra.mxu1 %v12296_v32  ;;  %v10865_v32 = vor.u32 %v12030_v24, %v10864_v2  ;;  %v12298_v29 = vld [vmem:[#allocation1 + $0x24] sm:$0xff] }
 0x5ca   : > { %7306 = vmatpush.bf16.msrb.mxu1 %v10937_v30  ;;  %7275 = vmatmul.bf16.vlgmr.msra.gmra.mxu2 %v12295_v14  ;;  %v12033_v30 = vld [vmem:[%s12736_s16 + $0xa00] sm:$0xf0] }
 0x5cb   : > { %7319 = vmatpush.bf16.msrb.mxu2 %v11033_v49  ;;  %7288 = vmatmul.bf16.vlgmr.msra.gmra.mxu3 %v12297_v18  ;;  %v10972_v49 = vld [vmem:[%s12736_s16 + $0xab8] sm:$0xf]  ;;  %v12003_v18 = vld [vmem:[%s12736_s16 + $0x910] sm:$0xf0] }
 0x5cc   : > { %7332 = vmatpush.bf16.msrb.mxu3 %v11129_v52  ;;  %v11068_v52 = vld [vmem:[%s12736_s16 + $0xb78] sm:$0xf]  ;;  %v10757_v27 = vor.u32 %v12003_v18, %v10756_v15 }
 0x5cd   : > { %7294 = vmatpush.bf16.msrb.mxu0 %v10829_v62  ;;  %v7068_v48 = vpop.f32.mrf.mxu2  ;;  %v7044_v58 = vpop.f32.mrf.mxu0  ;;  %v10877_v62 = vor.u32 %v12033_v30, %v10876_v47  ;;  %v11069_v3 = vor.u32 %v12081_v57, %v11068_v52 }
 0x5ce   : > { %7307 = vmatpush.bf16.msrb.mxu1 %v10925_v63  ;;  %v7069_v54 = vadd.f32 %v7068_v48, %v7056_v9  ;;  %v7081_v13 = vpop.f32.mrf.mxu3  ;;  %v7057_v60 = vpop.f32.mrf.mxu1  ;;  %v10973_v63 = vor.u32 %v12057_v53, %v10972_v49 }
 0x5cf   : > { %7320 = vmatpush.bf16.msrb.mxu2 %v11021_v6  ;;  %v10768_v6 = vld [vmem:[%s12736_s16 + $0x920] sm:$0xf] }
 0x5d0   : > { %7333 = vmatpush.bf16.msrb.mxu3 %v11117_v7  ;;  %v7082_v1 = vadd.f32 %v7081_v13, %v7069_v54  ;;  %v10960_v7 = vld [vmem:[%s12736_s16 + $0xaa0] sm:$0xf]  ;;  %v10769_v14 = vor.u32 %v12006_v0, %v10768_v6 }
 0x5d1   : > { %7295 = vmatpush.bf16.msrb.mxu0 %v10817_v19  ;;  %v10961_v35 = vor.u32 %v12054_v8, %v10960_v7  ;;  %v10852_v19 = vld [vmem:[%s12736_s16 + $0x9c8] sm:$0xf] }
 0x5d2   : > { %7308 = vmatpush.bf16.msrb.mxu1 %v10913_v43  ;;  %v11057_v43 = vor.u32 %v12078_v11, %v11056_v10 }
 0x5d3   : > { %7321 = vmatpush.bf16.msrb.mxu2 %v11009_v20  ;;  %v12027_v20 = vld [vmem:[%s12736_s16 + $0x9d0] sm:$0xf0] }
 0x5d4   : > { %7334 = vmatpush.bf16.msrb.mxu3 %v11105_v17  ;;  %v11044_v17 = vld [vmem:[%s12736_s16 + $0xb48] sm:$0xf]  ;;  %v10853_v28 = vor.u32 %v12027_v20, %v10852_v19 }
 0x5d5   : > { %7296 = vmatpush.bf16.msrb.mxu0 %v10805_v46  ;;  %v7070_v61 = vpop.f32.mrf.mxu2  ;;  %v11045_v16 = vor.u32 %v12075_v22, %v11044_v17  ;;  %v12299_v46 = vld [vmem:[#allocation1 + $0x2d] sm:$0xff] }
 0x5d6   : > { %7309 = vmatpush.bf16.msrb.mxu1 %v10901_v33  ;;  %v7083_v23 = vpop.f32.mrf.mxu3  ;;  %v12301_v33 = vld [vmem:[#allocation1 + $0x3f] sm:$0xff] }
 0x5d7   : > { %7322 = vmatpush.bf16.msrb.mxu2 %v10997_v34 }
 0x5d8   : > { %7335 = vmatpush.bf16.msrb.mxu3 %v11093_v37 }
 0x5d9   : > { %7297 = vmatpush.bf16.msrb.mxu0 %v10793_v41 }
 0x5da   : > { %7310 = vmatpush.bf16.msrb.mxu1 %v10889_v38 }
 0x5db   : > { %7323 = vmatpush.bf16.msrb.mxu2 %v10985_v44 }
 0x5dc   : > { %7336 = vmatpush.bf16.msrb.mxu3 %v11081_v5 }
 0x5dd   : > { %7298 = vmatpush.bf16.msrb.mxu0 %v10781_v4 }
 0x5de   : > { %7311 = vmatpush.bf16.msrb.mxu1 %v10877_v62 }
 0x5df   : > { %7324 = vmatpush.bf16.msrb.mxu2 %v10973_v63 }
 0x5e0   : > { %7337 = vmatpush.bf16.msrb.mxu3 %v11069_v3 }
 0x5e1   : > { %7299 = vmatpush.bf16.msrb.mxu0 %v10769_v14 }
 0x5e2   : > { %7312 = vmatpush.bf16.msrb.mxu1 %v10865_v32 }
 0x5e3   : > { %7325 = vmatpush.bf16.msrb.mxu2 %v10961_v35 }
 0x5e4   : > { %7338 = vmatpush.bf16.msrb.mxu3 %v11057_v43 }
 0x5e5   : > { %7300 = vmatpush.bf16.msrb.mxu0 %v10757_v27  ;;  %v7094_v34 = vpop.f32.mrf.mxu0 }
 0x5e6   : > { %7313 = vmatpush.bf16.msrb.mxu1 %v10853_v28  ;;  %v7095_v50 = vadd.f32 %v7094_v34, %v7082_v1  ;;  %v7107_v56 = vpop.f32.mrf.mxu1 }
 0x5e7   : > { %7326 = vmatpush.bf16.msrb.mxu2 %v10949_v26 }
 0x5e8   : > { %7339 = vmatpush.bf16.msrb.mxu3 %v11045_v16  ;;  %7301 = vmatmul.bf16.vlgmr.msrb.gmra.mxu0 %v12298_v29  ;;  %v7108_v36 = vadd.f32 %v7107_v56, %v7095_v50  ;;  %v4122_v16 = vld [vmem:[#allocation2] sm:$0x3f] }
 0x5e9   : > { %7314 = vmatmul.bf16.vlgmr.msrb.gmra.mxu1 %v12299_v46 }
 0x5ea   : > { %7327 = vmatmul.bf16.vlgmr.msrb.gmra.mxu2 %v12300_v31 }
 0x5eb   : > { %7340 = vmatmul.bf16.vlgmr.msrb.gmra.mxu3 %v12301_v33 }
 0x5ed   : > { %v7120_v37 = vpop.f32.mrf.mxu2  ;;  %v7096_v40 = vpop.f32.mrf.mxu0 }
 0x5ee   : > { %v7121_v9 = vadd.f32 %v7120_v37, %v7108_v36  ;;  %v7133_v39 = vpop.f32.mrf.mxu3  ;;  %v7109_v12 = vpop.f32.mrf.mxu1 }
 0x5f0   : > { %v7134_v51 = vadd.f32 %v7133_v39, %v7121_v9 }
 0x5f2   : > { %v7348_v42 = vrot.slane %v7134_v51, 6 }
 0x5f4   : > { %v7351_v41 = vsel %vm7350_vm14, %v13536_v59, %v7348_v42 }
 0x5f5   : > { %v7122_v38 = vpop.f32.mrf.mxu2 }
 0x5f6   : > { %v7135_v44 = vpop.f32.mrf.mxu3 }
 0x605   : > { %v7146_v25 = vpop.f32.mrf.mxu0 }
 0x606   : > { %v7159_v45 = vpop.f32.mrf.mxu1 }
 0x607   : > { %v7160_v47 = vadd.f32 %v7159_v45, %v7146_v25 }
 0x60d   : > { %v7172_v5 = vpop.f32.mrf.mxu2  ;;  %v7148_v53 = vpop.f32.mrf.mxu0 }
 0x60e   : > { %v7173_v48 = vadd.f32 %v7172_v5, %v7160_v47  ;;  %v7185_v30 = vpop.f32.mrf.mxu3  ;;  %v7161_v54 = vpop.f32.mrf.mxu1 }
 0x610   : > { %v7186_v49 = vadd.f32 %v7185_v30, %v7173_v48 }
 0x615   : > { %v7174_v13 = vpop.f32.mrf.mxu2 }
 0x616   : > { %v7187_v52 = vpop.f32.mrf.mxu3 }
 0x625   : > { %v7198_v57 = vpop.f32.mrf.mxu0 }
 0x626   : > { %v7211_v58 = vpop.f32.mrf.mxu1  ;;  %v7199_v2 = vadd.f32 %v7198_v57, %v7186_v49 }
 0x628   : > { %v7212_v8 = vadd.f32 %v7211_v58, %v7199_v2 }
 0x62d   : > { %v7224_v4 = vpop.f32.mrf.mxu2  ;;  %v7200_v1 = vpop.f32.mrf.mxu0 }
 0x62e   : > { %v7237_v60 = vpop.f32.mrf.mxu3  ;;  %v7213_v62 = vpop.f32.mrf.mxu1  ;;  %v7225_v11 = vadd.f32 %v7224_v4, %v7212_v8 }
 0x630   : > { %v7238_v35 = vadd.f32 %v7237_v60, %v7225_v11 }
 0x635   : > { %v7226_v59 = vpop.f32.mrf.mxu2 }
 0x636   : > { %v7239_v63 = vpop.f32.mrf.mxu3 }
 0x645   : > { %v7250_v6 = vpop.f32.mrf.mxu0 }
 0x646   : > { %v7263_v0 = vpop.f32.mrf.mxu1  ;;  %v7251_v15 = vadd.f32 %v7250_v6, %v7238_v35 }
 0x648   : > { %v7264_v18 = vadd.f32 %v7263_v0, %v7251_v15 }
 0x64d   : > { %v7276_v3 = vpop.f32.mrf.mxu2  ;;  %v7252_v7 = vpop.f32.mrf.mxu0 }
 0x64e   : > { %v7289_v24 = vpop.f32.mrf.mxu3  ;;  %v7265_v10 = vpop.f32.mrf.mxu1  ;;  %v7277_v19 = vadd.f32 %v7276_v3, %v7264_v18 }
 0x650   : > { %v7290_v43 = vadd.f32 %v7289_v24, %v7277_v19 }
 0x655   : > { %v7278_v14 = vpop.f32.mrf.mxu2 }
 0x656   : > { %v7291_v32 = vpop.f32.mrf.mxu3 }
 0x665   : > { %v7302_v20 = vpop.f32.mrf.mxu0 }
 0x666   : > { %v7315_v21 = vpop.f32.mrf.mxu1  ;;  %v7303_v55 = vadd.f32 %v7302_v20, %v7290_v43 }
 0x668   : > { %v7316_v61 = vadd.f32 %v7315_v21, %v7303_v55 }
 0x66d   : > { %v7328_v17 = vpop.f32.mrf.mxu2  ;;  %v7304_v27 = vpop.f32.mrf.mxu0 }
 0x66e   : > { %v7329_v22 = vadd.f32 %v7328_v17, %v7316_v61  ;;  %v7341_v23 = vpop.f32.mrf.mxu3  ;;  %v7317_v28 = vpop.f32.mrf.mxu1 }
 0x670   : > { %v7342_v26 = vadd.f32 %v7341_v23, %v7329_v22 }
 0x672   : > { %v7349_v29 = vrot.slane %v7342_v26, 4 }
 0x673   : > { %7360 = sbr.rel (%p11130_p1) target bundleno = 2087 (0x827), region = 108 }
 0x674   : > { %v7353_v46 = vsel %vm7352_vm15, %v7351_v41, %v7349_v29 }
 0x675   : > { %v7355_v31 = vadd.f32 %v7353_v46, %v4122_v16  ;;  %v7330_v33 = vpop.f32.mrf.mxu2 }
 0x676   : > { %v7343_v34 = vpop.f32.mrf.mxu3 }
 0x677   : > { %7356 = vst [vmem:[#allocation2] sm:$0x3f] %v7355_v31 }
 0x678   : > { %v12104_v50 = vld [vmem:[%s13934_s8 + $0x38] sm:$0xff]  ;;  %v12103_v36 = vld [vmem:[%s13934_s8 + $0x30] sm:$0xff]  ;;  %v12102_v51 = vld [vmem:[%s13934_s8 + $0x28] sm:$0xff]  ;;  %vm7918_vm2 = vcmask 48128   ;;  %vm7920_vm3 = vcmask 97280   ;;  %vm7922_vm6 = vcmask 146432  }
 0x679   : > { %v12112_v56 = vld [vmem:[%s13934_s8 + $0x78] sm:$0xff]  ;;  %7581 = vmatpush.bf16.msra.mxu0 %v12104_v50  ;;  %v12111_v37 = vld [vmem:[%s13934_s8 + $0x70] sm:$0xff]  ;;  %v12110_v42 = vld [vmem:[%s13934_s8 + $0x68] sm:$0xff]  ;;  %vm7924_vm7 = vcmask 195584  }
 0x67a   : > { %7594 = vmatpush.bf16.msra.mxu1 %v12112_v56  ;;  %v12120_v9 = vld [vmem:[%s13934_s8 + $0xb8] sm:$0xff]  ;;  %v12119_v40 = vld [vmem:[%s13934_s8 + $0xb0] sm:$0xff]  ;;  %v12118_v41 = vld [vmem:[%s13934_s8 + $0xa8] sm:$0xff] }
 0x67b   : > { %v12128_v39 = vld [vmem:[%s13938_s12 + $0x38] sm:$0xff]  ;;  %7607 = vmatpush.bf16.msra.mxu2 %v12120_v9  ;;  %v12127_v12 = vld [vmem:[%s13938_s12 + $0x30] sm:$0xff]  ;;  %v12126_v38 = vld [vmem:[%s13938_s12 + $0x28] sm:$0xff] }
 0x67c   : > { %7828 = vmatpush.bf16.msra.mxu3 %v12128_v39  ;;  %v12101_v44 = vld [vmem:[%s13934_s8 + $0x20] sm:$0xff]  ;;  %v7362_v45 = vld [vmem:[#allocation7] sm:$0x7]  ;;  %v12098_v3 = vld [vmem:[%s13934_s8 + $0x8] sm:$0xff] }
 0x67d   : > { %7582 = vmatpush.bf16.msra.mxu0 %v12103_v36  ;;  %v12109_v25 = vld [vmem:[%s13934_s8 + $0x60] sm:$0xff]  ;;  %v7364_v5 = vperm.slane %v7362_v45, 0  ;;  %v7365_v48 = vperm.slane %v7362_v45, 1  ;;  %v7366_v30 = vperm.slane %v7362_v45, 2  ;;  %v12100_v53 = vld [vmem:[%s13934_s8 + $0x18] sm:$0xff]  ;;  %v12099_v62 = vld [vmem:[%s13934_s8 + $0x10] sm:$0xff] }
 0x67e   : > { %7595 = vmatpush.bf16.msra.mxu1 %v12111_v37  ;;  %v12117_v47 = vld [vmem:[%s13934_s8 + $0xa0] sm:$0xff]  ;;  %v12108_v54 = vld [vmem:[%s13934_s8 + $0x58] sm:$0xff]  ;;  %v7361_v57 = vld [vmem:[#allocation2] sm:$0x3f] }
 0x67f   : > { %7608 = vmatpush.bf16.msra.mxu2 %v12119_v40  ;;  %v12125_v49 = vld [vmem:[%s13938_s12 + $0x20] sm:$0xff]  ;;  %v7367_v13 = vrot.slane %v7365_v48, 6  ;;  %v7368_v52 = vrot.slane %v7366_v30, 4  ;;  %v12116_v58 = vld [vmem:[%s13934_s8 + $0x98] sm:$0xff]  ;;  %v12107_v59 = vld [vmem:[%s13934_s8 + $0x50] sm:$0xff] }
 0x680   : > { %7829 = vmatpush.bf16.msra.mxu3 %v12127_v12  ;;  %v12124_v60 = vld [vmem:[%s13938_s12 + $0x18] sm:$0xff]  ;;  %v12115_v6 = vld [vmem:[%s13934_s8 + $0x90] sm:$0xff]  ;;  %v12106_v24 = vld [vmem:[%s13934_s8 + $0x48] sm:$0xff] }
 0x681   : > { %7583 = vmatpush.bf16.msra.mxu0 %v12102_v51  ;;  %v7369_v4 = vsel %vm7350_vm14, %v7364_v5, %v7367_v13  ;;  %v12123_v2 = vld [vmem:[%s13938_s12 + $0x10] sm:$0xff]  ;;  %v12114_v7 = vld [vmem:[%s13934_s8 + $0x88] sm:$0xff]  ;;  %v12097_v10 = vld [vmem:[%s13934_s8] sm:$0xff] }
 0x682   : > { %7596 = vmatpush.bf16.msra.mxu1 %v12110_v42  ;;  %v7370_v1 = vsel %vm7352_vm15, %v7369_v4, %v7368_v52  ;;  %v12122_v8 = vld [vmem:[%s13938_s12 + $0x8] sm:$0xff]  ;;  %v12105_v11 = vld [vmem:[%s13934_s8 + $0x40] sm:$0xff]  ;;  %v12136_v14 = vld [vmem:[%s13938_s12 + $0x78] sm:$0xff] }
 0x683   : > { %7609 = vmatpush.bf16.msra.mxu2 %v12118_v41  ;;  %v7372_v63 = vadd.f32 %v7370_v1, %v7361_v57  ;;  %v12144_v32 = vld [vmem:[%s13938_s12 + $0xb8] sm:$0xff]  ;;  %v12113_v35 = vld [vmem:[%s13934_s8 + $0x80] sm:$0xff]  ;;  %v7620_v15 = vld [vmem:[#allocation3] sm:$0x3f] }
 0x684   : > { %7830 = vmatpush.bf16.msra.mxu3 %v12126_v38  ;;  %v12121_v21 = vld [vmem:[%s13938_s12] sm:$0xff]  ;;  %v12135_v61 = vld [vmem:[%s13938_s12 + $0x70] sm:$0xff]  ;;  %v12134_v23 = vld [vmem:[%s13938_s12 + $0x68] sm:$0xff] }
 0x685   : > { %7584 = vmatpush.bf16.msra.mxu0 %v12101_v44  ;;  %v7373_v0 = vmax.f32 %v7372_v63, 0.0  ;;  %v12143_v17 = vld [vmem:[%s13938_s12 + $0xb0] sm:$0xff]  ;;  %v12142_v27 = vld [vmem:[%s13938_s12 + $0xa8] sm:$0xff]  ;;  %v12133_v26 = vld [vmem:[%s13938_s12 + $0x60] sm:$0xff] }
 0x686   : > { %7597 = vmatpush.bf16.msra.mxu1 %v12109_v25  ;;  %v12141_v16 = vld [vmem:[%s13938_s12 + $0xa0] sm:$0xff]  ;;  %v12132_v46 = vld [vmem:[%s13938_s12 + $0x58] sm:$0xff]  ;;  %v12131_v33 = vld [vmem:[%s13938_s12 + $0x50] sm:$0xff] }
 0x687   : > { %7610 = vmatpush.bf16.msra.mxu2 %v12117_v47  ;;  %7375 = vst [vmem:[#allocation1] ss:$4 sm:$0xff] %v7373_v0  ;;  %v12140_v31 = vld [vmem:[%s13938_s12 + $0x98] sm:$0xff]  ;;  %v12139_v34 = vld [vmem:[%s13938_s12 + $0x90] sm:$0xff]  ;;  %v12130_v50 = vld [vmem:[%s13938_s12 + $0x48] sm:$0xff] }
 0x688   : > { %7831 = vmatpush.bf16.msra.mxu3 %v12125_v49  ;;  %v12138_v56 = vld [vmem:[%s13938_s12 + $0x88] sm:$0xff]  ;;  %v12129_v36 = vld [vmem:[%s13938_s12 + $0x40] sm:$0xff]  ;;  %v12302_v47 = vld [vmem:[#allocation9] ss:$0 sm:$0xff] }
 0x689   : > { %7585 = vmatpush.bf16.msra.mxu0 %v12100_v53  ;;  %v12137_v37 = vld [vmem:[%s13938_s12 + $0x80] sm:$0xff] }
 0x68a   : > { %7598 = vmatpush.bf16.msra.mxu1 %v12108_v54  ;;  %v12303_v48 = vld [vmem:[#allocation13] ss:$0 sm:$0xff] }
 0x68b   : > { %7611 = vmatpush.bf16.msra.mxu2 %v12116_v58 }
 0x68c   : > { %7832 = vmatpush.bf16.msra.mxu3 %v12124_v60 }
 0x68d   : > { %7586 = vmatpush.bf16.msra.mxu0 %v12099_v62 }
 0x68e   : > { %7599 = vmatpush.bf16.msra.mxu1 %v12107_v59  ;;  %v7376_v18 = vld.sshfl [vmem:[#allocation1] sm:$0xff pattern:$0x73625140]  ;;  %v7377_v19 = vld.sshfl [vmem:[#allocation1 + $0x8] sm:$0xff pattern:$0x73625140] }
 0x68f   : > { %7612 = vmatpush.bf16.msra.mxu2 %v12115_v6  ;;  %v7382_v43 = vpack.c.bf16 %v7376_v18, %v7376_v18  ;;  %v7383_v20 = vpack.c.bf16 %v7377_v19, %v7377_v19  ;;  %v7378_v55 = vld.sshfl [vmem:[#allocation1 + $0x10] sm:$0xff pattern:$0x73625140] }
 0x690   : > { %7833 = vmatpush.bf16.msra.mxu3 %v12123_v2  ;;  %7622 = vst [vmem:[#allocation1] ss:$4 sm:$0xff] %v7620_v15  ;;  %v7384_v22 = vpack.c.bf16 %v7378_v55, %v7378_v55 }
 0x691   : > { %7587 = vmatpush.bf16.msra.mxu0 %v12098_v3 }
 0x692   : > { %7600 = vmatpush.bf16.msra.mxu1 %v12106_v24 }
 0x693   : > { %7613 = vmatpush.bf16.msra.mxu2 %v12114_v7 }
 0x694   : > { %7834 = vmatpush.bf16.msra.mxu3 %v12122_v8 }
 0x695   : > { %7588 = vmatpush.bf16.msra.mxu0 %v12097_v10 }
 0x696   : > { %7601 = vmatpush.bf16.msra.mxu1 %v12105_v11  ;;  %v7869_v11 = vld [vmem:[#allocation4] sm:$0x3] }
 0x697   : > { %7614 = vmatpush.bf16.msra.mxu2 %v12113_v35  ;;  %v7623_v28 = vld.sshfl [vmem:[#allocation1] sm:$0xff pattern:$0x73625140]  ;;  %v7624_v9 = vld.sshfl [vmem:[#allocation1 + $0x8] sm:$0xff pattern:$0x73625140] }
 0x698   : > { %7589 = vmatmul.bf16.vlgmr.msra.gmra.mxu0 %v7382_v43  ;;  %7835 = vmatpush.bf16.msra.mxu3 %v12121_v21  ;;  %v7629_v29 = vpack.c.bf16 %v7623_v28, %v7623_v28  ;;  %v7625_v39 = vld.sshfl [vmem:[#allocation1 + $0x10] sm:$0xff pattern:$0x73625140]  ;;  %v7630_v40 = vpack.c.bf16 %v7624_v9, %v7624_v9 }
 0x699   : > { %7841 = vmatpush.bf16.msrb.mxu0 %v12136_v14  ;;  %7602 = vmatmul.bf16.vlgmr.msra.gmra.mxu1 %v7383_v20  ;;  %v7631_v12 = vpack.c.bf16 %v7625_v39, %v7625_v39 }
 0x69a   : > { %7854 = vmatpush.bf16.msrb.mxu1 %v12144_v32  ;;  %7615 = vmatmul.bf16.vlgmr.msra.gmra.mxu2 %v7384_v22 }
 0x69b   : > { %7836 = vmatmul.bf16.vlgmr.msra.gmra.mxu3 %v7629_v29 }
 0x69d   : > { %7842 = vmatpush.bf16.msrb.mxu0 %v12135_v61 }
 0x69e   : > { %7855 = vmatpush.bf16.msrb.mxu1 %v12143_v17 }
 0x6a1   : > { %7843 = vmatpush.bf16.msrb.mxu0 %v12134_v23 }
 0x6a2   : > { %7856 = vmatpush.bf16.msrb.mxu1 %v12142_v27 }
 0x6a5   : > { %7844 = vmatpush.bf16.msrb.mxu0 %v12133_v26 }
 0x6a6   : > { %7857 = vmatpush.bf16.msrb.mxu1 %v12141_v16 }
 0x6a9   : > { %7845 = vmatpush.bf16.msrb.mxu0 %v12132_v46 }
 0x6aa   : > { %7858 = vmatpush.bf16.msrb.mxu1 %v12140_v31 }
 0x6ad   : > { %7846 = vmatpush.bf16.msrb.mxu0 %v12131_v33 }
 0x6ae   : > { %7859 = vmatpush.bf16.msrb.mxu1 %v12139_v34 }
 0x6b1   : > { %7847 = vmatpush.bf16.msrb.mxu0 %v12130_v50 }
 0x6b2   : > { %7860 = vmatpush.bf16.msrb.mxu1 %v12138_v56 }
 0x6b5   : > { %7848 = vmatpush.bf16.msrb.mxu0 %v12129_v36 }
 0x6b6   : > { %7861 = vmatpush.bf16.msrb.mxu1 %v12137_v37 }
 0x6b8   : > { %7849 = vmatmul.bf16.vlgmr.msrb.gmra.mxu0 %v7630_v40 }
 0x6b9   : > { %7862 = vmatmul.bf16.vlgmr.msrb.gmra.mxu1 %v7631_v12 }
 0x715   : > { %v7590_v51 = vpop.f32.mrf.mxu0 }
 0x716   : > { %v7603_v42 = vpop.f32.mrf.mxu1  ;;  %v7591_v5 = vadd.f32 %v12302_v47, %v7590_v51 }
 0x718   : > { %v7604_v49 = vadd.f32 %v7603_v42, %v7591_v5 }
 0x71d   : > { %v7592_v41 = vpop.f32.mrf.mxu0  ;;  %v7616_v44 = vpop.f32.mrf.mxu2 }
 0x71e   : > { %v7605_v38 = vpop.f32.mrf.mxu1  ;;  %v7837_v25 = vpop.f32.mrf.mxu3  ;;  %v7617_v52 = vadd.f32 %v7616_v44, %v7604_v49 }
 0x71f   : > { %v7838_v53 = vadd.f32 %v12303_v48, %v7837_v25 }
 0x720   : > { %v7867_v4 = vadd.f32 1.0, %v7617_v52 }
 0x722   : > { %v7877_v18 = vand.u32 2147483647, %v7867_v4 }
 0x724   : > { %v7878_v43 = vmul.f32 %v7877_v18, %v7869_v11 }
 0x725   : > { %v7618_v45 = vpop.f32.mrf.mxu2 }
 0x726   : > { %v7839_v30 = vpop.f32.mrf.mxu3 }
 0x735   : > { %v7850_v54 = vpop.f32.mrf.mxu0 }
 0x736   : > { %v7863_v13 = vpop.f32.mrf.mxu1  ;;  %v7851_v57 = vadd.f32 %v7850_v54, %v7838_v53 }
 0x738   : > { %v7864_v58 = vadd.f32 %v7863_v13, %v7851_v57 }
 0x73a   : > { %v7868_v60 = vadd.f32 1.0, %v7864_v58  ;;  %7873 = vrot.lane.b32.xlu0 %v7864_v58, %s12544_s11  ;;  %v7899_v1 = vadd.f32 %v7864_v58, %v7617_v52 }
 0x73c   : > { %v7884_v62 = vmul.f32 %v7868_v60, %v7867_v4  ;;  %v7900_v59 = vmul.f32 0.5, %v7899_v1  ;;  %v7870_v8 = vand.u32 2147483647, %v7868_v60 }
 0x73d   : > { %v7852_v63 = vpop.f32.mrf.mxu0 }
 0x73e   : > { %v7865_v6 = vpop.f32.mrf.mxu1  ;;  %7902 = vrot.lane.b32.xlu1 %v7900_v59, %s12544_s11  ;;  %v7885_v0 = vand.u32 2147483647, %v7884_v62  ;;  %v7871_v14 = vmul.f32 %v7870_v8, %v7869_v11 }
 0x740   : > { %12304 = vrsqrt.f32 %v7885_v0  ;;  %vm7893_vm0 = vcmp.eq.f32.partialorder %v7885_v0, inf  ;;  %v7896_v61 = vand.u32 2147483648, %v7885_v0  ;;  %vm7895_vm1 = vcmp.eq.f32.partialorder %v7885_v0, 0.0 }
 0x742   : > { %7880 = vrot.lane.b32.xlu0 %v7617_v52, %s12544_s11 }
 0x746   : > { %v12305_v2 = vpop.eup %12304 }
 0x747   : > { %v7887_v3 = vmul.f32 %v12305_v2, %v7885_v0 }
 0x749   : > { %v7888_v24 = vmul.f32 %v12305_v2, %v7887_v3 }
 0x74b   : > { %v7889_v7 = vmul.f32 0.5, %v7888_v24 }
 0x74d   : > { %v7890_v10 = vsub.f32 1.5, %v7889_v7 }
 0x74f   : > { %v7891_v15 = vmul.f32 %v12305_v2, %v7890_v10 }
 0x751   : > { %v7892_v19 = vmul.f32 %v7891_v15, %v7885_v0 }
 0x753   : > { %v7894_v21 = vsel %vm7893_vm0, %v7885_v0, %v7892_v19 }
 0x754   : > { %v7897_v17 = vsel %vm7895_vm1, %v7896_v61, %v7894_v21 }
 0x755   : > { %v7898_v23 = vmul.f32 %v7897_v17, %v7869_v11 }
 0x7ac   : > { %v7874_v32 = vpop.permute.xlu0 %7873 }
 0x7ad   : > { %v7876_v35 = vadd.f32 %v7874_v32, %v7871_v14 }
 0x7af   : > { %7907 = vrot.lane.b32.xlu1 %v7876_v35, %s12545_s21 }
 0x7b0   : > { %v7903_v22 = vpop.permute.xlu1 %7902 }
 0x7b1   : > { %v7905_v27 = vadd.f32 %v7903_v22, %v7898_v23 }
 0x7b4   : > { %v7881_v20 = vpop.permute.xlu0 %7880 }
 0x7b5   : > { %v7883_v55 = vadd.f32 %v7881_v20, %v7878_v43 }
 0x7b7   : > { %7911 = vrot.lane.b32.xlu2 %v7883_v55, %s12546_s20 }
 0x7bf   : > { %7915 = vrot.lane.b32.xlu2 %v7905_v27, %s12547_s22 }
 0x811   : > { %v7912_v28 = vpop.permute.xlu2 %7911 }
 0x819   : > { %v7916_v29 = vpop.permute.xlu2 %7915 }
 0x821   : > { %v7908_v26 = vpop.permute.xlu1 %7907 }
 0x822   : > { %v7919_v16 = vsel %vm7918_vm2, %v7869_v11, %v7908_v26 }
 0x823   : > { %v7921_v46 = vsel %vm7920_vm3, %v7919_v16, %v7912_v28 }
 0x824   : > { %v7923_v31 = vsel %vm7922_vm6, %v7921_v46, %v7916_v29 }
 0x825   : > { %v7925_v33 = vsel %vm7924_vm7, %v7923_v31, 0.0 }
 0x826   : > { %7926 = vst [vmem:[%s13960_s26] sm:$0x3] %v7925_v33 }
 0x827 PF: > { %p27_p3 = scmp.ge.s32.totalorder %s12691_s19, 7   ;;  %s13961_s29 = smov %s12524_s30 }
 0x828   : > { %s13962_s30 = smov %s12528_s15  ;;  %s13963_s15 = smov %s12702_s24 }
 0x829   : > { %s13964_s16 = smov %s12691_s19  ;;  %29 = sbr.rel (!%p27_p3) target bundleno = 13 (0xd), region = 143 }
 0x82e   :  { %7938 = vsyncpa [#allocation6], 1 }
 0x82f   :  { %7940 = vsyncpa [#allocation6 + $0x1], 1 }
 0x830   :  { %7941 = vsyncpa [#allocation8], 1 }
 0x831   :  { %7942 = vsyncpa [#allocation11], 1 }
 0x832   :  { %7943 = vsyncpa [#allocation14], 1 }

</bundles_post_ra>
